<compile_context>
chip_gen: v6e
topology: v6e:2x2x1
jax: 0.10.0
libtpu: 0.0.40
codegen_flags: <defaults>
</compile_context>

<pallas_src>
import functools
import numpy as np
import jax
import jax.numpy as jnp
from jax.experimental import pallas as pl
from jax.experimental.pallas import tpu as pltpu


def _round_up(n, m):
    return ((n + m - 1) // m) * m


def _tpu_kind():
    try:
        return jax.devices()[0].device_kind.lower()
    except Exception:
        return ""


def _is_modern_tpu():
    # v6e / v7x have bf16-native VPUs and a 256x256 MXU; v5e and older do not.
    kind = _tpu_kind()
    return ("tpu" in kind) and not any(f"v{v}" in kind for v in (2, 3, 4, 5))


def _act_dtype():
    return jnp.bfloat16 if _is_modern_tpu() else jnp.float32


def _mxu_m_align():
    return 256 if _is_modern_tpu() else 128


def _vmem_capacity_bytes():
    try:
        return int(pltpu.get_tpu_info().vmem_capacity_bytes)
    except Exception:
        return 64 * 2 ** 20        # conservative: v7x per-TensorCore VMEM


def coord_disc_kernel(padded_counts, bc, h_pad, act_dtype,
                      x_ref, lab_ref, w_pool_ref,
                      w1_ref, b1_ref, w2_ref, b2_ref, w3_ref, b3_ref,
                      wl_ref, bl_ref,
                      wf1a_ref, wf1b_ref, bf1_ref,
                      wf2_ref, bf2_ref, wo_ref, bo_ref,
                      feat_ref, out_ref):
    f32 = jnp.float32

    def leaky(v):
        # LeakyReLU(0.2) == max(v, 0.2*v): one VALU max instead of cmp+select
        return jnp.maximum(v, 0.2 * v)

    def mm(a, w_ref):
        # MXU matmul: bf16 operands, f32 accumulation
        return jnp.dot(a.astype(w_ref.dtype), w_ref[...],
                       preferred_element_type=f32)

    def epi(acc, b_ref):
        # bias + LeakyReLU epilogue in act_dtype (bf16 on v6e/v7x, f32 on v5e)
        return leaky(acc.astype(act_dtype) + b_ref[...])

    # conv1 (kernel (1,3)): K=3 contraction as three VPU broadcast FMAs instead
    # of a nearly-empty MXU pass.
    x = x_ref[...]                                     # (bc*h_pad, 3) f32
    w1 = w1_ref[...]                                   # (3, C1)       f32
    h = (x[:, 0:1] * w1[0:1, :]
         + x[:, 1:2] * w1[1:2, :]
         + x[:, 2:3] * w1[2:3, :]) + b1_ref[...]
    h = leaky(h).astype(act_dtype)                     # (bc*h_pad, C1)

    # 1x1 convs == channel matmuls.
    h = epi(mm(h, w2_ref), b2_ref)                     # (bc*h_pad, C1)
    h = epi(mm(h, w3_ref), b3_ref)                     # (bc*h_pad, C3)
    c3 = h.shape[-1]

    # per-element AvgPool2d((n_i, 1)): rows were padded host-side so every
    # element block is sublane-aligned; w_pool carries 1/n_i on real rows and
    # 0 on padding rows, so the mean is an aligned static slice + sum.
    h3 = h.reshape(bc, h_pad, c3) * w_pool_ref[...].reshape(1, h_pad, 1).astype(h.dtype)
    pooled = []
    off = 0
    for n_pad in padded_counts:                        # static unroll over elements
        pooled.append(jnp.sum(h3[:, off:off + n_pad, :], axis=1))
        off += n_pad
    pooled_all = jnp.concatenate(pooled, axis=-1)      # (bc, C3*E) element-major

    # label projection (label_dim lane-padded to 128 host-side)
    lab = epi(mm(lab_ref[...], wl_ref), bl_ref)        # (bc, LD_P)

    # fc1: concat([pooled, label_embed]) @ Wf1 as one fused split matmul.
    f1 = epi(mm(pooled_all, wf1a_ref) + mm(lab, wf1b_ref), bf1_ref)   # (bc, 1024)
    feat = epi(mm(f1, wf2_ref), bf2_ref)                              # (bc, 256)
    feat_ref[...] = feat.astype(feat_ref.dtype)
    out_ref[...] = mm(feat, wo_ref) + bo_ref[...]                     # (bc, 128)


def coordinate_discriminator_forward(x, labels, params, n_atoms_elements,
                                     batch_chunk=256):
    f32 = jnp.float32
    mxu = jnp.bfloat16
    act_dtype = _act_dtype()

    B, C, H, W = x.shape
    assert C == 1 and W == 3, "expects 1 channel and width-3 coordinates"
    counts = tuple(int(n) for n in n_atoms_elements)
    E = len(counts)
    assert sum(counts) == H

    W1, B1 = params["conv1"]; W2, B2 = params["conv2"]; W3, B3 = params["conv3"]
    Wl, Bl = params["label"]; Wf1, Bf1 = params["fc1"]
    Wf2, Bf2 = params["fc2"]; Wo, Bo = params["out"]
    C1 = W1.shape[0]
    C3 = W3.shape[0]
    F = Wl.shape[1]          # n_label_features
    Ld = Wl.shape[0]         # label_dim

    # lane-dense padded fc widths (no masked partial stores)
    LD_P = _round_up(Ld, 128)
    H1_P = _round_up(Wf1.shape[0], 128)
    H2_P = _round_up(Wf2.shape[0], 128)
    O_P = _round_up(Wo.shape[0], 128)

    # ---- sublane-aligned per-element row layout -----------------------------
    row_align = 16 if act_dtype == jnp.bfloat16 else 8   # bf16 packs 16 sublanes
    padded_counts = tuple(_round_up(n, row_align) for n in counts)
    H_pad = sum(padded_counts)
    segs, start = [], 0
    for n, n_pad in zip(counts, padded_counts):
        seg = x[:, 0, start:start + n, :]
        if n_pad > n:
            seg = jnp.pad(seg, ((0, 0), (0, n_pad - n), (0, 0)))
        segs.append(seg)
        start += n
    x_rows = jnp.concatenate(segs, axis=1).astype(f32)    # (B, H_pad, 3)

    pw = np.zeros((H_pad, 1), np.float32)                 # 1/n_i on real rows
    off = 0
    for n, n_pad in zip(counts, padded_counts):
        pw[off:off + n, 0] = 1.0 / n
        off += n_pad
    w_pool = jnp.asarray(pw)

    # ---- weight layouts for (x @ W) -----------------------------------------
    def pad2(a, rows, cols):
        return jnp.pad(a, ((0, rows - a.shape[0]), (0, cols - a.shape[1])))

    w1 = W1[:, 0, 0, :].T.astype(f32)                               # (3, C1) VPU path
    w2 = W2[:, :, 0, 0].T.astype(mxu)                               # (C1, C1)
    w3 = W3[:, :, 0, 0].T.astype(mxu)                               # (C1, C3)
    wl = pad2(Wl.T, F, LD_P).astype(mxu)                            # (F, 128)
    # PyTorch flattens pooled (B, C3, E, 1) channel-major (col = c*E + e);
    # permute fc1 columns to the kernel's element-major concat order.
    perm = np.array([c * E + e for e in range(E) for c in range(C3)])
    wf1a = pad2(Wf1[:, :C3 * E][:, perm].T, C3 * E, H1_P).astype(mxu)
    wf1b = pad2(Wf1[:, C3 * E:].T, LD_P, H1_P).astype(mxu)
    wf2 = pad2(Wf2.T, H1_P, H2_P).astype(mxu)
    wo = pad2(Wo.T, H2_P, O_P).astype(mxu)

    def row(b, n=None, dt=f32):
        r = b.reshape(1, -1).astype(f32)
        if n is not None:
            r = pad2(r, 1, n)
        return r.astype(dt)

    weight_args = (w_pool,
                   w1, row(B1),
                   w2, row(B2, dt=act_dtype),
                   w3, row(B3, dt=act_dtype),
                   wl, row(Bl, LD_P, act_dtype),
                   wf1a, wf1b, row(Bf1, H1_P, act_dtype),
                   wf2, row(Bf2, H2_P, act_dtype),
                   wo, row(Bo, O_P))
    w_bytes = sum(int(a.size) * a.dtype.itemsize for a in weight_args)

    # ---- batch-chunk selection: MXU row fill vs chip VMEM (v7x = 64 MiB) ----
    vmem_cap = _vmem_capacity_bytes()
    align = _mxu_m_align()
    ew = 2 if act_dtype == jnp.bfloat16 else 4
    # conservative live-activation bytes per batch row (bf16 activation copies,
    # pooled/f1/feat tensors and double-buffered IO blocks included)
    per_row = (H_pad * (3 * 4 * 2                 # x input block (2 pipeline bufs)
                        + C1 * (4 + 2 * ew)       # conv1 out f32 + conv2 in/out
                        + C3 * 2 * ew)            # conv3 out + pool-weighted copy
               + C3 * E * ew                      # pooled_all
               + F * 4 * 2 + LD_P * ew            # label block + embedding
               + H1_P * ew                        # fc1 activations
               + H2_P * (ew + 4 * 3)              # feat + f32 store + out bufs
               + O_P * 4 * 3)                     # logits + out bufs
    act_budget = max(8 * 2 ** 20,
                     min(int(0.33 * vmem_cap),
                         vmem_cap - 2 * w_bytes - 12 * 2 ** 20))
    bc_cap = max(8, act_budget // per_row)
    bc = max(8, min(int(batch_chunk), bc_cap))
    if B > 2 * 128 and bc >= B:
        # keep >= 2 chunks so both v7x TensorCores get work under "parallel"
        bc = _round_up(pl.cdiv(B, 2), 128)
    if bc >= B:
        Bc, n_chunks = B, 1
    else:
        # align chunk M to the MXU (256 on v6e/v7x, 128 on v5e), min 8 for blocks
        bc = (bc // align) * align if bc >= align else (bc // 8) * 8
        Bc = max(8, bc)
        n_chunks = pl.cdiv(B, Bc)
    B_pad = Bc * n_chunks

    lab2 = labels.astype(f32)
    if B_pad > B:
        # ragged batch: zero-pad instead of falling back to one giant chunk
        x_rows = jnp.pad(x_rows, ((0, B_pad - B), (0, 0), (0, 0)))
        lab2 = jnp.pad(lab2, ((0, B_pad - B), (0, 0)))
    x2d = x_rows.reshape(B_pad * H_pad, 3)

    # explicit VMEM budget: 2x weights (fallback double-buffer case) +
    # 1.5x live-activation estimate + Mosaic internal scratch margin
    vmem_limit = int(min(vmem_cap,
                         max(32 * 2 ** 20,
                             2 * w_bytes + int(1.5 * Bc * per_row) + 8 * 2 ** 20)))

    kernel = functools.partial(coord_disc_kernel, padded_counts, Bc, H_pad, act_dtype)

    out_specs = (pl.BlockSpec((Bc, H2_P), lambda i: (i, 0)),
                 pl.BlockSpec((Bc, O_P), lambda i: (i, 0)))

    def _in_specs(single_buffer_weights):
        def resident(a):
            idx = lambda i: (0,) * a.ndim
            if single_buffer_weights:
                # weight block never changes across grid steps -> 1 VMEM buffer
                return pl.BlockSpec(a.shape, idx, pipeline_mode=pl.Buffered(1))
            return pl.BlockSpec(a.shape, idx)
        return ([pl.BlockSpec((Bc * H_pad, 3), lambda i: (i, 0)),
                 pl.BlockSpec((Bc, F), lambda i: (i, 0))]
                + [resident(a) for a in weight_args])

    def _run(single_buffer_weights):
        return pl.pallas_call(
            kernel,
            out_shape=(jax.ShapeDtypeStruct((B_pad, H2_P), f32),
                       jax.ShapeDtypeStruct((B_pad, O_P), f32)),
            grid=(n_chunks,),
            in_specs=_in_specs(single_buffer_weights),
            out_specs=out_specs,
            compiler_params=pltpu.CompilerParams(
                dimension_semantics=("parallel",),
                vmem_limit_bytes=vmem_limit),
        )(x2d, lab2, *weight_args)

    try:
        # single-buffer the VMEM-resident weights (frees headroom on v7x 64 MiB)
        feat_p, out_p = _run(True)
    except Exception:
        # fallback for jax versions without pipeline_mode / Buffered(1)
        feat_p, out_p = _run(False)

    # strip batch padding and lane padding back to the real fc widths
    return feat_p[:B, :Wf2.shape[0]], out_p[:B, :Wo.shape[0]]


def reference_forward(x, labels, params, n_atoms_elements):
    """Pure-JAX mirror of the PyTorch forward (NCHW semantics) for validation."""
    def lk(v):
        return jnp.maximum(v, 0.2 * v)

    B = x.shape[0]
    W1, B1 = params["conv1"]; W2, B2 = params["conv2"]; W3, B3 = params["conv3"]
    Wl, Bl = params["label"]; Wf1, Bf1 = params["fc1"]
    Wf2, Bf2 = params["fc2"]; Wo, Bo = params["out"]
    out = jnp.einsum('bhw,cw->bch', x[:, 0], W1[:, 0, 0, :]) + B1[None, :, None]
    out = lk(out)
    out = jnp.einsum('bch,dc->bdh', out, W2[:, :, 0, 0]) + B2[None, :, None]
    out = lk(out)
    out = jnp.einsum('bch,dc->bdh', out, W3[:, :, 0, 0]) + B3[None, :, None]
    out = lk(out)                                                 # (B, 256, H)
    pooled, start = [], 0
    for n in n_atoms_elements:
        pooled.append(jnp.mean(out[:, :, start:start + n], axis=2))
        start += n
    output_all = jnp.stack(pooled, axis=-1).reshape(B, -1)        # channel-major
    lab = lk(labels @ Wl.T + Bl)
    comb = jnp.concatenate([output_all, lab], axis=1)
    feat = lk(lk(comb @ Wf1.T + Bf1) @ Wf2.T + Bf2)
    return feat, feat @ Wo.T + Bo


if __name__ == "__main__":
    def build(seed, B, n_atoms_elements, n_label_features, label_dim, disc_channels):
        H = sum(n_atoms_elements)
        E = len(n_atoms_elements)
        key = jax.random.PRNGKey(seed)
        keys = jax.random.split(key, 16)
        s = 0.05

        def nrm(k, shp):
            return jax.random.normal(k, shp, jnp.float32) * s

        params = {
            "conv1": (nrm(keys[0], (disc_channels, 1, 1, 3)), nrm(keys[1], (disc_channels,))),
            "conv2": (nrm(keys[2], (disc_channels, disc_channels, 1, 1)), nrm(keys[3], (disc_channels,))),
            "conv3": (nrm(keys[4], (256, disc_channels, 1, 1)), nrm(keys[5], (256,))),
            "label": (nrm(keys[6], (label_dim, n_label_features)), nrm(keys[7], (label_dim,))),
            "fc1": (nrm(keys[8], (1000, 256 * E + label_dim)), nrm(keys[9], (1000,))),
            "fc2": (nrm(keys[10], (200, 1000)), nrm(keys[11], (200,))),
            "out": (nrm(keys[12], (10, 200)), nrm(keys[13], (10,))),
        }
        x = jax.random.normal(keys[14], (B, 1, H, 3), jnp.float32)
        labels = jax.random.normal(keys[15], (B, n_label_features), jnp.float32)
        return params, x, labels

    def check(feat, out, ref_feat, ref_out):
        # bf16 MXU operands + bf16 epilogues (v6e/v7x) are an intentional
        # precision trade-off for this GAN discriminator; tolerances reflect it.
        np.testing.assert_allclose(np.asarray(feat), np.asarray(ref_feat),
                                   rtol=3e-2, atol=8e-3)
        np.testing.assert_allclose(np.asarray(out), np.asarray(ref_out),
                                   rtol=3e-2, atol=8e-3)

    n_atoms_elements = (4, 4)          # 2 elements, 4 atoms each -> H = 8

    # case 1: tiny batch (PRNGKey(0) inputs) -> single grid step
    params, x, labels = build(0, 2, n_atoms_elements, 8, 16, 128)
    feat, out = coordinate_discriminator_forward(x, labels, params, n_atoms_elements)
    feat = jax.block_until_ready(feat)
    out = jax.block_until_ready(out)
    check(feat, out, *reference_forward(x, labels, params, n_atoms_elements))

    # case 2: forced small chunk -> 2-step "parallel" grid, resident weights
    params2, x2, labels2 = build(1, 16, n_atoms_elements, 8, 16, 128)
    feat2, out2 = coordinate_discriminator_forward(x2, labels2, params2,
                                                   n_atoms_elements, batch_chunk=8)
    feat2 = jax.block_until_ready(feat2)
    out2 = jax.block_until_ready(out2)
    check(feat2, out2, *reference_forward(x2, labels2, params2, n_atoms_elements))

    # case 3: ragged batch (B % chunk != 0) -> zero-padded batch, outputs sliced
    params3, x3, labels3 = build(2, 10, n_atoms_elements, 8, 16, 128)
    feat3, out3 = coordinate_discriminator_forward(x3, labels3, params3,
                                                   n_atoms_elements, batch_chunk=8)
    feat3 = jax.block_until_ready(feat3)
    out3 = jax.block_until_ready(out3)
    check(feat3, out3, *reference_forward(x3, labels3, params3, n_atoms_elements))

    print("KERNEL_OK")
</pallas_src>

<mosaic_0001>
module attributes {stable_mosaic.version = 11 : i64} {
  func.func @coord_disc_kernel(%arg0: i32, %arg1: memref<32x3xf32, #tpu.memory_space<vmem>>, %arg2: memref<2x8xf32, #tpu.memory_space<vmem>>, %arg3: memref<16x1xf32, #tpu.memory_space<vmem>>, %arg4: memref<3x128xf32, #tpu.memory_space<vmem>>, %arg5: memref<1x128xf32, #tpu.memory_space<vmem>>, %arg6: memref<128x128xbf16, #tpu.memory_space<vmem>>, %arg7: memref<1x128xf32, #tpu.memory_space<vmem>>, %arg8: memref<128x256xbf16, #tpu.memory_space<vmem>>, %arg9: memref<1x256xf32, #tpu.memory_space<vmem>>, %arg10: memref<8x128xbf16, #tpu.memory_space<vmem>>, %arg11: memref<1x128xf32, #tpu.memory_space<vmem>>, %arg12: memref<512x1024xbf16, #tpu.memory_space<vmem>>, %arg13: memref<128x1024xbf16, #tpu.memory_space<vmem>>, %arg14: memref<1x1024xf32, #tpu.memory_space<vmem>>, %arg15: memref<1024x256xbf16, #tpu.memory_space<vmem>>, %arg16: memref<1x256xf32, #tpu.memory_space<vmem>>, %arg17: memref<256x128xbf16, #tpu.memory_space<vmem>>, %arg18: memref<1x128xf32, #tpu.memory_space<vmem>>, %arg19: memref<2x256xf32, #tpu.memory_space<vmem>>, %arg20: memref<2x128xf32, #tpu.memory_space<vmem>>) attributes {dimension_semantics = [#tpu.dimension_semantics<parallel>], iteration_bounds = array<i64: 1>, scalar_prefetch = 0 : i64, scratch_operands = 0 : i64, tpu.core_type = #tpu.core_type<tc>, window_params = [{transform_indices = @transform_0, window_bounds = array<i64: 32, 3>}, {transform_indices = @transform_1, window_bounds = array<i64: 2, 8>}, {pipeline_mode = #tpu.pipeline_mode<synchronous>, transform_indices = @transform_2, window_bounds = array<i64: 16, 1>}, {pipeline_mode = #tpu.pipeline_mode<synchronous>, transform_indices = @transform_3, window_bounds = array<i64: 3, 128>}, {pipeline_mode = #tpu.pipeline_mode<synchronous>, transform_indices = @transform_4, window_bounds = array<i64: 1, 128>}, {pipeline_mode = #tpu.pipeline_mode<synchronous>, transform_indices = @transform_5, window_bounds = array<i64: 128, 128>}, {pipeline_mode = #tpu.pipeline_mode<synchronous>, transform_indices = @transform_6, window_bounds = array<i64: 1, 128>}, {pipeline_mode = #tpu.pipeline_mode<synchronous>, transform_indices = @transform_7, window_bounds = array<i64: 128, 256>}, {pipeline_mode = #tpu.pipeline_mode<synchronous>, transform_indices = @transform_8, window_bounds = array<i64: 1, 256>}, {pipeline_mode = #tpu.pipeline_mode<synchronous>, transform_indices = @transform_9, window_bounds = array<i64: 8, 128>}, {pipeline_mode = #tpu.pipeline_mode<synchronous>, transform_indices = @transform_10, window_bounds = array<i64: 1, 128>}, {pipeline_mode = #tpu.pipeline_mode<synchronous>, transform_indices = @transform_11, window_bounds = array<i64: 512, 1024>}, {pipeline_mode = #tpu.pipeline_mode<synchronous>, transform_indices = @transform_12, window_bounds = array<i64: 128, 1024>}, {pipeline_mode = #tpu.pipeline_mode<synchronous>, transform_indices = @transform_13, window_bounds = array<i64: 1, 1024>}, {pipeline_mode = #tpu.pipeline_mode<synchronous>, transform_indices = @transform_14, window_bounds = array<i64: 1024, 256>}, {pipeline_mode = #tpu.pipeline_mode<synchronous>, transform_indices = @transform_15, window_bounds = array<i64: 1, 256>}, {pipeline_mode = #tpu.pipeline_mode<synchronous>, transform_indices = @transform_16, window_bounds = array<i64: 256, 128>}, {pipeline_mode = #tpu.pipeline_mode<synchronous>, transform_indices = @transform_17, window_bounds = array<i64: 1, 128>}, {transform_indices = @transform_18, window_bounds = array<i64: 2, 256>}, {transform_indices = @transform_19, window_bounds = array<i64: 2, 128>}]} {
    %c0 = arith.constant 0 : index
    %c0_0 = arith.constant 0 : index
    %0 = vector.load %arg1[%c0, %c0_0] : memref<32x3xf32, #tpu.memory_space<vmem>>, vector<32x3xf32>
    %c0_1 = arith.constant 0 : index
    %c0_2 = arith.constant 0 : index
    %1 = vector.load %arg4[%c0_1, %c0_2] : memref<3x128xf32, #tpu.memory_space<vmem>>, vector<3x128xf32>
    %2 = vector.extract_strided_slice %0 {offsets = [0, 0], sizes = [32, 1], strides = [1, 1]} : vector<32x3xf32> to vector<32x1xf32>
    %3 = vector.extract_strided_slice %1 {offsets = [0, 0], sizes = [1, 128], strides = [1, 1]} : vector<3x128xf32> to vector<1x128xf32>
    %4 = vector.broadcast %2 : vector<32x1xf32> to vector<32x128xf32>
    %5 = vector.broadcast %3 : vector<1x128xf32> to vector<32x128xf32>
    %6 = arith.mulf %4, %5 : vector<32x128xf32>
    %7 = vector.extract_strided_slice %0 {offsets = [0, 1], sizes = [32, 1], strides = [1, 1]} : vector<32x3xf32> to vector<32x1xf32>
    %8 = vector.extract_strided_slice %1 {offsets = [1, 0], sizes = [1, 128], strides = [1, 1]} : vector<3x128xf32> to vector<1x128xf32>
    %9 = vector.broadcast %7 : vector<32x1xf32> to vector<32x128xf32>
    %10 = vector.broadcast %8 : vector<1x128xf32> to vector<32x128xf32>
    %11 = arith.mulf %9, %10 : vector<32x128xf32>
    %12 = arith.addf %6, %11 : vector<32x128xf32>
    %13 = vector.extract_strided_slice %0 {offsets = [0, 2], sizes = [32, 1], strides = [1, 1]} : vector<32x3xf32> to vector<32x1xf32>
    %14 = vector.extract_strided_slice %1 {offsets = [2, 0], sizes = [1, 128], strides = [1, 1]} : vector<3x128xf32> to vector<1x128xf32>
    %15 = vector.broadcast %13 : vector<32x1xf32> to vector<32x128xf32>
    %16 = vector.broadcast %14 : vector<1x128xf32> to vector<32x128xf32>
    %17 = arith.mulf %15, %16 : vector<32x128xf32>
    %18 = arith.addf %12, %17 : vector<32x128xf32>
    %c0_3 = arith.constant 0 : index
    %c0_4 = arith.constant 0 : index
    %19 = vector.load %arg5[%c0_3, %c0_4] : memref<1x128xf32, #tpu.memory_space<vmem>>, vector<1x128xf32>
    %20 = vector.broadcast %19 : vector<1x128xf32> to vector<32x128xf32>
    %21 = arith.addf %18, %20 : vector<32x128xf32>
    %cst = arith.constant 2.000000e-01 : f32
    %22 = vector.broadcast %cst : f32 to vector<32x128xf32>
    %23 = arith.mulf %22, %21 : vector<32x128xf32>
    %24 = arith.maximumf %21, %23 : vector<32x128xf32>
    %25 = arith.truncf %24 : vector<32x128xf32> to vector<32x128xbf16>
    %c0_5 = arith.constant 0 : index
    %c0_6 = arith.constant 0 : index
    %26 = vector.load %arg6[%c0_5, %c0_6] : memref<128x128xbf16, #tpu.memory_space<vmem>>, vector<128x128xbf16>
    %cst_7 = arith.constant dense<0.000000e+00> : vector<32x128xf32>
    %27 = tpu.matmul %25, %26, %cst_7 {dimension_numbers = #tpu.dot_dimension_numbers<[1], [0], [0], [1], [0, 0, 1, 1], [], []>} : vector<32x128xbf16>, vector<128x128xbf16>, vector<32x128xf32> -> vector<32x128xf32>
    %c0_8 = arith.constant 0 : index
    %c0_9 = arith.constant 0 : index
    %28 = vector.load %arg7[%c0_8, %c0_9] : memref<1x128xf32, #tpu.memory_space<vmem>>, vector<1x128xf32>
    %29 = vector.broadcast %28 : vector<1x128xf32> to vector<32x128xf32>
    %30 = arith.addf %27, %29 : vector<32x128xf32>
    %cst_10 = arith.constant 2.000000e-01 : f32
    %31 = vector.broadcast %cst_10 : f32 to vector<32x128xf32>
    %32 = arith.mulf %31, %30 : vector<32x128xf32>
    %33 = arith.maximumf %30, %32 : vector<32x128xf32>
    %34 = arith.truncf %33 : vector<32x128xf32> to vector<32x128xbf16>
    %c0_11 = arith.constant 0 : index
    %c0_12 = arith.constant 0 : index
    %35 = vector.load %arg8[%c0_11, %c0_12] : memref<128x256xbf16, #tpu.memory_space<vmem>>, vector<128x256xbf16>
    %cst_13 = arith.constant dense<0.000000e+00> : vector<32x256xf32>
    %36 = tpu.matmul %34, %35, %cst_13 {dimension_numbers = #tpu.dot_dimension_numbers<[1], [0], [0], [1], [0, 0, 1, 1], [], []>} : vector<32x128xbf16>, vector<128x256xbf16>, vector<32x256xf32> -> vector<32x256xf32>
    %c0_14 = arith.constant 0 : index
    %c0_15 = arith.constant 0 : index
    %37 = vector.load %arg9[%c0_14, %c0_15] : memref<1x256xf32, #tpu.memory_space<vmem>>, vector<1x256xf32>
    %38 = vector.broadcast %37 : vector<1x256xf32> to vector<32x256xf32>
    %39 = arith.addf %36, %38 : vector<32x256xf32>
    %cst_16 = arith.constant 2.000000e-01 : f32
    %40 = vector.broadcast %cst_16 : f32 to vector<32x256xf32>
    %41 = arith.mulf %40, %39 : vector<32x256xf32>
    %42 = arith.maximumf %39, %41 : vector<32x256xf32>
    %43 = vector.shape_cast %42 : vector<32x256xf32> to vector<2x16x256xf32>
    %c0_17 = arith.constant 0 : index
    %c0_18 = arith.constant 0 : index
    %44 = vector.load %arg3[%c0_17, %c0_18] : memref<16x1xf32, #tpu.memory_space<vmem>>, vector<16x1xf32>
    %45 = vector.shape_cast %44 : vector<16x1xf32> to vector<1x16x1xf32>
    %46 = vector.broadcast %45 : vector<1x16x1xf32> to vector<2x16x256xf32>
    %47 = arith.mulf %43, %46 : vector<2x16x256xf32>
    %48 = vector.extract_strided_slice %47 {offsets = [0, 0, 0], sizes = [2, 8, 256], strides = [1, 1, 1]} : vector<2x16x256xf32> to vector<2x8x256xf32>
    %cst_19 = arith.constant dense<0.000000e+00> : vector<2x256xf32>
    %49 = vector.multi_reduction <add>, %48, %cst_19 [1] : vector<2x8x256xf32> to vector<2x256xf32>
    %50 = vector.extract_strided_slice %47 {offsets = [0, 8, 0], sizes = [2, 8, 256], strides = [1, 1, 1]} : vector<2x16x256xf32> to vector<2x8x256xf32>
    %cst_20 = arith.constant dense<0.000000e+00> : vector<2x256xf32>
    %51 = vector.multi_reduction <add>, %50, %cst_20 [1] : vector<2x8x256xf32> to vector<2x256xf32>
    %52 = tpu.concatenate %49, %51 in 1 : vector<2x256xf32>, vector<2x256xf32> -> vector<2x512xf32>
    %c0_21 = arith.constant 0 : index
    %c0_22 = arith.constant 0 : index
    %53 = vector.load %arg2[%c0_21, %c0_22] : memref<2x8xf32, #tpu.memory_space<vmem>>, vector<2x8xf32>
    %54 = arith.truncf %53 : vector<2x8xf32> to vector<2x8xbf16>
    %c0_23 = arith.constant 0 : index
    %c0_24 = arith.constant 0 : index
    %55 = vector.load %arg10[%c0_23, %c0_24] : memref<8x128xbf16, #tpu.memory_space<vmem>>, vector<8x128xbf16>
    %cst_25 = arith.constant dense<0.000000e+00> : vector<2x128xf32>
    %56 = tpu.matmul %54, %55, %cst_25 {dimension_numbers = #tpu.dot_dimension_numbers<[1], [0], [0], [1], [0, 0, 1, 1], [], []>} : vector<2x8xbf16>, vector<8x128xbf16>, vector<2x128xf32> -> vector<2x128xf32>
    %c0_26 = arith.constant 0 : index
    %c0_27 = arith.constant 0 : index
    %57 = vector.load %arg11[%c0_26, %c0_27] : memref<1x128xf32, #tpu.memory_space<vmem>>, vector<1x128xf32>
    %58 = vector.broadcast %57 : vector<1x128xf32> to vector<2x128xf32>
    %59 = arith.addf %56, %58 : vector<2x128xf32>
    %cst_28 = arith.constant 2.000000e-01 : f32
    %60 = vector.broadcast %cst_28 : f32 to vector<2x128xf32>
    %61 = arith.mulf %60, %59 : vector<2x128xf32>
    %62 = arith.maximumf %59, %61 : vector<2x128xf32>
    %63 = arith.truncf %52 : vector<2x512xf32> to vector<2x512xbf16>
    %c0_29 = arith.constant 0 : index
    %c0_30 = arith.constant 0 : index
    %64 = vector.load %arg12[%c0_29, %c0_30] : memref<512x1024xbf16, #tpu.memory_space<vmem>>, vector<512x1024xbf16>
    %cst_31 = arith.constant dense<0.000000e+00> : vector<2x1024xf32>
    %65 = tpu.matmul %63, %64, %cst_31 {dimension_numbers = #tpu.dot_dimension_numbers<[1], [0], [0], [1], [0, 0, 1, 1], [], []>} : vector<2x512xbf16>, vector<512x1024xbf16>, vector<2x1024xf32> -> vector<2x1024xf32>
    %66 = arith.truncf %62 : vector<2x128xf32> to vector<2x128xbf16>
    %c0_32 = arith.constant 0 : index
    %c0_33 = arith.constant 0 : index
    %67 = vector.load %arg13[%c0_32, %c0_33] : memref<128x1024xbf16, #tpu.memory_space<vmem>>, vector<128x1024xbf16>
    %cst_34 = arith.constant dense<0.000000e+00> : vector<2x1024xf32>
    %68 = tpu.matmul %66, %67, %cst_34 {dimension_numbers = #tpu.dot_dimension_numbers<[1], [0], [0], [1], [0, 0, 1, 1], [], []>} : vector<2x128xbf16>, vector<128x1024xbf16>, vector<2x1024xf32> -> vector<2x1024xf32>
    %69 = arith.addf %65, %68 : vector<2x1024xf32>
    %c0_35 = arith.constant 0 : index
    %c0_36 = arith.constant 0 : index
    %70 = vector.load %arg14[%c0_35, %c0_36] : memref<1x1024xf32, #tpu.memory_space<vmem>>, vector<1x1024xf32>
    %71 = vector.broadcast %70 : vector<1x1024xf32> to vector<2x1024xf32>
    %72 = arith.addf %69, %71 : vector<2x1024xf32>
    %cst_37 = arith.constant 2.000000e-01 : f32
    %73 = vector.broadcast %cst_37 : f32 to vector<2x1024xf32>
    %74 = arith.mulf %73, %72 : vector<2x1024xf32>
    %75 = arith.maximumf %72, %74 : vector<2x1024xf32>
    %76 = arith.truncf %75 : vector<2x1024xf32> to vector<2x1024xbf16>
    %c0_38 = arith.constant 0 : index
    %c0_39 = arith.constant 0 : index
    %77 = vector.load %arg15[%c0_38, %c0_39] : memref<1024x256xbf16, #tpu.memory_space<vmem>>, vector<1024x256xbf16>
    %cst_40 = arith.constant dense<0.000000e+00> : vector<2x256xf32>
    %78 = tpu.matmul %76, %77, %cst_40 {dimension_numbers = #tpu.dot_dimension_numbers<[1], [0], [0], [1], [0, 0, 1, 1], [], []>} : vector<2x1024xbf16>, vector<1024x256xbf16>, vector<2x256xf32> -> vector<2x256xf32>
    %c0_41 = arith.constant 0 : index
    %c0_42 = arith.constant 0 : index
    %79 = vector.load %arg16[%c0_41, %c0_42] : memref<1x256xf32, #tpu.memory_space<vmem>>, vector<1x256xf32>
    %80 = vector.broadcast %79 : vector<1x256xf32> to vector<2x256xf32>
    %81 = arith.addf %78, %80 : vector<2x256xf32>
    %cst_43 = arith.constant 2.000000e-01 : f32
    %82 = vector.broadcast %cst_43 : f32 to vector<2x256xf32>
    %83 = arith.mulf %82, %81 : vector<2x256xf32>
    %84 = arith.maximumf %81, %83 : vector<2x256xf32>
    %c0_44 = arith.constant 0 : index
    %c0_45 = arith.constant 0 : index
    %85 = vector.load %arg19[%c0_44, %c0_45] : memref<2x256xf32, #tpu.memory_space<vmem>>, vector<2x256xf32>
    tpu.vector_store %arg19[%c0_44, %c0_45], %84 {strides = array<i32>} : memref<2x256xf32, #tpu.memory_space<vmem>>, vector<2x256xf32>,
    %86 = arith.truncf %84 : vector<2x256xf32> to vector<2x256xbf16>
    %c0_46 = arith.constant 0 : index
    %c0_47 = arith.constant 0 : index
    %87 = vector.load %arg17[%c0_46, %c0_47] : memref<256x128xbf16, #tpu.memory_space<vmem>>, vector<256x128xbf16>
    %cst_48 = arith.constant dense<0.000000e+00> : vector<2x128xf32>
    %88 = tpu.matmul %86, %87, %cst_48 {dimension_numbers = #tpu.dot_dimension_numbers<[1], [0], [0], [1], [0, 0, 1, 1], [], []>} : vector<2x256xbf16>, vector<256x128xbf16>, vector<2x128xf32> -> vector<2x128xf32>
    %c0_49 = arith.constant 0 : index
    %c0_50 = arith.constant 0 : index
    %89 = vector.load %arg18[%c0_49, %c0_50] : memref<1x128xf32, #tpu.memory_space<vmem>>, vector<1x128xf32>
    %90 = vector.broadcast %89 : vector<1x128xf32> to vector<2x128xf32>
    %91 = arith.addf %88, %90 : vector<2x128xf32>
    %c0_51 = arith.constant 0 : index
    %c0_52 = arith.constant 0 : index
    %92 = vector.load %arg20[%c0_51, %c0_52] : memref<2x128xf32, #tpu.memory_space<vmem>>, vector<2x128xf32>
    tpu.vector_store %arg20[%c0_51, %c0_52], %91 {strides = array<i32>} : memref<2x128xf32, #tpu.memory_space<vmem>>, vector<2x128xf32>,
    return
  }
  func.func @transform_0(%arg0: i32) -> (i32, i32) {
    %c0_i32 = arith.constant 0 : i32
    %c0_i32_0 = arith.constant 0 : i32
    return %arg0, %c0_i32 : i32, i32
  }
  func.func @transform_1(%arg0: i32) -> (i32, i32) {
    %c0_i32 = arith.constant 0 : i32
    %c0_i32_0 = arith.constant 0 : i32
    return %arg0, %c0_i32 : i32, i32
  }
  func.func @transform_2(%arg0: i32) -> (i32, i32) {
    %c0_i32 = arith.constant 0 : i32
    %c0_i32_0 = arith.constant 0 : i32
    %c0_i32_1 = arith.constant 0 : i32
    return %c0_i32, %c0_i32_0 : i32, i32
  }
  func.func @transform_3(%arg0: i32) -> (i32, i32) {
    %c0_i32 = arith.constant 0 : i32
    %c0_i32_0 = arith.constant 0 : i32
    %c0_i32_1 = arith.constant 0 : i32
    return %c0_i32, %c0_i32_0 : i32, i32
  }
  func.func @transform_4(%arg0: i32) -> (i32, i32) {
    %c0_i32 = arith.constant 0 : i32
    %c0_i32_0 = arith.constant 0 : i32
    %c0_i32_1 = arith.constant 0 : i32
    return %c0_i32, %c0_i32_0 : i32, i32
  }
  func.func @transform_5(%arg0: i32) -> (i32, i32) {
    %c0_i32 = arith.constant 0 : i32
    %c0_i32_0 = arith.constant 0 : i32
    %c0_i32_1 = arith.constant 0 : i32
    return %c0_i32, %c0_i32_0 : i32, i32
  }
  func.func @transform_6(%arg0: i32) -> (i32, i32) {
    %c0_i32 = arith.constant 0 : i32
    %c0_i32_0 = arith.constant 0 : i32
    %c0_i32_1 = arith.constant 0 : i32
    return %c0_i32, %c0_i32_0 : i32, i32
  }
  func.func @transform_7(%arg0: i32) -> (i32, i32) {
    %c0_i32 = arith.constant 0 : i32
    %c0_i32_0 = arith.constant 0 : i32
    %c0_i32_1 = arith.constant 0 : i32
    return %c0_i32, %c0_i32_0 : i32, i32
  }
  func.func @transform_8(%arg0: i32) -> (i32, i32) {
    %c0_i32 = arith.constant 0 : i32
    %c0_i32_0 = arith.constant 0 : i32
    %c0_i32_1 = arith.constant 0 : i32
    return %c0_i32, %c0_i32_0 : i32, i32
  }
  func.func @transform_9(%arg0: i32) -> (i32, i32) {
    %c0_i32 = arith.constant 0 : i32
    %c0_i32_0 = arith.constant 0 : i32
    %c0_i32_1 = arith.constant 0 : i32
    return %c0_i32, %c0_i32_0 : i32, i32
  }
  func.func @transform_10(%arg0: i32) -> (i32, i32) {
    %c0_i32 = arith.constant 0 : i32
    %c0_i32_0 = arith.constant 0 : i32
    %c0_i32_1 = arith.constant 0 : i32
    return %c0_i32, %c0_i32_0 : i32, i32
  }
  func.func @transform_11(%arg0: i32) -> (i32, i32) {
    %c0_i32 = arith.constant 0 : i32
    %c0_i32_0 = arith.constant 0 : i32
    %c0_i32_1 = arith.constant 0 : i32
    return %c0_i32, %c0_i32_0 : i32, i32
  }
  func.func @transform_12(%arg0: i32) -> (i32, i32) {
    %c0_i32 = arith.constant 0 : i32
    %c0_i32_0 = arith.constant 0 : i32
    %c0_i32_1 = arith.constant 0 : i32
    return %c0_i32, %c0_i32_0 : i32, i32
  }
  func.func @transform_13(%arg0: i32) -> (i32, i32) {
    %c0_i32 = arith.constant 0 : i32
    %c0_i32_0 = arith.constant 0 : i32
    %c0_i32_1 = arith.constant 0 : i32
    return %c0_i32, %c0_i32_0 : i32, i32
  }
  func.func @transform_14(%arg0: i32) -> (i32, i32) {
    %c0_i32 = arith.constant 0 : i32
    %c0_i32_0 = arith.constant 0 : i32
    %c0_i32_1 = arith.constant 0 : i32
    return %c0_i32, %c0_i32_0 : i32, i32
  }
  func.func @transform_15(%arg0: i32) -> (i32, i32) {
    %c0_i32 = arith.constant 0 : i32
    %c0_i32_0 = arith.constant 0 : i32
    %c0_i32_1 = arith.constant 0 : i32
    return %c0_i32, %c0_i32_0 : i32, i32
  }
  func.func @transform_16(%arg0: i32) -> (i32, i32) {
    %c0_i32 = arith.constant 0 : i32
    %c0_i32_0 = arith.constant 0 : i32
    %c0_i32_1 = arith.constant 0 : i32
    return %c0_i32, %c0_i32_0 : i32, i32
  }
  func.func @transform_17(%arg0: i32) -> (i32, i32) {
    %c0_i32 = arith.constant 0 : i32
    %c0_i32_0 = arith.constant 0 : i32
    %c0_i32_1 = arith.constant 0 : i32
    return %c0_i32, %c0_i32_0 : i32, i32
  }
  func.func @transform_18(%arg0: i32) -> (i32, i32) {
    %c0_i32 = arith.constant 0 : i32
    %c0_i32_0 = arith.constant 0 : i32
    return %arg0, %c0_i32 : i32, i32
  }
  func.func @transform_19(%arg0: i32) -> (i32, i32) {
    %c0_i32 = arith.constant 0 : i32
    %c0_i32_0 = arith.constant 0 : i32
    return %arg0, %c0_i32 : i32, i32
  }
}

module attributes {stable_mosaic.version = 11 : i64} {
  func.func @coord_disc_kernel(%arg0: i32, %arg1: memref<32x3xf32, #tpu.memory_space<vmem>>, %arg2: memref<2x8xf32, #tpu.memory_space<vmem>>, %arg3: memref<16x1xf32, #tpu.memory_space<vmem>>, %arg4: memref<3x128xf32, #tpu.memory_space<vmem>>, %arg5: memref<1x128xf32, #tpu.memory_space<vmem>>, %arg6: memref<128x128xbf16, #tpu.memory_space<vmem>>, %arg7: memref<1x128xf32, #tpu.memory_space<vmem>>, %arg8: memref<128x256xbf16, #tpu.memory_space<vmem>>, %arg9: memref<1x256xf32, #tpu.memory_space<vmem>>, %arg10: memref<8x128xbf16, #tpu.memory_space<vmem>>, %arg11: memref<1x128xf32, #tpu.memory_space<vmem>>, %arg12: memref<512x1024xbf16, #tpu.memory_space<vmem>>, %arg13: memref<128x1024xbf16, #tpu.memory_space<vmem>>, %arg14: memref<1x1024xf32, #tpu.memory_space<vmem>>, %arg15: memref<1024x256xbf16, #tpu.memory_space<vmem>>, %arg16: memref<1x256xf32, #tpu.memory_space<vmem>>, %arg17: memref<256x128xbf16, #tpu.memory_space<vmem>>, %arg18: memref<1x128xf32, #tpu.memory_space<vmem>>, %arg19: memref<2x256xf32, #tpu.memory_space<vmem>>, %arg20: memref<2x128xf32, #tpu.memory_space<vmem>>) attributes {dimension_semantics = [#tpu.dimension_semantics<parallel>], iteration_bounds = array<i64: 1>, scalar_prefetch = 0 : i64, scratch_operands = 0 : i64, tpu.core_type = #tpu.core_type<tc>, window_params = [{transform_indices = @transform_0, window_bounds = array<i64: 32, 3>}, {transform_indices = @transform_1, window_bounds = array<i64: 2, 8>}, {pipeline_mode = #tpu.pipeline_mode<synchronous>, transform_indices = @transform_2, window_bounds = array<i64: 16, 1>}, {pipeline_mode = #tpu.pipeline_mode<synchronous>, transform_indices = @transform_3, window_bounds = array<i64: 3, 128>}, {pipeline_mode = #tpu.pipeline_mode<synchronous>, transform_indices = @transform_4, window_bounds = array<i64: 1, 128>}, {pipeline_mode = #tpu.pipeline_mode<synchronous>, transform_indices = @transform_5, window_bounds = array<i64: 128, 128>}, {pipeline_mode = #tpu.pipeline_mode<synchronous>, transform_indices = @transform_6, window_bounds = array<i64: 1, 128>}, {pipeline_mode = #tpu.pipeline_mode<synchronous>, transform_indices = @transform_7, window_bounds = array<i64: 128, 256>}, {pipeline_mode = #tpu.pipeline_mode<synchronous>, transform_indices = @transform_8, window_bounds = array<i64: 1, 256>}, {pipeline_mode = #tpu.pipeline_mode<synchronous>, transform_indices = @transform_9, window_bounds = array<i64: 8, 128>}, {pipeline_mode = #tpu.pipeline_mode<synchronous>, transform_indices = @transform_10, window_bounds = array<i64: 1, 128>}, {pipeline_mode = #tpu.pipeline_mode<synchronous>, transform_indices = @transform_11, window_bounds = array<i64: 512, 1024>}, {pipeline_mode = #tpu.pipeline_mode<synchronous>, transform_indices = @transform_12, window_bounds = array<i64: 128, 1024>}, {pipeline_mode = #tpu.pipeline_mode<synchronous>, transform_indices = @transform_13, window_bounds = array<i64: 1, 1024>}, {pipeline_mode = #tpu.pipeline_mode<synchronous>, transform_indices = @transform_14, window_bounds = array<i64: 1024, 256>}, {pipeline_mode = #tpu.pipeline_mode<synchronous>, transform_indices = @transform_15, window_bounds = array<i64: 1, 256>}, {pipeline_mode = #tpu.pipeline_mode<synchronous>, transform_indices = @transform_16, window_bounds = array<i64: 256, 128>}, {pipeline_mode = #tpu.pipeline_mode<synchronous>, transform_indices = @transform_17, window_bounds = array<i64: 1, 128>}, {transform_indices = @transform_18, window_bounds = array<i64: 2, 256>}, {transform_indices = @transform_19, window_bounds = array<i64: 2, 128>}]} {
    %c0 = arith.constant 0 : index
    %c0_0 = arith.constant 0 : index
    %0 = vector.load %arg1[%c0, %c0_0] : memref<32x3xf32, #tpu.memory_space<vmem>>, vector<32x3xf32>
    %c0_1 = arith.constant 0 : index
    %c0_2 = arith.constant 0 : index
    %1 = vector.load %arg4[%c0_1, %c0_2] : memref<3x128xf32, #tpu.memory_space<vmem>>, vector<3x128xf32>
    %2 = vector.extract_strided_slice %0 {offsets = [0, 0], sizes = [32, 1], strides = [1, 1]} : vector<32x3xf32> to vector<32x1xf32>
    %3 = vector.extract_strided_slice %1 {offsets = [0, 0], sizes = [1, 128], strides = [1, 1]} : vector<3x128xf32> to vector<1x128xf32>
    %4 = vector.broadcast %2 : vector<32x1xf32> to vector<32x128xf32>
    %5 = vector.broadcast %3 : vector<1x128xf32> to vector<32x128xf32>
    %6 = arith.mulf %4, %5 : vector<32x128xf32>
    %7 = vector.extract_strided_slice %0 {offsets = [0, 1], sizes = [32, 1], strides = [1, 1]} : vector<32x3xf32> to vector<32x1xf32>
    %8 = vector.extract_strided_slice %1 {offsets = [1, 0], sizes = [1, 128], strides = [1, 1]} : vector<3x128xf32> to vector<1x128xf32>
    %9 = vector.broadcast %7 : vector<32x1xf32> to vector<32x128xf32>
    %10 = vector.broadcast %8 : vector<1x128xf32> to vector<32x128xf32>
    %11 = arith.mulf %9, %10 : vector<32x128xf32>
    %12 = arith.addf %6, %11 : vector<32x128xf32>
    %13 = vector.extract_strided_slice %0 {offsets = [0, 2], sizes = [32, 1], strides = [1, 1]} : vector<32x3xf32> to vector<32x1xf32>
    %14 = vector.extract_strided_slice %1 {offsets = [2, 0], sizes = [1, 128], strides = [1, 1]} : vector<3x128xf32> to vector<1x128xf32>
    %15 = vector.broadcast %13 : vector<32x1xf32> to vector<32x128xf32>
    %16 = vector.broadcast %14 : vector<1x128xf32> to vector<32x128xf32>
    %17 = arith.mulf %15, %16 : vector<32x128xf32>
    %18 = arith.addf %12, %17 : vector<32x128xf32>
    %c0_3 = arith.constant 0 : index
    %c0_4 = arith.constant 0 : index
    %19 = vector.load %arg5[%c0_3, %c0_4] : memref<1x128xf32, #tpu.memory_space<vmem>>, vector<1x128xf32>
    %20 = vector.broadcast %19 : vector<1x128xf32> to vector<32x128xf32>
    %21 = arith.addf %18, %20 : vector<32x128xf32>
    %cst = arith.constant 2.000000e-01 : f32
    %22 = vector.broadcast %cst : f32 to vector<32x128xf32>
    %23 = arith.mulf %22, %21 : vector<32x128xf32>
    %24 = arith.maximumf %21, %23 : vector<32x128xf32>
    %25 = arith.truncf %24 : vector<32x128xf32> to vector<32x128xbf16>
    %c0_5 = arith.constant 0 : index
    %c0_6 = arith.constant 0 : index
    %26 = vector.load %arg6[%c0_5, %c0_6] : memref<128x128xbf16, #tpu.memory_space<vmem>>, vector<128x128xbf16>
    %cst_7 = arith.constant dense<0.000000e+00> : vector<32x128xf32>
    %27 = tpu.matmul %25, %26, %cst_7 {dimension_numbers = #tpu.dot_dimension_numbers<[1], [0], [0], [1], [0, 0, 1, 1], [], []>} : vector<32x128xbf16>, vector<128x128xbf16>, vector<32x128xf32> -> vector<32x128xf32>
    %c0_8 = arith.constant 0 : index
    %c0_9 = arith.constant 0 : index
    %28 = vector.load %arg7[%c0_8, %c0_9] : memref<1x128xf32, #tpu.memory_space<vmem>>, vector<1x128xf32>
    %29 = vector.broadcast %28 : vector<1x128xf32> to vector<32x128xf32>
    %30 = arith.addf %27, %29 : vector<32x128xf32>
    %cst_10 = arith.constant 2.000000e-01 : f32
    %31 = vector.broadcast %cst_10 : f32 to vector<32x128xf32>
    %32 = arith.mulf %31, %30 : vector<32x128xf32>
    %33 = arith.maximumf %30, %32 : vector<32x128xf32>
    %34 = arith.truncf %33 : vector<32x128xf32> to vector<32x128xbf16>
    %c0_11 = arith.constant 0 : index
    %c0_12 = arith.constant 0 : index
    %35 = vector.load %arg8[%c0_11, %c0_12] : memref<128x256xbf16, #tpu.memory_space<vmem>>, vector<128x256xbf16>
    %cst_13 = arith.constant dense<0.000000e+00> : vector<32x256xf32>
    %36 = tpu.matmul %34, %35, %cst_13 {dimension_numbers = #tpu.dot_dimension_numbers<[1], [0], [0], [1], [0, 0, 1, 1], [], []>} : vector<32x128xbf16>, vector<128x256xbf16>, vector<32x256xf32> -> vector<32x256xf32>
    %c0_14 = arith.constant 0 : index
    %c0_15 = arith.constant 0 : index
    %37 = vector.load %arg9[%c0_14, %c0_15] : memref<1x256xf32, #tpu.memory_space<vmem>>, vector<1x256xf32>
    %38 = vector.broadcast %37 : vector<1x256xf32> to vector<32x256xf32>
    %39 = arith.addf %36, %38 : vector<32x256xf32>
    %cst_16 = arith.constant 2.000000e-01 : f32
    %40 = vector.broadcast %cst_16 : f32 to vector<32x256xf32>
    %41 = arith.mulf %40, %39 : vector<32x256xf32>
    %42 = arith.maximumf %39, %41 : vector<32x256xf32>
    %43 = vector.shape_cast %42 : vector<32x256xf32> to vector<2x16x256xf32>
    %c0_17 = arith.constant 0 : index
    %c0_18 = arith.constant 0 : index
    %44 = vector.load %arg3[%c0_17, %c0_18] : memref<16x1xf32, #tpu.memory_space<vmem>>, vector<16x1xf32>
    %45 = vector.shape_cast %44 : vector<16x1xf32> to vector<1x16x1xf32>
    %46 = vector.broadcast %45 : vector<1x16x1xf32> to vector<2x16x256xf32>
    %47 = arith.mulf %43, %46 : vector<2x16x256xf32>
    %48 = vector.extract_strided_slice %47 {offsets = [0, 0, 0], sizes = [2, 8, 256], strides = [1, 1, 1]} : vector<2x16x256xf32> to vector<2x8x256xf32>
    %cst_19 = arith.constant dense<0.000000e+00> : vector<2x256xf32>
    %49 = vector.multi_reduction <add>, %48, %cst_19 [1] : vector<2x8x256xf32> to vector<2x256xf32>
    %50 = vector.extract_strided_slice %47 {offsets = [0, 8, 0], sizes = [2, 8, 256], strides = [1, 1, 1]} : vector<2x16x256xf32> to vector<2x8x256xf32>
    %cst_20 = arith.constant dense<0.000000e+00> : vector<2x256xf32>
    %51 = vector.multi_reduction <add>, %50, %cst_20 [1] : vector<2x8x256xf32> to vector<2x256xf32>
    %52 = tpu.concatenate %49, %51 in 1 : vector<2x256xf32>, vector<2x256xf32> -> vector<2x512xf32>
    %c0_21 = arith.constant 0 : index
    %c0_22 = arith.constant 0 : index
    %53 = vector.load %arg2[%c0_21, %c0_22] : memref<2x8xf32, #tpu.memory_space<vmem>>, vector<2x8xf32>
    %54 = arith.truncf %53 : vector<2x8xf32> to vector<2x8xbf16>
    %c0_23 = arith.constant 0 : index
    %c0_24 = arith.constant 0 : index
    %55 = vector.load %arg10[%c0_23, %c0_24] : memref<8x128xbf16, #tpu.memory_space<vmem>>, vector<8x128xbf16>
    %cst_25 = arith.constant dense<0.000000e+00> : vector<2x128xf32>
    %56 = tpu.matmul %54, %55, %cst_25 {dimension_numbers = #tpu.dot_dimension_numbers<[1], [0], [0], [1], [0, 0, 1, 1], [], []>} : vector<2x8xbf16>, vector<8x128xbf16>, vector<2x128xf32> -> vector<2x128xf32>
    %c0_26 = arith.constant 0 : index
    %c0_27 = arith.constant 0 : index
    %57 = vector.load %arg11[%c0_26, %c0_27] : memref<1x128xf32, #tpu.memory_space<vmem>>, vector<1x128xf32>
    %58 = vector.broadcast %57 : vector<1x128xf32> to vector<2x128xf32>
    %59 = arith.addf %56, %58 : vector<2x128xf32>
    %cst_28 = arith.constant 2.000000e-01 : f32
    %60 = vector.broadcast %cst_28 : f32 to vector<2x128xf32>
    %61 = arith.mulf %60, %59 : vector<2x128xf32>
    %62 = arith.maximumf %59, %61 : vector<2x128xf32>
    %63 = arith.truncf %52 : vector<2x512xf32> to vector<2x512xbf16>
    %c0_29 = arith.constant 0 : index
    %c0_30 = arith.constant 0 : index
    %64 = vector.load %arg12[%c0_29, %c0_30] : memref<512x1024xbf16, #tpu.memory_space<vmem>>, vector<512x1024xbf16>
    %cst_31 = arith.constant dense<0.000000e+00> : vector<2x1024xf32>
    %65 = tpu.matmul %63, %64, %cst_31 {dimension_numbers = #tpu.dot_dimension_numbers<[1], [0], [0], [1], [0, 0, 1, 1], [], []>} : vector<2x512xbf16>, vector<512x1024xbf16>, vector<2x1024xf32> -> vector<2x1024xf32>
    %66 = arith.truncf %62 : vector<2x128xf32> to vector<2x128xbf16>
    %c0_32 = arith.constant 0 : index
    %c0_33 = arith.constant 0 : index
    %67 = vector.load %arg13[%c0_32, %c0_33] : memref<128x1024xbf16, #tpu.memory_space<vmem>>, vector<128x1024xbf16>
    %cst_34 = arith.constant dense<0.000000e+00> : vector<2x1024xf32>
    %68 = tpu.matmul %66, %67, %cst_34 {dimension_numbers = #tpu.dot_dimension_numbers<[1], [0], [0], [1], [0, 0, 1, 1], [], []>} : vector<2x128xbf16>, vector<128x1024xbf16>, vector<2x1024xf32> -> vector<2x1024xf32>
    %69 = arith.addf %65, %68 : vector<2x1024xf32>
    %c0_35 = arith.constant 0 : index
    %c0_36 = arith.constant 0 : index
    %70 = vector.load %arg14[%c0_35, %c0_36] : memref<1x1024xf32, #tpu.memory_space<vmem>>, vector<1x1024xf32>
    %71 = vector.broadcast %70 : vector<1x1024xf32> to vector<2x1024xf32>
    %72 = arith.addf %69, %71 : vector<2x1024xf32>
    %cst_37 = arith.constant 2.000000e-01 : f32
    %73 = vector.broadcast %cst_37 : f32 to vector<2x1024xf32>
    %74 = arith.mulf %73, %72 : vector<2x1024xf32>
    %75 = arith.maximumf %72, %74 : vector<2x1024xf32>
    %76 = arith.truncf %75 : vector<2x1024xf32> to vector<2x1024xbf16>
    %c0_38 = arith.constant 0 : index
    %c0_39 = arith.constant 0 : index
    %77 = vector.load %arg15[%c0_38, %c0_39] : memref<1024x256xbf16, #tpu.memory_space<vmem>>, vector<1024x256xbf16>
    %cst_40 = arith.constant dense<0.000000e+00> : vector<2x256xf32>
    %78 = tpu.matmul %76, %77, %cst_40 {dimension_numbers = #tpu.dot_dimension_numbers<[1], [0], [0], [1], [0, 0, 1, 1], [], []>} : vector<2x1024xbf16>, vector<1024x256xbf16>, vector<2x256xf32> -> vector<2x256xf32>
    %c0_41 = arith.constant 0 : index
    %c0_42 = arith.constant 0 : index
    %79 = vector.load %arg16[%c0_41, %c0_42] : memref<1x256xf32, #tpu.memory_space<vmem>>, vector<1x256xf32>
    %80 = vector.broadcast %79 : vector<1x256xf32> to vector<2x256xf32>
    %81 = arith.addf %78, %80 : vector<2x256xf32>
    %cst_43 = arith.constant 2.000000e-01 : f32
    %82 = vector.broadcast %cst_43 : f32 to vector<2x256xf32>
    %83 = arith.mulf %82, %81 : vector<2x256xf32>
    %84 = arith.maximumf %81, %83 : vector<2x256xf32>
    %c0_44 = arith.constant 0 : index
    %c0_45 = arith.constant 0 : index
    %85 = vector.load %arg19[%c0_44, %c0_45] : memref<2x256xf32, #tpu.memory_space<vmem>>, vector<2x256xf32>
    tpu.vector_store %arg19[%c0_44, %c0_45], %84 {strides = array<i32>} : memref<2x256xf32, #tpu.memory_space<vmem>>, vector<2x256xf32>,
    %86 = arith.truncf %84 : vector<2x256xf32> to vector<2x256xbf16>
    %c0_46 = arith.constant 0 : index
    %c0_47 = arith.constant 0 : index
    %87 = vector.load %arg17[%c0_46, %c0_47] : memref<256x128xbf16, #tpu.memory_space<vmem>>, vector<256x128xbf16>
    %cst_48 = arith.constant dense<0.000000e+00> : vector<2x128xf32>
    %88 = tpu.matmul %86, %87, %cst_48 {dimension_numbers = #tpu.dot_dimension_numbers<[1], [0], [0], [1], [0, 0, 1, 1], [], []>} : vector<2x256xbf16>, vector<256x128xbf16>, vector<2x128xf32> -> vector<2x128xf32>
    %c0_49 = arith.constant 0 : index
    %c0_50 = arith.constant 0 : index
    %89 = vector.load %arg18[%c0_49, %c0_50] : memref<1x128xf32, #tpu.memory_space<vmem>>, vector<1x128xf32>
    %90 = vector.broadcast %89 : vector<1x128xf32> to vector<2x128xf32>
    %91 = arith.addf %88, %90 : vector<2x128xf32>
    %c0_51 = arith.constant 0 : index
    %c0_52 = arith.constant 0 : index
    %92 = vector.load %arg20[%c0_51, %c0_52] : memref<2x128xf32, #tpu.memory_space<vmem>>, vector<2x128xf32>
    tpu.vector_store %arg20[%c0_51, %c0_52], %91 {strides = array<i32>} : memref<2x128xf32, #tpu.memory_space<vmem>>, vector<2x128xf32>,
    return
  }
  func.func @transform_0(%arg0: i32) -> (i32, i32) {
    %c0_i32 = arith.constant 0 : i32
    %c0_i32_0 = arith.constant 0 : i32
    return %arg0, %c0_i32 : i32, i32
  }
  func.func @transform_1(%arg0: i32) -> (i32, i32) {
    %c0_i32 = arith.constant 0 : i32
    %c0_i32_0 = arith.constant 0 : i32
    return %arg0, %c0_i32 : i32, i32
  }
  func.func @transform_2(%arg0: i32) -> (i32, i32) {
    %c0_i32 = arith.constant 0 : i32
    %c0_i32_0 = arith.constant 0 : i32
    %c0_i32_1 = arith.constant 0 : i32
    return %c0_i32, %c0_i32_0 : i32, i32
  }
  func.func @transform_3(%arg0: i32) -> (i32, i32) {
    %c0_i32 = arith.constant 0 : i32
    %c0_i32_0 = arith.constant 0 : i32
    %c0_i32_1 = arith.constant 0 : i32
    return %c0_i32, %c0_i32_0 : i32, i32
  }
  func.func @transform_4(%arg0: i32) -> (i32, i32) {
    %c0_i32 = arith.constant 0 : i32
    %c0_i32_0 = arith.constant 0 : i32
    %c0_i32_1 = arith.constant 0 : i32
    return %c0_i32, %c0_i32_0 : i32, i32
  }
  func.func @transform_5(%arg0: i32) -> (i32, i32) {
    %c0_i32 = arith.constant 0 : i32
    %c0_i32_0 = arith.constant 0 : i32
    %c0_i32_1 = arith.constant 0 : i32
    return %c0_i32, %c0_i32_0 : i32, i32
  }
  func.func @transform_6(%arg0: i32) -> (i32, i32) {
    %c0_i32 = arith.constant 0 : i32
    %c0_i32_0 = arith.constant 0 : i32
    %c0_i32_1 = arith.constant 0 : i32
    return %c0_i32, %c0_i32_0 : i32, i32
  }
  func.func @transform_7(%arg0: i32) -> (i32, i32) {
    %c0_i32 = arith.constant 0 : i32
    %c0_i32_0 = arith.constant 0 : i32
    %c0_i32_1 = arith.constant 0 : i32
    return %c0_i32, %c0_i32_0 : i32, i32
  }
  func.func @transform_8(%arg0: i32) -> (i32, i32) {
    %c0_i32 = arith.constant 0 : i32
    %c0_i32_0 = arith.constant 0 : i32
    %c0_i32_1 = arith.constant 0 : i32
    return %c0_i32, %c0_i32_0 : i32, i32
  }
  func.func @transform_9(%arg0: i32) -> (i32, i32) {
    %c0_i32 = arith.constant 0 : i32
    %c0_i32_0 = arith.constant 0 : i32
    %c0_i32_1 = arith.constant 0 : i32
    return %c0_i32, %c0_i32_0 : i32, i32
  }
  func.func @transform_10(%arg0: i32) -> (i32, i32) {
    %c0_i32 = arith.constant 0 : i32
    %c0_i32_0 = arith.constant 0 : i32
    %c0_i32_1 = arith.constant 0 : i32
    return %c0_i32, %c0_i32_0 : i32, i32
  }
  func.func @transform_11(%arg0: i32) -> (i32, i32) {
    %c0_i32 = arith.constant 0 : i32
    %c0_i32_0 = arith.constant 0 : i32
    %c0_i32_1 = arith.constant 0 : i32
    return %c0_i32, %c0_i32_0 : i32, i32
  }
  func.func @transform_12(%arg0: i32) -> (i32, i32) {
    %c0_i32 = arith.constant 0 : i32
    %c0_i32_0 = arith.constant 0 : i32
    %c0_i32_1 = arith.constant 0 : i32
    return %c0_i32, %c0_i32_0 : i32, i32
  }
  func.func @transform_13(%arg0: i32) -> (i32, i32) {
    %c0_i32 = arith.constant 0 : i32
    %c0_i32_0 = arith.constant 0 : i32
    %c0_i32_1 = arith.constant 0 : i32
    return %c0_i32, %c0_i32_0 : i32, i32
  }
  func.func @transform_14(%arg0: i32) -> (i32, i32) {
    %c0_i32 = arith.constant 0 : i32
    %c0_i32_0 = arith.constant 0 : i32
    %c0_i32_1 = arith.constant 0 : i32
    return %c0_i32, %c0_i32_0 : i32, i32
  }
  func.func @transform_15(%arg0: i32) -> (i32, i32) {
    %c0_i32 = arith.constant 0 : i32
    %c0_i32_0 = arith.constant 0 : i32
    %c0_i32_1 = arith.constant 0 : i32
    return %c0_i32, %c0_i32_0 : i32, i32
  }
  func.func @transform_16(%arg0: i32) -> (i32, i32) {
    %c0_i32 = arith.constant 0 : i32
    %c0_i32_0 = arith.constant 0 : i32
    %c0_i32_1 = arith.constant 0 : i32
    return %c0_i32, %c0_i32_0 : i32, i32
  }
  func.func @transform_17(%arg0: i32) -> (i32, i32) {
    %c0_i32 = arith.constant 0 : i32
    %c0_i32_0 = arith.constant 0 : i32
    %c0_i32_1 = arith.constant 0 : i32
    return %c0_i32, %c0_i32_0 : i32, i32
  }
  func.func @transform_18(%arg0: i32) -> (i32, i32) {
    %c0_i32 = arith.constant 0 : i32
    %c0_i32_0 = arith.constant 0 : i32
    return %arg0, %c0_i32 : i32, i32
  }
  func.func @transform_19(%arg0: i32) -> (i32, i32) {
    %c0_i32 = arith.constant 0 : i32
    %c0_i32_0 = arith.constant 0 : i32
    return %arg0, %c0_i32 : i32, i32
  }
}

</mosaic_0001>

<bundles_post_ra>
// kernel: tpu_custom_call.1
= control target key start
LH: loop header
LB: loop body
LE: loop exit
PB: predicated region body
PF: predicated region fallthrough
CT: control target
= control target key end

     0   :  { %s5711_s0 = inlined_call_operand.vmem [shape: f32[32,3], index: 0, kind: input, shape index: {}]   ;;  %s5712_s1 = inlined_call_operand.vmem [shape: f32[2,8], index: 1, kind: input, shape index: {}]   ;;  %s5713_s2 = inlined_call_operand.vmem [shape: f32[16,1], index: 2, kind: input, shape index: {}]   ;;  %s5714_s3 = inlined_call_operand.vmem [shape: f32[3,128], index: 3, kind: input, shape index: {}]   ;;  %s5715_s4 = inlined_call_operand.vmem [shape: f32[1,128], index: 4, kind: input, shape index: {}]   ;;  %s5716_s5 = inlined_call_operand.hbm [shape: bf16[128,128], index: 5, kind: input, shape index: {}]   ;;  %s5717_s6 = inlined_call_operand.vmem [shape: f32[1,128], index: 6, kind: input, shape index: {}]   ;;  %s5718_s7 = inlined_call_operand.hbm [shape: bf16[128,256], index: 7, kind: input, shape index: {}]   ;;  %s5719_s8 = inlined_call_operand.vmem [shape: f32[1,256], index: 8, kind: input, shape index: {}]   ;;  %s5720_s9 = inlined_call_operand.vmem [shape: bf16[8,128], index: 9, kind: input, shape index: {}]   ;;  %s5721_s10 = inlined_call_operand.vmem [shape: f32[1,128], index: 10, kind: input, shape index: {}]   ;;  %s5722_s11 = inlined_call_operand.hbm [shape: bf16[512,1024], index: 11, kind: input, shape index: {}]   ;;  %s5723_s12 = inlined_call_operand.hbm [shape: bf16[128,1024], index: 12, kind: input, shape index: {}]   ;;  %s5724_s13 = inlined_call_operand.vmem [shape: f32[1,1024], index: 13, kind: input, shape index: {}]   ;;  %s5725_s14 = inlined_call_operand.hbm [shape: bf16[1024,256], index: 14, kind: input, shape index: {}]   ;;  %s5726_s15 = inlined_call_operand.vmem [shape: f32[1,256], index: 15, kind: input, shape index: {}]   ;;  %s5727_s16 = inlined_call_operand.hbm [shape: bf16[256,128], index: 16, kind: input, shape index: {}]   ;;  %s5728_s17 = inlined_call_operand.vmem [shape: f32[1,128], index: 17, kind: input, shape index: {}]   ;;  %s5729_s18 = inlined_call_operand.hbm [shape: f32[2,256], index: 18, kind: output, shape index: {0}]   ;;  %s5730_s19 = inlined_call_operand.hbm [shape: f32[2,128], index: 19, kind: output, shape index: {1}]  }
   0x1   :  { %5733 = sst [smem:[#allocation22_spill]] %s5711_s0 }
   0x2   :  { %5734 = sst [smem:[#allocation23_spill]] %s5712_s1 }
   0x3   :  { %5735 = sst [smem:[#allocation24_spill]] %s5713_s2 }
   0x4   :  { %5736 = sst [smem:[#allocation25_spill]] %s5714_s3 }
   0x5   :  { %25 = vsyncpa [#allocation3], 0 }
   0x6   :  { %26 = vsyncpa [#allocation6], 0 }
   0x7   :  { %27 = vsyncpa [#allocation9], 0 }
   0x8   :  { %28 = vsyncpa [#allocation12], 0 }
   0x9   :  { %29 = vsyncpa [#allocation4], 0 }
   0xa   :  { %30 = vsyncpa [#allocation15], 0  ;;  %s5363_s0 = smov [#allocation5]  }
   0xb   :  { %s60_s30 = sshll.u32 %s5363_s0, 4  ;;  %s61_s30 = int_to_ptr.vmem [resolvable:$true] %s60_s30 }
   0xc   :  { %s5199_s20 = scalar_lea.vmem %s61_s30, 2048  ;;  %p5204_p1 = scmp.lt.s32.totalorder %s61_s30, %s61_s30 }
   0xd   :  { %p5200_p0 = scmp.ne.s32.totalorder %s61_s30, %s5199_s20  ;;  %p5205_p2 = scmp.lt.s32.totalorder %s5199_s20, %s5199_s20 }
   0xf   :  { %p5206_p3 = por %p5205_p2, %p5204_p1 }
  0x11   :  { %p5207_p4 = pnand %p5206_p3, %p5200_p0 }
  0x13   :  { %5210 = shalt.err (!%p5207_p4)
}
  0x14   :  { %s5364_s21 = smov 128   ;;  %s5365_s1 = smov 8  }
  0x15   :  { %66 = dma.hbm_to_vmem [thread:$0]  %s5718_s7, 2048, %s61_s30, [#allocation6], %s5364_s21, %s5364_s21, %s5365_s1  }
  0x16   :  { %s5366_s23 = smov [#allocation8]   ;;  %s5367_s25 = smov [#allocation2]  }
  0x17   :  { %s90_s24 = sshll.u32 %s5366_s23, 4  ;;  %s46_s3 = sshll.u32 %s5367_s25, 4  ;;  %s91_s24 = int_to_ptr.vmem [resolvable:$true] %s90_s24  ;;  %s47_s3 = int_to_ptr.vmem [resolvable:$true] %s46_s3 }
  0x18   :  { %s5219_s26 = scalar_lea.vmem %s91_s24, 8192  ;;  %p5224_p6 = scmp.lt.s32.totalorder %s91_s24, %s91_s24 }
  0x19   :  { %p5220_p5 = scmp.ne.s32.totalorder %s91_s24, %s5219_s26  ;;  %p5225_p7 = scmp.lt.s32.totalorder %s5219_s26, %s5219_s26 }
  0x1b   :  { %p5226_p8 = por %p5225_p7, %p5224_p6 }
  0x1d   :  { %p5227_p9 = pnand %p5226_p8, %p5220_p5 }
  0x1f   :  { %5230 = shalt.err (!%p5227_p9)
}
  0x20   :  { %s5368_s27 = smov 512   ;;  %s5369_s28 = smov 32  }
  0x21   :  { %96 = dma.hbm_to_vmem [thread:$0]  %s5723_s12, 8192, %s91_s24, [#allocation9], %s5368_s27, %s5368_s27, %s5369_s28  }
  0x22   :  { %s5239_s7 = scalar_lea.vmem %s47_s3, 1024  ;;  %p5244_p11 = scmp.lt.s32.totalorder %s47_s3, %s47_s3 }
  0x23   :  { %p5240_p10 = scmp.ne.s32.totalorder %s47_s3, %s5239_s7  ;;  %p5245_p12 = scmp.lt.s32.totalorder %s5239_s7, %s5239_s7 }
  0x25   :  { %p5246_p13 = por %p5245_p12, %p5244_p11 }
  0x27   :  { %p5247_p0 = pnand %p5246_p13, %p5240_p10 }
  0x29   :  { %5250 = shalt.err (!%p5247_p0)
}
  0x2a   :  { %s5370_s30 = smov 64   ;;  %s5371_s20 = smov 4  }
  0x2b   :  { %52 = dma.hbm_to_vmem [thread:$0]  %s5716_s5, 1024, %s47_s3, [#allocation3], %s5370_s30, %s5370_s30, %s5371_s20  }
  0x2c   :  { %s5372_s23 = smov [#allocation7]   ;;  %s5373_s12 = smov [#allocation10]  }
  0x2d   :  { %s78_s25 = sshll.u32 %s5372_s23, 4  ;;  %s104_s24 = sshll.u32 %s5373_s12, 4  ;;  %s79_s25 = int_to_ptr.vmem [resolvable:$true] %s78_s25  ;;  %s105_s24 = int_to_ptr.vmem [resolvable:$true] %s104_s24 }
  0x2e   :  { %s5259_s26 = scalar_lea.vmem %s79_s25, 32768  ;;  %p5264_p2 = scmp.lt.s32.totalorder %s79_s25, %s79_s25 }
  0x2f   :  { %p5260_p1 = scmp.ne.s32.totalorder %s79_s25, %s5259_s26  ;;  %p5265_p3 = scmp.lt.s32.totalorder %s5259_s26, %s5259_s26 }
  0x31   :  { %p5266_p4 = por %p5265_p3, %p5264_p2 }
  0x33   :  { %p5267_p5 = pnand %p5266_p4, %p5260_p1 }
  0x35   :  { %5270 = shalt.err (!%p5267_p5)
}
  0x36   :  { %84 = dma.hbm_to_vmem [thread:$0]  %s5722_s11, 32768, %s79_s25, [#allocation6], %s5368_s27, %s5368_s27, %s5369_s28  }
  0x37   :  { %s5279_s7 = scalar_lea.vmem %s105_s24, 16384  ;;  %p5284_p7 = scmp.lt.s32.totalorder %s105_s24, %s105_s24 }
  0x38   :  { %p5280_p6 = scmp.ne.s32.totalorder %s105_s24, %s5279_s7  ;;  %p5285_p8 = scmp.lt.s32.totalorder %s5279_s7, %s5279_s7 }
  0x3a   :  { %p5286_p9 = por %p5285_p8, %p5284_p7 }
  0x3c   :  { %p5287_p10 = pnand %p5286_p9, %p5280_p6 }
  0x3e   :  { %5290 = shalt.err (!%p5287_p10)
}
  0x3f   :  { %110 = dma.hbm_to_vmem [thread:$0]  %s5725_s14, 16384, %s105_s24, [#allocation9], %s5364_s21, %s5364_s21, %s5365_s1  }
  0x40   :  { %s5374_s22 = smov [#allocation11]  }
  0x41   :  { %s118_s2 = sshll.u32 %s5374_s22, 4  ;;  %s119_s2 = int_to_ptr.vmem [resolvable:$true] %s118_s2 }
  0x42   :  { %s5299_s23 = scalar_lea.vmem %s119_s2, 2048  ;;  %p5304_p12 = scmp.lt.s32.totalorder %s119_s2, %s119_s2 }
  0x43   :  { %p5300_p11 = scmp.ne.s32.totalorder %s119_s2, %s5299_s23  ;;  %p5305_p13 = scmp.lt.s32.totalorder %s5299_s23, %s5299_s23 }
  0x45   :  { %p5306_p0 = por %p5305_p13, %p5304_p12 }
  0x47   :  { %p5307_p1 = pnand %p5306_p0, %p5300_p11 }
  0x49   :  { %5310 = shalt.err (!%p5307_p1)
}
  0x4a   :  { %124 = dma.hbm_to_vmem [thread:$0]  %s5727_s16, 2048, %s119_s2, [#allocation12], %s5370_s30, %s5370_s30, %s5371_s20  }
  0x4b   :  { %5351 = dma.done.wait [#allocation3], 1024  }
  0x4c   :  { %5352 = vsyncadd [#allocation3], 4294966272 }
  0x4d   :  { %5353 = dma.done.wait [#allocation6], 34816  }
  0x4e   :  { %5354 = vsyncadd [#allocation6], 4294932480 }
  0x4f   :  { %5355 = dma.done.wait [#allocation9], 24576  }
  0x50   :  { %5356 = vsyncadd [#allocation9], 4294942720 }
  0x51   :  { %5357 = dma.done.wait [#allocation12], 2048  }
  0x52   :  { %5358 = vsyncadd [#allocation12], 4294965248  ;;  %v5375_v0 = vmov 1   ;;  %v5376_v1 = vmov 0   ;;  %s5737_s1 = sld [smem:[#allocation22_spill]]  ;;  %v4951_v4 = vld [vmem:[#allocation2 + $0x38] sm:$0xff]   ;;  %v171_v25 = vlaneseq }
  0x53   :  { %4943 = vset.pattern.permute.xlu1 %v5375_v0  ;;  %4942 = vset.pattern.permute.xlu0 %v5376_v1  ;;  %v4952_v7 = vld [vmem:[#allocation2 + $0x30] sm:$0xff]   ;;  %v4953_v8 = vld [vmem:[#allocation2 + $0x28] sm:$0xff]   ;;  %v4954_v9 = vld [vmem:[#allocation2 + $0x20] sm:$0xff]   ;;  %v5377_v10 = vmov 2   ;;  %v5378_v15 = vmov 0.0   ;;  %s5738_s29 = sld [smem:[#allocation25_spill]] }
  0x54   :  { %526 = vmatprep.mubr.bf16.mxu1 %v5376_v1  ;;  %4897 = vmatprep.subr.bf16.mxu0 %v4951_v4  ;;  %v4955_v11 = vld [vmem:[#allocation2 + $0x18] sm:$0xff]   ;;  %v4956_v12 = vld [vmem:[#allocation2 + $0x10] sm:$0xff]   ;;  %v4957_v13 = vld [vmem:[#allocation2 + $0x8] sm:$0xff]   ;;  %v5530_v28 = vshrl.u32 %v171_v25, 7  ;;  %vm662_vm0 = vcmask 1043456   ;;  %vm5379_vm1 = vmmov 0  }
  0x55   :  { %4898 = vmatpush3.bf16.msra.mxu0 %v4951_v4  ;;  %v4958_v14 = vld [vmem:[#allocation2] sm:$0xff]   ;;  %v4959_v16 = vld [vmem:[#allocation5 + $0x74] ss:$8 sps:$4 sm:$0xff]   ;;  %v4961_v17 = vld [vmem:[#allocation5 + $0x70] ss:$8 sps:$4 sm:$0xff]   ;;  %s5739_s2 = sld [smem:[#allocation23_spill]] }
  0x56   :  { %4899 = vmatprep.subr.bf16.mxu0 %v4952_v7  ;;  %v4962_v18 = vld [vmem:[#allocation5 + $0x64] ss:$8 sps:$4 sm:$0xff]   ;;  %494 = vmatprep.subr.bf16.mxu1 %v4959_v16  ;;  %v4964_v19 = vld [vmem:[#allocation5 + $0x60] ss:$8 sps:$4 sm:$0xff]   ;;  %v4965_v20 = vld [vmem:[#allocation5 + $0x54] ss:$8 sps:$4 sm:$0xff]  }
  0x57   :  { %495 = vmatpush1.bf16.msra.mxu1 %v4961_v17  ;;  %v4967_v21 = vld [vmem:[#allocation5 + $0x50] ss:$8 sps:$4 sm:$0xff]   ;;  %v4968_v22 = vld [vmem:[#allocation5 + $0x44] ss:$8 sps:$4 sm:$0xff]   ;;  %v4970_v23 = vld [vmem:[#allocation5 + $0x40] ss:$8 sps:$4 sm:$0xff]  }
  0x58   :  { %v146_v2 = vld [vmem:[%s5737_s1] sm:$0xff]  ;;  %v147_v3 = vld [vmem:[%s5737_s1 + $0x8] sm:$0xff]  ;;  %v148_v5 = vld [vmem:[%s5737_s1 + $0x10] sm:$0xff]  ;;  %496 = vmatprep.subr.bf16.mxu1 %v4962_v18  ;;  %v5533_v31 = vsub.s32 1, %v5530_v28  ;;  %v5536_v32 = vsub.s32 0, %v5530_v28  ;;  %v225_v36 = vsub.s32 2, %v5530_v28 }
  0x59   :  { %180 = vperm.xlu1 %4943, %v146_v2   ;;  %153 = vperm.xlu0 %4942, %v146_v2   ;;  %v149_v6 = vld [vmem:[%s5737_s1 + $0x18] sm:$0xff]  ;;  %v150_v34 = vld [vmem:[%s5738_s29] sm:$0x7]  ;;  %vm658_vm2 = vcmask 64512   ;;  %s5740_s11 = sld [smem:[#allocation24_spill]]  ;;  %vm635_vm3 = vcmask 1041409  }
  0x5a   :  { %4900 = vmatpush3.bf16.msra.mxu0 %v4952_v7  ;;  %v4971_v24 = vld [vmem:[#allocation5 + $0x34] ss:$8 sps:$4 sm:$0xff]   ;;  %v198_v37 = vrot.slane %v150_v34, %v5533_v31  ;;  %v174_v38 = vrot.slane %v150_v34, %v5536_v32  ;;  %v226_v43 = vrot.slane %v150_v34, %v225_v36  ;;  %v4369_v53 = vld [vmem:[%s5715_s4] ss:$0 sm:$0xff]  ;;  %v1026_v34 = vld [vmem:[#allocation8 + $0x1c8] sm:$0xff] }
  0x5b   :  { %4901 = vmatprep.subr.bf16.mxu0 %v4953_v8  ;;  %497 = vmatpush1.bf16.msra.mxu1 %v4964_v19  ;;  %v650_v16 = vld [vmem:[%s5720_s9] sm:$0xf] }
  0x5c   :  { %498 = vmatprep.subr.bf16.mxu1 %v4965_v20  ;;  %v664_v20 = vsel %vm662_vm0, %v650_v16, 0  ;;  %v4976_v25 = vld [vmem:[#allocation5 + $0x20] ss:$8 sps:$4 sm:$0xff]  }
  0x5d   :  { %184 = vperm.xlu1 %4943, %v147_v3   ;;  %158 = vperm.xlu0 %4942, %v147_v3  }
  0x5e   :  { %4902 = vmatpush3.bf16.msra.mxu0 %v4953_v8 }
  0x5f   :  { %4903 = vmatprep.subr.bf16.mxu0 %v4954_v9  ;;  %499 = vmatpush1.bf16.msra.mxu1 %v4967_v21  ;;  %v648_v21 = vld [vmem:[%s5739_s2] sm:$0x3] }
  0x60   :  { %500 = vmatprep.subr.bf16.mxu1 %v4968_v22  ;;  %v649_v22 = vpack.c.bf16 %v648_v21, %v648_v21 }
  0x61   :  { %4944 = vset.pattern.permute.xlu1 %v5376_v1  ;;  %163 = vperm.xlu0 %4942, %v148_v5  }
  0x62   :  { %168 = vperm.xlu1 %4944, %v149_v6   ;;  %4904 = vmatpush3.bf16.msra.mxu0 %v4954_v9 }
  0x63   :  { %4905 = vmatprep.subr.bf16.mxu0 %v4955_v11  ;;  %501 = vmatpush1.bf16.msra.mxu1 %v4970_v23  ;;  %v4973_v23 = vld [vmem:[#allocation5 + $0x30] ss:$8 sps:$4 sm:$0xff]  }
  0x64   :  { %502 = vmatprep.subr.bf16.mxu1 %v4971_v24  ;;  %v4974_v24 = vld [vmem:[#allocation5 + $0x24] ss:$8 sps:$4 sm:$0xff]  }
  0x65   :  { %4945 = vset.pattern.permute.xlu0 %v5375_v0 }
  0x66   :  { %4946 = vset.pattern.permute.xlu1 %v5375_v0  ;;  %188 = vperm.xlu0 %4945, %v148_v5  }
  0x67   :  { %192 = vperm.xlu1 %4946, %v149_v6   ;;  %4906 = vmatpush3.bf16.msra.mxu0 %v4955_v11 }
  0x68   :  { %4907 = vmatprep.subr.bf16.mxu0 %v4956_v12  ;;  %503 = vmatpush1.bf16.msra.mxu1 %v4973_v23 }
  0x69   :  { %504 = vmatprep.subr.bf16.mxu1 %v4974_v24 }
  0x6a   :  { %4948 = vset.pattern.permute.xlu0 %v5377_v10 }
  0x6b   :  { %4947 = vset.pattern.permute.xlu1 %v5377_v10  ;;  %212 = vperm.xlu0 %4948, %v147_v3  }
  0x6c   :  { %208 = vperm.xlu1 %4947, %v146_v2   ;;  %4908 = vmatpush3.bf16.msra.mxu0 %v4956_v12 }
  0x6d   :  { %4909 = vmatprep.subr.bf16.mxu0 %v4957_v13  ;;  %505 = vmatpush1.bf16.msra.mxu1 %v4976_v25 }
  0x6f   :  { %4949 = vset.pattern.permute.xlu0 %v5376_v1 }
  0x70   :  { %216 = vperm.xlu1 %4947, %v148_v5   ;;  %4910 = vmatpush3.bf16.msra.mxu0 %v4957_v13 }
  0x71   :  { %4911 = vmatprep.subr.bf16.mxu0 %v4958_v14 }
  0x74   :  { %220 = vperm.xlu1 %4947, %v149_v6   ;;  %4912 = vmatpush3.bf16.msra.mxu0 %v4958_v14 }
  0x75   :  { %4917 = vmatprep.subr.bf16.mxu0 %v5378_v15 }
  0x78   :  { %4950 = vset.pattern.permute.xlu1 %v5376_v1 }
  0xd4   :  { %v181_v26 = vpop.permute.xlu1 %180  ;;  %v154_v27 = vpop.permute.xlu0 %153 }
  0xd5   :  { %v199_v44 = vmul.f32 %v198_v37, %v181_v26  ;;  %v175_v45 = vmul.f32 %v174_v38, %v154_v27  ;;  %v4977_v26 = vld [vmem:[#allocation5 + $0x14] ss:$8 sps:$4 sm:$0xff]   ;;  %v4979_v27 = vld [vmem:[#allocation5 + $0x10] ss:$8 sps:$4 sm:$0xff]  }
  0xd6   :  { %506 = vmatprep.subr.bf16.mxu1 %v4977_v26  ;;  %v1017_v26 = vld [vmem:[#allocation8 + $0x180] sm:$0xff] }
  0xd7   :  { %v203_v50 = vadd.f32 %v199_v44, %v175_v45  ;;  %507 = vmatpush1.bf16.msra.mxu1 %v4979_v27  ;;  %v1010_v44 = vld [vmem:[#allocation8 + $0x148] sm:$0xff]  ;;  %v1021_v27 = vld [vmem:[#allocation8 + $0x1a0] sm:$0xff] }
  0xd8   :  { %v185_v29 = vpop.permute.xlu1 %184  ;;  %v159_v30 = vpop.permute.xlu0 %158  ;;  %v1014_v45 = vld [vmem:[#allocation8 + $0x168] sm:$0xff] }
  0xd9   :  { %v200_v41 = vmul.f32 %v198_v37, %v185_v29  ;;  %v176_v42 = vmul.f32 %v174_v38, %v159_v30  ;;  %v4982_v29 = vld [vmem:[#allocation5] ss:$8 sps:$4 sm:$0xff]  }
  0xda   :  { %v5557_v30 = vld [vmem:[#allocation8 + $0x1c0] sm:$0xff] }
  0xdb   :  { %v204_v47 = vadd.f32 %v200_v41, %v176_v42  ;;  %v1018_v41 = vld [vmem:[#allocation8 + $0x188] sm:$0xff] }
  0xdc   :  { %v164_v33 = vpop.permute.xlu0 %163  ;;  %v1022_v42 = vld [vmem:[#allocation8 + $0x1a8] sm:$0xff] }
  0xdd   :  { %v169_v35 = vpop.permute.xlu1 %168  ;;  %v177_v55 = vmul.f32 %v174_v38, %v164_v33  ;;  %v5559_v33 = vld [vmem:[#allocation8 + $0x1e0] sm:$0xff] }
  0xde   :  { %v178_v0 = vmul.f32 %v174_v38, %v169_v35  ;;  %v4453_v35 = vcombine.low %v5557_v30, %v5559_v33  ;;  %v1030_v38 = vld [vmem:[#allocation8 + $0x1e8] sm:$0xff] }
  0xe1   :  { %v189_v39 = vpop.permute.xlu0 %188 }
  0xe2   :  { %v193_v40 = vpop.permute.xlu1 %192  ;;  %v201_v51 = vmul.f32 %v198_v37, %v189_v39  ;;  %v4455_v39 = vcombine.low %v1026_v34, %v1030_v38 }
  0xe3   :  { %v202_v60 = vmul.f32 %v198_v37, %v193_v40  ;;  %v4454_v37 = vcombine.high %v5557_v30, %v5559_v33  ;;  %v4456_v40 = vcombine.high %v1026_v34, %v1030_v38  ;;  %v1004_v33 = vld [vmem:[#allocation8 + $0x118] sm:$0xff] }
  0xe4   :  { %v205_v59 = vadd.f32 %v201_v51, %v177_v55  ;;  %v4439_v51 = vcombine.low %v1010_v44, %v1014_v45  ;;  %v998_v55 = vld [vmem:[#allocation8 + $0xe8] sm:$0xff] }
  0xe5   :  { %v206_v6 = vadd.f32 %v202_v60, %v178_v0 }
  0xe6   :  { %v213_v46 = vpop.permute.xlu0 %212 }
  0xe7   :  { %v228_v48 = vmul.f32 %v226_v43, %v213_v46  ;;  %v209_v49 = vpop.permute.xlu1 %208  ;;  %v4447_v46 = vcombine.low %v1018_v41, %v1022_v42 }
  0xe8   :  { %v227_v52 = vmul.f32 %v226_v43, %v209_v49  ;;  %v1002_v49 = vld [vmem:[#allocation8 + $0x108] sm:$0xff] }
  0xe9   :  { %v232_v54 = vadd.f32 %v228_v48, %v204_v47  ;;  %v563_v47 = vld [vmem:[%s5740_s11] sm:$0xff]  ;;  %v4440_v48 = vcombine.high %v1010_v44, %v1014_v45  ;;  %v4446_v44 = vcombine.high %v1017_v26, %v1021_v27 }
  0xea   :  { %v231_v56 = vadd.f32 %v227_v52, %v203_v50  ;;  %567 = vperm.xlu0 %4949, %v563_v47   ;;  %v1006_v50 = vld [vmem:[#allocation8 + $0x128] sm:$0xff]  ;;  %v1013_v47 = vld [vmem:[#allocation8 + $0x160] sm:$0xff] }
  0xeb   :  { %v217_v57 = vpop.permute.xlu1 %216  ;;  %v243_v58 = vadd.f32 %v4369_v53, %v232_v54  ;;  %v564_v52 = vld [vmem:[%s5740_s11 + $0x8] sm:$0xff] }
  0xec   :  { %v229_v61 = vmul.f32 %v226_v43, %v217_v57  ;;  %v242_v62 = vadd.f32 %v4369_v53, %v231_v56  ;;  %572 = vperm.xlu1 %4950, %v564_v52   ;;  %v994_v54 = vld [vmem:[#allocation8 + $0xc8] sm:$0xff]  ;;  %v4431_v56 = vcombine.low %v1002_v49, %v1006_v50  ;;  %v4445_v52 = vcombine.low %v1017_v26, %v1021_v27  ;;  %v969_v26 = vld [vmem:[#allocation8] sm:$0xff] }
  0xed   :  { %v247_v63 = vmul.f32 0.2, %v243_v58  ;;  %v4424_v57 = vcombine.high %v994_v54, %v998_v55  ;;  %v4423_v60 = vcombine.low %v994_v54, %v998_v55  ;;  %v1016_v54 = vld [vmem:[#allocation8 + $0x178] sm:$0xff]  ;;  %v973_v27 = vld [vmem:[#allocation8 + $0x20] sm:$0xff] }
  0xee   :  { %v233_v2 = vadd.f32 %v229_v61, %v205_v59  ;;  %v246_v3 = vmul.f32 0.2, %v242_v62  ;;  %v990_v59 = vld [vmem:[#allocation8 + $0xa8] sm:$0xff] }
  0xef   :  { %v221_v4 = vpop.permute.xlu1 %220  ;;  %v251_v5 = vmax.f32 %v243_v58, %v247_v63  ;;  %v986_v58 = vld [vmem:[#allocation8 + $0x88] sm:$0xff] }
  0xf0   :  { %v244_v7 = vadd.f32 %v4369_v53, %v233_v2  ;;  %v230_v8 = vmul.f32 %v226_v43, %v221_v4  ;;  %v250_v9 = vmax.f32 %v242_v62, %v246_v3  ;;  %v4448_v43 = vcombine.high %v1018_v41, %v1022_v42  ;;  %v978_v62 = vld [vmem:[#allocation8 + $0x48] sm:$0xff]  ;;  %v1028_v3 = vld [vmem:[#allocation8 + $0x1d8] sm:$0xff] }
  0xf1   :  { %v4416_v61 = vcombine.high %v986_v58, %v990_v59  ;;  %v982_v63 = vld [vmem:[#allocation8 + $0x68] sm:$0xff]  ;;  %v4415_v0 = vcombine.low %v986_v58, %v990_v59  ;;  %v1032_v4 = vld [vmem:[#allocation8 + $0x1f8] sm:$0xff]  ;;  %v1005_v58 = vld [vmem:[#allocation8 + $0x120] sm:$0xff] }
  0xf2   :  { %v234_v10 = vadd.f32 %v230_v8, %v206_v6  ;;  %v254_v11 = vpack.c.bf16 %v251_v5, %v250_v9  ;;  %v248_v12 = vmul.f32 0.2, %v244_v7  ;;  %v4408_v2 = vcombine.high %v978_v62, %v982_v63  ;;  %v970_v5 = vld [vmem:[#allocation8 + $0x8] sm:$0xff] }
  0xf3   :  { %v974_v6 = vld [vmem:[#allocation8 + $0x28] sm:$0xff]  ;;  %v4407_v8 = vcombine.low %v978_v62, %v982_v63 }
  0xf4   :  { %v245_v13 = vadd.f32 %v4369_v53, %v234_v10  ;;  %4913 = vmatprep.mubr.bf16.mxu0 %v254_v11  ;;  %v252_v17 = vmax.f32 %v244_v7, %v248_v12  ;;  %v4432_v53 = vcombine.high %v1002_v49, %v1006_v50  ;;  %v4459_v7 = vcombine.low %v1028_v3, %v1032_v4 }
  0xf5   :  { %v4400_v9 = vcombine.high %v970_v5, %v974_v6  ;;  %v4399_v10 = vcombine.low %v970_v5, %v974_v6  ;;  %v4460_v11 = vcombine.high %v1028_v3, %v1032_v4  ;;  %v996_v6 = vld [vmem:[#allocation8 + $0xd8] sm:$0xff] }
  0xf6   :  { %v249_v14 = vmul.f32 0.2, %v245_v13 }
  0xf8   :  { %v253_v18 = vmax.f32 %v245_v13, %v249_v14  ;;  %v4370_v13 = vld [vmem:[%s5717_s6] ss:$0 sm:$0xff] }
  0xfa   :  { %v255_v19 = vpack.c.bf16 %v253_v18, %v252_v17 }
  0xfc   :  { %4914 = vmatmul.mubr.bf16.vlgmr.msra.gmra.mxu0 %v255_v19  ;;  %v4395_v19 = vld [vmem:[%s5721_s10] ss:$0 sm:$0xff] }
  0xfd   :  { %4918 = vmatpush3.bf16.msra.mxu0 %v664_v20  ;;  %4919 = vmatprep.mubr.msk.bf16.mxu0 %vm5379_vm1, %v5378_v15  ;;  %v4980_v15 = vld [vmem:[#allocation5 + $0x4] ss:$8 sps:$4 sm:$0xff]  }
  0xfe   :  { %508 = vmatprep.subr.bf16.mxu1 %v4980_v15  ;;  %1394 = vmatprep.subr.bf16.mxu0 %v4456_v40  ;;  %v1024_v40 = vld [vmem:[#allocation8 + $0x1b8] sm:$0xff] }
  0xff   :  { %509 = vmatpush1.bf16.msra.mxu1 %v4982_v29 }
 0x100   :  { %1353 = vmatprep.subr.bf16.mxu1 %v4454_v37 }
 0x104   :  { %4920 = vmatmul.mubr.msk.bf16.vlgmr.msra.gmra.mxu0 %vm658_vm2, %v649_v22 }
 0x105   :  { %1426 = vmatprep.mubr.bf16.mxu0 %v5376_v1  ;;  %1395 = vmatpush1.bf16.msra.mxu0 %v4455_v39  ;;  %v1020_v39 = vld [vmem:[#allocation8 + $0x198] sm:$0xff] }
 0x106   :  { %1396 = vmatprep.subr.bf16.mxu0 %v4448_v43  ;;  %v4451_v59 = vcombine.low %v1020_v39, %v1024_v40 }
 0x109   :  { %1397 = vmatpush1.bf16.msra.mxu0 %v4447_v46  ;;  %v1009_v46 = vld [vmem:[#allocation8 + $0x140] sm:$0xff] }
 0x10a   :  { %1398 = vmatprep.subr.bf16.mxu0 %v4440_v48  ;;  %v4437_v30 = vcombine.low %v1009_v46, %v1013_v47 }
 0x10d   :  { %1399 = vmatpush1.bf16.msra.mxu0 %v4439_v51  ;;  %v4452_v51 = vcombine.high %v1020_v39, %v1024_v40  ;;  %v4398_v39 = vcombine.high %v969_v26, %v973_v27  ;;  %v1027_v40 = vld [vmem:[#allocation8 + $0x1d0] sm:$0xff] }
 0x10e   :  { %1400 = vmatprep.subr.bf16.mxu0 %v4432_v53  ;;  %v1012_v53 = vld [vmem:[#allocation8 + $0x158] sm:$0xff] }
 0x10f   :  { %v4443_v3 = vcombine.low %v1012_v53, %v1016_v54 }
 0x111   :  { %1401 = vmatpush1.bf16.msra.mxu0 %v4431_v56  ;;  %v4438_v56 = vcombine.high %v1009_v46, %v1013_v47  ;;  %v900_v46 = vld [vmem:[#allocation7 + $0x5e0] sm:$0xff] }
 0x112   :  { %1402 = vmatprep.subr.bf16.mxu0 %v4424_v57  ;;  %v1001_v57 = vld [vmem:[#allocation8 + $0x100] sm:$0xff] }
 0x113   :  { %v4430_v63 = vcombine.high %v1001_v57, %v1005_v58  ;;  %v4429_v5 = vcombine.low %v1001_v57, %v1005_v58  ;;  %v1011_v57 = vld [vmem:[#allocation8 + $0x150] sm:$0xff] }
 0x114   :  { %v1015_v58 = vld [vmem:[#allocation8 + $0x170] sm:$0xff] }
 0x115   :  { %1403 = vmatpush1.bf16.msra.mxu0 %v4423_v60 }
 0x116   :  { %1404 = vmatprep.subr.bf16.mxu0 %v4416_v61  ;;  %v4444_v61 = vcombine.high %v1012_v53, %v1016_v54  ;;  %v888_v54 = vld [vmem:[#allocation7 + $0x580] sm:$0xff] }
 0x119   :  { %1405 = vmatpush1.bf16.msra.mxu0 %v4415_v0  ;;  %v993_v0 = vld [vmem:[#allocation8 + $0xc0] sm:$0xff] }
 0x11a   :  { %1406 = vmatprep.subr.bf16.mxu0 %v4408_v2  ;;  %v997_v2 = vld [vmem:[#allocation8 + $0xe0] sm:$0xff] }
 0x11d   :  { %1407 = vmatpush1.bf16.msra.mxu0 %v4407_v8  ;;  %v4422_v8 = vcombine.high %v993_v0, %v997_v2 }
 0x11e   :  { %1408 = vmatprep.subr.bf16.mxu0 %v4400_v9  ;;  %v985_v9 = vld [vmem:[#allocation8 + $0x80] sm:$0xff] }
 0x121   :  { %1409 = vmatpush1.bf16.msra.mxu0 %v4399_v10  ;;  %v989_v10 = vld [vmem:[#allocation8 + $0xa0] sm:$0xff] }
 0x122   :  { %1476 = vmatprep.subr.bf16.mxu0 %v4460_v11 }
 0x1bc   :  { %v4915_v12 = vpop.f32.mrf.mxu0 }
 0x1bd   :  { %v370_v29 = vadd.f32 %v4915_v12, %v4370_v13 }
 0x1be   :  { %v361_v14 = vpop.f32.mrf.mxu0 }
 0x1bf   :  { %v362_v16 = vadd.f32 %v4370_v13, %v361_v14  ;;  %v378_v49 = vmul.f32 0.2, %v370_v29  ;;  %v988_v14 = vld [vmem:[#allocation8 + $0x98] sm:$0xff] }
 0x1c0   :  { %v4916_v17 = vpop.f32.mrf.mxu0 }
 0x1c1   :  { %v376_v20 = vmul.f32 0.2, %v362_v16  ;;  %v373_v23 = vadd.f32 %v4916_v17, %v4370_v13  ;;  %v382_v60 = vmax.f32 %v370_v29, %v378_v49  ;;  %v4414_v17 = vcombine.high %v985_v9, %v989_v10  ;;  %v1023_v49 = vld [vmem:[#allocation8 + $0x1b0] sm:$0xff] }
 0x1c2   :  { %v364_v18 = vpop.f32.mrf.mxu0 }
 0x1c3   :  { %v365_v21 = vadd.f32 %v4370_v13, %v364_v18  ;;  %v380_v34 = vmax.f32 %v362_v16, %v376_v20  ;;  %v379_v42 = vmul.f32 0.2, %v373_v23  ;;  %v4421_v13 = vcombine.low %v993_v0, %v997_v2  ;;  %v992_v16 = vld [vmem:[#allocation8 + $0xb8] sm:$0xff]  ;;  %v977_v18 = vld [vmem:[#allocation8 + $0x40] sm:$0xff] }
 0x1c4   :  { %v700_v22 = vpop.f32.mrf.mxu0 }
 0x1c5   :  { %v377_v24 = vmul.f32 0.2, %v365_v21  ;;  %v701_v25 = vadd.f32 %v4395_v19, %v700_v22  ;;  %v383_v55 = vmax.f32 %v373_v23, %v379_v42  ;;  %v981_v19 = vld [vmem:[#allocation8 + $0x60] sm:$0xff]  ;;  %v4413_v22 = vcombine.low %v985_v9, %v989_v10  ;;  %v980_v23 = vld [vmem:[#allocation8 + $0x58] sm:$0xff] }
 0x1c6   :  { %v4921_v15 = vpop.f32.mrf.mxu0 }
 0x1c7   :  { %v381_v37 = vmax.f32 %v365_v21, %v377_v24  ;;  %v706_v38 = vmul.f32 0.2, %v701_v25  ;;  %v385_v62 = vpack.c.bf16 %v383_v55, %v382_v60  ;;  %v4420_v21 = vcombine.high %v988_v14, %v992_v16  ;;  %v984_v24 = vld [vmem:[#allocation8 + $0x78] sm:$0xff]  ;;  %v892_v55 = vld [vmem:[#allocation7 + $0x5a0] sm:$0xff] }
 0x1c8   :  { %v703_v41 = vpop.f32.mrf.mxu0  ;;  %v4419_v15 = vcombine.low %v988_v14, %v992_v16  ;;  %v4412_v29 = vcombine.high %v980_v23, %v984_v24  ;;  %v4411_v42 = vcombine.low %v980_v23, %v984_v24  ;;  %v4638_v60 = vcombine.high %v888_v54, %v892_v55  ;;  %v987_v14 = vld [vmem:[#allocation8 + $0x90] sm:$0xff] }
 0x1c9   :  { %v384_v43 = vpack.c.bf16 %v381_v37, %v380_v34  ;;  %v707_v45 = vmax.f32 %v701_v25, %v706_v38  ;;  %v4406_v25 = vcombine.high %v977_v18, %v981_v19  ;;  %v4405_v34 = vcombine.low %v977_v18, %v981_v19  ;;  %v972_v37 = vld [vmem:[#allocation8 + $0x18] sm:$0xff]  ;;  %v1031_v41 = vld [vmem:[#allocation8 + $0x1f0] sm:$0xff] }
 0x1ca   :  { %v4922_v48 = vpop.f32.mrf.mxu0  ;;  %v976_v38 = vld [vmem:[#allocation8 + $0x38] sm:$0xff]  ;;  %v4458_v47 = vcombine.high %v1027_v40, %v1031_v41  ;;  %v4457_v53 = vcombine.low %v1027_v40, %v1031_v41  ;;  %v4637_v0 = vcombine.low %v888_v54, %v892_v55  ;;  %v991_v16 = vld [vmem:[#allocation8 + $0xb0] sm:$0xff]  ;;  %v756_v54 = vld [vmem:[#allocation7 + $0x160] sm:$0xff] }
 0x1cb   :  { %527 = vmatmul.mubr.bf16.vlgmr.msra.gmra.mxu1 %v384_v43  ;;  %v5577_v50 = vpack.c.bf16 %v707_v45, %v707_v45  ;;  %v4404_v43 = vcombine.high %v972_v37, %v976_v38  ;;  %v896_v45 = vld [vmem:[#allocation7 + $0x5c0] sm:$0xff]  ;;  %v1019_v48 = vld [vmem:[#allocation8 + $0x190] sm:$0xff] }
 0x1cc   :  { %536 = vmatprep.mubr.bf16.mxu1 %v5376_v1  ;;  %1354 = vmatpush1.bf16.msra.mxu1 %v4453_v35  ;;  %v1008_v35 = vld [vmem:[#allocation8 + $0x138] sm:$0xff]  ;;  %v979_v23 = vld [vmem:[#allocation8 + $0x50] sm:$0xff]  ;;  %v840_v55 = vld [vmem:[#allocation7 + $0x400] sm:$0xff] }
 0x1cd   :  { %1355 = vmatprep.subr.bf16.mxu1 %v4446_v44  ;;  %1427 = vmatmul.mubr.bf16.vlgmr.msra.gmra.mxu0 %v5577_v50  ;;  %v4436_v4 = vcombine.high %v1004_v33, %v1008_v35  ;;  %v4435_v11 = vcombine.low %v1004_v33, %v1008_v35  ;;  %v4397_v44 = vcombine.low %v969_v26, %v973_v27  ;;  %v884_v33 = vld [vmem:[#allocation7 + $0x560] sm:$0xff]  ;;  %v983_v24 = vld [vmem:[#allocation8 + $0x70] sm:$0xff] }
 0x1ce   :  { %1477 = vmatpush1.bf16.msra.mxu0 %v4459_v7  ;;  %1508 = vmatprep.mubr.bf16.mxu0 %v5376_v1  ;;  %v1000_v7 = vld [vmem:[#allocation8 + $0xf8] sm:$0xff]  ;;  %v4442_v35 = vcombine.high %v1011_v57, %v1015_v58  ;;  %v4417_v27 = vcombine.low %v987_v14, %v991_v16  ;;  %v4409_v41 = vcombine.low %v979_v23, %v983_v24 }
 0x1cf   :  { %1478 = vmatprep.subr.bf16.mxu0 %v4452_v51  ;;  %v4428_v12 = vcombine.high %v996_v6, %v1000_v7  ;;  %v4427_v20 = vcombine.low %v996_v6, %v1000_v7  ;;  %v4403_v51 = vcombine.low %v972_v37, %v976_v38  ;;  %v995_v7 = vld [vmem:[#allocation8 + $0xd0] sm:$0xff] }
 0x1d0   :  { %1356 = vmatpush1.bf16.msra.mxu1 %v4445_v52  ;;  %v4646_v52 = vcombine.high %v896_v45, %v900_v46  ;;  %v971_v37 = vld [vmem:[#allocation8 + $0x10] sm:$0xff] }
 0x1d1   :  { %1357 = vmatprep.subr.bf16.mxu1 %v4438_v56  ;;  %v4450_v56 = vcombine.high %v1019_v48, %v1023_v49  ;;  %v975_v38 = vld [vmem:[#allocation8 + $0x30] sm:$0xff] }
 0x1d2   :  { %1479 = vmatpush1.bf16.msra.mxu0 %v4451_v59  ;;  %v4645_v59 = vcombine.low %v896_v45, %v900_v46  ;;  %v4401_v46 = vcombine.low %v971_v37, %v975_v38 }
 0x1d3   :  { %537 = vmatmul.mubr.bf16.gmra.mxu1 %v385_v62  ;;  %1480 = vmatprep.subr.bf16.mxu0 %v4444_v61  ;;  %v4449_v61 = vcombine.low %v1019_v48, %v1023_v49  ;;  %v1003_v62 = vld [vmem:[#allocation8 + $0x110] sm:$0xff]  ;;  %v760_v48 = vld [vmem:[#allocation7 + $0x180] sm:$0xff] }
 0x1d4   :  { %1358 = vmatpush1.bf16.msra.mxu1 %v4437_v30  ;;  %1385 = vmatprep.mubr.bf16.mxu1 %v5376_v1  ;;  %v880_v30 = vld [vmem:[#allocation7 + $0x540] sm:$0xff] }
 0x1d5   :  { %1359 = vmatprep.subr.bf16.mxu1 %v4430_v63  ;;  %v1007_v63 = vld [vmem:[#allocation8 + $0x130] sm:$0xff]  ;;  %v4630_v2 = vcombine.high %v880_v30, %v884_v33  ;;  %v764_v49 = vld [vmem:[#allocation7 + $0x1a0] sm:$0xff] }
 0x1d6   :  { %1481 = vmatpush1.bf16.msra.mxu0 %v4443_v3  ;;  %v4441_v3 = vcombine.low %v1011_v57, %v1015_v58  ;;  %v4434_v6 = vcombine.high %v1003_v62, %v1007_v63  ;;  %v4433_v10 = vcombine.low %v1003_v62, %v1007_v63  ;;  %v4509_v57 = vcombine.low %v760_v48, %v764_v49 }
 0x1d7   :  { %1482 = vmatprep.subr.bf16.mxu0 %v4436_v4  ;;  %v872_v4 = vld [vmem:[#allocation7 + $0x500] sm:$0xff] }
 0x1d8   :  { %1360 = vmatpush1.bf16.msra.mxu1 %v4429_v5  ;;  %v876_v5 = vld [vmem:[#allocation7 + $0x520] sm:$0xff] }
 0x1d9   :  { %1361 = vmatprep.subr.bf16.mxu1 %v4422_v8  ;;  %v4629_v8 = vcombine.low %v880_v30, %v884_v33  ;;  %v4622_v9 = vcombine.high %v872_v4, %v876_v5  ;;  %v748_v30 = vld [vmem:[#allocation7 + $0x120] sm:$0xff] }
 0x1da   :  { %1483 = vmatpush1.bf16.msra.mxu0 %v4435_v11  ;;  %v864_v11 = vld [vmem:[#allocation7 + $0x4c0] sm:$0xff] }
 0x1db   :  { %1484 = vmatprep.subr.bf16.mxu0 %v4428_v12  ;;  %v868_v12 = vld [vmem:[#allocation7 + $0x4e0] sm:$0xff] }
 0x1dc   :  { %1362 = vmatpush1.bf16.msra.mxu1 %v4421_v13  ;;  %v4614_v18 = vcombine.high %v864_v11, %v868_v12  ;;  %v960_v33 = vld [vmem:[#allocation7 + $0x7c0] sm:$0xff] }
 0x1dd   :  { %1363 = vmatprep.subr.bf16.mxu1 %v4414_v17  ;;  %v4621_v17 = vcombine.low %v872_v4, %v876_v5  ;;  %v952_v4 = vld [vmem:[#allocation7 + $0x780] sm:$0xff] }
 0x1de   :  { %1485 = vmatpush1.bf16.msra.mxu0 %v4427_v20  ;;  %v856_v20 = vld [vmem:[#allocation7 + $0x480] sm:$0xff] }
 0x1df   :  { %1486 = vmatprep.subr.bf16.mxu0 %v4420_v21  ;;  %v860_v21 = vld [vmem:[#allocation7 + $0x4a0] sm:$0xff] }
 0x1e0   :  { %1364 = vmatpush1.bf16.msra.mxu1 %v4413_v22  ;;  %v4418_v22 = vcombine.high %v987_v14, %v991_v16  ;;  %v4606_v26 = vcombine.high %v856_v20, %v860_v21 }
 0x1e1   :  { %1365 = vmatprep.subr.bf16.mxu1 %v4406_v25  ;;  %v4613_v25 = vcombine.low %v864_v11, %v868_v12  ;;  %v944_v11 = vld [vmem:[#allocation7 + $0x740] sm:$0xff] }
 0x1e2   :  { %1487 = vmatpush1.bf16.msra.mxu0 %v4419_v15  ;;  %v848_v15 = vld [vmem:[#allocation7 + $0x440] sm:$0xff] }
 0x1e3   :  { %1488 = vmatprep.subr.bf16.mxu0 %v4412_v29  ;;  %v852_v29 = vld [vmem:[#allocation7 + $0x460] sm:$0xff] }
 0x1e4   :  { %1366 = vmatpush1.bf16.msra.mxu1 %v4405_v34  ;;  %v4410_v34 = vcombine.high %v979_v23, %v983_v24  ;;  %v4598_v40 = vcombine.high %v848_v15, %v852_v29  ;;  %v4597_v45 = vcombine.low %v848_v15, %v852_v29  ;;  %v928_v15 = vld [vmem:[#allocation7 + $0x6c0] sm:$0xff] }
 0x1e5   :  { %1367 = vmatprep.subr.bf16.mxu1 %v4398_v39  ;;  %v4605_v39 = vcombine.low %v856_v20, %v860_v21  ;;  %v936_v20 = vld [vmem:[#allocation7 + $0x700] sm:$0xff] }
 0x1e6   :  { %1489 = vmatpush1.bf16.msra.mxu0 %v4411_v42  ;;  %v4402_v42 = vcombine.high %v971_v37, %v975_v38 }
 0x1e7   :  { %1490 = vmatprep.subr.bf16.mxu0 %v4404_v43  ;;  %v768_v43 = vld [vmem:[#allocation7 + $0x1c0] sm:$0xff] }
 0x1e8   :  { %1368 = vmatpush1.bf16.msra.mxu1 %v4397_v44  ;;  %v772_v44 = vld [vmem:[#allocation7 + $0x1e0] sm:$0xff] }
 0x1e9   :  { %1435 = vmatprep.subr.bf16.mxu1 %v4458_v47  ;;  %v4518_v47 = vcombine.high %v768_v43, %v772_v44 }
 0x1ea   :  { %1491 = vmatpush1.bf16.msra.mxu0 %v4403_v51  ;;  %v4517_v51 = vcombine.low %v768_v43, %v772_v44  ;;  %v924_v44 = vld [vmem:[#allocation7 + $0x6a0] sm:$0xff] }
 0x1eb   :  { %1386 = vmatmul.mubr.bf16.vlgmr.msra.gmra.mxu1 %v5577_v50  ;;  %2838 = vmatprep.subr.bf16.mxu0 %v4646_v52  ;;  %v4510_v52 = vcombine.high %v760_v48, %v764_v49  ;;  %v824_v48 = vld [vmem:[#allocation7 + $0x380] sm:$0xff] }
 0x1ec   :  { %1436 = vmatpush1.bf16.msra.mxu1 %v4457_v53  ;;  %1467 = vmatprep.mubr.bf16.mxu1 %v5376_v1  ;;  %v999_v1 = vld [vmem:[#allocation8 + $0xf0] sm:$0xff]  ;;  %v752_v53 = vld [vmem:[#allocation7 + $0x140] sm:$0xff] }
 0x1ed   :  { %1437 = vmatprep.subr.bf16.mxu1 %v4450_v56  ;;  %1509 = vmatmul.mubr.bf16.vlgmr.msra.gmra.mxu0 %v5577_v50  ;;  %v4426_v13 = vcombine.high %v995_v7, %v999_v1  ;;  %v4425_v19 = vcombine.low %v995_v7, %v999_v1  ;;  %v844_v56 = vld [vmem:[#allocation7 + $0x420] sm:$0xff]  ;;  %v4501_v62 = vcombine.low %v752_v53, %v756_v54 }
 0x1ee   :  { %2839 = vmatpush1.bf16.msra.mxu0 %v4645_v59  ;;  %v4589_v58 = vcombine.low %v840_v55, %v844_v56  ;;  %v4590_v59 = vcombine.high %v840_v55, %v844_v56  ;;  %v828_v49 = vld [vmem:[#allocation7 + $0x3a0] sm:$0xff] }
 0x1ef   :  { %2840 = vmatprep.subr.bf16.mxu0 %v4638_v60  ;;  %v4502_v60 = vcombine.high %v752_v53, %v756_v54  ;;  %v916_v53 = vld [vmem:[#allocation7 + $0x660] sm:$0xff]  ;;  %v4574_v54 = vcombine.high %v824_v48, %v828_v49 }
 0x1f0   :  { %1438 = vmatpush1.bf16.msra.mxu1 %v4449_v61  ;;  %v744_v61 = vld [vmem:[#allocation7 + $0x100] sm:$0xff] }
 0x1f1   :  { %1439 = vmatprep.subr.bf16.mxu1 %v4442_v35  ;;  %v964_v35 = vld [vmem:[#allocation7 + $0x7e0] sm:$0xff]  ;;  %v4493_v5 = vcombine.low %v744_v61, %v748_v30 }
 0x1f2   :  { %2841 = vmatpush1.bf16.msra.mxu0 %v4637_v0  ;;  %v4709_v63 = vcombine.low %v960_v33, %v964_v35  ;;  %v4710_v0 = vcombine.high %v960_v33, %v964_v35  ;;  %v5592_v35 = vld [vmem:[#allocation7 + $0x1e8] sm:$0xff] }
 0x1f3   :  { %2842 = vmatprep.subr.bf16.mxu0 %v4630_v2  ;;  %v4494_v2 = vcombine.high %v744_v61, %v748_v30  ;;  %v5590_v61 = vld [vmem:[#allocation7 + $0x1c8] sm:$0xff]  ;;  %v4573_v30 = vcombine.low %v824_v48, %v828_v49 }
 0x1f4   :  { %1440 = vmatpush1.bf16.msra.mxu1 %v4441_v3  ;;  %v740_v3 = vld [vmem:[#allocation7 + $0xe0] sm:$0xff] }
 0x1f5   :  { %1441 = vmatprep.subr.bf16.mxu1 %v4434_v6  ;;  %v956_v6 = vld [vmem:[#allocation7 + $0x7a0] sm:$0xff] }
 0x1f6   :  { %2843 = vmatpush1.bf16.msra.mxu0 %v4629_v8  ;;  %v4701_v1 = vcombine.low %v952_v4, %v956_v6  ;;  %v4702_v8 = vcombine.high %v952_v4, %v956_v6  ;;  %v5596_v4 = vld [vmem:[#allocation7 + $0x5c8] sm:$0xff] }
 0x1f7   :  { %2844 = vmatprep.subr.bf16.mxu0 %v4622_v9  ;;  %v728_v9 = vld [vmem:[#allocation7 + $0x80] sm:$0xff]  ;;  %v5598_v6 = vld [vmem:[#allocation7 + $0x5e8] sm:$0xff] }
 0x1f8   :  { %1442 = vmatpush1.bf16.msra.mxu1 %v4433_v10  ;;  %v732_v10 = vld [vmem:[#allocation7 + $0xa0] sm:$0xff] }
 0x1f9   :  { %1443 = vmatprep.subr.bf16.mxu1 %v4426_v13  ;;  %v948_v13 = vld [vmem:[#allocation7 + $0x760] sm:$0xff]  ;;  %v4478_v14 = vcombine.high %v728_v9, %v732_v10  ;;  %v4477_v21 = vcombine.low %v728_v9, %v732_v10  ;;  %v4648_v9 = vcombine.high %v5596_v4, %v5598_v6 }
 0x1fa   :  { %2845 = vmatpush1.bf16.msra.mxu0 %v4621_v17  ;;  %v4693_v16 = vcombine.low %v944_v11, %v948_v13  ;;  %v4694_v17 = vcombine.high %v944_v11, %v948_v13  ;;  %v796_v13 = vld [vmem:[#allocation7 + $0x2a0] sm:$0xff] }
 0x1fb   :  { %2846 = vmatprep.subr.bf16.mxu0 %v4614_v18  ;;  %v720_v18 = vld [vmem:[#allocation7 + $0x40] sm:$0xff] }
 0x1fc   :  { %1444 = vmatpush1.bf16.msra.mxu1 %v4425_v19  ;;  %v724_v19 = vld [vmem:[#allocation7 + $0x60] sm:$0xff] }
 0x1fd   :  { %1445 = vmatprep.subr.bf16.mxu1 %v4418_v22  ;;  %v940_v22 = vld [vmem:[#allocation7 + $0x720] sm:$0xff]  ;;  %v4470_v23 = vcombine.high %v720_v18, %v724_v19  ;;  %v4469_v29 = vcombine.low %v720_v18, %v724_v19 }
 0x1fe   :  { %2847 = vmatpush1.bf16.msra.mxu0 %v4613_v25  ;;  %v4685_v24 = vcombine.low %v936_v20, %v940_v22  ;;  %v4686_v25 = vcombine.high %v936_v20, %v940_v22  ;;  %v788_v18 = vld [vmem:[#allocation7 + $0x260] sm:$0xff] }
 0x1ff   :  { %2848 = vmatprep.subr.bf16.mxu0 %v4606_v26  ;;  %v712_v26 = vld [vmem:[#allocation7] sm:$0xff] }
 0x200   :  { %1446 = vmatpush1.bf16.msra.mxu1 %v4417_v27  ;;  %v716_v27 = vld [vmem:[#allocation7 + $0x20] sm:$0xff] }
 0x201   :  { %1447 = vmatprep.subr.bf16.mxu1 %v4410_v34  ;;  %v932_v34 = vld [vmem:[#allocation7 + $0x6e0] sm:$0xff]  ;;  %v4462_v37 = vcombine.high %v712_v26, %v716_v27  ;;  %v4461_v43 = vcombine.low %v712_v26, %v716_v27  ;;  %v4520_v26 = vcombine.high %v5590_v61, %v5592_v35 }
 0x202   :  { %2849 = vmatpush1.bf16.msra.mxu0 %v4605_v39  ;;  %v4677_v38 = vcombine.low %v928_v15, %v932_v34  ;;  %v4678_v39 = vcombine.high %v928_v15, %v932_v34  ;;  %v780_v22 = vld [vmem:[#allocation7 + $0x220] sm:$0xff] }
 0x203   :  { %2850 = vmatprep.subr.bf16.mxu0 %v4598_v40  ;;  %v832_v40 = vld [vmem:[#allocation7 + $0x3c0] sm:$0xff] }
 0x204   :  { %1448 = vmatpush1.bf16.msra.mxu1 %v4409_v41  ;;  %v836_v41 = vld [vmem:[#allocation7 + $0x3e0] sm:$0xff] }
 0x205   :  { %1449 = vmatprep.subr.bf16.mxu1 %v4402_v42  ;;  %v920_v42 = vld [vmem:[#allocation7 + $0x680] sm:$0xff] }
 0x206   :  { %2851 = vmatpush1.bf16.msra.mxu0 %v4597_v45  ;;  %v4582_v45 = vcombine.high %v832_v40, %v836_v41  ;;  %v402_v27 = vld [vmem:[%s5719_s8] sm:$0x3] }
 0x207   :  { %2852 = vmatprep.subr.bf16.mxu0 %v4590_v59  ;;  %v904_v59 = vld [vmem:[#allocation7 + $0x600] sm:$0xff]  ;;  %v407_v15 = vrot.slane %v402_v27, %v5536_v32 }
 0x208   :  { %1450 = vmatpush1.bf16.msra.mxu1 %v4401_v46  ;;  %v4669_v46 = vcombine.low %v920_v42, %v924_v44 }
 0x209   :  { %2797 = vmatprep.subr.bf16.mxu1 %v4518_v47  ;;  %v4670_v47 = vcombine.high %v920_v42, %v924_v44  ;;  %v568_v42 = vpop.permute.xlu0 %567 }
 0x20a   :  { %2853 = vmatpush1.bf16.msra.mxu0 %v4589_v58  ;;  %v820_v58 = vld [vmem:[#allocation7 + $0x360] sm:$0xff] }
 0x20b   :  { %1468 = vmatmul.mubr.bf16.vlgmr.msra.gmra.mxu1 %v5577_v50  ;;  %v736_v50 = vld [vmem:[#allocation7 + $0xc0] sm:$0xff]  ;;  %2854 = vmatprep.subr.bf16.mxu0 %v4710_v0  ;;  %v4519_v0 = vcombine.low %v5590_v61, %v5592_v35 }
 0x20c   :  { %2798 = vmatpush1.bf16.msra.mxu1 %v4517_v51  ;;  %v4486_v7 = vcombine.high %v736_v50, %v740_v3  ;;  %v4485_v12 = vcombine.low %v736_v50, %v740_v3  ;;  %v912_v51 = vld [vmem:[#allocation7 + $0x640] sm:$0xff] }
 0x20d   :  { %2799 = vmatprep.subr.bf16.mxu1 %v4510_v52  ;;  %v4581_v52 = vcombine.low %v832_v40, %v836_v41  ;;  %v4661_v55 = vcombine.low %v912_v51, %v916_v53  ;;  %v4662_v56 = vcombine.high %v912_v51, %v916_v53  ;;  %v812_v50 = vld [vmem:[#allocation7 + $0x320] sm:$0xff] }
 0x20e   :  { %2855 = vmatpush2.bf16.msra.mxu0 %v4709_v63 }
 0x20f   :  { %2856 = vmatprep.subr.bf16.mxu0 %v4702_v8  ;;  %v4647_v8 = vcombine.low %v5596_v4, %v5598_v6 }
 0x210   :  { %2800 = vmatpush1.bf16.msra.mxu1 %v4509_v57  ;;  %v816_v57 = vld [vmem:[#allocation7 + $0x340] sm:$0xff] }
 0x211   :  { %2801 = vmatprep.subr.bf16.mxu1 %v4502_v60  ;;  %v908_v60 = vld [vmem:[#allocation7 + $0x620] sm:$0xff]  ;;  %v4565_v3 = vcombine.low %v816_v57, %v820_v58 }
 0x212   :  { %2857 = vmatpush2.bf16.msra.mxu0 %v4701_v1  ;;  %v4654_v33 = vcombine.high %v904_v59, %v908_v60  ;;  %v4653_v63 = vcombine.low %v904_v59, %v908_v60  ;;  %v804_v1 = vld [vmem:[#allocation7 + $0x2e0] sm:$0xff] }
 0x213   :  { %2858 = vmatprep.subr.bf16.mxu0 %v4694_v17  ;;  %v784_v17 = vld [vmem:[#allocation7 + $0x240] sm:$0xff] }
 0x214   :  { %2802 = vmatpush1.bf16.msra.mxu1 %v4501_v62  ;;  %v4566_v62 = vcombine.high %v816_v57, %v820_v58  ;;  %v4534_v20 = vcombine.high %v784_v17, %v788_v18 }
 0x215   :  { %2803 = vmatprep.subr.bf16.mxu1 %v4494_v2  ;;  %v808_v2 = vld [vmem:[#allocation7 + $0x300] sm:$0xff] }
 0x216   :  { %2859 = vmatpush2.bf16.msra.mxu0 %v4693_v16  ;;  %v4557_v10 = vcombine.low %v808_v2, %v812_v50 }
 0x217   :  { %2860 = vmatprep.subr.bf16.mxu0 %v4686_v25 }
 0x218   :  { %2804 = vmatpush1.bf16.msra.mxu1 %v4493_v5  ;;  %v4558_v5 = vcombine.high %v808_v2, %v812_v50 }
 0x219   :  { %2805 = vmatprep.subr.bf16.mxu1 %v4486_v7  ;;  %v800_v7 = vld [vmem:[#allocation7 + $0x2c0] sm:$0xff] }
 0x21a   :  { %2861 = vmatpush2.bf16.msra.mxu0 %v4685_v24  ;;  %v4550_v11 = vcombine.high %v800_v7, %v804_v1 }
 0x21b   :  { %2862 = vmatprep.subr.bf16.mxu0 %v4678_v39 }
 0x21c   :  { %2806 = vmatpush1.bf16.msra.mxu1 %v4485_v12  ;;  %v792_v12 = vld [vmem:[#allocation7 + $0x280] sm:$0xff] }
 0x21d   :  { %2807 = vmatprep.subr.bf16.mxu1 %v4478_v14  ;;  %v4549_v14 = vcombine.low %v800_v7, %v804_v1  ;;  %v4542_v16 = vcombine.high %v792_v12, %v796_v13  ;;  %v4541_v19 = vcombine.low %v792_v12, %v796_v13 }
 0x21e   :  { %2863 = vmatpush2.bf16.msra.mxu0 %v4677_v38 }
 0x21f   :  { %2864 = vmatprep.subr.bf16.mxu0 %v4670_v47 }
 0x220   :  { %2808 = vmatpush1.bf16.msra.mxu1 %v4477_v21  ;;  %v776_v21 = vld [vmem:[#allocation7 + $0x200] sm:$0xff] }
 0x221   :  { %2809 = vmatprep.subr.bf16.mxu1 %v4470_v23  ;;  %v4533_v23 = vcombine.low %v784_v17, %v788_v18  ;;  %v4526_v24 = vcombine.high %v776_v21, %v780_v22  ;;  %v4525_v25 = vcombine.low %v776_v21, %v780_v22 }
 0x222   :  { %2865 = vmatpush2.bf16.msra.mxu0 %v4669_v46 }
 0x223   :  { %2866 = vmatprep.subr.bf16.mxu0 %v4662_v56 }
 0x224   :  { %2810 = vmatpush1.bf16.msra.mxu1 %v4469_v29  ;;  %v411_v29 = vrot.slane %v402_v27, %v5533_v31 }
 0x225   :  { %2811 = vmatprep.subr.bf16.mxu1 %v4462_v37 }
 0x226   :  { %2867 = vmatpush2.bf16.msra.mxu0 %v4661_v55  ;;  %v573_v55 = vpop.permute.xlu1 %572 }
 0x227   :  { %2868 = vmatprep.subr.bf16.mxu0 %v4654_v33 }
 0x228   :  { %2812 = vmatpush1.bf16.msra.mxu1 %v4461_v43 }
 0x229   :  { %2813 = vmatprep.subr.bf16.mxu1 %v4582_v45 }
 0x22a   :  { %2869 = vmatpush2.bf16.msra.mxu0 %v4653_v63 }
 0x22b   :  { %2920 = vmatprep.subr.bf16.mxu0 %v4648_v9 }
 0x22c   :  { %2814 = vmatpush2.bf16.msra.mxu1 %v4581_v52 }
 0x22d   :  { %2815 = vmatprep.subr.bf16.mxu1 %v4574_v54 }
 0x230   :  { %2816 = vmatpush2.bf16.msra.mxu1 %v4573_v30 }
 0x231   :  { %2817 = vmatprep.subr.bf16.mxu1 %v4566_v62 }
 0x234   :  { %2818 = vmatpush2.bf16.msra.mxu1 %v4565_v3 }
 0x235   :  { %2819 = vmatprep.subr.bf16.mxu1 %v4558_v5 }
 0x238   :  { %2820 = vmatpush2.bf16.msra.mxu1 %v4557_v10 }
 0x239   :  { %2821 = vmatprep.subr.bf16.mxu1 %v4550_v11 }
 0x23c   :  { %2822 = vmatpush2.bf16.msra.mxu1 %v4549_v14 }
 0x23d   :  { %2823 = vmatprep.subr.bf16.mxu1 %v4542_v16 }
 0x240   :  { %2824 = vmatpush2.bf16.msra.mxu1 %v4541_v19 }
 0x241   :  { %2825 = vmatprep.subr.bf16.mxu1 %v4534_v20 }
 0x244   :  { %2826 = vmatpush2.bf16.msra.mxu1 %v4533_v23 }
 0x245   :  { %2827 = vmatprep.subr.bf16.mxu1 %v4526_v24 }
 0x248   :  { %2828 = vmatpush2.bf16.msra.mxu1 %v4525_v25 }
 0x249   :  { %2879 = vmatprep.subr.bf16.mxu1 %v4520_v26 }
 0x28b   :  { %v528_v34 = vpop.f32.mrf.mxu1 }
 0x28c   :  { %v529_v37 = vadd.f32 %v528_v34, %v407_v15 }
 0x28d   :  { %v530_v38 = vpop.f32.mrf.mxu1  ;;  %v5611_v39 = vpop.f32.mrf.mxu0 }
 0x28e   :  { %v547_v40 = vmul.f32 0.2, %v529_v37  ;;  %v531_v41 = vadd.f32 %v530_v38, %v411_v29 }
 0x28f   :  { %v532_v43 = vpop.f32.mrf.mxu1  ;;  %v5613_v44 = vpop.f32.mrf.mxu0 }
 0x290   :  { %v555_v45 = vmax.f32 %v529_v37, %v547_v40  ;;  %v548_v46 = vmul.f32 0.2, %v531_v41  ;;  %v533_v47 = vadd.f32 %v532_v43, %v407_v15 }
 0x291   :  { %v534_v48 = vpop.f32.mrf.mxu1  ;;  %v1432_v49 = vpop.f32.mrf.mxu0 }
 0x292   :  { %v556_v51 = vmax.f32 %v531_v41, %v548_v46  ;;  %v549_v52 = vmul.f32 0.2, %v533_v47  ;;  %v535_v53 = vadd.f32 %v534_v48, %v411_v29  ;;  %v575_v54 = vmul.f32 %v568_v42, %v555_v45 }
 0x293   :  { %v538_v56 = vpop.f32.mrf.mxu1  ;;  %v1433_v57 = vpop.f32.mrf.mxu0 }
 0x294   :  { %v557_v58 = vmax.f32 %v533_v47, %v549_v52  ;;  %v550_v59 = vmul.f32 0.2, %v535_v53  ;;  %v576_v60 = vmul.f32 %v568_v42, %v556_v51  ;;  %v583_v30 = vrot.slane %v575_v54, 4 }
 0x295   :  { %v539_v33 = vadd.f32 %v538_v56, %v407_v15  ;;  %v540_v62 = vpop.f32.mrf.mxu1 }
 0x296   :  { %v558_v63 = vmax.f32 %v535_v53, %v550_v59  ;;  %v589_v2 = vrot.slane %v576_v60, 4  ;;  %v577_v50 = vmul.f32 %v573_v55, %v557_v58  ;;  %v541_v5 = vadd.f32 %v540_v62, %v411_v29 }
 0x297   :  { %v551_v3 = vmul.f32 0.2, %v539_v33  ;;  %v542_v7 = vpop.f32.mrf.mxu1  ;;  %v584_v1 = vadd.f32 %v583_v30, %v575_v54 }
 0x298   :  { %v590_v9 = vadd.f32 %v589_v2, %v576_v60  ;;  %v578_v10 = vmul.f32 %v573_v55, %v558_v63  ;;  %v607_v11 = vrot.slane %v577_v50, 4  ;;  %v552_v13 = vmul.f32 0.2, %v541_v5 }
 0x299   :  { %v559_v12 = vmax.f32 %v539_v33, %v551_v3  ;;  %v543_v14 = vadd.f32 %v542_v7, %v407_v15  ;;  %v544_v16 = vpop.f32.mrf.mxu1  ;;  %v585_v22 = vrot.slane %v584_v1, 2 }
 0x29a   :  { %v613_v17 = vrot.slane %v578_v10, 4  ;;  %v560_v19 = vmax.f32 %v541_v5, %v552_v13  ;;  %v545_v21 = vadd.f32 %v544_v16, %v411_v29  ;;  %v591_v23 = vrot.slane %v590_v9, 2  ;;  %v761_v13 = vld [vmem:[#allocation7 + $0x188] sm:$0xff] }
 0x29b   :  { %v579_v18 = vmul.f32 %v568_v42, %v559_v12  ;;  %v553_v20 = vmul.f32 0.2, %v543_v14  ;;  %v608_v24 = vadd.f32 %v607_v11, %v577_v50  ;;  %v586_v45 = vadd.f32 %v585_v22, %v584_v1 }
 0x29c   :  { %v614_v25 = vadd.f32 %v613_v17, %v578_v10  ;;  %v580_v27 = vmul.f32 %v568_v42, %v560_v19  ;;  %v554_v37 = vmul.f32 0.2, %v545_v21  ;;  %v592_v15 = vadd.f32 %v591_v23, %v590_v9 }
 0x29d   :  { %v595_v26 = vrot.slane %v579_v18, 4  ;;  %v561_v34 = vmax.f32 %v543_v14, %v553_v20  ;;  %v609_v46 = vrot.slane %v608_v24, 2  ;;  %v587_v57 = vrot.slane %v586_v45, 1  ;;  %v765_v14 = vld [vmem:[#allocation7 + $0x1a8] sm:$0xff] }
 0x29e   :  { %v601_v40 = vrot.slane %v580_v27, 4  ;;  %v562_v43 = vmax.f32 %v545_v21, %v554_v37  ;;  %v615_v47 = vrot.slane %v614_v25, 2  ;;  %v593_v42 = vrot.slane %v592_v15, 1  ;;  %v753_v37 = vld [vmem:[#allocation7 + $0x148] sm:$0xff] }
 0x29f   :  { %v596_v38 = vadd.f32 %v595_v26, %v579_v18  ;;  %v581_v41 = vmul.f32 %v573_v55, %v561_v34  ;;  %v610_v58 = vadd.f32 %v609_v46, %v608_v24  ;;  %v588_v5 = vadd.f32 %v587_v57, %v586_v45  ;;  %v885_v57 = vld [vmem:[#allocation7 + $0x568] sm:$0xff] }
 0x2a0   :  { %v602_v49 = vadd.f32 %v601_v40, %v580_v27  ;;  %v582_v29 = vmul.f32 %v573_v55, %v562_v43  ;;  %v616_v59 = vadd.f32 %v615_v47, %v614_v25  ;;  %v594_v7 = vadd.f32 %v593_v42, %v592_v15  ;;  %v893_v43 = vld [vmem:[#allocation7 + $0x5a8] sm:$0xff] }
 0x2a1   :  { %v597_v48 = vrot.slane %v596_v38, 2  ;;  %v619_v51 = vrot.slane %v581_v41, 4  ;;  %v611_v55 = vrot.slane %v610_v58, 1  ;;  %v4512_v25 = vcombine.high %v761_v13, %v765_v14 }
 0x2a2   :  { %v603_v53 = vrot.slane %v602_v49, 2  ;;  %v625_v56 = vrot.slane %v582_v29, 4  ;;  %v617_v1 = vrot.slane %v616_v59, 1  ;;  %v4511_v47 = vcombine.low %v761_v13, %v765_v14 }
 0x2a3   :  { %v598_v52 = vadd.f32 %v597_v48, %v596_v38  ;;  %v620_v54 = vadd.f32 %v619_v51, %v581_v41  ;;  %v612_v20 = vadd.f32 %v611_v55, %v610_v58  ;;  %v757_v38 = vld [vmem:[#allocation7 + $0x168] sm:$0xff] }
 0x2a4   :  { %v604_v30 = vadd.f32 %v603_v53, %v602_v49  ;;  %v626_v62 = vadd.f32 %v625_v56, %v582_v29  ;;  %v618_v22 = vadd.f32 %v617_v1, %v616_v59  ;;  %v889_v41 = vld [vmem:[#allocation7 + $0x588] sm:$0xff]  ;;  %v4504_v49 = vcombine.high %v753_v37, %v757_v38 }
 0x2a5   :  { %v599_v60 = vrot.slane %v598_v52, 1  ;;  %v621_v33 = vrot.slane %v620_v54, 2  ;;  %v745_v51 = vld [vmem:[#allocation7 + $0x108] sm:$0xff]  ;;  %v4640_v53 = vcombine.high %v889_v41, %v893_v43  ;;  %v4503_v35 = vcombine.low %v753_v37, %v757_v38 }
 0x2a6   :  { %v605_v2 = vrot.slane %v604_v30, 1  ;;  %v627_v3 = vrot.slane %v626_v62, 2  ;;  %v881_v56 = vld [vmem:[#allocation7 + $0x548] sm:$0xff] }
 0x2a7   :  { %v600_v63 = vadd.f32 %v599_v60, %v598_v52  ;;  %v622_v50 = vadd.f32 %v621_v33, %v620_v54  ;;  %v749_v54 = vld [vmem:[#allocation7 + $0x128] sm:$0xff]  ;;  %v4632_v58 = vcombine.high %v881_v56, %v885_v57 }
 0x2a8   :  { %v606_v9 = vadd.f32 %v605_v2, %v604_v30  ;;  %v628_v11 = vadd.f32 %v627_v3, %v626_v62  ;;  %v4496_v42 = vcombine.high %v745_v51, %v749_v54  ;;  %v737_v59 = vld [vmem:[#allocation7 + $0xc8] sm:$0xff]  ;;  %v4495_v62 = vcombine.low %v745_v51, %v749_v54 }
 0x2a9   :  { %v623_v10 = vrot.slane %v622_v50, 1  ;;  %v636_v12 = vsel %vm635_vm3, %v600_v63, %v588_v5  ;;  %v741_v60 = vld [vmem:[#allocation7 + $0xe8] sm:$0xff]  ;;  %v4631_v63 = vcombine.low %v881_v56, %v885_v57 }
 0x2aa   :  { %v629_v17 = vrot.slane %v628_v11, 1  ;;  %v637_v18 = vsel %vm635_vm3, %v606_v9, %v594_v7  ;;  %v5621_v24 = vpack.c.bf16 %v636_v12, %v636_v12  ;;  %v873_v30 = vld [vmem:[#allocation7 + $0x508] sm:$0xff]  ;;  %v4488_v4 = vcombine.high %v737_v59, %v741_v60 }
 0x2ab   :  { %v624_v16 = vadd.f32 %v623_v10, %v622_v50  ;;  %v5617_v19 = vpop.f32.mrf.mxu1  ;;  %v5619_v21 = vpack.c.bf16 %v637_v18, %v637_v18  ;;  %v877_v33 = vld [vmem:[#allocation7 + $0x528] sm:$0xff]  ;;  %v4487_v5 = vcombine.low %v737_v59, %v741_v60 }
 0x2ac   :  { %v630_v23 = vadd.f32 %v629_v17, %v628_v11  ;;  %v4624_v6 = vcombine.high %v873_v30, %v877_v33  ;;  %v733_v2 = vld [vmem:[#allocation7 + $0xa8] sm:$0xff]  ;;  %v4623_v7 = vcombine.low %v873_v30, %v877_v33 }
 0x2ad   :  { %v5623_v26 = vpop.f32.mrf.mxu1  ;;  %v5625_v27 = vpop.f32.mrf.mxu0  ;;  %2829 = vmatprep.mubr.bf16.mxu1 %v5619_v21  ;;  %v644_v34 = vsel %vm635_vm3, %v624_v16, %v612_v20  ;;  %v865_v50 = vld [vmem:[#allocation7 + $0x4c8] sm:$0xff] }
 0x2ae   :  { %2830 = vmatmul.mubr.bf16.vlgmr.msra.gmra.mxu1 %v5621_v24  ;;  %v645_v40 = vsel %vm635_vm3, %v630_v23, %v618_v22  ;;  %v5639_v48 = vpack.c.bf16 %v644_v34, %v644_v34  ;;  %v869_v3 = vld [vmem:[#allocation7 + $0x4e8] sm:$0xff] }
 0x2af   :  { %v1391_v45 = vpop.f32.mrf.mxu1  ;;  %v5631_v15 = vpop.f32.mrf.mxu0  ;;  %2880 = vmatpush1.bf16.msra.mxu1 %v4519_v0  ;;  %2911 = vmatprep.mubr.bf16.mxu1 %v5619_v21  ;;  %v5637_v46 = vpack.c.bf16 %v645_v40, %v645_v40  ;;  %v4639_v0 = vcombine.low %v889_v41, %v893_v43  ;;  %v4616_v1 = vcombine.high %v865_v50, %v869_v3  ;;  %v721_v9 = vld [vmem:[#allocation7 + $0x48] sm:$0xff] }
 0x2b0   :  { %2881 = vmatprep.subr.bf16.mxu1 %v4512_v25  ;;  %v725_v10 = vld [vmem:[#allocation7 + $0x68] sm:$0xff]  ;;  %v4615_v14 = vcombine.low %v865_v50, %v869_v3 }
 0x2b1   :  { %v1392_v29 = vpop.f32.mrf.mxu1  ;;  %v1514_v52 = vpop.f32.mrf.mxu0  ;;  %2870 = vmatprep.mubr.bf16.mxu0 %v5637_v46  ;;  %v857_v11 = vld [vmem:[#allocation7 + $0x488] sm:$0xff]  ;;  %v4472_v16 = vcombine.high %v721_v9, %v725_v10  ;;  %v4471_v25 = vcombine.low %v721_v9, %v725_v10 }
 0x2b2   :  { %2871 = vmatmul.mubr.bf16.vlgmr.msra.gmra.mxu0 %v5639_v48  ;;  %v861_v12 = vld [vmem:[#allocation7 + $0x4a8] sm:$0xff] }
 0x2b3   :  { %v1515_v61 = vpop.f32.mrf.mxu0  ;;  %2882 = vmatpush1.bf16.msra.mxu1 %v4511_v47  ;;  %2921 = vmatpush1.bf16.msra.mxu0 %v4647_v8  ;;  %v729_v8 = vld [vmem:[#allocation7 + $0x88] sm:$0xff]  ;;  %v4608_v17 = vcombine.high %v857_v11, %v861_v12  ;;  %v4607_v34 = vcombine.low %v857_v11, %v861_v12 }
 0x2b4   :  { %2952 = vmatprep.mubr.bf16.mxu0 %v5637_v46  ;;  %2883 = vmatprep.subr.bf16.mxu1 %v4504_v49  ;;  %v4480_v55 = vcombine.high %v729_v8, %v733_v2  ;;  %v4479_v13 = vcombine.low %v729_v8, %v733_v2  ;;  %v713_v18 = vld [vmem:[#allocation7 + $0x8] sm:$0xff] }
 0x2b5   :  { %2922 = vmatprep.subr.bf16.mxu0 %v4640_v53  ;;  %v717_v20 = vld [vmem:[#allocation7 + $0x28] sm:$0xff] }
 0x2b6   :  { %v849_v22 = vld [vmem:[#allocation7 + $0x448] sm:$0xff]  ;;  %v4464_v37 = vcombine.high %v713_v18, %v717_v20  ;;  %v4463_v47 = vcombine.low %v713_v18, %v717_v20 }
 0x2b7   :  { %2884 = vmatpush1.bf16.msra.mxu1 %v4503_v35  ;;  %2923 = vmatpush1.bf16.msra.mxu0 %v4639_v0  ;;  %v853_v23 = vld [vmem:[#allocation7 + $0x468] sm:$0xff] }
 0x2b8   :  { %2885 = vmatprep.subr.bf16.mxu1 %v4496_v42  ;;  %2924 = vmatprep.subr.bf16.mxu0 %v4632_v58  ;;  %v4600_v38 = vcombine.high %v849_v22, %v853_v23  ;;  %v833_v40 = vld [vmem:[#allocation7 + $0x3c8] sm:$0xff]  ;;  %v4599_v49 = vcombine.low %v849_v22, %v853_v23 }
 0x2b9   :  { %v837_v41 = vld [vmem:[#allocation7 + $0x3e8] sm:$0xff] }
 0x2ba   :  { %v841_v43 = vld [vmem:[#allocation7 + $0x408] sm:$0xff]  ;;  %v4584_v51 = vcombine.high %v833_v40, %v837_v41  ;;  %v4583_v61 = vcombine.low %v833_v40, %v837_v41 }
 0x2bb   :  { %2886 = vmatpush1.bf16.msra.mxu1 %v4495_v62  ;;  %2925 = vmatpush1.bf16.msra.mxu0 %v4631_v63  ;;  %v845_v45 = vld [vmem:[#allocation7 + $0x428] sm:$0xff] }
 0x2bc   :  { %2887 = vmatprep.subr.bf16.mxu1 %v4488_v4  ;;  %2926 = vmatprep.subr.bf16.mxu0 %v4624_v6  ;;  %v4592_v29 = vcombine.high %v841_v43, %v845_v45  ;;  %v825_v52 = vld [vmem:[#allocation7 + $0x388] sm:$0xff]  ;;  %v4591_v35 = vcombine.low %v841_v43, %v845_v45 }
 0x2bd   :  { %v829_v53 = vld [vmem:[#allocation7 + $0x3a8] sm:$0xff] }
 0x2be   :  { %v961_v54 = vld [vmem:[#allocation7 + $0x7c8] sm:$0xff]  ;;  %v4576_v0 = vcombine.high %v825_v52, %v829_v53  ;;  %v4575_v63 = vcombine.low %v825_v52, %v829_v53 }
 0x2bf   :  { %2888 = vmatpush1.bf16.msra.mxu1 %v4487_v5  ;;  %2927 = vmatpush1.bf16.msra.mxu0 %v4623_v7  ;;  %v965_v56 = vld [vmem:[#allocation7 + $0x7e8] sm:$0xff] }
 0x2c0   :  { %2889 = vmatprep.subr.bf16.mxu1 %v4480_v55  ;;  %2928 = vmatprep.subr.bf16.mxu0 %v4616_v1  ;;  %v4712_v42 = vcombine.high %v961_v54, %v965_v56  ;;  %v817_v58 = vld [vmem:[#allocation7 + $0x348] sm:$0xff]  ;;  %v4711_v4 = vcombine.low %v961_v54, %v965_v56 }
 0x2c1   :  { %v821_v60 = vld [vmem:[#allocation7 + $0x368] sm:$0xff] }
 0x2c2   :  { %v953_v30 = vld [vmem:[#allocation7 + $0x788] sm:$0xff]  ;;  %v4568_v6 = vcombine.high %v817_v58, %v821_v60  ;;  %v4567_v55 = vcombine.low %v817_v58, %v821_v60 }
 0x2c3   :  { %2890 = vmatpush1.bf16.msra.mxu1 %v4479_v13  ;;  %2929 = vmatpush1.bf16.msra.mxu0 %v4615_v14  ;;  %v957_v33 = vld [vmem:[#allocation7 + $0x7a8] sm:$0xff] }
 0x2c4   :  { %2891 = vmatprep.subr.bf16.mxu1 %v4472_v16  ;;  %2930 = vmatprep.subr.bf16.mxu0 %v4608_v17  ;;  %v4704_v8 = vcombine.high %v953_v30, %v957_v33  ;;  %v809_v2 = vld [vmem:[#allocation7 + $0x308] sm:$0xff]  ;;  %v4703_v1 = vcombine.low %v953_v30, %v957_v33 }
 0x2c5   :  { %v813_v3 = vld [vmem:[#allocation7 + $0x328] sm:$0xff] }
 0x2c6   :  { %v945_v5 = vld [vmem:[#allocation7 + $0x748] sm:$0xff]  ;;  %v4560_v9 = vcombine.high %v809_v2, %v813_v3  ;;  %v4559_v16 = vcombine.low %v809_v2, %v813_v3  ;;  %v766_v3 = vld [vmem:[#allocation7 + $0x1b0] sm:$0xff] }
 0x2c7   :  { %2892 = vmatpush1.bf16.msra.mxu1 %v4471_v25  ;;  %2931 = vmatpush1.bf16.msra.mxu0 %v4607_v34  ;;  %v949_v7 = vld [vmem:[#allocation7 + $0x768] sm:$0xff] }
 0x2c8   :  { %2893 = vmatprep.subr.bf16.mxu1 %v4464_v37  ;;  %2932 = vmatprep.subr.bf16.mxu0 %v4600_v38  ;;  %v4696_v10 = vcombine.high %v945_v5, %v949_v7  ;;  %v801_v11 = vld [vmem:[#allocation7 + $0x2c8] sm:$0xff]  ;;  %v4695_v17 = vcombine.low %v945_v5, %v949_v7  ;;  %v898_v5 = vld [vmem:[#allocation7 + $0x5d0] sm:$0xff] }
 0x2c9   :  { %v805_v12 = vld [vmem:[#allocation7 + $0x2e8] sm:$0xff]  ;;  %v902_v7 = vld [vmem:[#allocation7 + $0x5f0] sm:$0xff] }
 0x2ca   :  { %v937_v13 = vld [vmem:[#allocation7 + $0x708] sm:$0xff]  ;;  %v4552_v18 = vcombine.high %v801_v11, %v805_v12  ;;  %v4551_v37 = vcombine.low %v801_v11, %v805_v12  ;;  %v754_v11 = vld [vmem:[#allocation7 + $0x150] sm:$0xff] }
 0x2cb   :  { %v5647_v57 = vpop.f32.mrf.mxu1  ;;  %2894 = vmatpush1.bf16.msra.mxu1 %v4463_v47  ;;  %2933 = vmatpush1.bf16.msra.mxu0 %v4599_v49  ;;  %v941_v14 = vld [vmem:[#allocation7 + $0x728] sm:$0xff]  ;;  %v758_v12 = vld [vmem:[#allocation7 + $0x170] sm:$0xff] }
 0x2cc   :  { %2895 = vmatprep.subr.bf16.mxu1 %v4584_v51  ;;  %2934 = vmatprep.subr.bf16.mxu0 %v4592_v29  ;;  %v4688_v20 = vcombine.high %v937_v13, %v941_v14  ;;  %v793_v22 = vld [vmem:[#allocation7 + $0x288] sm:$0xff]  ;;  %v4687_v38 = vcombine.low %v937_v13, %v941_v14  ;;  %v890_v13 = vld [vmem:[#allocation7 + $0x590] sm:$0xff] }
 0x2cd   :  { %v5649_v59 = vpop.f32.mrf.mxu1  ;;  %v797_v23 = vld [vmem:[#allocation7 + $0x2a8] sm:$0xff]  ;;  %v894_v14 = vld [vmem:[#allocation7 + $0x5b0] sm:$0xff] }
 0x2ce   :  { %v929_v25 = vld [vmem:[#allocation7 + $0x6c8] sm:$0xff]  ;;  %v4544_v40 = vcombine.high %v793_v22, %v797_v23  ;;  %v4543_v51 = vcombine.low %v793_v22, %v797_v23  ;;  %v4642_v22 = vcombine.high %v890_v13, %v894_v14  ;;  %v750_v23 = vld [vmem:[#allocation7 + $0x130] sm:$0xff] }
 0x2cf   :  { %v1473_v62 = vpop.f32.mrf.mxu1  ;;  %2896 = vmatpush2.bf16.msra.mxu1 %v4583_v61  ;;  %2935 = vmatpush1.bf16.msra.mxu0 %v4591_v35  ;;  %v933_v34 = vld [vmem:[#allocation7 + $0x6e8] sm:$0xff] }
 0x2d0   :  { %2897 = vmatprep.subr.bf16.mxu1 %v4576_v0  ;;  %2936 = vmatprep.subr.bf16.mxu0 %v4712_v42  ;;  %v4680_v41 = vcombine.high %v929_v25, %v933_v34  ;;  %v785_v43 = vld [vmem:[#allocation7 + $0x248] sm:$0xff]  ;;  %v4679_v29 = vcombine.low %v929_v25, %v933_v34  ;;  %v770_v62 = vld [vmem:[#allocation7 + $0x1d0] sm:$0xff] }
 0x2d1   :  { %v1474_v50 = vpop.f32.mrf.mxu1  ;;  %v789_v45 = vld [vmem:[#allocation7 + $0x268] sm:$0xff]  ;;  %v882_v25 = vld [vmem:[#allocation7 + $0x550] sm:$0xff] }
 0x2d2   :  { %v921_v47 = vld [vmem:[#allocation7 + $0x688] sm:$0xff]  ;;  %v4536_v52 = vcombine.high %v785_v43, %v789_v45  ;;  %v4535_v0 = vcombine.low %v785_v43, %v789_v45  ;;  %v762_v50 = vld [vmem:[#allocation7 + $0x190] sm:$0xff] }
 0x2d3   :  { %2898 = vmatpush2.bf16.msra.mxu1 %v4575_v63  ;;  %2937 = vmatpush2.bf16.msra.mxu0 %v4711_v4  ;;  %v925_v49 = vld [vmem:[#allocation7 + $0x6a8] sm:$0xff]  ;;  %v774_v63 = vld [vmem:[#allocation7 + $0x1f0] sm:$0xff] }
 0x2d4   :  { %2899 = vmatprep.subr.bf16.mxu1 %v4568_v6  ;;  %2938 = vmatprep.subr.bf16.mxu0 %v4704_v8  ;;  %v4672_v53 = vcombine.high %v921_v47, %v925_v49  ;;  %v777_v54 = vld [vmem:[#allocation7 + $0x208] sm:$0xff]  ;;  %v4671_v42 = vcombine.low %v921_v47, %v925_v49  ;;  %v4522_v2 = vcombine.high %v770_v62, %v774_v63  ;;  %v886_v34 = vld [vmem:[#allocation7 + $0x570] sm:$0xff] }
 0x2d5   :  { %v781_v56 = vld [vmem:[#allocation7 + $0x228] sm:$0xff]  ;;  %v738_v43 = vld [vmem:[#allocation7 + $0xd0] sm:$0xff] }
 0x2d6   :  { %v913_v61 = vld [vmem:[#allocation7 + $0x648] sm:$0xff]  ;;  %v4528_v58 = vcombine.high %v777_v54, %v781_v56  ;;  %v4527_v4 = vcombine.low %v777_v54, %v781_v56  ;;  %v742_v45 = vld [vmem:[#allocation7 + $0xf0] sm:$0xff] }
 0x2d7   :  { %2900 = vmatpush2.bf16.msra.mxu1 %v4567_v55  ;;  %2939 = vmatpush2.bf16.msra.mxu0 %v4703_v1  ;;  %v917_v35 = vld [vmem:[#allocation7 + $0x668] sm:$0xff]  ;;  %v4521_v1 = vcombine.low %v770_v62, %v774_v63  ;;  %v874_v47 = vld [vmem:[#allocation7 + $0x510] sm:$0xff] }
 0x2d8   :  { %2901 = vmatprep.subr.bf16.mxu1 %v4560_v9  ;;  %2940 = vmatprep.subr.bf16.mxu0 %v4696_v10  ;;  %v4664_v60 = vcombine.high %v913_v61, %v917_v35  ;;  %v905_v30 = vld [vmem:[#allocation7 + $0x608] sm:$0xff]  ;;  %v4663_v6 = vcombine.low %v913_v61, %v917_v35  ;;  %v4514_v9 = vcombine.high %v762_v50, %v766_v3  ;;  %v878_v49 = vld [vmem:[#allocation7 + $0x530] sm:$0xff] }
 0x2d9   :  { %v909_v33 = vld [vmem:[#allocation7 + $0x628] sm:$0xff]  ;;  %v4650_v10 = vcombine.high %v898_v5, %v902_v7  ;;  %v730_v54 = vld [vmem:[#allocation7 + $0x90] sm:$0xff] }
 0x2da   :  { %v4656_v8 = vcombine.high %v905_v30, %v909_v33  ;;  %v4655_v55 = vcombine.low %v905_v30, %v909_v33  ;;  %v734_v56 = vld [vmem:[#allocation7 + $0xb0] sm:$0xff] }
 0x2db   :  { %2902 = vmatpush2.bf16.msra.mxu1 %v4559_v16  ;;  %2941 = vmatpush2.bf16.msra.mxu0 %v4695_v17  ;;  %v4513_v16 = vcombine.low %v762_v50, %v766_v3  ;;  %v4649_v17 = vcombine.low %v898_v5, %v902_v7  ;;  %v866_v61 = vld [vmem:[#allocation7 + $0x4d0] sm:$0xff] }
 0x2dc   :  { %2903 = vmatprep.subr.bf16.mxu1 %v4552_v18  ;;  %2942 = vmatprep.subr.bf16.mxu0 %v4688_v20  ;;  %v4506_v18 = vcombine.high %v754_v11, %v758_v12  ;;  %v746_v20 = vld [vmem:[#allocation7 + $0x110] sm:$0xff] }
 0x2dd   :  { %v870_v35 = vld [vmem:[#allocation7 + $0x4f0] sm:$0xff] }
 0x2de   :  { %v722_v30 = vld [vmem:[#allocation7 + $0x50] sm:$0xff] }
 0x2df   :  { %2904 = vmatpush2.bf16.msra.mxu1 %v4551_v37  ;;  %2943 = vmatpush2.bf16.msra.mxu0 %v4687_v38  ;;  %v4505_v37 = vcombine.low %v754_v11, %v758_v12  ;;  %v4641_v38 = vcombine.low %v890_v13, %v894_v14  ;;  %v726_v33 = vld [vmem:[#allocation7 + $0x70] sm:$0xff] }
 0x2e0   :  { %2905 = vmatprep.subr.bf16.mxu1 %v4544_v40  ;;  %2944 = vmatprep.subr.bf16.mxu0 %v4680_v41  ;;  %v4498_v40 = vcombine.high %v746_v20, %v750_v23  ;;  %v4634_v41 = vcombine.high %v882_v25, %v886_v34  ;;  %v858_v62 = vld [vmem:[#allocation7 + $0x490] sm:$0xff] }
 0x2e1   :  { %v862_v63 = vld [vmem:[#allocation7 + $0x4b0] sm:$0xff] }
 0x2e2   :  { %v714_v50 = vld [vmem:[#allocation7 + $0x10] sm:$0xff] }
 0x2e3   :  { %2906 = vmatpush2.bf16.msra.mxu1 %v4543_v51  ;;  %2945 = vmatpush2.bf16.msra.mxu0 %v4679_v29  ;;  %v4497_v51 = vcombine.low %v746_v20, %v750_v23  ;;  %v4633_v29 = vcombine.low %v882_v25, %v886_v34  ;;  %v718_v3 = vld [vmem:[#allocation7 + $0x30] sm:$0xff] }
 0x2e4   :  { %2907 = vmatprep.subr.bf16.mxu1 %v4536_v52  ;;  %2946 = vmatprep.subr.bf16.mxu0 %v4672_v53  ;;  %v4490_v52 = vcombine.high %v738_v43, %v742_v45  ;;  %v4626_v53 = vcombine.high %v874_v47, %v878_v49  ;;  %v850_v5 = vld [vmem:[#allocation7 + $0x450] sm:$0xff] }
 0x2e5   :  { %v854_v7 = vld [vmem:[#allocation7 + $0x470] sm:$0xff] }
 0x2e6   :  { %v834_v11 = vld [vmem:[#allocation7 + $0x3d0] sm:$0xff] }
 0x2e7   :  { %2908 = vmatpush2.bf16.msra.mxu1 %v4535_v0  ;;  %2947 = vmatpush2.bf16.msra.mxu0 %v4671_v42  ;;  %v4489_v0 = vcombine.low %v738_v43, %v742_v45  ;;  %v4625_v42 = vcombine.low %v874_v47, %v878_v49  ;;  %v838_v12 = vld [vmem:[#allocation7 + $0x3f0] sm:$0xff] }
 0x2e8   :  { %2909 = vmatprep.subr.bf16.mxu1 %v4528_v58  ;;  %2948 = vmatprep.subr.bf16.mxu0 %v4664_v60  ;;  %v4482_v58 = vcombine.high %v730_v54, %v734_v56  ;;  %v4618_v60 = vcombine.high %v866_v61, %v870_v35  ;;  %v842_v13 = vld [vmem:[#allocation7 + $0x410] sm:$0xff] }
 0x2e9   :  { %v846_v14 = vld [vmem:[#allocation7 + $0x430] sm:$0xff] }
 0x2ea   :  { %v4594_v20 = vcombine.high %v842_v13, %v846_v14  ;;  %v830_v23 = vld [vmem:[#allocation7 + $0x3b0] sm:$0xff] }
 0x2eb   :  { %2910 = vmatpush2.bf16.msra.mxu1 %v4527_v4  ;;  %2949 = vmatpush2.bf16.msra.mxu0 %v4663_v6  ;;  %v4481_v4 = vcombine.low %v730_v54, %v734_v56  ;;  %v4617_v6 = vcombine.low %v866_v61, %v870_v35  ;;  %v962_v25 = vld [vmem:[#allocation7 + $0x7d0] sm:$0xff] }
 0x2ec   :  { %2950 = vmatprep.subr.bf16.mxu0 %v4656_v8  ;;  %2961 = vmatprep.subr.bf16.mxu1 %v4522_v2  ;;  %v4474_v8 = vcombine.high %v722_v30, %v726_v33  ;;  %v4610_v2 = vcombine.high %v858_v62, %v862_v63  ;;  %v966_v34 = vld [vmem:[#allocation7 + $0x7f0] sm:$0xff] }
 0x2ed   :  { %v818_v43 = vld [vmem:[#allocation7 + $0x350] sm:$0xff] }
 0x2ee   :  { %2912 = vmatmul.mubr.bf16.vlgmr.msra.gmra.mxu1 %v5621_v24  ;;  %v822_v45 = vld [vmem:[#allocation7 + $0x370] sm:$0xff] }
 0x2ef   :  { %2951 = vmatpush2.bf16.msra.mxu0 %v4655_v55  ;;  %2962 = vmatpush1.bf16.msra.mxu1 %v4521_v1  ;;  %v4473_v55 = vcombine.low %v722_v30, %v726_v33  ;;  %v4609_v1 = vcombine.low %v858_v62, %v862_v63  ;;  %v954_v47 = vld [vmem:[#allocation7 + $0x790] sm:$0xff] }
 0x2f0   :  { %2993 = vmatprep.mubr.bf16.mxu1 %v5619_v21  ;;  %2963 = vmatprep.subr.bf16.mxu1 %v4514_v9  ;;  %v4466_v9 = vcombine.high %v714_v50, %v718_v3  ;;  %v958_v49 = vld [vmem:[#allocation7 + $0x7b0] sm:$0xff] }
 0x2f1   :  { %3002 = vmatprep.subr.bf16.mxu0 %v4650_v10  ;;  %v4602_v10 = vcombine.high %v850_v5, %v854_v7  ;;  %v810_v54 = vld [vmem:[#allocation7 + $0x310] sm:$0xff] }
 0x2f2   :  { %2953 = vmatmul.mubr.bf16.vlgmr.msra.gmra.mxu0 %v5639_v48  ;;  %v814_v56 = vld [vmem:[#allocation7 + $0x330] sm:$0xff] }
 0x2f3   :  { %2964 = vmatpush1.bf16.msra.mxu1 %v4513_v16  ;;  %3003 = vmatpush1.bf16.msra.mxu0 %v4649_v17  ;;  %v4465_v16 = vcombine.low %v714_v50, %v718_v3  ;;  %v4601_v17 = vcombine.low %v850_v5, %v854_v7  ;;  %v946_v61 = vld [vmem:[#allocation7 + $0x750] sm:$0xff] }
 0x2f4   :  { %3034 = vmatprep.mubr.bf16.mxu0 %v5637_v46  ;;  %2965 = vmatprep.subr.bf16.mxu1 %v4506_v18  ;;  %v4586_v18 = vcombine.high %v834_v11, %v838_v12  ;;  %v950_v35 = vld [vmem:[#allocation7 + $0x770] sm:$0xff] }
 0x2f5   :  { %3004 = vmatprep.subr.bf16.mxu0 %v4642_v22  ;;  %v826_v22 = vld [vmem:[#allocation7 + $0x390] sm:$0xff] }
 0x2f6   :  { %v802_v30 = vld [vmem:[#allocation7 + $0x2d0] sm:$0xff] }
 0x2f7   :  { %2966 = vmatpush1.bf16.msra.mxu1 %v4505_v37  ;;  %3005 = vmatpush1.bf16.msra.mxu0 %v4641_v38  ;;  %v4585_v37 = vcombine.low %v834_v11, %v838_v12  ;;  %v4593_v38 = vcombine.low %v842_v13, %v846_v14  ;;  %v806_v33 = vld [vmem:[#allocation7 + $0x2f0] sm:$0xff] }
 0x2f8   :  { %2967 = vmatprep.subr.bf16.mxu1 %v4498_v40  ;;  %3006 = vmatprep.subr.bf16.mxu0 %v4634_v41  ;;  %v4578_v40 = vcombine.high %v826_v22, %v830_v23  ;;  %v4714_v41 = vcombine.high %v962_v25, %v966_v34  ;;  %v938_v62 = vld [vmem:[#allocation7 + $0x710] sm:$0xff] }
 0x2f9   :  { %v942_v63 = vld [vmem:[#allocation7 + $0x730] sm:$0xff] }
 0x2fa   :  { %v794_v50 = vld [vmem:[#allocation7 + $0x290] sm:$0xff] }
 0x2fb   :  { %2968 = vmatpush1.bf16.msra.mxu1 %v4497_v51  ;;  %3007 = vmatpush1.bf16.msra.mxu0 %v4633_v29  ;;  %v4577_v51 = vcombine.low %v826_v22, %v830_v23  ;;  %v4713_v29 = vcombine.low %v962_v25, %v966_v34  ;;  %v798_v3 = vld [vmem:[#allocation7 + $0x2b0] sm:$0xff] }
 0x2fc   :  { %2969 = vmatprep.subr.bf16.mxu1 %v4490_v52  ;;  %3008 = vmatprep.subr.bf16.mxu0 %v4626_v53  ;;  %v4570_v52 = vcombine.high %v818_v43, %v822_v45  ;;  %v4706_v53 = vcombine.high %v954_v47, %v958_v49  ;;  %v930_v5 = vld [vmem:[#allocation7 + $0x6d0] sm:$0xff] }
 0x2fd   :  { %v934_v7 = vld [vmem:[#allocation7 + $0x6f0] sm:$0xff] }
 0x2fe   :  { %v786_v11 = vld [vmem:[#allocation7 + $0x250] sm:$0xff] }
 0x2ff   :  { %2970 = vmatpush1.bf16.msra.mxu1 %v4489_v0  ;;  %3009 = vmatpush1.bf16.msra.mxu0 %v4625_v42  ;;  %v4569_v0 = vcombine.low %v818_v43, %v822_v45  ;;  %v4705_v42 = vcombine.low %v954_v47, %v958_v49  ;;  %v790_v12 = vld [vmem:[#allocation7 + $0x270] sm:$0xff]  ;;  %v771_v47 = vld [vmem:[#allocation7 + $0x1d8] sm:$0xff] }
 0x300   :  { %2971 = vmatprep.subr.bf16.mxu1 %v4482_v58  ;;  %3010 = vmatprep.subr.bf16.mxu0 %v4618_v60  ;;  %v4562_v58 = vcombine.high %v810_v54, %v814_v56  ;;  %v4698_v60 = vcombine.high %v946_v61, %v950_v35  ;;  %v922_v13 = vld [vmem:[#allocation7 + $0x690] sm:$0xff]  ;;  %v775_v49 = vld [vmem:[#allocation7 + $0x1f8] sm:$0xff] }
 0x301   :  { %v926_v14 = vld [vmem:[#allocation7 + $0x6b0] sm:$0xff] }
 0x302   :  { %v778_v22 = vld [vmem:[#allocation7 + $0x210] sm:$0xff] }
 0x303   :  { %2972 = vmatpush1.bf16.msra.mxu1 %v4481_v4  ;;  %3011 = vmatpush1.bf16.msra.mxu0 %v4617_v6  ;;  %v4561_v4 = vcombine.low %v810_v54, %v814_v56  ;;  %v4697_v6 = vcombine.low %v946_v61, %v950_v35  ;;  %v782_v23 = vld [vmem:[#allocation7 + $0x230] sm:$0xff]  ;;  %v763_v54 = vld [vmem:[#allocation7 + $0x198] sm:$0xff] }
 0x304   :  { %2973 = vmatprep.subr.bf16.mxu1 %v4474_v8  ;;  %3012 = vmatprep.subr.bf16.mxu0 %v4610_v2  ;;  %v4554_v8 = vcombine.high %v802_v30, %v806_v33  ;;  %v4690_v2 = vcombine.high %v938_v62, %v942_v63  ;;  %v914_v25 = vld [vmem:[#allocation7 + $0x650] sm:$0xff]  ;;  %v767_v56 = vld [vmem:[#allocation7 + $0x1b8] sm:$0xff] }
 0x305   :  { %v918_v34 = vld [vmem:[#allocation7 + $0x670] sm:$0xff]  ;;  %v899_v61 = vld [vmem:[#allocation7 + $0x5d8] sm:$0xff] }
 0x306   :  { %v906_v43 = vld [vmem:[#allocation7 + $0x610] sm:$0xff]  ;;  %v903_v35 = vld [vmem:[#allocation7 + $0x5f8] sm:$0xff] }
 0x307   :  { %2974 = vmatpush1.bf16.msra.mxu1 %v4473_v55  ;;  %3013 = vmatpush1.bf16.msra.mxu0 %v4609_v1  ;;  %v4553_v55 = vcombine.low %v802_v30, %v806_v33  ;;  %v4689_v1 = vcombine.low %v938_v62, %v942_v63  ;;  %v910_v45 = vld [vmem:[#allocation7 + $0x630] sm:$0xff]  ;;  %v755_v30 = vld [vmem:[#allocation7 + $0x158] sm:$0xff] }
 0x308   :  { %2975 = vmatprep.subr.bf16.mxu1 %v4466_v9  ;;  %3014 = vmatprep.subr.bf16.mxu0 %v4602_v10  ;;  %v4546_v9 = vcombine.high %v794_v50, %v798_v3  ;;  %v4682_v10 = vcombine.high %v930_v5, %v934_v7  ;;  %v759_v33 = vld [vmem:[#allocation7 + $0x178] sm:$0xff] }
 0x309   :  { %v891_v62 = vld [vmem:[#allocation7 + $0x598] sm:$0xff] }
 0x30a   :  { %v895_v63 = vld [vmem:[#allocation7 + $0x5b8] sm:$0xff] }
 0x30b   :  { %2976 = vmatpush1.bf16.msra.mxu1 %v4465_v16  ;;  %3015 = vmatpush1.bf16.msra.mxu0 %v4601_v17  ;;  %v4545_v16 = vcombine.low %v794_v50, %v798_v3  ;;  %v4681_v17 = vcombine.low %v930_v5, %v934_v7  ;;  %v4644_v50 = vcombine.high %v891_v62, %v895_v63  ;;  %v751_v3 = vld [vmem:[#allocation7 + $0x138] sm:$0xff] }
 0x30c   :  { %2977 = vmatprep.subr.bf16.mxu1 %v4586_v18  ;;  %3016 = vmatprep.subr.bf16.mxu0 %v4594_v20  ;;  %v4538_v18 = vcombine.high %v786_v11, %v790_v12  ;;  %v4674_v20 = vcombine.high %v922_v13, %v926_v14  ;;  %v883_v5 = vld [vmem:[#allocation7 + $0x558] sm:$0xff] }
 0x30d   :  { %v887_v7 = vld [vmem:[#allocation7 + $0x578] sm:$0xff] }
 0x30f   :  { %2978 = vmatpush2.bf16.msra.mxu1 %v4585_v37  ;;  %3017 = vmatpush1.bf16.msra.mxu0 %v4593_v38  ;;  %v4537_v37 = vcombine.low %v786_v11, %v790_v12  ;;  %v4673_v38 = vcombine.low %v922_v13, %v926_v14  ;;  %v743_v11 = vld [vmem:[#allocation7 + $0xf8] sm:$0xff] }
 0x310   :  { %2979 = vmatprep.subr.bf16.mxu1 %v4578_v40  ;;  %3018 = vmatprep.subr.bf16.mxu0 %v4714_v41  ;;  %v4530_v40 = vcombine.high %v778_v22, %v782_v23  ;;  %v4666_v41 = vcombine.high %v914_v25, %v918_v34  ;;  %v875_v12 = vld [vmem:[#allocation7 + $0x518] sm:$0xff] }
 0x311   :  { %v879_v13 = vld [vmem:[#allocation7 + $0x538] sm:$0xff] }
 0x313   :  { %2980 = vmatpush2.bf16.msra.mxu1 %v4577_v51  ;;  %3019 = vmatpush2.bf16.msra.mxu0 %v4713_v29  ;;  %v4529_v51 = vcombine.low %v778_v22, %v782_v23  ;;  %v4665_v29 = vcombine.low %v914_v25, %v918_v34  ;;  %v735_v22 = vld [vmem:[#allocation7 + $0xb8] sm:$0xff]  ;;  %v4627_v34 = vcombine.low %v875_v12, %v879_v13 }
 0x314   :  { %2981 = vmatprep.subr.bf16.mxu1 %v4570_v52  ;;  %3020 = vmatprep.subr.bf16.mxu0 %v4706_v53  ;;  %v4658_v52 = vcombine.high %v906_v43, %v910_v45  ;;  %v4524_v53 = vcombine.high %v771_v47, %v775_v49  ;;  %v867_v23 = vld [vmem:[#allocation7 + $0x4d8] sm:$0xff] }
 0x317   :  { %2982 = vmatpush2.bf16.msra.mxu1 %v4569_v0  ;;  %3021 = vmatpush2.bf16.msra.mxu0 %v4705_v42  ;;  %v4657_v0 = vcombine.low %v906_v43, %v910_v45  ;;  %v4523_v42 = vcombine.low %v771_v47, %v775_v49  ;;  %v859_v43 = vld [vmem:[#allocation7 + $0x498] sm:$0xff] }
 0x318   :  { %2983 = vmatprep.subr.bf16.mxu1 %v4562_v58  ;;  %3022 = vmatprep.subr.bf16.mxu0 %v4698_v60  ;;  %v4516_v58 = vcombine.high %v763_v54, %v767_v56  ;;  %v4652_v60 = vcombine.high %v899_v61, %v903_v35  ;;  %v863_v45 = vld [vmem:[#allocation7 + $0x4b8] sm:$0xff] }
 0x31b   :  { %2984 = vmatpush2.bf16.msra.mxu1 %v4561_v4  ;;  %3023 = vmatpush2.bf16.msra.mxu0 %v4697_v6  ;;  %v4515_v4 = vcombine.low %v763_v54, %v767_v56  ;;  %v4651_v6 = vcombine.low %v899_v61, %v903_v35  ;;  %v851_v54 = vld [vmem:[#allocation7 + $0x458] sm:$0xff]  ;;  %v4611_v35 = vcombine.low %v859_v43, %v863_v45 }
 0x31c   :  { %2985 = vmatprep.subr.bf16.mxu1 %v4554_v8  ;;  %3024 = vmatprep.subr.bf16.mxu0 %v4690_v2  ;;  %v4508_v8 = vcombine.high %v755_v30, %v759_v33  ;;  %v747_v2 = vld [vmem:[#allocation7 + $0x118] sm:$0xff] }
 0x31d   :  { %v4499_v14 = vcombine.low %v747_v2, %v751_v3  ;;  %v855_v56 = vld [vmem:[#allocation7 + $0x478] sm:$0xff] }
 0x31f   :  { %2986 = vmatpush2.bf16.msra.mxu1 %v4553_v55  ;;  %3025 = vmatpush2.bf16.msra.mxu0 %v4689_v1  ;;  %v4507_v55 = vcombine.low %v755_v30, %v759_v33  ;;  %v4643_v1 = vcombine.low %v891_v62, %v895_v63  ;;  %v843_v30 = vld [vmem:[#allocation7 + $0x418] sm:$0xff]  ;;  %v4603_v63 = vcombine.low %v851_v54, %v855_v56 }
 0x320   :  { %2987 = vmatprep.subr.bf16.mxu1 %v4546_v9  ;;  %3026 = vmatprep.subr.bf16.mxu0 %v4682_v10  ;;  %v4500_v9 = vcombine.high %v747_v2, %v751_v3  ;;  %v4636_v10 = vcombine.high %v883_v5, %v887_v7  ;;  %v847_v33 = vld [vmem:[#allocation7 + $0x438] sm:$0xff] }
 0x321   :  { %v831_v2 = vld [vmem:[#allocation7 + $0x3b8] sm:$0xff] }
 0x322   :  { %v967_v3 = vld [vmem:[#allocation7 + $0x7f8] sm:$0xff] }
 0x323   :  { %2988 = vmatpush2.bf16.msra.mxu1 %v4545_v16  ;;  %3027 = vmatpush2.bf16.msra.mxu0 %v4681_v17  ;;  %v4635_v16 = vcombine.low %v883_v5, %v887_v7  ;;  %v4595_v7 = vcombine.low %v843_v30, %v847_v33 }
 0x324   :  { %2989 = vmatprep.subr.bf16.mxu1 %v4538_v18  ;;  %3028 = vmatprep.subr.bf16.mxu0 %v4674_v20  ;;  %v4628_v18 = vcombine.high %v875_v12, %v879_v13  ;;  %v731_v20 = vld [vmem:[#allocation7 + $0x98] sm:$0xff] }
 0x325   :  { %v4483_v47 = vcombine.low %v731_v20, %v735_v22 }
 0x327   :  { %2990 = vmatpush2.bf16.msra.mxu1 %v4537_v37  ;;  %3029 = vmatpush2.bf16.msra.mxu0 %v4673_v38  ;;  %v4484_v37 = vcombine.high %v731_v20, %v735_v22  ;;  %v947_v20 = vld [vmem:[#allocation7 + $0x758] sm:$0xff] }
 0x328   :  { %2991 = vmatprep.subr.bf16.mxu1 %v4530_v40  ;;  %3030 = vmatprep.subr.bf16.mxu0 %v4666_v41  ;;  %v723_v40 = vld [vmem:[#allocation7 + $0x58] sm:$0xff] }
 0x329   :  { %v727_v41 = vld [vmem:[#allocation7 + $0x78] sm:$0xff] }
 0x32a   :  { %v4475_v61 = vcombine.low %v723_v40, %v727_v41  ;;  %v951_v22 = vld [vmem:[#allocation7 + $0x778] sm:$0xff] }
 0x32b   :  { %2992 = vmatpush2.bf16.msra.mxu1 %v4529_v51  ;;  %3031 = vmatpush2.bf16.msra.mxu0 %v4665_v29  ;;  %v4476_v51 = vcombine.high %v723_v40, %v727_v41  ;;  %v4612_v29 = vcombine.high %v859_v43, %v863_v45  ;;  %v939_v40 = vld [vmem:[#allocation7 + $0x718] sm:$0xff]  ;;  %v4699_v45 = vcombine.low %v947_v20, %v951_v22 }
 0x32c   :  { %3032 = vmatprep.subr.bf16.mxu0 %v4658_v52  ;;  %3043 = vmatprep.subr.bf16.mxu1 %v4524_v53  ;;  %v715_v52 = vld [vmem:[#allocation7 + $0x18] sm:$0xff] }
 0x32d   :  { %v719_v53 = vld [vmem:[#allocation7 + $0x38] sm:$0xff] }
 0x32e   :  { %2994 = vmatmul.mubr.bf16.vlgmr.msra.gmra.mxu1 %v5621_v24  ;;  %v4467_v62 = vcombine.low %v715_v52, %v719_v53  ;;  %v943_v41 = vld [vmem:[#allocation7 + $0x738] sm:$0xff] }
 0x32f   :  { %3033 = vmatpush2.bf16.msra.mxu0 %v4657_v0  ;;  %3044 = vmatpush1.bf16.msra.mxu1 %v4523_v42  ;;  %v4468_v0 = vcombine.high %v715_v52, %v719_v53  ;;  %v4604_v42 = vcombine.high %v851_v54, %v855_v56  ;;  %v931_v52 = vld [vmem:[#allocation7 + $0x6d8] sm:$0xff]  ;;  %v4691_v56 = vcombine.low %v939_v40, %v943_v41 }
 0x330   :  { %3075 = vmatprep.mubr.bf16.mxu1 %v5619_v21  ;;  %3045 = vmatprep.subr.bf16.mxu1 %v4516_v58  ;;  %v739_v21 = vld [vmem:[#allocation7 + $0xd8] sm:$0xff] }
 0x331   :  { %3084 = vmatprep.subr.bf16.mxu0 %v4652_v60  ;;  %v4492_v17 = vcombine.high %v739_v21, %v743_v11  ;;  %v4491_v25 = vcombine.low %v739_v21, %v743_v11  ;;  %v835_v58 = vld [vmem:[#allocation7 + $0x3d8] sm:$0xff] }
 0x332   :  { %3035 = vmatmul.mubr.bf16.vlgmr.msra.gmra.mxu0 %v5639_v48  ;;  %v839_v60 = vld [vmem:[#allocation7 + $0x3f8] sm:$0xff] }
 0x333   :  { %3046 = vmatpush1.bf16.msra.mxu1 %v4515_v4  ;;  %3085 = vmatpush1.bf16.msra.mxu0 %v4651_v6  ;;  %v4588_v4 = vcombine.high %v835_v58, %v839_v60  ;;  %v4596_v6 = vcombine.high %v843_v30, %v847_v33  ;;  %v4587_v5 = vcombine.low %v835_v58, %v839_v60  ;;  %v955_v21 = vld [vmem:[#allocation7 + $0x798] sm:$0xff] }
 0x334   :  { %3116 = vmatprep.mubr.bf16.mxu0 %v5637_v46  ;;  %3047 = vmatprep.subr.bf16.mxu1 %v4508_v8  ;;  %v871_v46 = vld [vmem:[#allocation7 + $0x4f8] sm:$0xff] }
 0x335   :  { %3086 = vmatprep.subr.bf16.mxu0 %v4644_v50  ;;  %v4620_v38 = vcombine.high %v867_v23, %v871_v46  ;;  %v4619_v49 = vcombine.low %v867_v23, %v871_v46  ;;  %v827_v8 = vld [vmem:[#allocation7 + $0x398] sm:$0xff] }
 0x336   :  { %v963_v50 = vld [vmem:[#allocation7 + $0x7d8] sm:$0xff]  ;;  %v4579_v12 = vcombine.low %v827_v8, %v831_v2 }
 0x337   :  { %3048 = vmatpush1.bf16.msra.mxu1 %v4507_v55  ;;  %3087 = vmatpush1.bf16.msra.mxu0 %v4643_v1  ;;  %v4580_v55 = vcombine.high %v827_v8, %v831_v2  ;;  %v4716_v1 = vcombine.high %v963_v50, %v967_v3  ;;  %v959_v11 = vld [vmem:[#allocation7 + $0x7b8] sm:$0xff]  ;;  %v4715_v13 = vcombine.low %v963_v50, %v967_v3 }
 0x338   :  { %3049 = vmatprep.subr.bf16.mxu1 %v4500_v9  ;;  %3088 = vmatprep.subr.bf16.mxu0 %v4636_v10  ;;  %v819_v9 = vld [vmem:[#allocation7 + $0x358] sm:$0xff]  ;;  %v4707_v46 = vcombine.low %v955_v21, %v959_v11 }
 0x339   :  { %v823_v10 = vld [vmem:[#allocation7 + $0x378] sm:$0xff] }
 0x33a   :  { %v4571_v23 = vcombine.low %v819_v9, %v823_v10  ;;  %v935_v53 = vld [vmem:[#allocation7 + $0x6f8] sm:$0xff] }
 0x33b   :  { %3050 = vmatpush1.bf16.msra.mxu1 %v4499_v14  ;;  %3089 = vmatpush1.bf16.msra.mxu0 %v4635_v16  ;;  %v4572_v14 = vcombine.high %v819_v9, %v823_v10  ;;  %v4708_v16 = vcombine.high %v955_v21, %v959_v11  ;;  %v923_v58 = vld [vmem:[#allocation7 + $0x698] sm:$0xff]  ;;  %v4683_v33 = vcombine.low %v931_v52, %v935_v53 }
 0x33c   :  { %3051 = vmatprep.subr.bf16.mxu1 %v4492_v17  ;;  %3090 = vmatprep.subr.bf16.mxu0 %v4628_v18  ;;  %v811_v17 = vld [vmem:[#allocation7 + $0x318] sm:$0xff] }
 0x33d   :  { %v815_v18 = vld [vmem:[#allocation7 + $0x338] sm:$0xff] }
 0x33e   :  { %v4563_v43 = vcombine.low %v811_v17, %v815_v18  ;;  %v927_v60 = vld [vmem:[#allocation7 + $0x6b8] sm:$0xff] }
 0x33f   :  { %3052 = vmatpush1.bf16.msra.mxu1 %v4491_v25  ;;  %3091 = vmatpush1.bf16.msra.mxu0 %v4627_v34  ;;  %v4564_v25 = vcombine.high %v811_v17, %v815_v18  ;;  %v4700_v34 = vcombine.high %v947_v20, %v951_v22  ;;  %v915_v8 = vld [vmem:[#allocation7 + $0x658] sm:$0xff]  ;;  %v4675_v3 = vcombine.low %v923_v58, %v927_v60  ;;  %v4986_v18 = vld [vmem:[#allocation10 + $0x60] ss:$8 sps:$4 sm:$0xff]  }
 0x340   :  { %3053 = vmatprep.subr.bf16.mxu1 %v4484_v37  ;;  %3092 = vmatprep.subr.bf16.mxu0 %v4620_v38  ;;  %v803_v37 = vld [vmem:[#allocation7 + $0x2d8] sm:$0xff] }
 0x341   :  { %v807_v38 = vld [vmem:[#allocation7 + $0x2f8] sm:$0xff] }
 0x342   :  { %v4555_v54 = vcombine.low %v803_v37, %v807_v38  ;;  %v919_v2 = vld [vmem:[#allocation7 + $0x678] sm:$0xff] }
 0x343   :  { %3054 = vmatpush1.bf16.msra.mxu1 %v4483_v47  ;;  %3093 = vmatpush1.bf16.msra.mxu0 %v4619_v49  ;;  %v4556_v47 = vcombine.high %v803_v37, %v807_v38  ;;  %v4692_v49 = vcombine.high %v939_v40, %v943_v41  ;;  %v4667_v10 = vcombine.low %v915_v8, %v919_v2  ;;  %v4985_v11 = vld [vmem:[#allocation10 + $0x74] ss:$8 sps:$4 sm:$0xff]   ;;  %v4998_v20 = vld [vmem:[#allocation10 + $0x170] ss:$8 sps:$4 sm:$0xff]   ;;  %v5004_v41 = vld [vmem:[#allocation10 + $0x160] ss:$8 sps:$4 sm:$0xff]  }
 0x344   :  { %3055 = vmatprep.subr.bf16.mxu1 %v4476_v51  ;;  %3094 = vmatprep.subr.bf16.mxu0 %v4612_v29  ;;  %v795_v51 = vld [vmem:[#allocation7 + $0x298] sm:$0xff] }
 0x345   :  { %v799_v29 = vld [vmem:[#allocation7 + $0x2b8] sm:$0xff] }
 0x346   :  { %v4547_v30 = vcombine.low %v795_v51, %v799_v29  ;;  %v4989_v40 = vld [vmem:[#allocation10 + $0x50] ss:$8 sps:$4 sm:$0xff]  }
 0x347   :  { %3056 = vmatpush1.bf16.msra.mxu1 %v4475_v61  ;;  %3095 = vmatpush1.bf16.msra.mxu0 %v4611_v35  ;;  %v4548_v61 = vcombine.high %v795_v51, %v799_v29  ;;  %v4684_v35 = vcombine.high %v931_v52, %v935_v53  ;;  %v4992_v52 = vld [vmem:[#allocation10 + $0x40] ss:$8 sps:$4 sm:$0xff]  }
 0x348   :  { %3057 = vmatprep.subr.bf16.mxu1 %v4468_v0  ;;  %3096 = vmatprep.subr.bf16.mxu0 %v4604_v42  ;;  %v787_v0 = vld [vmem:[#allocation7 + $0x258] sm:$0xff] }
 0x349   :  { %v791_v42 = vld [vmem:[#allocation7 + $0x278] sm:$0xff] }
 0x34a   :  { %v4539_v50 = vcombine.low %v787_v0, %v791_v42 }
 0x34b   :  { %3058 = vmatpush1.bf16.msra.mxu1 %v4467_v62  ;;  %3097 = vmatpush1.bf16.msra.mxu0 %v4603_v63  ;;  %v4540_v62 = vcombine.high %v787_v0, %v791_v42  ;;  %v4676_v63 = vcombine.high %v923_v58, %v927_v60  ;;  %v5003_v42 = vld [vmem:[#allocation10 + $0x24] ss:$8 sps:$4 sm:$0xff]   ;;  %v5016_v58 = vld [vmem:[#allocation10 + $0x140] ss:$8 sps:$4 sm:$0xff]  }
 0x34c   :  { %3059 = vmatprep.subr.bf16.mxu1 %v4588_v4  ;;  %3098 = vmatprep.subr.bf16.mxu0 %v4596_v6  ;;  %v779_v4 = vld [vmem:[#allocation7 + $0x218] sm:$0xff] }
 0x34d   :  { %v783_v6 = vld [vmem:[#allocation7 + $0x238] sm:$0xff] }
 0x34e   :  { %v4531_v9 = vcombine.low %v779_v4, %v783_v6 }
 0x34f   :  { %3060 = vmatpush2.bf16.msra.mxu1 %v4587_v5  ;;  %3099 = vmatpush1.bf16.msra.mxu0 %v4595_v7  ;;  %v4532_v5 = vcombine.high %v779_v4, %v783_v6  ;;  %v4668_v7 = vcombine.high %v915_v8, %v919_v2  ;;  %v5030_v4 = vld [vmem:[#allocation10 + $0x124] ss:$8 sps:$4 sm:$0xff]   ;;  %v5007_v6 = vld [vmem:[#allocation10 + $0x10] ss:$8 sps:$4 sm:$0xff]   ;;  %v5028_v2 = vld [vmem:[#allocation10 + $0x120] ss:$8 sps:$4 sm:$0xff]  }
 0x350   :  { %3061 = vmatprep.subr.bf16.mxu1 %v4580_v55  ;;  %3100 = vmatprep.subr.bf16.mxu0 %v4716_v1  ;;  %v907_v55 = vld [vmem:[#allocation7 + $0x618] sm:$0xff]  ;;  %v5015_v8 = vld [vmem:[#allocation10 + $0x4] ss:$8 sps:$4 sm:$0xff]  }
 0x351   :  { %v911_v1 = vld [vmem:[#allocation7 + $0x638] sm:$0xff] }
 0x352   :  { %v4660_v21 = vcombine.high %v907_v55, %v911_v1 }
 0x353   :  { %3062 = vmatpush2.bf16.msra.mxu1 %v4579_v12  ;;  %3101 = vmatpush2.bf16.msra.mxu0 %v4715_v13  ;;  %v4659_v12 = vcombine.low %v907_v55, %v911_v1  ;;  %v4983_v13 = vld [vmem:[#allocation10 + $0x70] ss:$8 sps:$4 sm:$0xff]   ;;  %v5042_v55 = vld [vmem:[#allocation10 + $0x104] ss:$8 sps:$4 sm:$0xff]  }
 0x354   :  { %3063 = vmatprep.subr.bf16.mxu1 %v4572_v14  ;;  %3102 = vmatprep.subr.bf16.mxu0 %v4708_v16  ;;  %v4988_v14 = vld [vmem:[#allocation10 + $0x64] ss:$8 sps:$4 sm:$0xff]   ;;  %v5000_v16 = vld [vmem:[#allocation10 + $0x174] ss:$8 sps:$4 sm:$0xff]   ;;  %v5019_v1 = vld [vmem:[#allocation10 + $0xf0] ss:$8 sps:$4 sm:$0xff]  }
 0x357   :  { %3064 = vmatpush2.bf16.msra.mxu1 %v4571_v23  ;;  %3103 = vmatpush2.bf16.msra.mxu0 %v4707_v46  ;;  %v4991_v23 = vld [vmem:[#allocation10 + $0x54] ss:$8 sps:$4 sm:$0xff]   ;;  %v5006_v46 = vld [vmem:[#allocation10 + $0x164] ss:$8 sps:$4 sm:$0xff]  }
 0x358   :  { %3065 = vmatprep.subr.bf16.mxu1 %v4564_v25  ;;  %3104 = vmatprep.subr.bf16.mxu0 %v4700_v34 }
 0x35b   :  { %3066 = vmatpush2.bf16.msra.mxu1 %v4563_v43  ;;  %3105 = vmatpush2.bf16.msra.mxu0 %v4699_v45 }
 0x35c   :  { %3067 = vmatprep.subr.bf16.mxu1 %v4556_v47  ;;  %3106 = vmatprep.subr.bf16.mxu0 %v4692_v49  ;;  %v5012_v47 = vld [vmem:[#allocation10 + $0x154] ss:$8 sps:$4 sm:$0xff]  }
 0x35f   :  { %3068 = vmatpush2.bf16.msra.mxu1 %v4555_v54  ;;  %3107 = vmatpush2.bf16.msra.mxu0 %v4691_v56  ;;  %v4997_v54 = vld [vmem:[#allocation10 + $0x34] ss:$8 sps:$4 sm:$0xff]   ;;  %v5018_v56 = vld [vmem:[#allocation10 + $0x144] ss:$8 sps:$4 sm:$0xff]  }
 0x360   :  { %3069 = vmatprep.subr.bf16.mxu1 %v4548_v61  ;;  %3108 = vmatprep.subr.bf16.mxu0 %v4684_v35  ;;  %v4995_v35 = vld [vmem:[#allocation10 + $0x30] ss:$8 sps:$4 sm:$0xff]  }
 0x363   :  { %3070 = vmatpush2.bf16.msra.mxu1 %v4547_v30  ;;  %3109 = vmatpush2.bf16.msra.mxu0 %v4683_v33  ;;  %v5024_v30 = vld [vmem:[#allocation10 + $0x134] ss:$8 sps:$4 sm:$0xff]   ;;  %v5001_v33 = vld [vmem:[#allocation10 + $0x20] ss:$8 sps:$4 sm:$0xff]  }
 0x364   :  { %3071 = vmatprep.subr.bf16.mxu1 %v4540_v62  ;;  %3110 = vmatprep.subr.bf16.mxu0 %v4676_v63  ;;  %v5009_v62 = vld [vmem:[#allocation10 + $0x14] ss:$8 sps:$4 sm:$0xff]   ;;  %v5022_v63 = vld [vmem:[#allocation10 + $0x130] ss:$8 sps:$4 sm:$0xff]  }
 0x367   :  { %3072 = vmatpush2.bf16.msra.mxu1 %v4539_v50  ;;  %3111 = vmatpush2.bf16.msra.mxu0 %v4675_v3  ;;  %v5036_v50 = vld [vmem:[#allocation10 + $0x114] ss:$8 sps:$4 sm:$0xff]   ;;  %v5013_v3 = vld [vmem:[#allocation10] ss:$8 sps:$4 sm:$0xff]  }
 0x368   :  { %3073 = vmatprep.subr.bf16.mxu1 %v4532_v5  ;;  %3112 = vmatprep.subr.bf16.mxu0 %v4668_v7  ;;  %v5021_v5 = vld [vmem:[#allocation10 + $0xf4] ss:$8 sps:$4 sm:$0xff]   ;;  %v5034_v7 = vld [vmem:[#allocation10 + $0x110] ss:$8 sps:$4 sm:$0xff]  }
 0x36b   :  { %3074 = vmatpush2.bf16.msra.mxu1 %v4531_v9  ;;  %3113 = vmatpush2.bf16.msra.mxu0 %v4667_v10  ;;  %v5027_v9 = vld [vmem:[#allocation10 + $0xe4] ss:$8 sps:$4 sm:$0xff]   ;;  %v5040_v10 = vld [vmem:[#allocation10 + $0x100] ss:$8 sps:$4 sm:$0xff]  }
 0x36c   :  { %3114 = vmatprep.subr.bf16.mxu0 %v4660_v21  ;;  %3979 = vmatprep.subr.bf16.mxu1 %v4985_v11  ;;  %v5048_v21 = vld [vmem:[#allocation10 + $0x1f4] ss:$8 sps:$4 sm:$0xff]   ;;  %v5025_v11 = vld [vmem:[#allocation10 + $0xe0] ss:$8 sps:$4 sm:$0xff]  }
 0x36e   :  { %3076 = vmatmul.mubr.bf16.vlgmr.msra.gmra.mxu1 %v5621_v24  ;;  %v5660_v17 = vpop.f32.mrf.mxu1  ;;  %v5668_v24 = vld [vmem:[%s5724_s13] sm:$0xff] }
 0x36f   :  { %3115 = vmatpush2.bf16.msra.mxu0 %v4659_v12  ;;  %3980 = vmatpush1.bf16.msra.mxu1 %v4983_v13  ;;  %v3134_v38 = vrot.slane %v5668_v24, %v5533_v31  ;;  %v5033_v12 = vld [vmem:[#allocation10 + $0xd4] ss:$8 sps:$4 sm:$0xff]   ;;  %v5046_v13 = vld [vmem:[#allocation10 + $0x1f0] ss:$8 sps:$4 sm:$0xff]  }
 0x370   :  { %v2833_v22 = vpop.f32.mrf.mxu1  ;;  %3981 = vmatprep.subr.bf16.mxu1 %v4988_v14  ;;  %4020 = vmatprep.subr.bf16.mxu0 %v5000_v16  ;;  %v5054_v14 = vld [vmem:[#allocation10 + $0x1e4] ss:$8 sps:$4 sm:$0xff]   ;;  %v5031_v16 = vld [vmem:[#allocation10 + $0xd0] ss:$8 sps:$4 sm:$0xff]  }
 0x371   :  { %v2834_v37 = vadd.f32 %v2833_v22, %v5623_v26  ;;  %v5010_v26 = vld [vmem:[#allocation10 + $0x150] ss:$8 sps:$4 sm:$0xff]   ;;  %v5060_v22 = vld [vmem:[#allocation10 + $0x1d4] ss:$8 sps:$4 sm:$0xff]  }
 0x372   :  { %3117 = vmatmul.mubr.bf16.vlgmr.msra.gmra.mxu0 %v5639_v48  ;;  %v2835_v25 = vpop.f32.mrf.mxu1  ;;  %v5663_v34 = vpop.f32.mrf.mxu0  ;;  %v4994_v48 = vld [vmem:[#allocation10 + $0x44] ss:$8 sps:$4 sm:$0xff]  }
 0x373   :  { %3982 = vmatpush1.bf16.msra.mxu1 %v4986_v18  ;;  %4021 = vmatpush1.bf16.msra.mxu0 %v4998_v20  ;;  %v5039_v18 = vld [vmem:[#allocation10 + $0xc4] ss:$8 sps:$4 sm:$0xff]   ;;  %v5052_v20 = vld [vmem:[#allocation10 + $0x1e0] ss:$8 sps:$4 sm:$0xff]   ;;  %v5058_v25 = vld [vmem:[#allocation10 + $0x1d0] ss:$8 sps:$4 sm:$0xff]  }
 0x374   :  { %v2836_v43 = vpop.f32.mrf.mxu1  ;;  %v2874_v45 = vpop.f32.mrf.mxu0  ;;  %3983 = vmatprep.subr.bf16.mxu1 %v4991_v23  ;;  %4022 = vmatprep.subr.bf16.mxu0 %v5006_v46  ;;  %v5037_v23 = vld [vmem:[#allocation10 + $0xc0] ss:$8 sps:$4 sm:$0xff]   ;;  %v5045_v46 = vld [vmem:[#allocation10 + $0xb4] ss:$8 sps:$4 sm:$0xff]  }
 0x375   :  { %v2875_v49 = vadd.f32 %v2874_v45, %v2834_v37  ;;  %v5066_v37 = vld [vmem:[#allocation10 + $0x1c4] ss:$8 sps:$4 sm:$0xff]   ;;  %v3130_v43 = vrot.slane %v5668_v24, %v5536_v32 }
 0x376   :  { %v2876_v51 = vpop.f32.mrf.mxu0  ;;  %v5051_v45 = vld [vmem:[#allocation10 + $0xa4] ss:$8 sps:$4 sm:$0xff]  }
 0x377   :  { %v3168_v29 = vadd.f32 %v3134_v38, %v2875_v49  ;;  %3984 = vmatpush1.bf16.msra.mxu1 %v4989_v40  ;;  %4023 = vmatpush1.bf16.msra.mxu0 %v5004_v41  ;;  %v2832_v38 = vadd.f32 %v5660_v17, %v5617_v19  ;;  %v5043_v40 = vld [vmem:[#allocation10 + $0xb0] ss:$8 sps:$4 sm:$0xff]   ;;  %v5049_v49 = vld [vmem:[#allocation10 + $0xa0] ss:$8 sps:$4 sm:$0xff]   ;;  %v5072_v17 = vld [vmem:[#allocation10 + $0x1a4] ss:$8 sps:$4 sm:$0xff]  }
 0x378   :  { %v2877_v53 = vpop.f32.mrf.mxu0  ;;  %3985 = vmatprep.subr.bf16.mxu1 %v4994_v48  ;;  %4024 = vmatprep.subr.bf16.mxu0 %v5012_v47  ;;  %v5064_v48 = vld [vmem:[#allocation10 + $0x1c0] ss:$8 sps:$4 sm:$0xff]   ;;  %v5069_v47 = vld [vmem:[#allocation10 + $0x1b4] ss:$8 sps:$4 sm:$0xff]   ;;  %v5067_v19 = vld [vmem:[#allocation10 + $0x1b0] ss:$8 sps:$4 sm:$0xff]  }
 0x379   :  { %v3176_v61 = vmul.f32 0.2, %v3168_v29  ;;  %v2873_v41 = vadd.f32 %v5663_v34, %v2832_v38  ;;  %v5055_v34 = vld [vmem:[#allocation10 + $0x90] ss:$8 sps:$4 sm:$0xff]   ;;  %v5070_v53 = vld [vmem:[#allocation10 + $0x1a0] ss:$8 sps:$4 sm:$0xff]  }
 0x37b   :  { %3986 = vmatpush1.bf16.msra.mxu1 %v4992_v52  ;;  %v3184_v0 = vmax.f32 %v3168_v29, %v3176_v61  ;;  %4025 = vmatpush1.bf16.msra.mxu0 %v5010_v26  ;;  %v3167_v51 = vadd.f32 %v3130_v43, %v2873_v41  ;;  %v5057_v29 = vld [vmem:[#allocation10 + $0x94] ss:$8 sps:$4 sm:$0xff]   ;;  %v5063_v26 = vld [vmem:[#allocation10 + $0x84] ss:$8 sps:$4 sm:$0xff]  }
 0x37c   :  { %3987 = vmatprep.subr.bf16.mxu1 %v4997_v54  ;;  %4026 = vmatprep.subr.bf16.mxu0 %v5018_v56  ;;  %v5075_v54 = vld [vmem:[#allocation10 + $0x194] ss:$8 sps:$4 sm:$0xff]   ;;  %v5061_v56 = vld [vmem:[#allocation10 + $0x80] ss:$8 sps:$4 sm:$0xff]   ;;  %v5132_v43 = vld [vmem:[#allocation10 + $0x364] ss:$8 sps:$4 sm:$0xff]  }
 0x37d   :  { %v3192_v60 = vpack.c.bf16 %v3184_v0, %v3184_v0  ;;  %v3175_v52 = vmul.f32 0.2, %v3167_v51  ;;  %v5081_v0 = vld [vmem:[#allocation10 + $0x274] ss:$8 sps:$4 sm:$0xff]  }
 0x37f   :  { %3988 = vmatpush1.bf16.msra.mxu1 %v4995_v35  ;;  %4011 = vmatprep.mubr.bf16.mxu1 %v3192_v60  ;;  %v3183_v61 = vmax.f32 %v3167_v51, %v3175_v52  ;;  %v5073_v35 = vld [vmem:[#allocation10 + $0x190] ss:$8 sps:$4 sm:$0xff]   ;;  %v5105_v52 = vld [vmem:[#allocation10 + $0x2f4] ss:$8 sps:$4 sm:$0xff]  }
 0x380   :  { %3989 = vmatprep.subr.bf16.mxu1 %v5003_v42  ;;  %4027 = vmatpush1.bf16.msra.mxu0 %v5016_v58  ;;  %v5078_v42 = vld [vmem:[#allocation10 + $0x184] ss:$8 sps:$4 sm:$0xff]   ;;  %v5079_v58 = vld [vmem:[#allocation10 + $0x270] ss:$8 sps:$4 sm:$0xff]  }
 0x381   :  { %4028 = vmatprep.subr.bf16.mxu0 %v5024_v30  ;;  %v3191_v60 = vpack.c.bf16 %v3183_v61, %v3183_v61  ;;  %v5076_v30 = vld [vmem:[#allocation10 + $0x180] ss:$8 sps:$4 sm:$0xff]   ;;  %v5097_v51 = vld [vmem:[#allocation10 + $0x210] ss:$8 sps:$4 sm:$0xff]  }
 0x382   :  { %v5139_v61 = vld [vmem:[#allocation10 + $0x330] ss:$8 sps:$4 sm:$0xff]  }
 0x383   :  { %3990 = vmatpush1.bf16.msra.mxu1 %v5001_v33  ;;  %v5084_v33 = vld [vmem:[#allocation10 + $0x264] ss:$8 sps:$4 sm:$0xff]  }
 0x384   :  { %3991 = vmatprep.subr.bf16.mxu1 %v5009_v62  ;;  %4029 = vmatpush1.bf16.msra.mxu0 %v5022_v63  ;;  %v5129_v62 = vld [vmem:[#allocation10 + $0x374] ss:$8 sps:$4 sm:$0xff]  }
 0x385   :  { %4030 = vmatprep.subr.bf16.mxu0 %v5030_v4  ;;  %v3141_v4 = vsub.s32 3, %v5530_v28 }
 0x387   :  { %3992 = vmatpush1.bf16.msra.mxu1 %v5007_v6  ;;  %v5082_v6 = vld [vmem:[#allocation10 + $0x260] ss:$8 sps:$4 sm:$0xff]  }
 0x388   :  { %3993 = vmatprep.subr.bf16.mxu1 %v5015_v8  ;;  %4031 = vmatpush1.bf16.msra.mxu0 %v5028_v2  ;;  %v5087_v2 = vld [vmem:[#allocation10 + $0x254] ss:$8 sps:$4 sm:$0xff]  }
 0x389   :  { %4032 = vmatprep.subr.bf16.mxu0 %v5036_v50 }
 0x38b   :  { %3994 = vmatpush1.bf16.msra.mxu1 %v5013_v3  ;;  %v3138_v3 = vrot.slane %v5668_v24, %v225_v36  ;;  %v5088_v36 = vld [vmem:[#allocation10 + $0x240] ss:$8 sps:$4 sm:$0xff]  }
 0x38c   :  { %3995 = vmatprep.subr.bf16.mxu1 %v5021_v5  ;;  %4033 = vmatpush1.bf16.msra.mxu0 %v5034_v7 }
 0x38d   :  { %4034 = vmatprep.subr.bf16.mxu0 %v5042_v55 }
 0x38f   :  { %3996 = vmatpush2.bf16.msra.mxu1 %v5019_v1 }
 0x390   :  { %3997 = vmatprep.subr.bf16.mxu1 %v5027_v9  ;;  %4035 = vmatpush1.bf16.msra.mxu0 %v5040_v10  ;;  %v3142_v9 = vrot.slane %v5668_v24, %v3141_v4  ;;  %v5085_v10 = vld [vmem:[#allocation10 + $0x250] ss:$8 sps:$4 sm:$0xff]   ;;  %v5112_v4 = vld [vmem:[#allocation10 + $0x2c0] ss:$8 sps:$4 sm:$0xff]  }
 0x391   :  { %4036 = vmatprep.subr.bf16.mxu0 %v5048_v21 }
 0x393   :  { %3998 = vmatpush2.bf16.msra.mxu1 %v5025_v11 }
 0x394   :  { %3999 = vmatprep.subr.bf16.mxu1 %v5033_v12  ;;  %4037 = vmatpush2.bf16.msra.mxu0 %v5046_v13  ;;  %v5090_v12 = vld [vmem:[#allocation10 + $0x244] ss:$8 sps:$4 sm:$0xff]  }
 0x395   :  { %4038 = vmatprep.subr.bf16.mxu0 %v5054_v14 }
 0x397   :  { %4000 = vmatpush2.bf16.msra.mxu1 %v5031_v16 }
 0x398   :  { %4001 = vmatprep.subr.bf16.mxu1 %v5039_v18  ;;  %4039 = vmatpush2.bf16.msra.mxu0 %v5052_v20 }
 0x399   :  { %4040 = vmatprep.subr.bf16.mxu0 %v5060_v22  ;;  %v5093_v22 = vld [vmem:[#allocation10 + $0x234] ss:$8 sps:$4 sm:$0xff]  }
 0x39b   :  { %4002 = vmatpush2.bf16.msra.mxu1 %v5037_v23 }
 0x39c   :  { %4003 = vmatprep.subr.bf16.mxu1 %v5045_v46  ;;  %4041 = vmatpush2.bf16.msra.mxu0 %v5058_v25  ;;  %v5091_v25 = vld [vmem:[#allocation10 + $0x230] ss:$8 sps:$4 sm:$0xff]  }
 0x39d   :  { %4042 = vmatprep.subr.bf16.mxu0 %v5066_v37  ;;  %v5096_v37 = vld [vmem:[#allocation10 + $0x224] ss:$8 sps:$4 sm:$0xff]  }
 0x39f   :  { %4004 = vmatpush2.bf16.msra.mxu1 %v5043_v40  ;;  %v5127_v40 = vld [vmem:[#allocation10 + $0x370] ss:$8 sps:$4 sm:$0xff]  }
 0x3a0   :  { %4005 = vmatprep.subr.bf16.mxu1 %v5051_v45  ;;  %4043 = vmatpush2.bf16.msra.mxu0 %v5064_v48  ;;  %v5094_v45 = vld [vmem:[#allocation10 + $0x220] ss:$8 sps:$4 sm:$0xff]   ;;  %v5099_v48 = vld [vmem:[#allocation10 + $0x214] ss:$8 sps:$4 sm:$0xff]  }
 0x3a1   :  { %4044 = vmatprep.subr.bf16.mxu0 %v5069_v47  ;;  %v5130_v47 = vld [vmem:[#allocation10 + $0x360] ss:$8 sps:$4 sm:$0xff]  }
 0x3a3   :  { %4006 = vmatpush2.bf16.msra.mxu1 %v5049_v49  ;;  %v5135_v49 = vld [vmem:[#allocation10 + $0x354] ss:$8 sps:$4 sm:$0xff]  }
 0x3a4   :  { %4007 = vmatprep.subr.bf16.mxu1 %v5057_v29  ;;  %4045 = vmatpush2.bf16.msra.mxu0 %v5067_v19  ;;  %v5102_v29 = vld [vmem:[#allocation10 + $0x204] ss:$8 sps:$4 sm:$0xff]   ;;  %v5133_v19 = vld [vmem:[#allocation10 + $0x350] ss:$8 sps:$4 sm:$0xff]  }
 0x3a5   :  { %4046 = vmatprep.subr.bf16.mxu0 %v5072_v17  ;;  %v5138_v17 = vld [vmem:[#allocation10 + $0x344] ss:$8 sps:$4 sm:$0xff]  }
 0x3a7   :  { %4008 = vmatpush2.bf16.msra.mxu1 %v5055_v34  ;;  %v5100_v34 = vld [vmem:[#allocation10 + $0x200] ss:$8 sps:$4 sm:$0xff]  }
 0x3a8   :  { %4009 = vmatprep.subr.bf16.mxu1 %v5063_v26  ;;  %4047 = vmatpush2.bf16.msra.mxu0 %v5070_v53  ;;  %v5136_v26 = vld [vmem:[#allocation10 + $0x340] ss:$8 sps:$4 sm:$0xff]   ;;  %v5141_v53 = vld [vmem:[#allocation10 + $0x334] ss:$8 sps:$4 sm:$0xff]  }
 0x3a9   :  { %4048 = vmatprep.subr.bf16.mxu0 %v5075_v54  ;;  %v5103_v54 = vld [vmem:[#allocation10 + $0x2f0] ss:$8 sps:$4 sm:$0xff]  }
 0x3ab   :  { %4010 = vmatpush2.bf16.msra.mxu1 %v5061_v56  ;;  %v5108_v56 = vld [vmem:[#allocation10 + $0x2e4] ss:$8 sps:$4 sm:$0xff]  }
 0x3ac   :  { %4049 = vmatpush2.bf16.msra.mxu0 %v5073_v35  ;;  %4061 = vmatprep.subr.bf16.mxu1 %v5081_v0  ;;  %v5144_v35 = vld [vmem:[#allocation10 + $0x324] ss:$8 sps:$4 sm:$0xff]   ;;  %v5106_v0 = vld [vmem:[#allocation10 + $0x2e0] ss:$8 sps:$4 sm:$0xff]  }
 0x3ad   :  { %4050 = vmatprep.subr.bf16.mxu0 %v5078_v42  ;;  %v5111_v42 = vld [vmem:[#allocation10 + $0x2d4] ss:$8 sps:$4 sm:$0xff]  }
 0x3ae   :  { %v2913_v63 = vpop.f32.mrf.mxu1  ;;  %4012 = vmatmul.mubr.bf16.vlgmr.msra.gmra.mxu1 %v3191_v60  ;;  %v5147_v60 = vld [vmem:[#allocation10 + $0x314] ss:$8 sps:$4 sm:$0xff]  }
 0x3af   :  { %4062 = vmatpush1.bf16.msra.mxu1 %v5079_v58  ;;  %v2914_v50 = vadd.f32 %v2913_v63, %v5611_v39  ;;  %v5142_v58 = vld [vmem:[#allocation10 + $0x320] ss:$8 sps:$4 sm:$0xff]   ;;  %v5150_v63 = vld [vmem:[#allocation10 + $0x304] ss:$8 sps:$4 sm:$0xff]  }
 0x3b0   :  { %v2915_v8 = vpop.f32.mrf.mxu1  ;;  %4051 = vmatpush2.bf16.msra.mxu0 %v5076_v30  ;;  %4063 = vmatprep.subr.bf16.mxu1 %v5084_v33  ;;  %v5109_v30 = vld [vmem:[#allocation10 + $0x2d0] ss:$8 sps:$4 sm:$0xff]   ;;  %v5114_v33 = vld [vmem:[#allocation10 + $0x2c4] ss:$8 sps:$4 sm:$0xff]  }
 0x3b1   :  { %4102 = vmatprep.subr.bf16.mxu0 %v5129_v62  ;;  %v2916_v55 = vadd.f32 %v2915_v8, %v5613_v44  ;;  %v5145_v62 = vld [vmem:[#allocation10 + $0x310] ss:$8 sps:$4 sm:$0xff]   ;;  %v5148_v8 = vld [vmem:[#allocation10 + $0x300] ss:$8 sps:$4 sm:$0xff]  }
 0x3b2   :  { %v2917_v5 = vpop.f32.mrf.mxu1  ;;  %v2954_v7 = vpop.f32.mrf.mxu0 }
 0x3b3   :  { %v2955_v1 = vadd.f32 %v2954_v7, %v2914_v50  ;;  %4064 = vmatpush1.bf16.msra.mxu1 %v5082_v6  ;;  %v5117_v6 = vld [vmem:[#allocation10 + $0x2b4] ss:$8 sps:$4 sm:$0xff]   ;;  %v5115_v50 = vld [vmem:[#allocation10 + $0x2b0] ss:$8 sps:$4 sm:$0xff]   ;;  %v5156_v7 = vld [vmem:[#allocation10 + $0x3e4] ss:$8 sps:$4 sm:$0xff]  }
 0x3b4   :  { %v2918_v21 = vpop.f32.mrf.mxu1  ;;  %v2956_v11 = vpop.f32.mrf.mxu0  ;;  %4065 = vmatprep.subr.bf16.mxu1 %v5087_v2  ;;  %v5153_v2 = vld [vmem:[#allocation10 + $0x3f4] ss:$8 sps:$4 sm:$0xff]   ;;  %v5151_v5 = vld [vmem:[#allocation10 + $0x3f0] ss:$8 sps:$4 sm:$0xff]  }
 0x3b5   :  { %v3169_v13 = vadd.f32 %v3138_v3, %v2955_v1  ;;  %v2957_v39 = vadd.f32 %v2956_v11, %v2916_v55  ;;  %v5120_v3 = vld [vmem:[#allocation10 + $0x2a4] ss:$8 sps:$4 sm:$0xff]   ;;  %v5118_v55 = vld [vmem:[#allocation10 + $0x2a0] ss:$8 sps:$4 sm:$0xff]   ;;  %v5123_v1 = vld [vmem:[#allocation10 + $0x294] ss:$8 sps:$4 sm:$0xff]  }
 0x3b6   :  { %v2958_v14 = vpop.f32.mrf.mxu0  ;;  %v5121_v21 = vld [vmem:[#allocation10 + $0x290] ss:$8 sps:$4 sm:$0xff]   ;;  %v5126_v11 = vld [vmem:[#allocation10 + $0x284] ss:$8 sps:$4 sm:$0xff]  }
 0x3b7   :  { %v3177_v16 = vmul.f32 0.2, %v3169_v13  ;;  %v3170_v18 = vadd.f32 %v3142_v9, %v2957_v39  ;;  %4066 = vmatpush1.bf16.msra.mxu1 %v5085_v10  ;;  %v5154_v9 = vld [vmem:[#allocation10 + $0x3e0] ss:$8 sps:$4 sm:$0xff]   ;;  %v5159_v10 = vld [vmem:[#allocation10 + $0x3d4] ss:$8 sps:$4 sm:$0xff]  }
 0x3b8   :  { %v2959_v20 = vpop.f32.mrf.mxu0  ;;  %4067 = vmatprep.subr.bf16.mxu1 %v5090_v12  ;;  %v5157_v12 = vld [vmem:[#allocation10 + $0x3d0] ss:$8 sps:$4 sm:$0xff]   ;;  %v5124_v39 = vld [vmem:[#allocation10 + $0x280] ss:$8 sps:$4 sm:$0xff]  }
 0x3b9   :  { %v3178_v44 = vmul.f32 0.2, %v3170_v18  ;;  %v3185_v23 = vmax.f32 %v3169_v13, %v3177_v16  ;;  %v5162_v13 = vld [vmem:[#allocation10 + $0x3c4] ss:$8 sps:$4 sm:$0xff]   ;;  %v5160_v14 = vld [vmem:[#allocation10 + $0x3c0] ss:$8 sps:$4 sm:$0xff]  }
 0x3ba   :  { %v5165_v16 = vld [vmem:[#allocation10 + $0x3b4] ss:$8 sps:$4 sm:$0xff]  }
 0x3bb   :  { %v3186_v46 = vmax.f32 %v3170_v18, %v3178_v44  ;;  %4068 = vmatpush1.bf16.msra.mxu1 %v5088_v36  ;;  %v3193_v41 = vpack.c.bf16 %v3185_v23, %v3185_v23  ;;  %v3145_v18 = vsub.s32 4, %v5530_v28  ;;  %v5163_v36 = vld [vmem:[#allocation10 + $0x3b0] ss:$8 sps:$4 sm:$0xff]   ;;  %v3149_v44 = vsub.s32 5, %v5530_v28 }
 0x3bc   :  { %4069 = vmatprep.subr.bf16.mxu1 %v5093_v22  ;;  %v5168_v22 = vld [vmem:[#allocation10 + $0x3a4] ss:$8 sps:$4 sm:$0xff]  }
 0x3bd   :  { %v3194_v38 = vpack.c.bf16 %v3186_v46, %v3186_v46 }
 0x3bf   :  { %4052 = vmatprep.mubr.bf16.mxu0 %v3194_v38  ;;  %4070 = vmatpush1.bf16.msra.mxu1 %v5091_v25  ;;  %v3146_v25 = vrot.slane %v5668_v24, %v3145_v18  ;;  %v5182_v18 = vld [vmem:[#allocation11 + $0x20] sm:$0xff]  }
 0x3c0   :  { %4053 = vmatmul.mubr.bf16.vlgmr.msra.gmra.mxu0 %v3193_v41  ;;  %4071 = vmatprep.subr.bf16.mxu1 %v5096_v37  ;;  %v5166_v37 = vld [vmem:[#allocation10 + $0x3a0] ss:$8 sps:$4 sm:$0xff]   ;;  %v5171_v41 = vld [vmem:[#allocation10 + $0x394] ss:$8 sps:$4 sm:$0xff]  }
 0x3c1   :  { %4103 = vmatpush1.bf16.msra.mxu0 %v5127_v40 }
 0x3c2   :  { %4104 = vmatprep.subr.bf16.mxu0 %v5132_v43 }
 0x3c3   :  { %4072 = vmatpush1.bf16.msra.mxu1 %v5094_v45 }
 0x3c4   :  { %4073 = vmatprep.subr.bf16.mxu1 %v5099_v48  ;;  %v3150_v48 = vrot.slane %v5668_v24, %v3149_v44 }
 0x3c5   :  { %4105 = vmatpush1.bf16.msra.mxu0 %v5130_v47 }
 0x3c6   :  { %4106 = vmatprep.subr.bf16.mxu0 %v5135_v49 }
 0x3c7   :  { %4074 = vmatpush1.bf16.msra.mxu1 %v5097_v51 }
 0x3c8   :  { %4075 = vmatprep.subr.bf16.mxu1 %v5102_v29 }
 0x3c9   :  { %4107 = vmatpush1.bf16.msra.mxu0 %v5133_v19  ;;  %v5169_v19 = vld [vmem:[#allocation10 + $0x390] ss:$8 sps:$4 sm:$0xff]  }
 0x3ca   :  { %4108 = vmatprep.subr.bf16.mxu0 %v5138_v17  ;;  %v5174_v17 = vld [vmem:[#allocation10 + $0x384] ss:$8 sps:$4 sm:$0xff]  }
 0x3cb   :  { %4076 = vmatpush1.bf16.msra.mxu1 %v5100_v34 }
 0x3cc   :  { %4077 = vmatprep.subr.bf16.mxu1 %v5105_v52 }
 0x3cd   :  { %4109 = vmatpush1.bf16.msra.mxu0 %v5136_v26 }
 0x3ce   :  { %4110 = vmatprep.subr.bf16.mxu0 %v5141_v53 }
 0x3cf   :  { %4078 = vmatpush2.bf16.msra.mxu1 %v5103_v54  ;;  %v5172_v54 = vld [vmem:[#allocation10 + $0x380] ss:$8 sps:$4 sm:$0xff]  }
 0x3d0   :  { %4079 = vmatprep.subr.bf16.mxu1 %v5108_v56 }
 0x3d1   :  { %4111 = vmatpush1.bf16.msra.mxu0 %v5139_v61 }
 0x3d2   :  { %4112 = vmatprep.subr.bf16.mxu0 %v5144_v35 }
 0x3d3   :  { %4080 = vmatpush2.bf16.msra.mxu1 %v5106_v0  ;;  %v3153_v0 = vsub.s32 6, %v5530_v28 }
 0x3d4   :  { %4081 = vmatprep.subr.bf16.mxu1 %v5111_v42 }
 0x3d5   :  { %4113 = vmatpush1.bf16.msra.mxu0 %v5142_v58  ;;  %v3157_v58 = vsub.s32 7, %v5530_v28 }
 0x3d6   :  { %4114 = vmatprep.subr.bf16.mxu0 %v5147_v60 }
 0x3d7   :  { %4082 = vmatpush2.bf16.msra.mxu1 %v5109_v30 }
 0x3d8   :  { %4083 = vmatprep.subr.bf16.mxu1 %v5114_v33  ;;  %v3154_v33 = vrot.slane %v5668_v24, %v3153_v0 }
 0x3d9   :  { %4115 = vmatpush1.bf16.msra.mxu0 %v5145_v62 }
 0x3da   :  { %4116 = vmatprep.subr.bf16.mxu0 %v5150_v63 }
 0x3db   :  { %4084 = vmatpush2.bf16.msra.mxu1 %v5112_v4 }
 0x3dc   :  { %4085 = vmatprep.subr.bf16.mxu1 %v5117_v6 }
 0x3dd   :  { %4117 = vmatpush1.bf16.msra.mxu0 %v5148_v8  ;;  %v3158_v8 = vrot.slane %v5668_v24, %v3157_v58  ;;  %v5178_v24 = vld [vmem:[#allocation11 + $0x30] sm:$0xff]  }
 0x3de   :  { %4118 = vmatprep.subr.bf16.mxu0 %v5153_v2 }
 0x3df   :  { %4086 = vmatpush2.bf16.msra.mxu1 %v5115_v50 }
 0x3e0   :  { %4087 = vmatprep.subr.bf16.mxu1 %v5120_v3 }
 0x3e1   :  { %4119 = vmatpush2.bf16.msra.mxu0 %v5151_v5 }
 0x3e2   :  { %4120 = vmatprep.subr.bf16.mxu0 %v5156_v7 }
 0x3e3   :  { %4088 = vmatpush2.bf16.msra.mxu1 %v5118_v55 }
 0x3e4   :  { %4089 = vmatprep.subr.bf16.mxu1 %v5123_v1 }
 0x3e5   :  { %4121 = vmatpush2.bf16.msra.mxu0 %v5154_v9 }
 0x3e6   :  { %4122 = vmatprep.subr.bf16.mxu0 %v5159_v10 }
 0x3e7   :  { %4090 = vmatpush2.bf16.msra.mxu1 %v5121_v21 }
 0x3e8   :  { %4091 = vmatprep.subr.bf16.mxu1 %v5126_v11 }
 0x3e9   :  { %4123 = vmatpush2.bf16.msra.mxu0 %v5157_v12  ;;  %v5175_v12 = vld [vmem:[#allocation11 + $0x78] sm:$0xff]  }
 0x3ea   :  { %4124 = vmatprep.subr.bf16.mxu0 %v5162_v13  ;;  %v5177_v13 = vld [vmem:[#allocation11 + $0x70] sm:$0xff]  }
 0x3eb   :  { %4092 = vmatpush2.bf16.msra.mxu1 %v5124_v39  ;;  %v5179_v39 = vld [vmem:[#allocation11 + $0x68] sm:$0xff]  }
 0x3ec   :  { %4875 = vmatprep.subr.bf16.mxu1 %v5175_v12 }
 0x3ed   :  { %4125 = vmatpush2.bf16.msra.mxu0 %v5160_v14  ;;  %v5180_v14 = vld [vmem:[#allocation11 + $0x28] sm:$0xff]  }
 0x3ee   :  { %v2995_v20 = vpop.f32.mrf.mxu1  ;;  %4126 = vmatprep.subr.bf16.mxu0 %v5165_v16  ;;  %v5181_v16 = vld [vmem:[#allocation11 + $0x60] sm:$0xff]  }
 0x3ef   :  { %v2996_v46 = vadd.f32 %v2995_v20, %v5647_v57  ;;  %v5184_v20 = vld [vmem:[#allocation11 + $0x18] sm:$0xff]  }
 0x3f0   :  { %v2997_v23 = vpop.f32.mrf.mxu1 }
 0x3f1   :  { %4127 = vmatpush2.bf16.msra.mxu0 %v5163_v36  ;;  %v2998_v43 = vadd.f32 %v2997_v23, %v5649_v59  ;;  %v5183_v36 = vld [vmem:[#allocation11 + $0x58] sm:$0xff]  }
 0x3f2   :  { %v2999_v38 = vpop.f32.mrf.mxu1  ;;  %v3036_v40 = vpop.f32.mrf.mxu0  ;;  %4128 = vmatprep.subr.bf16.mxu0 %v5168_v22 }
 0x3f3   :  { %v3037_v45 = vadd.f32 %v3036_v40, %v2996_v46 }
 0x3f4   :  { %v3000_v47 = vpop.f32.mrf.mxu1  ;;  %v3038_v49 = vpop.f32.mrf.mxu0 }
 0x3f5   :  { %v3171_v51 = vadd.f32 %v3146_v25, %v3037_v45  ;;  %v3039_v29 = vadd.f32 %v3038_v49, %v2998_v43  ;;  %4129 = vmatpush2.bf16.msra.mxu0 %v5166_v37  ;;  %v3327_v25 = vld [vmem:[%s5726_s15] sm:$0x3]  ;;  %v5186_v45 = vld [vmem:[#allocation11 + $0x10] sm:$0xff]   ;;  %s5380_s15 = smov [#allocation13]  }
 0x3f6   :  { %v3040_v57 = vpop.f32.mrf.mxu0  ;;  %4130 = vmatprep.subr.bf16.mxu0 %v5171_v41  ;;  %v3332_v37 = vrot.slane %v3327_v25, %v5536_v32  ;;  %v3336_v38 = vrot.slane %v3327_v25, %v5533_v31  ;;  %v5185_v41 = vld [vmem:[#allocation11 + $0x50] sm:$0xff]   ;;  %v5190_v32 = vld [vmem:[#allocation11] sm:$0xff]   ;;  %s4343_s25 = sshll.u32 %s5380_s15, 4  ;;  %s4344_s25 = int_to_ptr.vmem [resolvable:$true] %s4343_s25 }
 0x3f7   :  { %v3179_v34 = vmul.f32 0.2, %v3171_v51  ;;  %v3172_v52 = vadd.f32 %v3150_v48, %v3039_v29  ;;  %v5187_v29 = vld [vmem:[#allocation11 + $0x48] sm:$0xff]   ;;  %s5311_s12 = scalar_lea.vmem %s4344_s25, 64  ;;  %p5316_p3 = scmp.lt.s32.totalorder %s4344_s25, %s4344_s25 }
 0x3f8   :  { %v3041_v26 = vpop.f32.mrf.mxu0  ;;  %v5188_v57 = vld [vmem:[#allocation11 + $0x8] sm:$0xff]   ;;  %p5312_p2 = scmp.ne.s32.totalorder %s4344_s25, %s5311_s12  ;;  %p5317_p4 = scmp.lt.s32.totalorder %s5311_s12, %s5311_s12 }
 0x3f9   :  { %v3180_v53 = vmul.f32 0.2, %v3172_v52  ;;  %4131 = vmatpush2.bf16.msra.mxu0 %v5169_v19  ;;  %v3187_v56 = vmax.f32 %v3171_v51, %v3179_v34  ;;  %v5189_v34 = vld [vmem:[#allocation11 + $0x40] sm:$0xff]  }
 0x3fa   :  { %4132 = vmatprep.subr.bf16.mxu0 %v5174_v17  ;;  %p5318_p5 = por %p5317_p4, %p5316_p3 }
 0x3fb   :  { %v3188_v59 = vmax.f32 %v3172_v52, %v3180_v53  ;;  %v3195_v35 = vpack.c.bf16 %v3187_v56, %v3187_v56 }
 0x3fc   :  { %p5319_p6 = pnand %p5318_p5, %p5312_p2 }
 0x3fd   :  { %v3196_v61 = vpack.c.bf16 %v3188_v59, %v3188_v59  ;;  %4133 = vmatpush2.bf16.msra.mxu0 %v5172_v54 }
 0x3ff   :  { %4093 = vmatprep.mubr.bf16.mxu1 %v3196_v61 }
 0x400   :  { %4094 = vmatmul.mubr.bf16.vlgmr.msra.gmra.mxu1 %v3195_v35 }
 0x42e   :  { %v3077_v42 = vpop.f32.mrf.mxu1 }
 0x42f   :  { %v3078_v30 = vadd.f32 %v3077_v42, %v5625_v27 }
 0x430   :  { %v3079_v60 = vpop.f32.mrf.mxu1 }
 0x431   :  { %v3080_v4 = vadd.f32 %v3079_v60, %v5631_v15  ;;  %v5176_v15 = vld [vmem:[#allocation11 + $0x38] sm:$0xff]  }
 0x432   :  { %v3081_v62 = vpop.f32.mrf.mxu1  ;;  %v3118_v63 = vpop.f32.mrf.mxu0  ;;  %4876 = vmatpush3.bf16.msra.mxu1 %v5176_v15 }
 0x433   :  { %v3119_v6 = vadd.f32 %v3118_v63, %v3078_v30  ;;  %4877 = vmatprep.subr.bf16.mxu1 %v5177_v13 }
 0x434   :  { %v3082_v2 = vpop.f32.mrf.mxu1  ;;  %v3120_v50 = vpop.f32.mrf.mxu0 }
 0x435   :  { %v3173_v3 = vadd.f32 %v3154_v33, %v3119_v6  ;;  %v3121_v5 = vadd.f32 %v3120_v50, %v3080_v4 }
 0x436   :  { %v3122_v7 = vpop.f32.mrf.mxu0  ;;  %4878 = vmatpush3.bf16.msra.mxu1 %v5178_v24 }
 0x437   :  { %v3181_v55 = vmul.f32 0.2, %v3173_v3  ;;  %v3174_v1 = vadd.f32 %v3158_v8, %v3121_v5  ;;  %4879 = vmatprep.subr.bf16.mxu1 %v5179_v39 }
 0x438   :  { %v3123_v28 = vpop.f32.mrf.mxu0 }
 0x439   :  { %v3182_v9 = vmul.f32 0.2, %v3174_v1  ;;  %v3189_v10 = vmax.f32 %v3173_v3, %v3181_v55 }
 0x43a   :  { %4880 = vmatpush3.bf16.msra.mxu1 %v5180_v14 }
 0x43b   :  { %v3190_v27 = vmax.f32 %v3174_v1, %v3182_v9  ;;  %v3197_v11 = vpack.c.bf16 %v3189_v10, %v3189_v10  ;;  %4881 = vmatprep.subr.bf16.mxu1 %v5181_v16 }
 0x43d   :  { %v3198_v21 = vpack.c.bf16 %v3190_v27, %v3190_v27 }
 0x43e   :  { %4882 = vmatpush3.bf16.msra.mxu1 %v5182_v18 }
 0x43f   :  { %4134 = vmatprep.mubr.bf16.mxu0 %v3198_v21  ;;  %4883 = vmatprep.subr.bf16.mxu1 %v5183_v36 }
 0x440   :  { %4135 = vmatmul.mubr.bf16.vlgmr.msra.gmra.mxu0 %v3197_v11 }
 0x442   :  { %4884 = vmatpush3.bf16.msra.mxu1 %v5184_v20 }
 0x443   :  { %4885 = vmatprep.subr.bf16.mxu1 %v5185_v41 }
 0x446   :  { %4886 = vmatpush3.bf16.msra.mxu1 %v5186_v45 }
 0x447   :  { %4887 = vmatprep.subr.bf16.mxu1 %v5187_v29 }
 0x44a   :  { %4888 = vmatpush3.bf16.msra.mxu1 %v5188_v57 }
 0x44b   :  { %4889 = vmatprep.subr.bf16.mxu1 %v5189_v34 }
 0x44e   :  { %4890 = vmatpush3.bf16.msra.mxu1 %v5190_v32 }
 0x46e   :  { %v4013_v22 = vpop.f32.mrf.mxu1 }
 0x46f   :  { %v4014_v40 = vadd.f32 %v4013_v22, %v3332_v37 }
 0x470   :  { %v4015_v44 = vpop.f32.mrf.mxu1 }
 0x471   :  { %v4016_v48 = vadd.f32 %v4015_v44, %v3336_v38 }
 0x472   :  { %v4017_v23 = vpop.f32.mrf.mxu1 }
 0x474   :  { %v4018_v46 = vpop.f32.mrf.mxu1 }
 0x480   :  { %v4054_v43 = vpop.f32.mrf.mxu0 }
 0x481   :  { %v4055_v47 = vadd.f32 %v4054_v43, %v4014_v40 }
 0x482   :  { %v4056_v49 = vpop.f32.mrf.mxu0 }
 0x483   :  { %v4057_v51 = vadd.f32 %v4056_v49, %v4016_v48 }
 0x484   :  { %v4058_v19 = vpop.f32.mrf.mxu0 }
 0x486   :  { %v4059_v17 = vpop.f32.mrf.mxu0 }
 0x4c0   :  { %v4095_v31 = vpop.f32.mrf.mxu1 }
 0x4c1   :  { %v4096_v52 = vadd.f32 %v4095_v31, %v4055_v47 }
 0x4c2   :  { %v4097_v26 = vpop.f32.mrf.mxu1 }
 0x4c3   :  { %v4098_v59 = vadd.f32 %v4097_v26, %v4057_v51 }
 0x4c4   :  { %v4099_v53 = vpop.f32.mrf.mxu1 }
 0x4c6   :  { %v4100_v54 = vpop.f32.mrf.mxu1 }
 0x500   :  { %v4136_v56 = vpop.f32.mrf.mxu0 }
 0x501   :  { %v4137_v61 = vadd.f32 %v4136_v56, %v4096_v52 }
 0x502   :  { %v4138_v35 = vpop.f32.mrf.mxu0 }
 0x503   :  { %v4143_v0 = vmul.f32 0.2, %v4137_v61  ;;  %v4139_v42 = vadd.f32 %v4138_v35, %v4098_v59 }
 0x504   :  { %v4140_v58 = vpop.f32.mrf.mxu0 }
 0x505   :  { %v4144_v60 = vmul.f32 0.2, %v4139_v42  ;;  %v4145_v30 = vmax.f32 %v4137_v61, %v4143_v0 }
 0x506   :  { %v4141_v33 = vpop.f32.mrf.mxu0 }
 0x507   :  { %v4146_v62 = vmax.f32 %v4139_v42, %v4144_v60  ;;  %v4159_v6 = vpack.c.bf16 %v4145_v30, %v4145_v30 }
 0x509   :  { %v4160_v63 = vpack.c.bf16 %v4146_v62, %v4146_v62  ;;  %v4149_v4 = vcombine.low %v4145_v30, %v4146_v62 }
 0x50b   :  { %4328 = vmatprep.mubr.bf16.mxu1 %v4160_v63  ;;  %4845 = vst.sshfl [vmem:[#allocation13] sm:$0x33 pattern:$0x76325410] %v4149_v4 }
 0x50c   :  { %4329 = vmatmul.mubr.bf16.vlgmr.msra.gmra.mxu1 %v4159_v6 }
 0x50d   :  { %5322 = shalt.err (!%p5319_p6)
}
 0x50e   :  { %4346 = dma.vmem_to_hbm [thread:$0]  %s4344_s25, 64, %s5729_s18, [#allocation4]   ;;  %v4846_v2 = vld [vmem:[%s5728_s17] ss:$0 sm:$0xff] }
 0x50f   :  { %s5381_s7 = smov [#allocation14]  }
 0x510   :  { %s4353_s4 = sshll.u32 %s5381_s7, 4  ;;  %s4354_s4 = int_to_ptr.vmem [resolvable:$true] %s4353_s4 }
 0x511   :  { %s5331_s5 = scalar_lea.vmem %s4354_s4, 32  ;;  %p5336_p8 = scmp.lt.s32.totalorder %s4354_s4, %s4354_s4 }
 0x512   :  { %p5332_p7 = scmp.ne.s32.totalorder %s4354_s4, %s5331_s5  ;;  %p5337_p9 = scmp.lt.s32.totalorder %s5331_s5, %s5331_s5 }
 0x514   :  { %p5338_p10 = por %p5337_p9, %p5336_p8 }
 0x516   :  { %p5339_p11 = pnand %p5338_p10, %p5332_p7 }
 0x5cc   :  { %v4891_v8 = vpop.f32.mrf.mxu1 }
 0x5ce   :  { %v4892_v50 = vpop.f32.mrf.mxu1 }
 0x5cf   :  { %v4893_v3 = vadd.f32 %v4892_v50, %v4891_v8 }
 0x5d0   :  { %v4894_v5 = vpop.f32.mrf.mxu1 }
 0x5d1   :  { %v4331_v7 = vadd.f32 %v4893_v3, %v4846_v2 }
 0x5d2   :  { %v4895_v55 = vpop.f32.mrf.mxu1 }
 0x5d3   :  { %4336 = vst [vmem:[#allocation14] sm:$0x3] %v4331_v7 }
 0x5d4   :  { %5342 = shalt.err (!%p5339_p11)
}
 0x5d5   :  { %4356 = dma.vmem_to_hbm [thread:$0]  %s4354_s4, 32, %s5730_s19, [#allocation15]  }
 0x5d6   :  { %5359 = dma.done.wait [#allocation4], 64  }
 0x5d7   :  { %5360 = vsyncadd [#allocation4], 4294967232 }
 0x5d8   :  { %5361 = dma.done.wait [#allocation15], 32  }
 0x5d9   :  { %5362 = vsyncadd [#allocation15], 4294967264 }
 0x5da   :  { %4363 = vsyncpa [#allocation3], 1 }
 0x5db   :  { %4364 = vsyncpa [#allocation6], 1 }
 0x5dc   :  { %4365 = vsyncpa [#allocation9], 1 }
 0x5dd   :  { %4366 = vsyncpa [#allocation12], 1 }
 0x5de   :  { %4367 = vsyncpa [#allocation4], 1 }
 0x5df   :  { %4368 = vsyncpa [#allocation15], 1 }

// kernel: tpu_custom_call.1
= control target key start
LH: loop header
LB: loop body
LE: loop exit
PB: predicated region body
PF: predicated region fallthrough
CT: control target
= control target key end

     0   :  { %s5711_s0 = inlined_call_operand.vmem [shape: f32[32,3], index: 0, kind: input, shape index: {}]   ;;  %s5712_s1 = inlined_call_operand.vmem [shape: f32[2,8], index: 1, kind: input, shape index: {}]   ;;  %s5713_s2 = inlined_call_operand.vmem [shape: f32[16,1], index: 2, kind: input, shape index: {}]   ;;  %s5714_s3 = inlined_call_operand.vmem [shape: f32[3,128], index: 3, kind: input, shape index: {}]   ;;  %s5715_s4 = inlined_call_operand.vmem [shape: f32[1,128], index: 4, kind: input, shape index: {}]   ;;  %s5716_s5 = inlined_call_operand.hbm [shape: bf16[128,128], index: 5, kind: input, shape index: {}]   ;;  %s5717_s6 = inlined_call_operand.vmem [shape: f32[1,128], index: 6, kind: input, shape index: {}]   ;;  %s5718_s7 = inlined_call_operand.hbm [shape: bf16[128,256], index: 7, kind: input, shape index: {}]   ;;  %s5719_s8 = inlined_call_operand.vmem [shape: f32[1,256], index: 8, kind: input, shape index: {}]   ;;  %s5720_s9 = inlined_call_operand.vmem [shape: bf16[8,128], index: 9, kind: input, shape index: {}]   ;;  %s5721_s10 = inlined_call_operand.vmem [shape: f32[1,128], index: 10, kind: input, shape index: {}]   ;;  %s5722_s11 = inlined_call_operand.hbm [shape: bf16[512,1024], index: 11, kind: input, shape index: {}]   ;;  %s5723_s12 = inlined_call_operand.hbm [shape: bf16[128,1024], index: 12, kind: input, shape index: {}]   ;;  %s5724_s13 = inlined_call_operand.vmem [shape: f32[1,1024], index: 13, kind: input, shape index: {}]   ;;  %s5725_s14 = inlined_call_operand.hbm [shape: bf16[1024,256], index: 14, kind: input, shape index: {}]   ;;  %s5726_s15 = inlined_call_operand.vmem [shape: f32[1,256], index: 15, kind: input, shape index: {}]   ;;  %s5727_s16 = inlined_call_operand.hbm [shape: bf16[256,128], index: 16, kind: input, shape index: {}]   ;;  %s5728_s17 = inlined_call_operand.vmem [shape: f32[1,128], index: 17, kind: input, shape index: {}]   ;;  %s5729_s18 = inlined_call_operand.hbm [shape: f32[2,256], index: 18, kind: output, shape index: {0}]   ;;  %s5730_s19 = inlined_call_operand.hbm [shape: f32[2,128], index: 19, kind: output, shape index: {1}]  }
   0x1   :  { %5733 = sst [smem:[#allocation22_spill]] %s5711_s0 }
   0x2   :  { %5734 = sst [smem:[#allocation23_spill]] %s5712_s1 }
   0x3   :  { %5735 = sst [smem:[#allocation24_spill]] %s5713_s2 }
   0x4   :  { %5736 = sst [smem:[#allocation25_spill]] %s5714_s3 }
   0x5   :  { %25 = vsyncpa [#allocation3], 0 }
   0x6   :  { %26 = vsyncpa [#allocation6], 0 }
   0x7   :  { %27 = vsyncpa [#allocation9], 0 }
   0x8   :  { %28 = vsyncpa [#allocation12], 0 }
   0x9   :  { %29 = vsyncpa [#allocation4], 0 }
   0xa   :  { %30 = vsyncpa [#allocation15], 0  ;;  %s5363_s0 = smov [#allocation5]  }
   0xb   :  { %s60_s30 = sshll.u32 %s5363_s0, 4  ;;  %s61_s30 = int_to_ptr.vmem [resolvable:$true] %s60_s30 }
   0xc   :  { %s5199_s20 = scalar_lea.vmem %s61_s30, 2048  ;;  %p5204_p1 = scmp.lt.s32.totalorder %s61_s30, %s61_s30 }
   0xd   :  { %p5200_p0 = scmp.ne.s32.totalorder %s61_s30, %s5199_s20  ;;  %p5205_p2 = scmp.lt.s32.totalorder %s5199_s20, %s5199_s20 }
   0xf   :  { %p5206_p3 = por %p5205_p2, %p5204_p1 }
  0x11   :  { %p5207_p4 = pnand %p5206_p3, %p5200_p0 }
  0x13   :  { %5210 = shalt.err (!%p5207_p4)
}
  0x14   :  { %s5364_s21 = smov 128   ;;  %s5365_s1 = smov 8  }
  0x15   :  { %66 = dma.hbm_to_vmem [thread:$0]  %s5718_s7, 2048, %s61_s30, [#allocation6], %s5364_s21, %s5364_s21, %s5365_s1  }
  0x16   :  { %s5366_s23 = smov [#allocation8]   ;;  %s5367_s25 = smov [#allocation2]  }
  0x17   :  { %s90_s24 = sshll.u32 %s5366_s23, 4  ;;  %s46_s3 = sshll.u32 %s5367_s25, 4  ;;  %s91_s24 = int_to_ptr.vmem [resolvable:$true] %s90_s24  ;;  %s47_s3 = int_to_ptr.vmem [resolvable:$true] %s46_s3 }
  0x18   :  { %s5219_s26 = scalar_lea.vmem %s91_s24, 8192  ;;  %p5224_p6 = scmp.lt.s32.totalorder %s91_s24, %s91_s24 }
  0x19   :  { %p5220_p5 = scmp.ne.s32.totalorder %s91_s24, %s5219_s26  ;;  %p5225_p7 = scmp.lt.s32.totalorder %s5219_s26, %s5219_s26 }
  0x1b   :  { %p5226_p8 = por %p5225_p7, %p5224_p6 }
  0x1d   :  { %p5227_p9 = pnand %p5226_p8, %p5220_p5 }
  0x1f   :  { %5230 = shalt.err (!%p5227_p9)
}
  0x20   :  { %s5368_s27 = smov 512   ;;  %s5369_s28 = smov 32  }
  0x21   :  { %96 = dma.hbm_to_vmem [thread:$0]  %s5723_s12, 8192, %s91_s24, [#allocation9], %s5368_s27, %s5368_s27, %s5369_s28  }
  0x22   :  { %s5239_s7 = scalar_lea.vmem %s47_s3, 1024  ;;  %p5244_p11 = scmp.lt.s32.totalorder %s47_s3, %s47_s3 }
  0x23   :  { %p5240_p10 = scmp.ne.s32.totalorder %s47_s3, %s5239_s7  ;;  %p5245_p12 = scmp.lt.s32.totalorder %s5239_s7, %s5239_s7 }
  0x25   :  { %p5246_p13 = por %p5245_p12, %p5244_p11 }
  0x27   :  { %p5247_p0 = pnand %p5246_p13, %p5240_p10 }
  0x29   :  { %5250 = shalt.err (!%p5247_p0)
}
  0x2a   :  { %s5370_s30 = smov 64   ;;  %s5371_s20 = smov 4  }
  0x2b   :  { %52 = dma.hbm_to_vmem [thread:$0]  %s5716_s5, 1024, %s47_s3, [#allocation3], %s5370_s30, %s5370_s30, %s5371_s20  }
  0x2c   :  { %s5372_s23 = smov [#allocation7]   ;;  %s5373_s12 = smov [#allocation10]  }
  0x2d   :  { %s78_s25 = sshll.u32 %s5372_s23, 4  ;;  %s104_s24 = sshll.u32 %s5373_s12, 4  ;;  %s79_s25 = int_to_ptr.vmem [resolvable:$true] %s78_s25  ;;  %s105_s24 = int_to_ptr.vmem [resolvable:$true] %s104_s24 }
  0x2e   :  { %s5259_s26 = scalar_lea.vmem %s79_s25, 32768  ;;  %p5264_p2 = scmp.lt.s32.totalorder %s79_s25, %s79_s25 }
  0x2f   :  { %p5260_p1 = scmp.ne.s32.totalorder %s79_s25, %s5259_s26  ;;  %p5265_p3 = scmp.lt.s32.totalorder %s5259_s26, %s5259_s26 }
  0x31   :  { %p5266_p4 = por %p5265_p3, %p5264_p2 }
  0x33   :  { %p5267_p5 = pnand %p5266_p4, %p5260_p1 }
  0x35   :  { %5270 = shalt.err (!%p5267_p5)
}
  0x36   :  { %84 = dma.hbm_to_vmem [thread:$0]  %s5722_s11, 32768, %s79_s25, [#allocation6], %s5368_s27, %s5368_s27, %s5369_s28  }
  0x37   :  { %s5279_s7 = scalar_lea.vmem %s105_s24, 16384  ;;  %p5284_p7 = scmp.lt.s32.totalorder %s105_s24, %s105_s24 }
  0x38   :  { %p5280_p6 = scmp.ne.s32.totalorder %s105_s24, %s5279_s7  ;;  %p5285_p8 = scmp.lt.s32.totalorder %s5279_s7, %s5279_s7 }
  0x3a   :  { %p5286_p9 = por %p5285_p8, %p5284_p7 }
  0x3c   :  { %p5287_p10 = pnand %p5286_p9, %p5280_p6 }
  0x3e   :  { %5290 = shalt.err (!%p5287_p10)
}
  0x3f   :  { %110 = dma.hbm_to_vmem [thread:$0]  %s5725_s14, 16384, %s105_s24, [#allocation9], %s5364_s21, %s5364_s21, %s5365_s1  }
  0x40   :  { %s5374_s22 = smov [#allocation11]  }
  0x41   :  { %s118_s2 = sshll.u32 %s5374_s22, 4  ;;  %s119_s2 = int_to_ptr.vmem [resolvable:$true] %s118_s2 }
  0x42   :  { %s5299_s23 = scalar_lea.vmem %s119_s2, 2048  ;;  %p5304_p12 = scmp.lt.s32.totalorder %s119_s2, %s119_s2 }
  0x43   :  { %p5300_p11 = scmp.ne.s32.totalorder %s119_s2, %s5299_s23  ;;  %p5305_p13 = scmp.lt.s32.totalorder %s5299_s23, %s5299_s23 }
  0x45   :  { %p5306_p0 = por %p5305_p13, %p5304_p12 }
  0x47   :  { %p5307_p1 = pnand %p5306_p0, %p5300_p11 }
  0x49   :  { %5310 = shalt.err (!%p5307_p1)
}
  0x4a   :  { %124 = dma.hbm_to_vmem [thread:$0]  %s5727_s16, 2048, %s119_s2, [#allocation12], %s5370_s30, %s5370_s30, %s5371_s20  }
  0x4b   :  { %5351 = dma.done.wait [#allocation3], 1024  }
  0x4c   :  { %5352 = vsyncadd [#allocation3], 4294966272 }
  0x4d   :  { %5353 = dma.done.wait [#allocation6], 34816  }
  0x4e   :  { %5354 = vsyncadd [#allocation6], 4294932480 }
  0x4f   :  { %5355 = dma.done.wait [#allocation9], 24576  }
  0x50   :  { %5356 = vsyncadd [#allocation9], 4294942720 }
  0x51   :  { %5357 = dma.done.wait [#allocation12], 2048  }
  0x52   :  { %5358 = vsyncadd [#allocation12], 4294965248  ;;  %v5375_v0 = vmov 1   ;;  %v5376_v1 = vmov 0   ;;  %s5737_s1 = sld [smem:[#allocation22_spill]]  ;;  %v4951_v4 = vld [vmem:[#allocation2 + $0x38] sm:$0xff]   ;;  %v171_v25 = vlaneseq }
  0x53   :  { %4943 = vset.pattern.permute.xlu1 %v5375_v0  ;;  %4942 = vset.pattern.permute.xlu0 %v5376_v1  ;;  %v4952_v7 = vld [vmem:[#allocation2 + $0x30] sm:$0xff]   ;;  %v4953_v8 = vld [vmem:[#allocation2 + $0x28] sm:$0xff]   ;;  %v4954_v9 = vld [vmem:[#allocation2 + $0x20] sm:$0xff]   ;;  %v5377_v10 = vmov 2   ;;  %v5378_v15 = vmov 0.0   ;;  %s5738_s29 = sld [smem:[#allocation25_spill]] }
  0x54   :  { %526 = vmatprep.mubr.bf16.mxu1 %v5376_v1  ;;  %4897 = vmatprep.subr.bf16.mxu0 %v4951_v4  ;;  %v4955_v11 = vld [vmem:[#allocation2 + $0x18] sm:$0xff]   ;;  %v4956_v12 = vld [vmem:[#allocation2 + $0x10] sm:$0xff]   ;;  %v4957_v13 = vld [vmem:[#allocation2 + $0x8] sm:$0xff]   ;;  %v5530_v28 = vshrl.u32 %v171_v25, 7  ;;  %vm662_vm0 = vcmask 1043456   ;;  %vm5379_vm1 = vmmov 0  }
  0x55   :  { %4898 = vmatpush3.bf16.msra.mxu0 %v4951_v4  ;;  %v4958_v14 = vld [vmem:[#allocation2] sm:$0xff]   ;;  %v4959_v16 = vld [vmem:[#allocation5 + $0x74] ss:$8 sps:$4 sm:$0xff]   ;;  %v4961_v17 = vld [vmem:[#allocation5 + $0x70] ss:$8 sps:$4 sm:$0xff]   ;;  %s5739_s2 = sld [smem:[#allocation23_spill]] }
  0x56   :  { %4899 = vmatprep.subr.bf16.mxu0 %v4952_v7  ;;  %v4962_v18 = vld [vmem:[#allocation5 + $0x64] ss:$8 sps:$4 sm:$0xff]   ;;  %494 = vmatprep.subr.bf16.mxu1 %v4959_v16  ;;  %v4964_v19 = vld [vmem:[#allocation5 + $0x60] ss:$8 sps:$4 sm:$0xff]   ;;  %v4965_v20 = vld [vmem:[#allocation5 + $0x54] ss:$8 sps:$4 sm:$0xff]  }
  0x57   :  { %495 = vmatpush1.bf16.msra.mxu1 %v4961_v17  ;;  %v4967_v21 = vld [vmem:[#allocation5 + $0x50] ss:$8 sps:$4 sm:$0xff]   ;;  %v4968_v22 = vld [vmem:[#allocation5 + $0x44] ss:$8 sps:$4 sm:$0xff]   ;;  %v4970_v23 = vld [vmem:[#allocation5 + $0x40] ss:$8 sps:$4 sm:$0xff]  }
  0x58   :  { %v146_v2 = vld [vmem:[%s5737_s1] sm:$0xff]  ;;  %v147_v3 = vld [vmem:[%s5737_s1 + $0x8] sm:$0xff]  ;;  %v148_v5 = vld [vmem:[%s5737_s1 + $0x10] sm:$0xff]  ;;  %496 = vmatprep.subr.bf16.mxu1 %v4962_v18  ;;  %v5533_v31 = vsub.s32 1, %v5530_v28  ;;  %v5536_v32 = vsub.s32 0, %v5530_v28  ;;  %v225_v36 = vsub.s32 2, %v5530_v28 }
  0x59   :  { %180 = vperm.xlu1 %4943, %v146_v2   ;;  %153 = vperm.xlu0 %4942, %v146_v2   ;;  %v149_v6 = vld [vmem:[%s5737_s1 + $0x18] sm:$0xff]  ;;  %v150_v34 = vld [vmem:[%s5738_s29] sm:$0x7]  ;;  %vm658_vm2 = vcmask 64512   ;;  %s5740_s11 = sld [smem:[#allocation24_spill]]  ;;  %vm635_vm3 = vcmask 1041409  }
  0x5a   :  { %4900 = vmatpush3.bf16.msra.mxu0 %v4952_v7  ;;  %v4971_v24 = vld [vmem:[#allocation5 + $0x34] ss:$8 sps:$4 sm:$0xff]   ;;  %v198_v37 = vrot.slane %v150_v34, %v5533_v31  ;;  %v174_v38 = vrot.slane %v150_v34, %v5536_v32  ;;  %v226_v43 = vrot.slane %v150_v34, %v225_v36  ;;  %v4369_v53 = vld [vmem:[%s5715_s4] ss:$0 sm:$0xff]  ;;  %v1026_v34 = vld [vmem:[#allocation8 + $0x1c8] sm:$0xff] }
  0x5b   :  { %4901 = vmatprep.subr.bf16.mxu0 %v4953_v8  ;;  %497 = vmatpush1.bf16.msra.mxu1 %v4964_v19  ;;  %v650_v16 = vld [vmem:[%s5720_s9] sm:$0xf] }
  0x5c   :  { %498 = vmatprep.subr.bf16.mxu1 %v4965_v20  ;;  %v664_v20 = vsel %vm662_vm0, %v650_v16, 0  ;;  %v4976_v25 = vld [vmem:[#allocation5 + $0x20] ss:$8 sps:$4 sm:$0xff]  }
  0x5d   :  { %184 = vperm.xlu1 %4943, %v147_v3   ;;  %158 = vperm.xlu0 %4942, %v147_v3  }
  0x5e   :  { %4902 = vmatpush3.bf16.msra.mxu0 %v4953_v8 }
  0x5f   :  { %4903 = vmatprep.subr.bf16.mxu0 %v4954_v9  ;;  %499 = vmatpush1.bf16.msra.mxu1 %v4967_v21  ;;  %v648_v21 = vld [vmem:[%s5739_s2] sm:$0x3] }
  0x60   :  { %500 = vmatprep.subr.bf16.mxu1 %v4968_v22  ;;  %v649_v22 = vpack.c.bf16 %v648_v21, %v648_v21 }
  0x61   :  { %4944 = vset.pattern.permute.xlu1 %v5376_v1  ;;  %163 = vperm.xlu0 %4942, %v148_v5  }
  0x62   :  { %168 = vperm.xlu1 %4944, %v149_v6   ;;  %4904 = vmatpush3.bf16.msra.mxu0 %v4954_v9 }
  0x63   :  { %4905 = vmatprep.subr.bf16.mxu0 %v4955_v11  ;;  %501 = vmatpush1.bf16.msra.mxu1 %v4970_v23  ;;  %v4973_v23 = vld [vmem:[#allocation5 + $0x30] ss:$8 sps:$4 sm:$0xff]  }
  0x64   :  { %502 = vmatprep.subr.bf16.mxu1 %v4971_v24  ;;  %v4974_v24 = vld [vmem:[#allocation5 + $0x24] ss:$8 sps:$4 sm:$0xff]  }
  0x65   :  { %4945 = vset.pattern.permute.xlu0 %v5375_v0 }
  0x66   :  { %4946 = vset.pattern.permute.xlu1 %v5375_v0  ;;  %188 = vperm.xlu0 %4945, %v148_v5  }
  0x67   :  { %192 = vperm.xlu1 %4946, %v149_v6   ;;  %4906 = vmatpush3.bf16.msra.mxu0 %v4955_v11 }
  0x68   :  { %4907 = vmatprep.subr.bf16.mxu0 %v4956_v12  ;;  %503 = vmatpush1.bf16.msra.mxu1 %v4973_v23 }
  0x69   :  { %504 = vmatprep.subr.bf16.mxu1 %v4974_v24 }
  0x6a   :  { %4948 = vset.pattern.permute.xlu0 %v5377_v10 }
  0x6b   :  { %4947 = vset.pattern.permute.xlu1 %v5377_v10  ;;  %212 = vperm.xlu0 %4948, %v147_v3  }
  0x6c   :  { %208 = vperm.xlu1 %4947, %v146_v2   ;;  %4908 = vmatpush3.bf16.msra.mxu0 %v4956_v12 }
  0x6d   :  { %4909 = vmatprep.subr.bf16.mxu0 %v4957_v13  ;;  %505 = vmatpush1.bf16.msra.mxu1 %v4976_v25 }
  0x6f   :  { %4949 = vset.pattern.permute.xlu0 %v5376_v1 }
  0x70   :  { %216 = vperm.xlu1 %4947, %v148_v5   ;;  %4910 = vmatpush3.bf16.msra.mxu0 %v4957_v13 }
  0x71   :  { %4911 = vmatprep.subr.bf16.mxu0 %v4958_v14 }
  0x74   :  { %220 = vperm.xlu1 %4947, %v149_v6   ;;  %4912 = vmatpush3.bf16.msra.mxu0 %v4958_v14 }
  0x75   :  { %4917 = vmatprep.subr.bf16.mxu0 %v5378_v15 }
  0x78   :  { %4950 = vset.pattern.permute.xlu1 %v5376_v1 }
  0xd4   :  { %v181_v26 = vpop.permute.xlu1 %180  ;;  %v154_v27 = vpop.permute.xlu0 %153 }
  0xd5   :  { %v199_v44 = vmul.f32 %v198_v37, %v181_v26  ;;  %v175_v45 = vmul.f32 %v174_v38, %v154_v27  ;;  %v4977_v26 = vld [vmem:[#allocation5 + $0x14] ss:$8 sps:$4 sm:$0xff]   ;;  %v4979_v27 = vld [vmem:[#allocation5 + $0x10] ss:$8 sps:$4 sm:$0xff]  }
  0xd6   :  { %506 = vmatprep.subr.bf16.mxu1 %v4977_v26  ;;  %v1017_v26 = vld [vmem:[#allocation8 + $0x180] sm:$0xff] }
  0xd7   :  { %v203_v50 = vadd.f32 %v199_v44, %v175_v45  ;;  %507 = vmatpush1.bf16.msra.mxu1 %v4979_v27  ;;  %v1010_v44 = vld [vmem:[#allocation8 + $0x148] sm:$0xff]  ;;  %v1021_v27 = vld [vmem:[#allocation8 + $0x1a0] sm:$0xff] }
  0xd8   :  { %v185_v29 = vpop.permute.xlu1 %184  ;;  %v159_v30 = vpop.permute.xlu0 %158  ;;  %v1014_v45 = vld [vmem:[#allocation8 + $0x168] sm:$0xff] }
  0xd9   :  { %v200_v41 = vmul.f32 %v198_v37, %v185_v29  ;;  %v176_v42 = vmul.f32 %v174_v38, %v159_v30  ;;  %v4982_v29 = vld [vmem:[#allocation5] ss:$8 sps:$4 sm:$0xff]  }
  0xda   :  { %v5557_v30 = vld [vmem:[#allocation8 + $0x1c0] sm:$0xff] }
  0xdb   :  { %v204_v47 = vadd.f32 %v200_v41, %v176_v42  ;;  %v1018_v41 = vld [vmem:[#allocation8 + $0x188] sm:$0xff] }
  0xdc   :  { %v164_v33 = vpop.permute.xlu0 %163  ;;  %v1022_v42 = vld [vmem:[#allocation8 + $0x1a8] sm:$0xff] }
  0xdd   :  { %v169_v35 = vpop.permute.xlu1 %168  ;;  %v177_v55 = vmul.f32 %v174_v38, %v164_v33  ;;  %v5559_v33 = vld [vmem:[#allocation8 + $0x1e0] sm:$0xff] }
  0xde   :  { %v178_v0 = vmul.f32 %v174_v38, %v169_v35  ;;  %v4453_v35 = vcombine.low %v5557_v30, %v5559_v33  ;;  %v1030_v38 = vld [vmem:[#allocation8 + $0x1e8] sm:$0xff] }
  0xe1   :  { %v189_v39 = vpop.permute.xlu0 %188 }
  0xe2   :  { %v193_v40 = vpop.permute.xlu1 %192  ;;  %v201_v51 = vmul.f32 %v198_v37, %v189_v39  ;;  %v4455_v39 = vcombine.low %v1026_v34, %v1030_v38 }
  0xe3   :  { %v202_v60 = vmul.f32 %v198_v37, %v193_v40  ;;  %v4454_v37 = vcombine.high %v5557_v30, %v5559_v33  ;;  %v4456_v40 = vcombine.high %v1026_v34, %v1030_v38  ;;  %v1004_v33 = vld [vmem:[#allocation8 + $0x118] sm:$0xff] }
  0xe4   :  { %v205_v59 = vadd.f32 %v201_v51, %v177_v55  ;;  %v4439_v51 = vcombine.low %v1010_v44, %v1014_v45  ;;  %v998_v55 = vld [vmem:[#allocation8 + $0xe8] sm:$0xff] }
  0xe5   :  { %v206_v6 = vadd.f32 %v202_v60, %v178_v0 }
  0xe6   :  { %v213_v46 = vpop.permute.xlu0 %212 }
  0xe7   :  { %v228_v48 = vmul.f32 %v226_v43, %v213_v46  ;;  %v209_v49 = vpop.permute.xlu1 %208  ;;  %v4447_v46 = vcombine.low %v1018_v41, %v1022_v42 }
  0xe8   :  { %v227_v52 = vmul.f32 %v226_v43, %v209_v49  ;;  %v1002_v49 = vld [vmem:[#allocation8 + $0x108] sm:$0xff] }
  0xe9   :  { %v232_v54 = vadd.f32 %v228_v48, %v204_v47  ;;  %v563_v47 = vld [vmem:[%s5740_s11] sm:$0xff]  ;;  %v4440_v48 = vcombine.high %v1010_v44, %v1014_v45  ;;  %v4446_v44 = vcombine.high %v1017_v26, %v1021_v27 }
  0xea   :  { %v231_v56 = vadd.f32 %v227_v52, %v203_v50  ;;  %567 = vperm.xlu0 %4949, %v563_v47   ;;  %v1006_v50 = vld [vmem:[#allocation8 + $0x128] sm:$0xff]  ;;  %v1013_v47 = vld [vmem:[#allocation8 + $0x160] sm:$0xff] }
  0xeb   :  { %v217_v57 = vpop.permute.xlu1 %216  ;;  %v243_v58 = vadd.f32 %v4369_v53, %v232_v54  ;;  %v564_v52 = vld [vmem:[%s5740_s11 + $0x8] sm:$0xff] }
  0xec   :  { %v229_v61 = vmul.f32 %v226_v43, %v217_v57  ;;  %v242_v62 = vadd.f32 %v4369_v53, %v231_v56  ;;  %572 = vperm.xlu1 %4950, %v564_v52   ;;  %v994_v54 = vld [vmem:[#allocation8 + $0xc8] sm:$0xff]  ;;  %v4431_v56 = vcombine.low %v1002_v49, %v1006_v50  ;;  %v4445_v52 = vcombine.low %v1017_v26, %v1021_v27  ;;  %v969_v26 = vld [vmem:[#allocation8] sm:$0xff] }
  0xed   :  { %v247_v63 = vmul.f32 0.2, %v243_v58  ;;  %v4424_v57 = vcombine.high %v994_v54, %v998_v55  ;;  %v4423_v60 = vcombine.low %v994_v54, %v998_v55  ;;  %v1016_v54 = vld [vmem:[#allocation8 + $0x178] sm:$0xff]  ;;  %v973_v27 = vld [vmem:[#allocation8 + $0x20] sm:$0xff] }
  0xee   :  { %v233_v2 = vadd.f32 %v229_v61, %v205_v59  ;;  %v246_v3 = vmul.f32 0.2, %v242_v62  ;;  %v990_v59 = vld [vmem:[#allocation8 + $0xa8] sm:$0xff] }
  0xef   :  { %v221_v4 = vpop.permute.xlu1 %220  ;;  %v251_v5 = vmax.f32 %v243_v58, %v247_v63  ;;  %v986_v58 = vld [vmem:[#allocation8 + $0x88] sm:$0xff] }
  0xf0   :  { %v244_v7 = vadd.f32 %v4369_v53, %v233_v2  ;;  %v230_v8 = vmul.f32 %v226_v43, %v221_v4  ;;  %v250_v9 = vmax.f32 %v242_v62, %v246_v3  ;;  %v4448_v43 = vcombine.high %v1018_v41, %v1022_v42  ;;  %v978_v62 = vld [vmem:[#allocation8 + $0x48] sm:$0xff]  ;;  %v1028_v3 = vld [vmem:[#allocation8 + $0x1d8] sm:$0xff] }
  0xf1   :  { %v4416_v61 = vcombine.high %v986_v58, %v990_v59  ;;  %v982_v63 = vld [vmem:[#allocation8 + $0x68] sm:$0xff]  ;;  %v4415_v0 = vcombine.low %v986_v58, %v990_v59  ;;  %v1032_v4 = vld [vmem:[#allocation8 + $0x1f8] sm:$0xff]  ;;  %v1005_v58 = vld [vmem:[#allocation8 + $0x120] sm:$0xff] }
  0xf2   :  { %v234_v10 = vadd.f32 %v230_v8, %v206_v6  ;;  %v254_v11 = vpack.c.bf16 %v251_v5, %v250_v9  ;;  %v248_v12 = vmul.f32 0.2, %v244_v7  ;;  %v4408_v2 = vcombine.high %v978_v62, %v982_v63  ;;  %v970_v5 = vld [vmem:[#allocation8 + $0x8] sm:$0xff] }
  0xf3   :  { %v974_v6 = vld [vmem:[#allocation8 + $0x28] sm:$0xff]  ;;  %v4407_v8 = vcombine.low %v978_v62, %v982_v63 }
  0xf4   :  { %v245_v13 = vadd.f32 %v4369_v53, %v234_v10  ;;  %4913 = vmatprep.mubr.bf16.mxu0 %v254_v11  ;;  %v252_v17 = vmax.f32 %v244_v7, %v248_v12  ;;  %v4432_v53 = vcombine.high %v1002_v49, %v1006_v50  ;;  %v4459_v7 = vcombine.low %v1028_v3, %v1032_v4 }
  0xf5   :  { %v4400_v9 = vcombine.high %v970_v5, %v974_v6  ;;  %v4399_v10 = vcombine.low %v970_v5, %v974_v6  ;;  %v4460_v11 = vcombine.high %v1028_v3, %v1032_v4  ;;  %v996_v6 = vld [vmem:[#allocation8 + $0xd8] sm:$0xff] }
  0xf6   :  { %v249_v14 = vmul.f32 0.2, %v245_v13 }
  0xf8   :  { %v253_v18 = vmax.f32 %v245_v13, %v249_v14  ;;  %v4370_v13 = vld [vmem:[%s5717_s6] ss:$0 sm:$0xff] }
  0xfa   :  { %v255_v19 = vpack.c.bf16 %v253_v18, %v252_v17 }
  0xfc   :  { %4914 = vmatmul.mubr.bf16.vlgmr.msra.gmra.mxu0 %v255_v19  ;;  %v4395_v19 = vld [vmem:[%s5721_s10] ss:$0 sm:$0xff] }
  0xfd   :  { %4918 = vmatpush3.bf16.msra.mxu0 %v664_v20  ;;  %4919 = vmatprep.mubr.msk.bf16.mxu0 %vm5379_vm1, %v5378_v15  ;;  %v4980_v15 = vld [vmem:[#allocation5 + $0x4] ss:$8 sps:$4 sm:$0xff]  }
  0xfe   :  { %508 = vmatprep.subr.bf16.mxu1 %v4980_v15  ;;  %1394 = vmatprep.subr.bf16.mxu0 %v4456_v40  ;;  %v1024_v40 = vld [vmem:[#allocation8 + $0x1b8] sm:$0xff] }
  0xff   :  { %509 = vmatpush1.bf16.msra.mxu1 %v4982_v29 }
 0x100   :  { %1353 = vmatprep.subr.bf16.mxu1 %v4454_v37 }
 0x104   :  { %4920 = vmatmul.mubr.msk.bf16.vlgmr.msra.gmra.mxu0 %vm658_vm2, %v649_v22 }
 0x105   :  { %1426 = vmatprep.mubr.bf16.mxu0 %v5376_v1  ;;  %1395 = vmatpush1.bf16.msra.mxu0 %v4455_v39  ;;  %v1020_v39 = vld [vmem:[#allocation8 + $0x198] sm:$0xff] }
 0x106   :  { %1396 = vmatprep.subr.bf16.mxu0 %v4448_v43  ;;  %v4451_v59 = vcombine.low %v1020_v39, %v1024_v40 }
 0x109   :  { %1397 = vmatpush1.bf16.msra.mxu0 %v4447_v46  ;;  %v1009_v46 = vld [vmem:[#allocation8 + $0x140] sm:$0xff] }
 0x10a   :  { %1398 = vmatprep.subr.bf16.mxu0 %v4440_v48  ;;  %v4437_v30 = vcombine.low %v1009_v46, %v1013_v47 }
 0x10d   :  { %1399 = vmatpush1.bf16.msra.mxu0 %v4439_v51  ;;  %v4452_v51 = vcombine.high %v1020_v39, %v1024_v40  ;;  %v4398_v39 = vcombine.high %v969_v26, %v973_v27  ;;  %v1027_v40 = vld [vmem:[#allocation8 + $0x1d0] sm:$0xff] }
 0x10e   :  { %1400 = vmatprep.subr.bf16.mxu0 %v4432_v53  ;;  %v1012_v53 = vld [vmem:[#allocation8 + $0x158] sm:$0xff] }
 0x10f   :  { %v4443_v3 = vcombine.low %v1012_v53, %v1016_v54 }
 0x111   :  { %1401 = vmatpush1.bf16.msra.mxu0 %v4431_v56  ;;  %v4438_v56 = vcombine.high %v1009_v46, %v1013_v47  ;;  %v900_v46 = vld [vmem:[#allocation7 + $0x5e0] sm:$0xff] }
 0x112   :  { %1402 = vmatprep.subr.bf16.mxu0 %v4424_v57  ;;  %v1001_v57 = vld [vmem:[#allocation8 + $0x100] sm:$0xff] }
 0x113   :  { %v4430_v63 = vcombine.high %v1001_v57, %v1005_v58  ;;  %v4429_v5 = vcombine.low %v1001_v57, %v1005_v58  ;;  %v1011_v57 = vld [vmem:[#allocation8 + $0x150] sm:$0xff] }
 0x114   :  { %v1015_v58 = vld [vmem:[#allocation8 + $0x170] sm:$0xff] }
 0x115   :  { %1403 = vmatpush1.bf16.msra.mxu0 %v4423_v60 }
 0x116   :  { %1404 = vmatprep.subr.bf16.mxu0 %v4416_v61  ;;  %v4444_v61 = vcombine.high %v1012_v53, %v1016_v54  ;;  %v888_v54 = vld [vmem:[#allocation7 + $0x580] sm:$0xff] }
 0x119   :  { %1405 = vmatpush1.bf16.msra.mxu0 %v4415_v0  ;;  %v993_v0 = vld [vmem:[#allocation8 + $0xc0] sm:$0xff] }
 0x11a   :  { %1406 = vmatprep.subr.bf16.mxu0 %v4408_v2  ;;  %v997_v2 = vld [vmem:[#allocation8 + $0xe0] sm:$0xff] }
 0x11d   :  { %1407 = vmatpush1.bf16.msra.mxu0 %v4407_v8  ;;  %v4422_v8 = vcombine.high %v993_v0, %v997_v2 }
 0x11e   :  { %1408 = vmatprep.subr.bf16.mxu0 %v4400_v9  ;;  %v985_v9 = vld [vmem:[#allocation8 + $0x80] sm:$0xff] }
 0x121   :  { %1409 = vmatpush1.bf16.msra.mxu0 %v4399_v10  ;;  %v989_v10 = vld [vmem:[#allocation8 + $0xa0] sm:$0xff] }
 0x122   :  { %1476 = vmatprep.subr.bf16.mxu0 %v4460_v11 }
 0x1bc   :  { %v4915_v12 = vpop.f32.mrf.mxu0 }
 0x1bd   :  { %v370_v29 = vadd.f32 %v4915_v12, %v4370_v13 }
 0x1be   :  { %v361_v14 = vpop.f32.mrf.mxu0 }
 0x1bf   :  { %v362_v16 = vadd.f32 %v4370_v13, %v361_v14  ;;  %v378_v49 = vmul.f32 0.2, %v370_v29  ;;  %v988_v14 = vld [vmem:[#allocation8 + $0x98] sm:$0xff] }
 0x1c0   :  { %v4916_v17 = vpop.f32.mrf.mxu0 }
 0x1c1   :  { %v376_v20 = vmul.f32 0.2, %v362_v16  ;;  %v373_v23 = vadd.f32 %v4916_v17, %v4370_v13  ;;  %v382_v60 = vmax.f32 %v370_v29, %v378_v49  ;;  %v4414_v17 = vcombine.high %v985_v9, %v989_v10  ;;  %v1023_v49 = vld [vmem:[#allocation8 + $0x1b0] sm:$0xff] }
 0x1c2   :  { %v364_v18 = vpop.f32.mrf.mxu0 }
 0x1c3   :  { %v365_v21 = vadd.f32 %v4370_v13, %v364_v18  ;;  %v380_v34 = vmax.f32 %v362_v16, %v376_v20  ;;  %v379_v42 = vmul.f32 0.2, %v373_v23  ;;  %v4421_v13 = vcombine.low %v993_v0, %v997_v2  ;;  %v992_v16 = vld [vmem:[#allocation8 + $0xb8] sm:$0xff]  ;;  %v977_v18 = vld [vmem:[#allocation8 + $0x40] sm:$0xff] }
 0x1c4   :  { %v700_v22 = vpop.f32.mrf.mxu0 }
 0x1c5   :  { %v377_v24 = vmul.f32 0.2, %v365_v21  ;;  %v701_v25 = vadd.f32 %v4395_v19, %v700_v22  ;;  %v383_v55 = vmax.f32 %v373_v23, %v379_v42  ;;  %v981_v19 = vld [vmem:[#allocation8 + $0x60] sm:$0xff]  ;;  %v4413_v22 = vcombine.low %v985_v9, %v989_v10  ;;  %v980_v23 = vld [vmem:[#allocation8 + $0x58] sm:$0xff] }
 0x1c6   :  { %v4921_v15 = vpop.f32.mrf.mxu0 }
 0x1c7   :  { %v381_v37 = vmax.f32 %v365_v21, %v377_v24  ;;  %v706_v38 = vmul.f32 0.2, %v701_v25  ;;  %v385_v62 = vpack.c.bf16 %v383_v55, %v382_v60  ;;  %v4420_v21 = vcombine.high %v988_v14, %v992_v16  ;;  %v984_v24 = vld [vmem:[#allocation8 + $0x78] sm:$0xff]  ;;  %v892_v55 = vld [vmem:[#allocation7 + $0x5a0] sm:$0xff] }
 0x1c8   :  { %v703_v41 = vpop.f32.mrf.mxu0  ;;  %v4419_v15 = vcombine.low %v988_v14, %v992_v16  ;;  %v4412_v29 = vcombine.high %v980_v23, %v984_v24  ;;  %v4411_v42 = vcombine.low %v980_v23, %v984_v24  ;;  %v4638_v60 = vcombine.high %v888_v54, %v892_v55  ;;  %v987_v14 = vld [vmem:[#allocation8 + $0x90] sm:$0xff] }
 0x1c9   :  { %v384_v43 = vpack.c.bf16 %v381_v37, %v380_v34  ;;  %v707_v45 = vmax.f32 %v701_v25, %v706_v38  ;;  %v4406_v25 = vcombine.high %v977_v18, %v981_v19  ;;  %v4405_v34 = vcombine.low %v977_v18, %v981_v19  ;;  %v972_v37 = vld [vmem:[#allocation8 + $0x18] sm:$0xff]  ;;  %v1031_v41 = vld [vmem:[#allocation8 + $0x1f0] sm:$0xff] }
 0x1ca   :  { %v4922_v48 = vpop.f32.mrf.mxu0  ;;  %v976_v38 = vld [vmem:[#allocation8 + $0x38] sm:$0xff]  ;;  %v4458_v47 = vcombine.high %v1027_v40, %v1031_v41  ;;  %v4457_v53 = vcombine.low %v1027_v40, %v1031_v41  ;;  %v4637_v0 = vcombine.low %v888_v54, %v892_v55  ;;  %v991_v16 = vld [vmem:[#allocation8 + $0xb0] sm:$0xff]  ;;  %v756_v54 = vld [vmem:[#allocation7 + $0x160] sm:$0xff] }
 0x1cb   :  { %527 = vmatmul.mubr.bf16.vlgmr.msra.gmra.mxu1 %v384_v43  ;;  %v5577_v50 = vpack.c.bf16 %v707_v45, %v707_v45  ;;  %v4404_v43 = vcombine.high %v972_v37, %v976_v38  ;;  %v896_v45 = vld [vmem:[#allocation7 + $0x5c0] sm:$0xff]  ;;  %v1019_v48 = vld [vmem:[#allocation8 + $0x190] sm:$0xff] }
 0x1cc   :  { %536 = vmatprep.mubr.bf16.mxu1 %v5376_v1  ;;  %1354 = vmatpush1.bf16.msra.mxu1 %v4453_v35  ;;  %v1008_v35 = vld [vmem:[#allocation8 + $0x138] sm:$0xff]  ;;  %v979_v23 = vld [vmem:[#allocation8 + $0x50] sm:$0xff]  ;;  %v840_v55 = vld [vmem:[#allocation7 + $0x400] sm:$0xff] }
 0x1cd   :  { %1355 = vmatprep.subr.bf16.mxu1 %v4446_v44  ;;  %1427 = vmatmul.mubr.bf16.vlgmr.msra.gmra.mxu0 %v5577_v50  ;;  %v4436_v4 = vcombine.high %v1004_v33, %v1008_v35  ;;  %v4435_v11 = vcombine.low %v1004_v33, %v1008_v35  ;;  %v4397_v44 = vcombine.low %v969_v26, %v973_v27  ;;  %v884_v33 = vld [vmem:[#allocation7 + $0x560] sm:$0xff]  ;;  %v983_v24 = vld [vmem:[#allocation8 + $0x70] sm:$0xff] }
 0x1ce   :  { %1477 = vmatpush1.bf16.msra.mxu0 %v4459_v7  ;;  %1508 = vmatprep.mubr.bf16.mxu0 %v5376_v1  ;;  %v1000_v7 = vld [vmem:[#allocation8 + $0xf8] sm:$0xff]  ;;  %v4442_v35 = vcombine.high %v1011_v57, %v1015_v58  ;;  %v4417_v27 = vcombine.low %v987_v14, %v991_v16  ;;  %v4409_v41 = vcombine.low %v979_v23, %v983_v24 }
 0x1cf   :  { %1478 = vmatprep.subr.bf16.mxu0 %v4452_v51  ;;  %v4428_v12 = vcombine.high %v996_v6, %v1000_v7  ;;  %v4427_v20 = vcombine.low %v996_v6, %v1000_v7  ;;  %v4403_v51 = vcombine.low %v972_v37, %v976_v38  ;;  %v995_v7 = vld [vmem:[#allocation8 + $0xd0] sm:$0xff] }
 0x1d0   :  { %1356 = vmatpush1.bf16.msra.mxu1 %v4445_v52  ;;  %v4646_v52 = vcombine.high %v896_v45, %v900_v46  ;;  %v971_v37 = vld [vmem:[#allocation8 + $0x10] sm:$0xff] }
 0x1d1   :  { %1357 = vmatprep.subr.bf16.mxu1 %v4438_v56  ;;  %v4450_v56 = vcombine.high %v1019_v48, %v1023_v49  ;;  %v975_v38 = vld [vmem:[#allocation8 + $0x30] sm:$0xff] }
 0x1d2   :  { %1479 = vmatpush1.bf16.msra.mxu0 %v4451_v59  ;;  %v4645_v59 = vcombine.low %v896_v45, %v900_v46  ;;  %v4401_v46 = vcombine.low %v971_v37, %v975_v38 }
 0x1d3   :  { %537 = vmatmul.mubr.bf16.gmra.mxu1 %v385_v62  ;;  %1480 = vmatprep.subr.bf16.mxu0 %v4444_v61  ;;  %v4449_v61 = vcombine.low %v1019_v48, %v1023_v49  ;;  %v1003_v62 = vld [vmem:[#allocation8 + $0x110] sm:$0xff]  ;;  %v760_v48 = vld [vmem:[#allocation7 + $0x180] sm:$0xff] }
 0x1d4   :  { %1358 = vmatpush1.bf16.msra.mxu1 %v4437_v30  ;;  %1385 = vmatprep.mubr.bf16.mxu1 %v5376_v1  ;;  %v880_v30 = vld [vmem:[#allocation7 + $0x540] sm:$0xff] }
 0x1d5   :  { %1359 = vmatprep.subr.bf16.mxu1 %v4430_v63  ;;  %v1007_v63 = vld [vmem:[#allocation8 + $0x130] sm:$0xff]  ;;  %v4630_v2 = vcombine.high %v880_v30, %v884_v33  ;;  %v764_v49 = vld [vmem:[#allocation7 + $0x1a0] sm:$0xff] }
 0x1d6   :  { %1481 = vmatpush1.bf16.msra.mxu0 %v4443_v3  ;;  %v4441_v3 = vcombine.low %v1011_v57, %v1015_v58  ;;  %v4434_v6 = vcombine.high %v1003_v62, %v1007_v63  ;;  %v4433_v10 = vcombine.low %v1003_v62, %v1007_v63  ;;  %v4509_v57 = vcombine.low %v760_v48, %v764_v49 }
 0x1d7   :  { %1482 = vmatprep.subr.bf16.mxu0 %v4436_v4  ;;  %v872_v4 = vld [vmem:[#allocation7 + $0x500] sm:$0xff] }
 0x1d8   :  { %1360 = vmatpush1.bf16.msra.mxu1 %v4429_v5  ;;  %v876_v5 = vld [vmem:[#allocation7 + $0x520] sm:$0xff] }
 0x1d9   :  { %1361 = vmatprep.subr.bf16.mxu1 %v4422_v8  ;;  %v4629_v8 = vcombine.low %v880_v30, %v884_v33  ;;  %v4622_v9 = vcombine.high %v872_v4, %v876_v5  ;;  %v748_v30 = vld [vmem:[#allocation7 + $0x120] sm:$0xff] }
 0x1da   :  { %1483 = vmatpush1.bf16.msra.mxu0 %v4435_v11  ;;  %v864_v11 = vld [vmem:[#allocation7 + $0x4c0] sm:$0xff] }
 0x1db   :  { %1484 = vmatprep.subr.bf16.mxu0 %v4428_v12  ;;  %v868_v12 = vld [vmem:[#allocation7 + $0x4e0] sm:$0xff] }
 0x1dc   :  { %1362 = vmatpush1.bf16.msra.mxu1 %v4421_v13  ;;  %v4614_v18 = vcombine.high %v864_v11, %v868_v12  ;;  %v960_v33 = vld [vmem:[#allocation7 + $0x7c0] sm:$0xff] }
 0x1dd   :  { %1363 = vmatprep.subr.bf16.mxu1 %v4414_v17  ;;  %v4621_v17 = vcombine.low %v872_v4, %v876_v5  ;;  %v952_v4 = vld [vmem:[#allocation7 + $0x780] sm:$0xff] }
 0x1de   :  { %1485 = vmatpush1.bf16.msra.mxu0 %v4427_v20  ;;  %v856_v20 = vld [vmem:[#allocation7 + $0x480] sm:$0xff] }
 0x1df   :  { %1486 = vmatprep.subr.bf16.mxu0 %v4420_v21  ;;  %v860_v21 = vld [vmem:[#allocation7 + $0x4a0] sm:$0xff] }
 0x1e0   :  { %1364 = vmatpush1.bf16.msra.mxu1 %v4413_v22  ;;  %v4418_v22 = vcombine.high %v987_v14, %v991_v16  ;;  %v4606_v26 = vcombine.high %v856_v20, %v860_v21 }
 0x1e1   :  { %1365 = vmatprep.subr.bf16.mxu1 %v4406_v25  ;;  %v4613_v25 = vcombine.low %v864_v11, %v868_v12  ;;  %v944_v11 = vld [vmem:[#allocation7 + $0x740] sm:$0xff] }
 0x1e2   :  { %1487 = vmatpush1.bf16.msra.mxu0 %v4419_v15  ;;  %v848_v15 = vld [vmem:[#allocation7 + $0x440] sm:$0xff] }
 0x1e3   :  { %1488 = vmatprep.subr.bf16.mxu0 %v4412_v29  ;;  %v852_v29 = vld [vmem:[#allocation7 + $0x460] sm:$0xff] }
 0x1e4   :  { %1366 = vmatpush1.bf16.msra.mxu1 %v4405_v34  ;;  %v4410_v34 = vcombine.high %v979_v23, %v983_v24  ;;  %v4598_v40 = vcombine.high %v848_v15, %v852_v29  ;;  %v4597_v45 = vcombine.low %v848_v15, %v852_v29  ;;  %v928_v15 = vld [vmem:[#allocation7 + $0x6c0] sm:$0xff] }
 0x1e5   :  { %1367 = vmatprep.subr.bf16.mxu1 %v4398_v39  ;;  %v4605_v39 = vcombine.low %v856_v20, %v860_v21  ;;  %v936_v20 = vld [vmem:[#allocation7 + $0x700] sm:$0xff] }
 0x1e6   :  { %1489 = vmatpush1.bf16.msra.mxu0 %v4411_v42  ;;  %v4402_v42 = vcombine.high %v971_v37, %v975_v38 }
 0x1e7   :  { %1490 = vmatprep.subr.bf16.mxu0 %v4404_v43  ;;  %v768_v43 = vld [vmem:[#allocation7 + $0x1c0] sm:$0xff] }
 0x1e8   :  { %1368 = vmatpush1.bf16.msra.mxu1 %v4397_v44  ;;  %v772_v44 = vld [vmem:[#allocation7 + $0x1e0] sm:$0xff] }
 0x1e9   :  { %1435 = vmatprep.subr.bf16.mxu1 %v4458_v47  ;;  %v4518_v47 = vcombine.high %v768_v43, %v772_v44 }
 0x1ea   :  { %1491 = vmatpush1.bf16.msra.mxu0 %v4403_v51  ;;  %v4517_v51 = vcombine.low %v768_v43, %v772_v44  ;;  %v924_v44 = vld [vmem:[#allocation7 + $0x6a0] sm:$0xff] }
 0x1eb   :  { %1386 = vmatmul.mubr.bf16.vlgmr.msra.gmra.mxu1 %v5577_v50  ;;  %2838 = vmatprep.subr.bf16.mxu0 %v4646_v52  ;;  %v4510_v52 = vcombine.high %v760_v48, %v764_v49  ;;  %v824_v48 = vld [vmem:[#allocation7 + $0x380] sm:$0xff] }
 0x1ec   :  { %1436 = vmatpush1.bf16.msra.mxu1 %v4457_v53  ;;  %1467 = vmatprep.mubr.bf16.mxu1 %v5376_v1  ;;  %v999_v1 = vld [vmem:[#allocation8 + $0xf0] sm:$0xff]  ;;  %v752_v53 = vld [vmem:[#allocation7 + $0x140] sm:$0xff] }
 0x1ed   :  { %1437 = vmatprep.subr.bf16.mxu1 %v4450_v56  ;;  %1509 = vmatmul.mubr.bf16.vlgmr.msra.gmra.mxu0 %v5577_v50  ;;  %v4426_v13 = vcombine.high %v995_v7, %v999_v1  ;;  %v4425_v19 = vcombine.low %v995_v7, %v999_v1  ;;  %v844_v56 = vld [vmem:[#allocation7 + $0x420] sm:$0xff]  ;;  %v4501_v62 = vcombine.low %v752_v53, %v756_v54 }
 0x1ee   :  { %2839 = vmatpush1.bf16.msra.mxu0 %v4645_v59  ;;  %v4589_v58 = vcombine.low %v840_v55, %v844_v56  ;;  %v4590_v59 = vcombine.high %v840_v55, %v844_v56  ;;  %v828_v49 = vld [vmem:[#allocation7 + $0x3a0] sm:$0xff] }
 0x1ef   :  { %2840 = vmatprep.subr.bf16.mxu0 %v4638_v60  ;;  %v4502_v60 = vcombine.high %v752_v53, %v756_v54  ;;  %v916_v53 = vld [vmem:[#allocation7 + $0x660] sm:$0xff]  ;;  %v4574_v54 = vcombine.high %v824_v48, %v828_v49 }
 0x1f0   :  { %1438 = vmatpush1.bf16.msra.mxu1 %v4449_v61  ;;  %v744_v61 = vld [vmem:[#allocation7 + $0x100] sm:$0xff] }
 0x1f1   :  { %1439 = vmatprep.subr.bf16.mxu1 %v4442_v35  ;;  %v964_v35 = vld [vmem:[#allocation7 + $0x7e0] sm:$0xff]  ;;  %v4493_v5 = vcombine.low %v744_v61, %v748_v30 }
 0x1f2   :  { %2841 = vmatpush1.bf16.msra.mxu0 %v4637_v0  ;;  %v4709_v63 = vcombine.low %v960_v33, %v964_v35  ;;  %v4710_v0 = vcombine.high %v960_v33, %v964_v35  ;;  %v5592_v35 = vld [vmem:[#allocation7 + $0x1e8] sm:$0xff] }
 0x1f3   :  { %2842 = vmatprep.subr.bf16.mxu0 %v4630_v2  ;;  %v4494_v2 = vcombine.high %v744_v61, %v748_v30  ;;  %v5590_v61 = vld [vmem:[#allocation7 + $0x1c8] sm:$0xff]  ;;  %v4573_v30 = vcombine.low %v824_v48, %v828_v49 }
 0x1f4   :  { %1440 = vmatpush1.bf16.msra.mxu1 %v4441_v3  ;;  %v740_v3 = vld [vmem:[#allocation7 + $0xe0] sm:$0xff] }
 0x1f5   :  { %1441 = vmatprep.subr.bf16.mxu1 %v4434_v6  ;;  %v956_v6 = vld [vmem:[#allocation7 + $0x7a0] sm:$0xff] }
 0x1f6   :  { %2843 = vmatpush1.bf16.msra.mxu0 %v4629_v8  ;;  %v4701_v1 = vcombine.low %v952_v4, %v956_v6  ;;  %v4702_v8 = vcombine.high %v952_v4, %v956_v6  ;;  %v5596_v4 = vld [vmem:[#allocation7 + $0x5c8] sm:$0xff] }
 0x1f7   :  { %2844 = vmatprep.subr.bf16.mxu0 %v4622_v9  ;;  %v728_v9 = vld [vmem:[#allocation7 + $0x80] sm:$0xff]  ;;  %v5598_v6 = vld [vmem:[#allocation7 + $0x5e8] sm:$0xff] }
 0x1f8   :  { %1442 = vmatpush1.bf16.msra.mxu1 %v4433_v10  ;;  %v732_v10 = vld [vmem:[#allocation7 + $0xa0] sm:$0xff] }
 0x1f9   :  { %1443 = vmatprep.subr.bf16.mxu1 %v4426_v13  ;;  %v948_v13 = vld [vmem:[#allocation7 + $0x760] sm:$0xff]  ;;  %v4478_v14 = vcombine.high %v728_v9, %v732_v10  ;;  %v4477_v21 = vcombine.low %v728_v9, %v732_v10  ;;  %v4648_v9 = vcombine.high %v5596_v4, %v5598_v6 }
 0x1fa   :  { %2845 = vmatpush1.bf16.msra.mxu0 %v4621_v17  ;;  %v4693_v16 = vcombine.low %v944_v11, %v948_v13  ;;  %v4694_v17 = vcombine.high %v944_v11, %v948_v13  ;;  %v796_v13 = vld [vmem:[#allocation7 + $0x2a0] sm:$0xff] }
 0x1fb   :  { %2846 = vmatprep.subr.bf16.mxu0 %v4614_v18  ;;  %v720_v18 = vld [vmem:[#allocation7 + $0x40] sm:$0xff] }
 0x1fc   :  { %1444 = vmatpush1.bf16.msra.mxu1 %v4425_v19  ;;  %v724_v19 = vld [vmem:[#allocation7 + $0x60] sm:$0xff] }
 0x1fd   :  { %1445 = vmatprep.subr.bf16.mxu1 %v4418_v22  ;;  %v940_v22 = vld [vmem:[#allocation7 + $0x720] sm:$0xff]  ;;  %v4470_v23 = vcombine.high %v720_v18, %v724_v19  ;;  %v4469_v29 = vcombine.low %v720_v18, %v724_v19 }
 0x1fe   :  { %2847 = vmatpush1.bf16.msra.mxu0 %v4613_v25  ;;  %v4685_v24 = vcombine.low %v936_v20, %v940_v22  ;;  %v4686_v25 = vcombine.high %v936_v20, %v940_v22  ;;  %v788_v18 = vld [vmem:[#allocation7 + $0x260] sm:$0xff] }
 0x1ff   :  { %2848 = vmatprep.subr.bf16.mxu0 %v4606_v26  ;;  %v712_v26 = vld [vmem:[#allocation7] sm:$0xff] }
 0x200   :  { %1446 = vmatpush1.bf16.msra.mxu1 %v4417_v27  ;;  %v716_v27 = vld [vmem:[#allocation7 + $0x20] sm:$0xff] }
 0x201   :  { %1447 = vmatprep.subr.bf16.mxu1 %v4410_v34  ;;  %v932_v34 = vld [vmem:[#allocation7 + $0x6e0] sm:$0xff]  ;;  %v4462_v37 = vcombine.high %v712_v26, %v716_v27  ;;  %v4461_v43 = vcombine.low %v712_v26, %v716_v27  ;;  %v4520_v26 = vcombine.high %v5590_v61, %v5592_v35 }
 0x202   :  { %2849 = vmatpush1.bf16.msra.mxu0 %v4605_v39  ;;  %v4677_v38 = vcombine.low %v928_v15, %v932_v34  ;;  %v4678_v39 = vcombine.high %v928_v15, %v932_v34  ;;  %v780_v22 = vld [vmem:[#allocation7 + $0x220] sm:$0xff] }
 0x203   :  { %2850 = vmatprep.subr.bf16.mxu0 %v4598_v40  ;;  %v832_v40 = vld [vmem:[#allocation7 + $0x3c0] sm:$0xff] }
 0x204   :  { %1448 = vmatpush1.bf16.msra.mxu1 %v4409_v41  ;;  %v836_v41 = vld [vmem:[#allocation7 + $0x3e0] sm:$0xff] }
 0x205   :  { %1449 = vmatprep.subr.bf16.mxu1 %v4402_v42  ;;  %v920_v42 = vld [vmem:[#allocation7 + $0x680] sm:$0xff] }
 0x206   :  { %2851 = vmatpush1.bf16.msra.mxu0 %v4597_v45  ;;  %v4582_v45 = vcombine.high %v832_v40, %v836_v41  ;;  %v402_v27 = vld [vmem:[%s5719_s8] sm:$0x3] }
 0x207   :  { %2852 = vmatprep.subr.bf16.mxu0 %v4590_v59  ;;  %v904_v59 = vld [vmem:[#allocation7 + $0x600] sm:$0xff]  ;;  %v407_v15 = vrot.slane %v402_v27, %v5536_v32 }
 0x208   :  { %1450 = vmatpush1.bf16.msra.mxu1 %v4401_v46  ;;  %v4669_v46 = vcombine.low %v920_v42, %v924_v44 }
 0x209   :  { %2797 = vmatprep.subr.bf16.mxu1 %v4518_v47  ;;  %v4670_v47 = vcombine.high %v920_v42, %v924_v44  ;;  %v568_v42 = vpop.permute.xlu0 %567 }
 0x20a   :  { %2853 = vmatpush1.bf16.msra.mxu0 %v4589_v58  ;;  %v820_v58 = vld [vmem:[#allocation7 + $0x360] sm:$0xff] }
 0x20b   :  { %1468 = vmatmul.mubr.bf16.vlgmr.msra.gmra.mxu1 %v5577_v50  ;;  %v736_v50 = vld [vmem:[#allocation7 + $0xc0] sm:$0xff]  ;;  %2854 = vmatprep.subr.bf16.mxu0 %v4710_v0  ;;  %v4519_v0 = vcombine.low %v5590_v61, %v5592_v35 }
 0x20c   :  { %2798 = vmatpush1.bf16.msra.mxu1 %v4517_v51  ;;  %v4486_v7 = vcombine.high %v736_v50, %v740_v3  ;;  %v4485_v12 = vcombine.low %v736_v50, %v740_v3  ;;  %v912_v51 = vld [vmem:[#allocation7 + $0x640] sm:$0xff] }
 0x20d   :  { %2799 = vmatprep.subr.bf16.mxu1 %v4510_v52  ;;  %v4581_v52 = vcombine.low %v832_v40, %v836_v41  ;;  %v4661_v55 = vcombine.low %v912_v51, %v916_v53  ;;  %v4662_v56 = vcombine.high %v912_v51, %v916_v53  ;;  %v812_v50 = vld [vmem:[#allocation7 + $0x320] sm:$0xff] }
 0x20e   :  { %2855 = vmatpush2.bf16.msra.mxu0 %v4709_v63 }
 0x20f   :  { %2856 = vmatprep.subr.bf16.mxu0 %v4702_v8  ;;  %v4647_v8 = vcombine.low %v5596_v4, %v5598_v6 }
 0x210   :  { %2800 = vmatpush1.bf16.msra.mxu1 %v4509_v57  ;;  %v816_v57 = vld [vmem:[#allocation7 + $0x340] sm:$0xff] }
 0x211   :  { %2801 = vmatprep.subr.bf16.mxu1 %v4502_v60  ;;  %v908_v60 = vld [vmem:[#allocation7 + $0x620] sm:$0xff]  ;;  %v4565_v3 = vcombine.low %v816_v57, %v820_v58 }
 0x212   :  { %2857 = vmatpush2.bf16.msra.mxu0 %v4701_v1  ;;  %v4654_v33 = vcombine.high %v904_v59, %v908_v60  ;;  %v4653_v63 = vcombine.low %v904_v59, %v908_v60  ;;  %v804_v1 = vld [vmem:[#allocation7 + $0x2e0] sm:$0xff] }
 0x213   :  { %2858 = vmatprep.subr.bf16.mxu0 %v4694_v17  ;;  %v784_v17 = vld [vmem:[#allocation7 + $0x240] sm:$0xff] }
 0x214   :  { %2802 = vmatpush1.bf16.msra.mxu1 %v4501_v62  ;;  %v4566_v62 = vcombine.high %v816_v57, %v820_v58  ;;  %v4534_v20 = vcombine.high %v784_v17, %v788_v18 }
 0x215   :  { %2803 = vmatprep.subr.bf16.mxu1 %v4494_v2  ;;  %v808_v2 = vld [vmem:[#allocation7 + $0x300] sm:$0xff] }
 0x216   :  { %2859 = vmatpush2.bf16.msra.mxu0 %v4693_v16  ;;  %v4557_v10 = vcombine.low %v808_v2, %v812_v50 }
 0x217   :  { %2860 = vmatprep.subr.bf16.mxu0 %v4686_v25 }
 0x218   :  { %2804 = vmatpush1.bf16.msra.mxu1 %v4493_v5  ;;  %v4558_v5 = vcombine.high %v808_v2, %v812_v50 }
 0x219   :  { %2805 = vmatprep.subr.bf16.mxu1 %v4486_v7  ;;  %v800_v7 = vld [vmem:[#allocation7 + $0x2c0] sm:$0xff] }
 0x21a   :  { %2861 = vmatpush2.bf16.msra.mxu0 %v4685_v24  ;;  %v4550_v11 = vcombine.high %v800_v7, %v804_v1 }
 0x21b   :  { %2862 = vmatprep.subr.bf16.mxu0 %v4678_v39 }
 0x21c   :  { %2806 = vmatpush1.bf16.msra.mxu1 %v4485_v12  ;;  %v792_v12 = vld [vmem:[#allocation7 + $0x280] sm:$0xff] }
 0x21d   :  { %2807 = vmatprep.subr.bf16.mxu1 %v4478_v14  ;;  %v4549_v14 = vcombine.low %v800_v7, %v804_v1  ;;  %v4542_v16 = vcombine.high %v792_v12, %v796_v13  ;;  %v4541_v19 = vcombine.low %v792_v12, %v796_v13 }
 0x21e   :  { %2863 = vmatpush2.bf16.msra.mxu0 %v4677_v38 }
 0x21f   :  { %2864 = vmatprep.subr.bf16.mxu0 %v4670_v47 }
 0x220   :  { %2808 = vmatpush1.bf16.msra.mxu1 %v4477_v21  ;;  %v776_v21 = vld [vmem:[#allocation7 + $0x200] sm:$0xff] }
 0x221   :  { %2809 = vmatprep.subr.bf16.mxu1 %v4470_v23  ;;  %v4533_v23 = vcombine.low %v784_v17, %v788_v18  ;;  %v4526_v24 = vcombine.high %v776_v21, %v780_v22  ;;  %v4525_v25 = vcombine.low %v776_v21, %v780_v22 }
 0x222   :  { %2865 = vmatpush2.bf16.msra.mxu0 %v4669_v46 }
 0x223   :  { %2866 = vmatprep.subr.bf16.mxu0 %v4662_v56 }
 0x224   :  { %2810 = vmatpush1.bf16.msra.mxu1 %v4469_v29  ;;  %v411_v29 = vrot.slane %v402_v27, %v5533_v31 }
 0x225   :  { %2811 = vmatprep.subr.bf16.mxu1 %v4462_v37 }
 0x226   :  { %2867 = vmatpush2.bf16.msra.mxu0 %v4661_v55  ;;  %v573_v55 = vpop.permute.xlu1 %572 }
 0x227   :  { %2868 = vmatprep.subr.bf16.mxu0 %v4654_v33 }
 0x228   :  { %2812 = vmatpush1.bf16.msra.mxu1 %v4461_v43 }
 0x229   :  { %2813 = vmatprep.subr.bf16.mxu1 %v4582_v45 }
 0x22a   :  { %2869 = vmatpush2.bf16.msra.mxu0 %v4653_v63 }
 0x22b   :  { %2920 = vmatprep.subr.bf16.mxu0 %v4648_v9 }
 0x22c   :  { %2814 = vmatpush2.bf16.msra.mxu1 %v4581_v52 }
 0x22d   :  { %2815 = vmatprep.subr.bf16.mxu1 %v4574_v54 }
 0x230   :  { %2816 = vmatpush2.bf16.msra.mxu1 %v4573_v30 }
 0x231   :  { %2817 = vmatprep.subr.bf16.mxu1 %v4566_v62 }
 0x234   :  { %2818 = vmatpush2.bf16.msra.mxu1 %v4565_v3 }
 0x235   :  { %2819 = vmatprep.subr.bf16.mxu1 %v4558_v5 }
 0x238   :  { %2820 = vmatpush2.bf16.msra.mxu1 %v4557_v10 }
 0x239   :  { %2821 = vmatprep.subr.bf16.mxu1 %v4550_v11 }
 0x23c   :  { %2822 = vmatpush2.bf16.msra.mxu1 %v4549_v14 }
 0x23d   :  { %2823 = vmatprep.subr.bf16.mxu1 %v4542_v16 }
 0x240   :  { %2824 = vmatpush2.bf16.msra.mxu1 %v4541_v19 }
 0x241   :  { %2825 = vmatprep.subr.bf16.mxu1 %v4534_v20 }
 0x244   :  { %2826 = vmatpush2.bf16.msra.mxu1 %v4533_v23 }
 0x245   :  { %2827 = vmatprep.subr.bf16.mxu1 %v4526_v24 }
 0x248   :  { %2828 = vmatpush2.bf16.msra.mxu1 %v4525_v25 }
 0x249   :  { %2879 = vmatprep.subr.bf16.mxu1 %v4520_v26 }
 0x28b   :  { %v528_v34 = vpop.f32.mrf.mxu1 }
 0x28c   :  { %v529_v37 = vadd.f32 %v528_v34, %v407_v15 }
 0x28d   :  { %v530_v38 = vpop.f32.mrf.mxu1  ;;  %v5611_v39 = vpop.f32.mrf.mxu0 }
 0x28e   :  { %v547_v40 = vmul.f32 0.2, %v529_v37  ;;  %v531_v41 = vadd.f32 %v530_v38, %v411_v29 }
 0x28f   :  { %v532_v43 = vpop.f32.mrf.mxu1  ;;  %v5613_v44 = vpop.f32.mrf.mxu0 }
 0x290   :  { %v555_v45 = vmax.f32 %v529_v37, %v547_v40  ;;  %v548_v46 = vmul.f32 0.2, %v531_v41  ;;  %v533_v47 = vadd.f32 %v532_v43, %v407_v15 }
 0x291   :  { %v534_v48 = vpop.f32.mrf.mxu1  ;;  %v1432_v49 = vpop.f32.mrf.mxu0 }
 0x292   :  { %v556_v51 = vmax.f32 %v531_v41, %v548_v46  ;;  %v549_v52 = vmul.f32 0.2, %v533_v47  ;;  %v535_v53 = vadd.f32 %v534_v48, %v411_v29  ;;  %v575_v54 = vmul.f32 %v568_v42, %v555_v45 }
 0x293   :  { %v538_v56 = vpop.f32.mrf.mxu1  ;;  %v1433_v57 = vpop.f32.mrf.mxu0 }
 0x294   :  { %v557_v58 = vmax.f32 %v533_v47, %v549_v52  ;;  %v550_v59 = vmul.f32 0.2, %v535_v53  ;;  %v576_v60 = vmul.f32 %v568_v42, %v556_v51  ;;  %v583_v30 = vrot.slane %v575_v54, 4 }
 0x295   :  { %v539_v33 = vadd.f32 %v538_v56, %v407_v15  ;;  %v540_v62 = vpop.f32.mrf.mxu1 }
 0x296   :  { %v558_v63 = vmax.f32 %v535_v53, %v550_v59  ;;  %v589_v2 = vrot.slane %v576_v60, 4  ;;  %v577_v50 = vmul.f32 %v573_v55, %v557_v58  ;;  %v541_v5 = vadd.f32 %v540_v62, %v411_v29 }
 0x297   :  { %v551_v3 = vmul.f32 0.2, %v539_v33  ;;  %v542_v7 = vpop.f32.mrf.mxu1  ;;  %v584_v1 = vadd.f32 %v583_v30, %v575_v54 }
 0x298   :  { %v590_v9 = vadd.f32 %v589_v2, %v576_v60  ;;  %v578_v10 = vmul.f32 %v573_v55, %v558_v63  ;;  %v607_v11 = vrot.slane %v577_v50, 4  ;;  %v552_v13 = vmul.f32 0.2, %v541_v5 }
 0x299   :  { %v559_v12 = vmax.f32 %v539_v33, %v551_v3  ;;  %v543_v14 = vadd.f32 %v542_v7, %v407_v15  ;;  %v544_v16 = vpop.f32.mrf.mxu1  ;;  %v585_v22 = vrot.slane %v584_v1, 2 }
 0x29a   :  { %v613_v17 = vrot.slane %v578_v10, 4  ;;  %v560_v19 = vmax.f32 %v541_v5, %v552_v13  ;;  %v545_v21 = vadd.f32 %v544_v16, %v411_v29  ;;  %v591_v23 = vrot.slane %v590_v9, 2  ;;  %v761_v13 = vld [vmem:[#allocation7 + $0x188] sm:$0xff] }
 0x29b   :  { %v579_v18 = vmul.f32 %v568_v42, %v559_v12  ;;  %v553_v20 = vmul.f32 0.2, %v543_v14  ;;  %v608_v24 = vadd.f32 %v607_v11, %v577_v50  ;;  %v586_v45 = vadd.f32 %v585_v22, %v584_v1 }
 0x29c   :  { %v614_v25 = vadd.f32 %v613_v17, %v578_v10  ;;  %v580_v27 = vmul.f32 %v568_v42, %v560_v19  ;;  %v554_v37 = vmul.f32 0.2, %v545_v21  ;;  %v592_v15 = vadd.f32 %v591_v23, %v590_v9 }
 0x29d   :  { %v595_v26 = vrot.slane %v579_v18, 4  ;;  %v561_v34 = vmax.f32 %v543_v14, %v553_v20  ;;  %v609_v46 = vrot.slane %v608_v24, 2  ;;  %v587_v57 = vrot.slane %v586_v45, 1  ;;  %v765_v14 = vld [vmem:[#allocation7 + $0x1a8] sm:$0xff] }
 0x29e   :  { %v601_v40 = vrot.slane %v580_v27, 4  ;;  %v562_v43 = vmax.f32 %v545_v21, %v554_v37  ;;  %v615_v47 = vrot.slane %v614_v25, 2  ;;  %v593_v42 = vrot.slane %v592_v15, 1  ;;  %v753_v37 = vld [vmem:[#allocation7 + $0x148] sm:$0xff] }
 0x29f   :  { %v596_v38 = vadd.f32 %v595_v26, %v579_v18  ;;  %v581_v41 = vmul.f32 %v573_v55, %v561_v34  ;;  %v610_v58 = vadd.f32 %v609_v46, %v608_v24  ;;  %v588_v5 = vadd.f32 %v587_v57, %v586_v45  ;;  %v885_v57 = vld [vmem:[#allocation7 + $0x568] sm:$0xff] }
 0x2a0   :  { %v602_v49 = vadd.f32 %v601_v40, %v580_v27  ;;  %v582_v29 = vmul.f32 %v573_v55, %v562_v43  ;;  %v616_v59 = vadd.f32 %v615_v47, %v614_v25  ;;  %v594_v7 = vadd.f32 %v593_v42, %v592_v15  ;;  %v893_v43 = vld [vmem:[#allocation7 + $0x5a8] sm:$0xff] }
 0x2a1   :  { %v597_v48 = vrot.slane %v596_v38, 2  ;;  %v619_v51 = vrot.slane %v581_v41, 4  ;;  %v611_v55 = vrot.slane %v610_v58, 1  ;;  %v4512_v25 = vcombine.high %v761_v13, %v765_v14 }
 0x2a2   :  { %v603_v53 = vrot.slane %v602_v49, 2  ;;  %v625_v56 = vrot.slane %v582_v29, 4  ;;  %v617_v1 = vrot.slane %v616_v59, 1  ;;  %v4511_v47 = vcombine.low %v761_v13, %v765_v14 }
 0x2a3   :  { %v598_v52 = vadd.f32 %v597_v48, %v596_v38  ;;  %v620_v54 = vadd.f32 %v619_v51, %v581_v41  ;;  %v612_v20 = vadd.f32 %v611_v55, %v610_v58  ;;  %v757_v38 = vld [vmem:[#allocation7 + $0x168] sm:$0xff] }
 0x2a4   :  { %v604_v30 = vadd.f32 %v603_v53, %v602_v49  ;;  %v626_v62 = vadd.f32 %v625_v56, %v582_v29  ;;  %v618_v22 = vadd.f32 %v617_v1, %v616_v59  ;;  %v889_v41 = vld [vmem:[#allocation7 + $0x588] sm:$0xff]  ;;  %v4504_v49 = vcombine.high %v753_v37, %v757_v38 }
 0x2a5   :  { %v599_v60 = vrot.slane %v598_v52, 1  ;;  %v621_v33 = vrot.slane %v620_v54, 2  ;;  %v745_v51 = vld [vmem:[#allocation7 + $0x108] sm:$0xff]  ;;  %v4640_v53 = vcombine.high %v889_v41, %v893_v43  ;;  %v4503_v35 = vcombine.low %v753_v37, %v757_v38 }
 0x2a6   :  { %v605_v2 = vrot.slane %v604_v30, 1  ;;  %v627_v3 = vrot.slane %v626_v62, 2  ;;  %v881_v56 = vld [vmem:[#allocation7 + $0x548] sm:$0xff] }
 0x2a7   :  { %v600_v63 = vadd.f32 %v599_v60, %v598_v52  ;;  %v622_v50 = vadd.f32 %v621_v33, %v620_v54  ;;  %v749_v54 = vld [vmem:[#allocation7 + $0x128] sm:$0xff]  ;;  %v4632_v58 = vcombine.high %v881_v56, %v885_v57 }
 0x2a8   :  { %v606_v9 = vadd.f32 %v605_v2, %v604_v30  ;;  %v628_v11 = vadd.f32 %v627_v3, %v626_v62  ;;  %v4496_v42 = vcombine.high %v745_v51, %v749_v54  ;;  %v737_v59 = vld [vmem:[#allocation7 + $0xc8] sm:$0xff]  ;;  %v4495_v62 = vcombine.low %v745_v51, %v749_v54 }
 0x2a9   :  { %v623_v10 = vrot.slane %v622_v50, 1  ;;  %v636_v12 = vsel %vm635_vm3, %v600_v63, %v588_v5  ;;  %v741_v60 = vld [vmem:[#allocation7 + $0xe8] sm:$0xff]  ;;  %v4631_v63 = vcombine.low %v881_v56, %v885_v57 }
 0x2aa   :  { %v629_v17 = vrot.slane %v628_v11, 1  ;;  %v637_v18 = vsel %vm635_vm3, %v606_v9, %v594_v7  ;;  %v5621_v24 = vpack.c.bf16 %v636_v12, %v636_v12  ;;  %v873_v30 = vld [vmem:[#allocation7 + $0x508] sm:$0xff]  ;;  %v4488_v4 = vcombine.high %v737_v59, %v741_v60 }
 0x2ab   :  { %v624_v16 = vadd.f32 %v623_v10, %v622_v50  ;;  %v5617_v19 = vpop.f32.mrf.mxu1  ;;  %v5619_v21 = vpack.c.bf16 %v637_v18, %v637_v18  ;;  %v877_v33 = vld [vmem:[#allocation7 + $0x528] sm:$0xff]  ;;  %v4487_v5 = vcombine.low %v737_v59, %v741_v60 }
 0x2ac   :  { %v630_v23 = vadd.f32 %v629_v17, %v628_v11  ;;  %v4624_v6 = vcombine.high %v873_v30, %v877_v33  ;;  %v733_v2 = vld [vmem:[#allocation7 + $0xa8] sm:$0xff]  ;;  %v4623_v7 = vcombine.low %v873_v30, %v877_v33 }
 0x2ad   :  { %v5623_v26 = vpop.f32.mrf.mxu1  ;;  %v5625_v27 = vpop.f32.mrf.mxu0  ;;  %2829 = vmatprep.mubr.bf16.mxu1 %v5619_v21  ;;  %v644_v34 = vsel %vm635_vm3, %v624_v16, %v612_v20  ;;  %v865_v50 = vld [vmem:[#allocation7 + $0x4c8] sm:$0xff] }
 0x2ae   :  { %2830 = vmatmul.mubr.bf16.vlgmr.msra.gmra.mxu1 %v5621_v24  ;;  %v645_v40 = vsel %vm635_vm3, %v630_v23, %v618_v22  ;;  %v5639_v48 = vpack.c.bf16 %v644_v34, %v644_v34  ;;  %v869_v3 = vld [vmem:[#allocation7 + $0x4e8] sm:$0xff] }
 0x2af   :  { %v1391_v45 = vpop.f32.mrf.mxu1  ;;  %v5631_v15 = vpop.f32.mrf.mxu0  ;;  %2880 = vmatpush1.bf16.msra.mxu1 %v4519_v0  ;;  %2911 = vmatprep.mubr.bf16.mxu1 %v5619_v21  ;;  %v5637_v46 = vpack.c.bf16 %v645_v40, %v645_v40  ;;  %v4639_v0 = vcombine.low %v889_v41, %v893_v43  ;;  %v4616_v1 = vcombine.high %v865_v50, %v869_v3  ;;  %v721_v9 = vld [vmem:[#allocation7 + $0x48] sm:$0xff] }
 0x2b0   :  { %2881 = vmatprep.subr.bf16.mxu1 %v4512_v25  ;;  %v725_v10 = vld [vmem:[#allocation7 + $0x68] sm:$0xff]  ;;  %v4615_v14 = vcombine.low %v865_v50, %v869_v3 }
 0x2b1   :  { %v1392_v29 = vpop.f32.mrf.mxu1  ;;  %v1514_v52 = vpop.f32.mrf.mxu0  ;;  %2870 = vmatprep.mubr.bf16.mxu0 %v5637_v46  ;;  %v857_v11 = vld [vmem:[#allocation7 + $0x488] sm:$0xff]  ;;  %v4472_v16 = vcombine.high %v721_v9, %v725_v10  ;;  %v4471_v25 = vcombine.low %v721_v9, %v725_v10 }
 0x2b2   :  { %2871 = vmatmul.mubr.bf16.vlgmr.msra.gmra.mxu0 %v5639_v48  ;;  %v861_v12 = vld [vmem:[#allocation7 + $0x4a8] sm:$0xff] }
 0x2b3   :  { %v1515_v61 = vpop.f32.mrf.mxu0  ;;  %2882 = vmatpush1.bf16.msra.mxu1 %v4511_v47  ;;  %2921 = vmatpush1.bf16.msra.mxu0 %v4647_v8  ;;  %v729_v8 = vld [vmem:[#allocation7 + $0x88] sm:$0xff]  ;;  %v4608_v17 = vcombine.high %v857_v11, %v861_v12  ;;  %v4607_v34 = vcombine.low %v857_v11, %v861_v12 }
 0x2b4   :  { %2952 = vmatprep.mubr.bf16.mxu0 %v5637_v46  ;;  %2883 = vmatprep.subr.bf16.mxu1 %v4504_v49  ;;  %v4480_v55 = vcombine.high %v729_v8, %v733_v2  ;;  %v4479_v13 = vcombine.low %v729_v8, %v733_v2  ;;  %v713_v18 = vld [vmem:[#allocation7 + $0x8] sm:$0xff] }
 0x2b5   :  { %2922 = vmatprep.subr.bf16.mxu0 %v4640_v53  ;;  %v717_v20 = vld [vmem:[#allocation7 + $0x28] sm:$0xff] }
 0x2b6   :  { %v849_v22 = vld [vmem:[#allocation7 + $0x448] sm:$0xff]  ;;  %v4464_v37 = vcombine.high %v713_v18, %v717_v20  ;;  %v4463_v47 = vcombine.low %v713_v18, %v717_v20 }
 0x2b7   :  { %2884 = vmatpush1.bf16.msra.mxu1 %v4503_v35  ;;  %2923 = vmatpush1.bf16.msra.mxu0 %v4639_v0  ;;  %v853_v23 = vld [vmem:[#allocation7 + $0x468] sm:$0xff] }
 0x2b8   :  { %2885 = vmatprep.subr.bf16.mxu1 %v4496_v42  ;;  %2924 = vmatprep.subr.bf16.mxu0 %v4632_v58  ;;  %v4600_v38 = vcombine.high %v849_v22, %v853_v23  ;;  %v833_v40 = vld [vmem:[#allocation7 + $0x3c8] sm:$0xff]  ;;  %v4599_v49 = vcombine.low %v849_v22, %v853_v23 }
 0x2b9   :  { %v837_v41 = vld [vmem:[#allocation7 + $0x3e8] sm:$0xff] }
 0x2ba   :  { %v841_v43 = vld [vmem:[#allocation7 + $0x408] sm:$0xff]  ;;  %v4584_v51 = vcombine.high %v833_v40, %v837_v41  ;;  %v4583_v61 = vcombine.low %v833_v40, %v837_v41 }
 0x2bb   :  { %2886 = vmatpush1.bf16.msra.mxu1 %v4495_v62  ;;  %2925 = vmatpush1.bf16.msra.mxu0 %v4631_v63  ;;  %v845_v45 = vld [vmem:[#allocation7 + $0x428] sm:$0xff] }
 0x2bc   :  { %2887 = vmatprep.subr.bf16.mxu1 %v4488_v4  ;;  %2926 = vmatprep.subr.bf16.mxu0 %v4624_v6  ;;  %v4592_v29 = vcombine.high %v841_v43, %v845_v45  ;;  %v825_v52 = vld [vmem:[#allocation7 + $0x388] sm:$0xff]  ;;  %v4591_v35 = vcombine.low %v841_v43, %v845_v45 }
 0x2bd   :  { %v829_v53 = vld [vmem:[#allocation7 + $0x3a8] sm:$0xff] }
 0x2be   :  { %v961_v54 = vld [vmem:[#allocation7 + $0x7c8] sm:$0xff]  ;;  %v4576_v0 = vcombine.high %v825_v52, %v829_v53  ;;  %v4575_v63 = vcombine.low %v825_v52, %v829_v53 }
 0x2bf   :  { %2888 = vmatpush1.bf16.msra.mxu1 %v4487_v5  ;;  %2927 = vmatpush1.bf16.msra.mxu0 %v4623_v7  ;;  %v965_v56 = vld [vmem:[#allocation7 + $0x7e8] sm:$0xff] }
 0x2c0   :  { %2889 = vmatprep.subr.bf16.mxu1 %v4480_v55  ;;  %2928 = vmatprep.subr.bf16.mxu0 %v4616_v1  ;;  %v4712_v42 = vcombine.high %v961_v54, %v965_v56  ;;  %v817_v58 = vld [vmem:[#allocation7 + $0x348] sm:$0xff]  ;;  %v4711_v4 = vcombine.low %v961_v54, %v965_v56 }
 0x2c1   :  { %v821_v60 = vld [vmem:[#allocation7 + $0x368] sm:$0xff] }
 0x2c2   :  { %v953_v30 = vld [vmem:[#allocation7 + $0x788] sm:$0xff]  ;;  %v4568_v6 = vcombine.high %v817_v58, %v821_v60  ;;  %v4567_v55 = vcombine.low %v817_v58, %v821_v60 }
 0x2c3   :  { %2890 = vmatpush1.bf16.msra.mxu1 %v4479_v13  ;;  %2929 = vmatpush1.bf16.msra.mxu0 %v4615_v14  ;;  %v957_v33 = vld [vmem:[#allocation7 + $0x7a8] sm:$0xff] }
 0x2c4   :  { %2891 = vmatprep.subr.bf16.mxu1 %v4472_v16  ;;  %2930 = vmatprep.subr.bf16.mxu0 %v4608_v17  ;;  %v4704_v8 = vcombine.high %v953_v30, %v957_v33  ;;  %v809_v2 = vld [vmem:[#allocation7 + $0x308] sm:$0xff]  ;;  %v4703_v1 = vcombine.low %v953_v30, %v957_v33 }
 0x2c5   :  { %v813_v3 = vld [vmem:[#allocation7 + $0x328] sm:$0xff] }
 0x2c6   :  { %v945_v5 = vld [vmem:[#allocation7 + $0x748] sm:$0xff]  ;;  %v4560_v9 = vcombine.high %v809_v2, %v813_v3  ;;  %v4559_v16 = vcombine.low %v809_v2, %v813_v3  ;;  %v766_v3 = vld [vmem:[#allocation7 + $0x1b0] sm:$0xff] }
 0x2c7   :  { %2892 = vmatpush1.bf16.msra.mxu1 %v4471_v25  ;;  %2931 = vmatpush1.bf16.msra.mxu0 %v4607_v34  ;;  %v949_v7 = vld [vmem:[#allocation7 + $0x768] sm:$0xff] }
 0x2c8   :  { %2893 = vmatprep.subr.bf16.mxu1 %v4464_v37  ;;  %2932 = vmatprep.subr.bf16.mxu0 %v4600_v38  ;;  %v4696_v10 = vcombine.high %v945_v5, %v949_v7  ;;  %v801_v11 = vld [vmem:[#allocation7 + $0x2c8] sm:$0xff]  ;;  %v4695_v17 = vcombine.low %v945_v5, %v949_v7  ;;  %v898_v5 = vld [vmem:[#allocation7 + $0x5d0] sm:$0xff] }
 0x2c9   :  { %v805_v12 = vld [vmem:[#allocation7 + $0x2e8] sm:$0xff]  ;;  %v902_v7 = vld [vmem:[#allocation7 + $0x5f0] sm:$0xff] }
 0x2ca   :  { %v937_v13 = vld [vmem:[#allocation7 + $0x708] sm:$0xff]  ;;  %v4552_v18 = vcombine.high %v801_v11, %v805_v12  ;;  %v4551_v37 = vcombine.low %v801_v11, %v805_v12  ;;  %v754_v11 = vld [vmem:[#allocation7 + $0x150] sm:$0xff] }
 0x2cb   :  { %v5647_v57 = vpop.f32.mrf.mxu1  ;;  %2894 = vmatpush1.bf16.msra.mxu1 %v4463_v47  ;;  %2933 = vmatpush1.bf16.msra.mxu0 %v4599_v49  ;;  %v941_v14 = vld [vmem:[#allocation7 + $0x728] sm:$0xff]  ;;  %v758_v12 = vld [vmem:[#allocation7 + $0x170] sm:$0xff] }
 0x2cc   :  { %2895 = vmatprep.subr.bf16.mxu1 %v4584_v51  ;;  %2934 = vmatprep.subr.bf16.mxu0 %v4592_v29  ;;  %v4688_v20 = vcombine.high %v937_v13, %v941_v14  ;;  %v793_v22 = vld [vmem:[#allocation7 + $0x288] sm:$0xff]  ;;  %v4687_v38 = vcombine.low %v937_v13, %v941_v14  ;;  %v890_v13 = vld [vmem:[#allocation7 + $0x590] sm:$0xff] }
 0x2cd   :  { %v5649_v59 = vpop.f32.mrf.mxu1  ;;  %v797_v23 = vld [vmem:[#allocation7 + $0x2a8] sm:$0xff]  ;;  %v894_v14 = vld [vmem:[#allocation7 + $0x5b0] sm:$0xff] }
 0x2ce   :  { %v929_v25 = vld [vmem:[#allocation7 + $0x6c8] sm:$0xff]  ;;  %v4544_v40 = vcombine.high %v793_v22, %v797_v23  ;;  %v4543_v51 = vcombine.low %v793_v22, %v797_v23  ;;  %v4642_v22 = vcombine.high %v890_v13, %v894_v14  ;;  %v750_v23 = vld [vmem:[#allocation7 + $0x130] sm:$0xff] }
 0x2cf   :  { %v1473_v62 = vpop.f32.mrf.mxu1  ;;  %2896 = vmatpush2.bf16.msra.mxu1 %v4583_v61  ;;  %2935 = vmatpush1.bf16.msra.mxu0 %v4591_v35  ;;  %v933_v34 = vld [vmem:[#allocation7 + $0x6e8] sm:$0xff] }
 0x2d0   :  { %2897 = vmatprep.subr.bf16.mxu1 %v4576_v0  ;;  %2936 = vmatprep.subr.bf16.mxu0 %v4712_v42  ;;  %v4680_v41 = vcombine.high %v929_v25, %v933_v34  ;;  %v785_v43 = vld [vmem:[#allocation7 + $0x248] sm:$0xff]  ;;  %v4679_v29 = vcombine.low %v929_v25, %v933_v34  ;;  %v770_v62 = vld [vmem:[#allocation7 + $0x1d0] sm:$0xff] }
 0x2d1   :  { %v1474_v50 = vpop.f32.mrf.mxu1  ;;  %v789_v45 = vld [vmem:[#allocation7 + $0x268] sm:$0xff]  ;;  %v882_v25 = vld [vmem:[#allocation7 + $0x550] sm:$0xff] }
 0x2d2   :  { %v921_v47 = vld [vmem:[#allocation7 + $0x688] sm:$0xff]  ;;  %v4536_v52 = vcombine.high %v785_v43, %v789_v45  ;;  %v4535_v0 = vcombine.low %v785_v43, %v789_v45  ;;  %v762_v50 = vld [vmem:[#allocation7 + $0x190] sm:$0xff] }
 0x2d3   :  { %2898 = vmatpush2.bf16.msra.mxu1 %v4575_v63  ;;  %2937 = vmatpush2.bf16.msra.mxu0 %v4711_v4  ;;  %v925_v49 = vld [vmem:[#allocation7 + $0x6a8] sm:$0xff]  ;;  %v774_v63 = vld [vmem:[#allocation7 + $0x1f0] sm:$0xff] }
 0x2d4   :  { %2899 = vmatprep.subr.bf16.mxu1 %v4568_v6  ;;  %2938 = vmatprep.subr.bf16.mxu0 %v4704_v8  ;;  %v4672_v53 = vcombine.high %v921_v47, %v925_v49  ;;  %v777_v54 = vld [vmem:[#allocation7 + $0x208] sm:$0xff]  ;;  %v4671_v42 = vcombine.low %v921_v47, %v925_v49  ;;  %v4522_v2 = vcombine.high %v770_v62, %v774_v63  ;;  %v886_v34 = vld [vmem:[#allocation7 + $0x570] sm:$0xff] }
 0x2d5   :  { %v781_v56 = vld [vmem:[#allocation7 + $0x228] sm:$0xff]  ;;  %v738_v43 = vld [vmem:[#allocation7 + $0xd0] sm:$0xff] }
 0x2d6   :  { %v913_v61 = vld [vmem:[#allocation7 + $0x648] sm:$0xff]  ;;  %v4528_v58 = vcombine.high %v777_v54, %v781_v56  ;;  %v4527_v4 = vcombine.low %v777_v54, %v781_v56  ;;  %v742_v45 = vld [vmem:[#allocation7 + $0xf0] sm:$0xff] }
 0x2d7   :  { %2900 = vmatpush2.bf16.msra.mxu1 %v4567_v55  ;;  %2939 = vmatpush2.bf16.msra.mxu0 %v4703_v1  ;;  %v917_v35 = vld [vmem:[#allocation7 + $0x668] sm:$0xff]  ;;  %v4521_v1 = vcombine.low %v770_v62, %v774_v63  ;;  %v874_v47 = vld [vmem:[#allocation7 + $0x510] sm:$0xff] }
 0x2d8   :  { %2901 = vmatprep.subr.bf16.mxu1 %v4560_v9  ;;  %2940 = vmatprep.subr.bf16.mxu0 %v4696_v10  ;;  %v4664_v60 = vcombine.high %v913_v61, %v917_v35  ;;  %v905_v30 = vld [vmem:[#allocation7 + $0x608] sm:$0xff]  ;;  %v4663_v6 = vcombine.low %v913_v61, %v917_v35  ;;  %v4514_v9 = vcombine.high %v762_v50, %v766_v3  ;;  %v878_v49 = vld [vmem:[#allocation7 + $0x530] sm:$0xff] }
 0x2d9   :  { %v909_v33 = vld [vmem:[#allocation7 + $0x628] sm:$0xff]  ;;  %v4650_v10 = vcombine.high %v898_v5, %v902_v7  ;;  %v730_v54 = vld [vmem:[#allocation7 + $0x90] sm:$0xff] }
 0x2da   :  { %v4656_v8 = vcombine.high %v905_v30, %v909_v33  ;;  %v4655_v55 = vcombine.low %v905_v30, %v909_v33  ;;  %v734_v56 = vld [vmem:[#allocation7 + $0xb0] sm:$0xff] }
 0x2db   :  { %2902 = vmatpush2.bf16.msra.mxu1 %v4559_v16  ;;  %2941 = vmatpush2.bf16.msra.mxu0 %v4695_v17  ;;  %v4513_v16 = vcombine.low %v762_v50, %v766_v3  ;;  %v4649_v17 = vcombine.low %v898_v5, %v902_v7  ;;  %v866_v61 = vld [vmem:[#allocation7 + $0x4d0] sm:$0xff] }
 0x2dc   :  { %2903 = vmatprep.subr.bf16.mxu1 %v4552_v18  ;;  %2942 = vmatprep.subr.bf16.mxu0 %v4688_v20  ;;  %v4506_v18 = vcombine.high %v754_v11, %v758_v12  ;;  %v746_v20 = vld [vmem:[#allocation7 + $0x110] sm:$0xff] }
 0x2dd   :  { %v870_v35 = vld [vmem:[#allocation7 + $0x4f0] sm:$0xff] }
 0x2de   :  { %v722_v30 = vld [vmem:[#allocation7 + $0x50] sm:$0xff] }
 0x2df   :  { %2904 = vmatpush2.bf16.msra.mxu1 %v4551_v37  ;;  %2943 = vmatpush2.bf16.msra.mxu0 %v4687_v38  ;;  %v4505_v37 = vcombine.low %v754_v11, %v758_v12  ;;  %v4641_v38 = vcombine.low %v890_v13, %v894_v14  ;;  %v726_v33 = vld [vmem:[#allocation7 + $0x70] sm:$0xff] }
 0x2e0   :  { %2905 = vmatprep.subr.bf16.mxu1 %v4544_v40  ;;  %2944 = vmatprep.subr.bf16.mxu0 %v4680_v41  ;;  %v4498_v40 = vcombine.high %v746_v20, %v750_v23  ;;  %v4634_v41 = vcombine.high %v882_v25, %v886_v34  ;;  %v858_v62 = vld [vmem:[#allocation7 + $0x490] sm:$0xff] }
 0x2e1   :  { %v862_v63 = vld [vmem:[#allocation7 + $0x4b0] sm:$0xff] }
 0x2e2   :  { %v714_v50 = vld [vmem:[#allocation7 + $0x10] sm:$0xff] }
 0x2e3   :  { %2906 = vmatpush2.bf16.msra.mxu1 %v4543_v51  ;;  %2945 = vmatpush2.bf16.msra.mxu0 %v4679_v29  ;;  %v4497_v51 = vcombine.low %v746_v20, %v750_v23  ;;  %v4633_v29 = vcombine.low %v882_v25, %v886_v34  ;;  %v718_v3 = vld [vmem:[#allocation7 + $0x30] sm:$0xff] }
 0x2e4   :  { %2907 = vmatprep.subr.bf16.mxu1 %v4536_v52  ;;  %2946 = vmatprep.subr.bf16.mxu0 %v4672_v53  ;;  %v4490_v52 = vcombine.high %v738_v43, %v742_v45  ;;  %v4626_v53 = vcombine.high %v874_v47, %v878_v49  ;;  %v850_v5 = vld [vmem:[#allocation7 + $0x450] sm:$0xff] }
 0x2e5   :  { %v854_v7 = vld [vmem:[#allocation7 + $0x470] sm:$0xff] }
 0x2e6   :  { %v834_v11 = vld [vmem:[#allocation7 + $0x3d0] sm:$0xff] }
 0x2e7   :  { %2908 = vmatpush2.bf16.msra.mxu1 %v4535_v0  ;;  %2947 = vmatpush2.bf16.msra.mxu0 %v4671_v42  ;;  %v4489_v0 = vcombine.low %v738_v43, %v742_v45  ;;  %v4625_v42 = vcombine.low %v874_v47, %v878_v49  ;;  %v838_v12 = vld [vmem:[#allocation7 + $0x3f0] sm:$0xff] }
 0x2e8   :  { %2909 = vmatprep.subr.bf16.mxu1 %v4528_v58  ;;  %2948 = vmatprep.subr.bf16.mxu0 %v4664_v60  ;;  %v4482_v58 = vcombine.high %v730_v54, %v734_v56  ;;  %v4618_v60 = vcombine.high %v866_v61, %v870_v35  ;;  %v842_v13 = vld [vmem:[#allocation7 + $0x410] sm:$0xff] }
 0x2e9   :  { %v846_v14 = vld [vmem:[#allocation7 + $0x430] sm:$0xff] }
 0x2ea   :  { %v4594_v20 = vcombine.high %v842_v13, %v846_v14  ;;  %v830_v23 = vld [vmem:[#allocation7 + $0x3b0] sm:$0xff] }
 0x2eb   :  { %2910 = vmatpush2.bf16.msra.mxu1 %v4527_v4  ;;  %2949 = vmatpush2.bf16.msra.mxu0 %v4663_v6  ;;  %v4481_v4 = vcombine.low %v730_v54, %v734_v56  ;;  %v4617_v6 = vcombine.low %v866_v61, %v870_v35  ;;  %v962_v25 = vld [vmem:[#allocation7 + $0x7d0] sm:$0xff] }
 0x2ec   :  { %2950 = vmatprep.subr.bf16.mxu0 %v4656_v8  ;;  %2961 = vmatprep.subr.bf16.mxu1 %v4522_v2  ;;  %v4474_v8 = vcombine.high %v722_v30, %v726_v33  ;;  %v4610_v2 = vcombine.high %v858_v62, %v862_v63  ;;  %v966_v34 = vld [vmem:[#allocation7 + $0x7f0] sm:$0xff] }
 0x2ed   :  { %v818_v43 = vld [vmem:[#allocation7 + $0x350] sm:$0xff] }
 0x2ee   :  { %2912 = vmatmul.mubr.bf16.vlgmr.msra.gmra.mxu1 %v5621_v24  ;;  %v822_v45 = vld [vmem:[#allocation7 + $0x370] sm:$0xff] }
 0x2ef   :  { %2951 = vmatpush2.bf16.msra.mxu0 %v4655_v55  ;;  %2962 = vmatpush1.bf16.msra.mxu1 %v4521_v1  ;;  %v4473_v55 = vcombine.low %v722_v30, %v726_v33  ;;  %v4609_v1 = vcombine.low %v858_v62, %v862_v63  ;;  %v954_v47 = vld [vmem:[#allocation7 + $0x790] sm:$0xff] }
 0x2f0   :  { %2993 = vmatprep.mubr.bf16.mxu1 %v5619_v21  ;;  %2963 = vmatprep.subr.bf16.mxu1 %v4514_v9  ;;  %v4466_v9 = vcombine.high %v714_v50, %v718_v3  ;;  %v958_v49 = vld [vmem:[#allocation7 + $0x7b0] sm:$0xff] }
 0x2f1   :  { %3002 = vmatprep.subr.bf16.mxu0 %v4650_v10  ;;  %v4602_v10 = vcombine.high %v850_v5, %v854_v7  ;;  %v810_v54 = vld [vmem:[#allocation7 + $0x310] sm:$0xff] }
 0x2f2   :  { %2953 = vmatmul.mubr.bf16.vlgmr.msra.gmra.mxu0 %v5639_v48  ;;  %v814_v56 = vld [vmem:[#allocation7 + $0x330] sm:$0xff] }
 0x2f3   :  { %2964 = vmatpush1.bf16.msra.mxu1 %v4513_v16  ;;  %3003 = vmatpush1.bf16.msra.mxu0 %v4649_v17  ;;  %v4465_v16 = vcombine.low %v714_v50, %v718_v3  ;;  %v4601_v17 = vcombine.low %v850_v5, %v854_v7  ;;  %v946_v61 = vld [vmem:[#allocation7 + $0x750] sm:$0xff] }
 0x2f4   :  { %3034 = vmatprep.mubr.bf16.mxu0 %v5637_v46  ;;  %2965 = vmatprep.subr.bf16.mxu1 %v4506_v18  ;;  %v4586_v18 = vcombine.high %v834_v11, %v838_v12  ;;  %v950_v35 = vld [vmem:[#allocation7 + $0x770] sm:$0xff] }
 0x2f5   :  { %3004 = vmatprep.subr.bf16.mxu0 %v4642_v22  ;;  %v826_v22 = vld [vmem:[#allocation7 + $0x390] sm:$0xff] }
 0x2f6   :  { %v802_v30 = vld [vmem:[#allocation7 + $0x2d0] sm:$0xff] }
 0x2f7   :  { %2966 = vmatpush1.bf16.msra.mxu1 %v4505_v37  ;;  %3005 = vmatpush1.bf16.msra.mxu0 %v4641_v38  ;;  %v4585_v37 = vcombine.low %v834_v11, %v838_v12  ;;  %v4593_v38 = vcombine.low %v842_v13, %v846_v14  ;;  %v806_v33 = vld [vmem:[#allocation7 + $0x2f0] sm:$0xff] }
 0x2f8   :  { %2967 = vmatprep.subr.bf16.mxu1 %v4498_v40  ;;  %3006 = vmatprep.subr.bf16.mxu0 %v4634_v41  ;;  %v4578_v40 = vcombine.high %v826_v22, %v830_v23  ;;  %v4714_v41 = vcombine.high %v962_v25, %v966_v34  ;;  %v938_v62 = vld [vmem:[#allocation7 + $0x710] sm:$0xff] }
 0x2f9   :  { %v942_v63 = vld [vmem:[#allocation7 + $0x730] sm:$0xff] }
 0x2fa   :  { %v794_v50 = vld [vmem:[#allocation7 + $0x290] sm:$0xff] }
 0x2fb   :  { %2968 = vmatpush1.bf16.msra.mxu1 %v4497_v51  ;;  %3007 = vmatpush1.bf16.msra.mxu0 %v4633_v29  ;;  %v4577_v51 = vcombine.low %v826_v22, %v830_v23  ;;  %v4713_v29 = vcombine.low %v962_v25, %v966_v34  ;;  %v798_v3 = vld [vmem:[#allocation7 + $0x2b0] sm:$0xff] }
 0x2fc   :  { %2969 = vmatprep.subr.bf16.mxu1 %v4490_v52  ;;  %3008 = vmatprep.subr.bf16.mxu0 %v4626_v53  ;;  %v4570_v52 = vcombine.high %v818_v43, %v822_v45  ;;  %v4706_v53 = vcombine.high %v954_v47, %v958_v49  ;;  %v930_v5 = vld [vmem:[#allocation7 + $0x6d0] sm:$0xff] }
 0x2fd   :  { %v934_v7 = vld [vmem:[#allocation7 + $0x6f0] sm:$0xff] }
 0x2fe   :  { %v786_v11 = vld [vmem:[#allocation7 + $0x250] sm:$0xff] }
 0x2ff   :  { %2970 = vmatpush1.bf16.msra.mxu1 %v4489_v0  ;;  %3009 = vmatpush1.bf16.msra.mxu0 %v4625_v42  ;;  %v4569_v0 = vcombine.low %v818_v43, %v822_v45  ;;  %v4705_v42 = vcombine.low %v954_v47, %v958_v49  ;;  %v790_v12 = vld [vmem:[#allocation7 + $0x270] sm:$0xff]  ;;  %v771_v47 = vld [vmem:[#allocation7 + $0x1d8] sm:$0xff] }
 0x300   :  { %2971 = vmatprep.subr.bf16.mxu1 %v4482_v58  ;;  %3010 = vmatprep.subr.bf16.mxu0 %v4618_v60  ;;  %v4562_v58 = vcombine.high %v810_v54, %v814_v56  ;;  %v4698_v60 = vcombine.high %v946_v61, %v950_v35  ;;  %v922_v13 = vld [vmem:[#allocation7 + $0x690] sm:$0xff]  ;;  %v775_v49 = vld [vmem:[#allocation7 + $0x1f8] sm:$0xff] }
 0x301   :  { %v926_v14 = vld [vmem:[#allocation7 + $0x6b0] sm:$0xff] }
 0x302   :  { %v778_v22 = vld [vmem:[#allocation7 + $0x210] sm:$0xff] }
 0x303   :  { %2972 = vmatpush1.bf16.msra.mxu1 %v4481_v4  ;;  %3011 = vmatpush1.bf16.msra.mxu0 %v4617_v6  ;;  %v4561_v4 = vcombine.low %v810_v54, %v814_v56  ;;  %v4697_v6 = vcombine.low %v946_v61, %v950_v35  ;;  %v782_v23 = vld [vmem:[#allocation7 + $0x230] sm:$0xff]  ;;  %v763_v54 = vld [vmem:[#allocation7 + $0x198] sm:$0xff] }
 0x304   :  { %2973 = vmatprep.subr.bf16.mxu1 %v4474_v8  ;;  %3012 = vmatprep.subr.bf16.mxu0 %v4610_v2  ;;  %v4554_v8 = vcombine.high %v802_v30, %v806_v33  ;;  %v4690_v2 = vcombine.high %v938_v62, %v942_v63  ;;  %v914_v25 = vld [vmem:[#allocation7 + $0x650] sm:$0xff]  ;;  %v767_v56 = vld [vmem:[#allocation7 + $0x1b8] sm:$0xff] }
 0x305   :  { %v918_v34 = vld [vmem:[#allocation7 + $0x670] sm:$0xff]  ;;  %v899_v61 = vld [vmem:[#allocation7 + $0x5d8] sm:$0xff] }
 0x306   :  { %v906_v43 = vld [vmem:[#allocation7 + $0x610] sm:$0xff]  ;;  %v903_v35 = vld [vmem:[#allocation7 + $0x5f8] sm:$0xff] }
 0x307   :  { %2974 = vmatpush1.bf16.msra.mxu1 %v4473_v55  ;;  %3013 = vmatpush1.bf16.msra.mxu0 %v4609_v1  ;;  %v4553_v55 = vcombine.low %v802_v30, %v806_v33  ;;  %v4689_v1 = vcombine.low %v938_v62, %v942_v63  ;;  %v910_v45 = vld [vmem:[#allocation7 + $0x630] sm:$0xff]  ;;  %v755_v30 = vld [vmem:[#allocation7 + $0x158] sm:$0xff] }
 0x308   :  { %2975 = vmatprep.subr.bf16.mxu1 %v4466_v9  ;;  %3014 = vmatprep.subr.bf16.mxu0 %v4602_v10  ;;  %v4546_v9 = vcombine.high %v794_v50, %v798_v3  ;;  %v4682_v10 = vcombine.high %v930_v5, %v934_v7  ;;  %v759_v33 = vld [vmem:[#allocation7 + $0x178] sm:$0xff] }
 0x309   :  { %v891_v62 = vld [vmem:[#allocation7 + $0x598] sm:$0xff] }
 0x30a   :  { %v895_v63 = vld [vmem:[#allocation7 + $0x5b8] sm:$0xff] }
 0x30b   :  { %2976 = vmatpush1.bf16.msra.mxu1 %v4465_v16  ;;  %3015 = vmatpush1.bf16.msra.mxu0 %v4601_v17  ;;  %v4545_v16 = vcombine.low %v794_v50, %v798_v3  ;;  %v4681_v17 = vcombine.low %v930_v5, %v934_v7  ;;  %v4644_v50 = vcombine.high %v891_v62, %v895_v63  ;;  %v751_v3 = vld [vmem:[#allocation7 + $0x138] sm:$0xff] }
 0x30c   :  { %2977 = vmatprep.subr.bf16.mxu1 %v4586_v18  ;;  %3016 = vmatprep.subr.bf16.mxu0 %v4594_v20  ;;  %v4538_v18 = vcombine.high %v786_v11, %v790_v12  ;;  %v4674_v20 = vcombine.high %v922_v13, %v926_v14  ;;  %v883_v5 = vld [vmem:[#allocation7 + $0x558] sm:$0xff] }
 0x30d   :  { %v887_v7 = vld [vmem:[#allocation7 + $0x578] sm:$0xff] }
 0x30f   :  { %2978 = vmatpush2.bf16.msra.mxu1 %v4585_v37  ;;  %3017 = vmatpush1.bf16.msra.mxu0 %v4593_v38  ;;  %v4537_v37 = vcombine.low %v786_v11, %v790_v12  ;;  %v4673_v38 = vcombine.low %v922_v13, %v926_v14  ;;  %v743_v11 = vld [vmem:[#allocation7 + $0xf8] sm:$0xff] }
 0x310   :  { %2979 = vmatprep.subr.bf16.mxu1 %v4578_v40  ;;  %3018 = vmatprep.subr.bf16.mxu0 %v4714_v41  ;;  %v4530_v40 = vcombine.high %v778_v22, %v782_v23  ;;  %v4666_v41 = vcombine.high %v914_v25, %v918_v34  ;;  %v875_v12 = vld [vmem:[#allocation7 + $0x518] sm:$0xff] }
 0x311   :  { %v879_v13 = vld [vmem:[#allocation7 + $0x538] sm:$0xff] }
 0x313   :  { %2980 = vmatpush2.bf16.msra.mxu1 %v4577_v51  ;;  %3019 = vmatpush2.bf16.msra.mxu0 %v4713_v29  ;;  %v4529_v51 = vcombine.low %v778_v22, %v782_v23  ;;  %v4665_v29 = vcombine.low %v914_v25, %v918_v34  ;;  %v735_v22 = vld [vmem:[#allocation7 + $0xb8] sm:$0xff]  ;;  %v4627_v34 = vcombine.low %v875_v12, %v879_v13 }
 0x314   :  { %2981 = vmatprep.subr.bf16.mxu1 %v4570_v52  ;;  %3020 = vmatprep.subr.bf16.mxu0 %v4706_v53  ;;  %v4658_v52 = vcombine.high %v906_v43, %v910_v45  ;;  %v4524_v53 = vcombine.high %v771_v47, %v775_v49  ;;  %v867_v23 = vld [vmem:[#allocation7 + $0x4d8] sm:$0xff] }
 0x317   :  { %2982 = vmatpush2.bf16.msra.mxu1 %v4569_v0  ;;  %3021 = vmatpush2.bf16.msra.mxu0 %v4705_v42  ;;  %v4657_v0 = vcombine.low %v906_v43, %v910_v45  ;;  %v4523_v42 = vcombine.low %v771_v47, %v775_v49  ;;  %v859_v43 = vld [vmem:[#allocation7 + $0x498] sm:$0xff] }
 0x318   :  { %2983 = vmatprep.subr.bf16.mxu1 %v4562_v58  ;;  %3022 = vmatprep.subr.bf16.mxu0 %v4698_v60  ;;  %v4516_v58 = vcombine.high %v763_v54, %v767_v56  ;;  %v4652_v60 = vcombine.high %v899_v61, %v903_v35  ;;  %v863_v45 = vld [vmem:[#allocation7 + $0x4b8] sm:$0xff] }
 0x31b   :  { %2984 = vmatpush2.bf16.msra.mxu1 %v4561_v4  ;;  %3023 = vmatpush2.bf16.msra.mxu0 %v4697_v6  ;;  %v4515_v4 = vcombine.low %v763_v54, %v767_v56  ;;  %v4651_v6 = vcombine.low %v899_v61, %v903_v35  ;;  %v851_v54 = vld [vmem:[#allocation7 + $0x458] sm:$0xff]  ;;  %v4611_v35 = vcombine.low %v859_v43, %v863_v45 }
 0x31c   :  { %2985 = vmatprep.subr.bf16.mxu1 %v4554_v8  ;;  %3024 = vmatprep.subr.bf16.mxu0 %v4690_v2  ;;  %v4508_v8 = vcombine.high %v755_v30, %v759_v33  ;;  %v747_v2 = vld [vmem:[#allocation7 + $0x118] sm:$0xff] }
 0x31d   :  { %v4499_v14 = vcombine.low %v747_v2, %v751_v3  ;;  %v855_v56 = vld [vmem:[#allocation7 + $0x478] sm:$0xff] }
 0x31f   :  { %2986 = vmatpush2.bf16.msra.mxu1 %v4553_v55  ;;  %3025 = vmatpush2.bf16.msra.mxu0 %v4689_v1  ;;  %v4507_v55 = vcombine.low %v755_v30, %v759_v33  ;;  %v4643_v1 = vcombine.low %v891_v62, %v895_v63  ;;  %v843_v30 = vld [vmem:[#allocation7 + $0x418] sm:$0xff]  ;;  %v4603_v63 = vcombine.low %v851_v54, %v855_v56 }
 0x320   :  { %2987 = vmatprep.subr.bf16.mxu1 %v4546_v9  ;;  %3026 = vmatprep.subr.bf16.mxu0 %v4682_v10  ;;  %v4500_v9 = vcombine.high %v747_v2, %v751_v3  ;;  %v4636_v10 = vcombine.high %v883_v5, %v887_v7  ;;  %v847_v33 = vld [vmem:[#allocation7 + $0x438] sm:$0xff] }
 0x321   :  { %v831_v2 = vld [vmem:[#allocation7 + $0x3b8] sm:$0xff] }
 0x322   :  { %v967_v3 = vld [vmem:[#allocation7 + $0x7f8] sm:$0xff] }
 0x323   :  { %2988 = vmatpush2.bf16.msra.mxu1 %v4545_v16  ;;  %3027 = vmatpush2.bf16.msra.mxu0 %v4681_v17  ;;  %v4635_v16 = vcombine.low %v883_v5, %v887_v7  ;;  %v4595_v7 = vcombine.low %v843_v30, %v847_v33 }
 0x324   :  { %2989 = vmatprep.subr.bf16.mxu1 %v4538_v18  ;;  %3028 = vmatprep.subr.bf16.mxu0 %v4674_v20  ;;  %v4628_v18 = vcombine.high %v875_v12, %v879_v13  ;;  %v731_v20 = vld [vmem:[#allocation7 + $0x98] sm:$0xff] }
 0x325   :  { %v4483_v47 = vcombine.low %v731_v20, %v735_v22 }
 0x327   :  { %2990 = vmatpush2.bf16.msra.mxu1 %v4537_v37  ;;  %3029 = vmatpush2.bf16.msra.mxu0 %v4673_v38  ;;  %v4484_v37 = vcombine.high %v731_v20, %v735_v22  ;;  %v947_v20 = vld [vmem:[#allocation7 + $0x758] sm:$0xff] }
 0x328   :  { %2991 = vmatprep.subr.bf16.mxu1 %v4530_v40  ;;  %3030 = vmatprep.subr.bf16.mxu0 %v4666_v41  ;;  %v723_v40 = vld [vmem:[#allocation7 + $0x58] sm:$0xff] }
 0x329   :  { %v727_v41 = vld [vmem:[#allocation7 + $0x78] sm:$0xff] }
 0x32a   :  { %v4475_v61 = vcombine.low %v723_v40, %v727_v41  ;;  %v951_v22 = vld [vmem:[#allocation7 + $0x778] sm:$0xff] }
 0x32b   :  { %2992 = vmatpush2.bf16.msra.mxu1 %v4529_v51  ;;  %3031 = vmatpush2.bf16.msra.mxu0 %v4665_v29  ;;  %v4476_v51 = vcombine.high %v723_v40, %v727_v41  ;;  %v4612_v29 = vcombine.high %v859_v43, %v863_v45  ;;  %v939_v40 = vld [vmem:[#allocation7 + $0x718] sm:$0xff]  ;;  %v4699_v45 = vcombine.low %v947_v20, %v951_v22 }
 0x32c   :  { %3032 = vmatprep.subr.bf16.mxu0 %v4658_v52  ;;  %3043 = vmatprep.subr.bf16.mxu1 %v4524_v53  ;;  %v715_v52 = vld [vmem:[#allocation7 + $0x18] sm:$0xff] }
 0x32d   :  { %v719_v53 = vld [vmem:[#allocation7 + $0x38] sm:$0xff] }
 0x32e   :  { %2994 = vmatmul.mubr.bf16.vlgmr.msra.gmra.mxu1 %v5621_v24  ;;  %v4467_v62 = vcombine.low %v715_v52, %v719_v53  ;;  %v943_v41 = vld [vmem:[#allocation7 + $0x738] sm:$0xff] }
 0x32f   :  { %3033 = vmatpush2.bf16.msra.mxu0 %v4657_v0  ;;  %3044 = vmatpush1.bf16.msra.mxu1 %v4523_v42  ;;  %v4468_v0 = vcombine.high %v715_v52, %v719_v53  ;;  %v4604_v42 = vcombine.high %v851_v54, %v855_v56  ;;  %v931_v52 = vld [vmem:[#allocation7 + $0x6d8] sm:$0xff]  ;;  %v4691_v56 = vcombine.low %v939_v40, %v943_v41 }
 0x330   :  { %3075 = vmatprep.mubr.bf16.mxu1 %v5619_v21  ;;  %3045 = vmatprep.subr.bf16.mxu1 %v4516_v58  ;;  %v739_v21 = vld [vmem:[#allocation7 + $0xd8] sm:$0xff] }
 0x331   :  { %3084 = vmatprep.subr.bf16.mxu0 %v4652_v60  ;;  %v4492_v17 = vcombine.high %v739_v21, %v743_v11  ;;  %v4491_v25 = vcombine.low %v739_v21, %v743_v11  ;;  %v835_v58 = vld [vmem:[#allocation7 + $0x3d8] sm:$0xff] }
 0x332   :  { %3035 = vmatmul.mubr.bf16.vlgmr.msra.gmra.mxu0 %v5639_v48  ;;  %v839_v60 = vld [vmem:[#allocation7 + $0x3f8] sm:$0xff] }
 0x333   :  { %3046 = vmatpush1.bf16.msra.mxu1 %v4515_v4  ;;  %3085 = vmatpush1.bf16.msra.mxu0 %v4651_v6  ;;  %v4588_v4 = vcombine.high %v835_v58, %v839_v60  ;;  %v4596_v6 = vcombine.high %v843_v30, %v847_v33  ;;  %v4587_v5 = vcombine.low %v835_v58, %v839_v60  ;;  %v955_v21 = vld [vmem:[#allocation7 + $0x798] sm:$0xff] }
 0x334   :  { %3116 = vmatprep.mubr.bf16.mxu0 %v5637_v46  ;;  %3047 = vmatprep.subr.bf16.mxu1 %v4508_v8  ;;  %v871_v46 = vld [vmem:[#allocation7 + $0x4f8] sm:$0xff] }
 0x335   :  { %3086 = vmatprep.subr.bf16.mxu0 %v4644_v50  ;;  %v4620_v38 = vcombine.high %v867_v23, %v871_v46  ;;  %v4619_v49 = vcombine.low %v867_v23, %v871_v46  ;;  %v827_v8 = vld [vmem:[#allocation7 + $0x398] sm:$0xff] }
 0x336   :  { %v963_v50 = vld [vmem:[#allocation7 + $0x7d8] sm:$0xff]  ;;  %v4579_v12 = vcombine.low %v827_v8, %v831_v2 }
 0x337   :  { %3048 = vmatpush1.bf16.msra.mxu1 %v4507_v55  ;;  %3087 = vmatpush1.bf16.msra.mxu0 %v4643_v1  ;;  %v4580_v55 = vcombine.high %v827_v8, %v831_v2  ;;  %v4716_v1 = vcombine.high %v963_v50, %v967_v3  ;;  %v959_v11 = vld [vmem:[#allocation7 + $0x7b8] sm:$0xff]  ;;  %v4715_v13 = vcombine.low %v963_v50, %v967_v3 }
 0x338   :  { %3049 = vmatprep.subr.bf16.mxu1 %v4500_v9  ;;  %3088 = vmatprep.subr.bf16.mxu0 %v4636_v10  ;;  %v819_v9 = vld [vmem:[#allocation7 + $0x358] sm:$0xff]  ;;  %v4707_v46 = vcombine.low %v955_v21, %v959_v11 }
 0x339   :  { %v823_v10 = vld [vmem:[#allocation7 + $0x378] sm:$0xff] }
 0x33a   :  { %v4571_v23 = vcombine.low %v819_v9, %v823_v10  ;;  %v935_v53 = vld [vmem:[#allocation7 + $0x6f8] sm:$0xff] }
 0x33b   :  { %3050 = vmatpush1.bf16.msra.mxu1 %v4499_v14  ;;  %3089 = vmatpush1.bf16.msra.mxu0 %v4635_v16  ;;  %v4572_v14 = vcombine.high %v819_v9, %v823_v10  ;;  %v4708_v16 = vcombine.high %v955_v21, %v959_v11  ;;  %v923_v58 = vld [vmem:[#allocation7 + $0x698] sm:$0xff]  ;;  %v4683_v33 = vcombine.low %v931_v52, %v935_v53 }
 0x33c   :  { %3051 = vmatprep.subr.bf16.mxu1 %v4492_v17  ;;  %3090 = vmatprep.subr.bf16.mxu0 %v4628_v18  ;;  %v811_v17 = vld [vmem:[#allocation7 + $0x318] sm:$0xff] }
 0x33d   :  { %v815_v18 = vld [vmem:[#allocation7 + $0x338] sm:$0xff] }
 0x33e   :  { %v4563_v43 = vcombine.low %v811_v17, %v815_v18  ;;  %v927_v60 = vld [vmem:[#allocation7 + $0x6b8] sm:$0xff] }
 0x33f   :  { %3052 = vmatpush1.bf16.msra.mxu1 %v4491_v25  ;;  %3091 = vmatpush1.bf16.msra.mxu0 %v4627_v34  ;;  %v4564_v25 = vcombine.high %v811_v17, %v815_v18  ;;  %v4700_v34 = vcombine.high %v947_v20, %v951_v22  ;;  %v915_v8 = vld [vmem:[#allocation7 + $0x658] sm:$0xff]  ;;  %v4675_v3 = vcombine.low %v923_v58, %v927_v60  ;;  %v4986_v18 = vld [vmem:[#allocation10 + $0x60] ss:$8 sps:$4 sm:$0xff]  }
 0x340   :  { %3053 = vmatprep.subr.bf16.mxu1 %v4484_v37  ;;  %3092 = vmatprep.subr.bf16.mxu0 %v4620_v38  ;;  %v803_v37 = vld [vmem:[#allocation7 + $0x2d8] sm:$0xff] }
 0x341   :  { %v807_v38 = vld [vmem:[#allocation7 + $0x2f8] sm:$0xff] }
 0x342   :  { %v4555_v54 = vcombine.low %v803_v37, %v807_v38  ;;  %v919_v2 = vld [vmem:[#allocation7 + $0x678] sm:$0xff] }
 0x343   :  { %3054 = vmatpush1.bf16.msra.mxu1 %v4483_v47  ;;  %3093 = vmatpush1.bf16.msra.mxu0 %v4619_v49  ;;  %v4556_v47 = vcombine.high %v803_v37, %v807_v38  ;;  %v4692_v49 = vcombine.high %v939_v40, %v943_v41  ;;  %v4667_v10 = vcombine.low %v915_v8, %v919_v2  ;;  %v4985_v11 = vld [vmem:[#allocation10 + $0x74] ss:$8 sps:$4 sm:$0xff]   ;;  %v4998_v20 = vld [vmem:[#allocation10 + $0x170] ss:$8 sps:$4 sm:$0xff]   ;;  %v5004_v41 = vld [vmem:[#allocation10 + $0x160] ss:$8 sps:$4 sm:$0xff]  }
 0x344   :  { %3055 = vmatprep.subr.bf16.mxu1 %v4476_v51  ;;  %3094 = vmatprep.subr.bf16.mxu0 %v4612_v29  ;;  %v795_v51 = vld [vmem:[#allocation7 + $0x298] sm:$0xff] }
 0x345   :  { %v799_v29 = vld [vmem:[#allocation7 + $0x2b8] sm:$0xff] }
 0x346   :  { %v4547_v30 = vcombine.low %v795_v51, %v799_v29  ;;  %v4989_v40 = vld [vmem:[#allocation10 + $0x50] ss:$8 sps:$4 sm:$0xff]  }
 0x347   :  { %3056 = vmatpush1.bf16.msra.mxu1 %v4475_v61  ;;  %3095 = vmatpush1.bf16.msra.mxu0 %v4611_v35  ;;  %v4548_v61 = vcombine.high %v795_v51, %v799_v29  ;;  %v4684_v35 = vcombine.high %v931_v52, %v935_v53  ;;  %v4992_v52 = vld [vmem:[#allocation10 + $0x40] ss:$8 sps:$4 sm:$0xff]  }
 0x348   :  { %3057 = vmatprep.subr.bf16.mxu1 %v4468_v0  ;;  %3096 = vmatprep.subr.bf16.mxu0 %v4604_v42  ;;  %v787_v0 = vld [vmem:[#allocation7 + $0x258] sm:$0xff] }
 0x349   :  { %v791_v42 = vld [vmem:[#allocation7 + $0x278] sm:$0xff] }
 0x34a   :  { %v4539_v50 = vcombine.low %v787_v0, %v791_v42 }
 0x34b   :  { %3058 = vmatpush1.bf16.msra.mxu1 %v4467_v62  ;;  %3097 = vmatpush1.bf16.msra.mxu0 %v4603_v63  ;;  %v4540_v62 = vcombine.high %v787_v0, %v791_v42  ;;  %v4676_v63 = vcombine.high %v923_v58, %v927_v60  ;;  %v5003_v42 = vld [vmem:[#allocation10 + $0x24] ss:$8 sps:$4 sm:$0xff]   ;;  %v5016_v58 = vld [vmem:[#allocation10 + $0x140] ss:$8 sps:$4 sm:$0xff]  }
 0x34c   :  { %3059 = vmatprep.subr.bf16.mxu1 %v4588_v4  ;;  %3098 = vmatprep.subr.bf16.mxu0 %v4596_v6  ;;  %v779_v4 = vld [vmem:[#allocation7 + $0x218] sm:$0xff] }
 0x34d   :  { %v783_v6 = vld [vmem:[#allocation7 + $0x238] sm:$0xff] }
 0x34e   :  { %v4531_v9 = vcombine.low %v779_v4, %v783_v6 }
 0x34f   :  { %3060 = vmatpush2.bf16.msra.mxu1 %v4587_v5  ;;  %3099 = vmatpush1.bf16.msra.mxu0 %v4595_v7  ;;  %v4532_v5 = vcombine.high %v779_v4, %v783_v6  ;;  %v4668_v7 = vcombine.high %v915_v8, %v919_v2  ;;  %v5030_v4 = vld [vmem:[#allocation10 + $0x124] ss:$8 sps:$4 sm:$0xff]   ;;  %v5007_v6 = vld [vmem:[#allocation10 + $0x10] ss:$8 sps:$4 sm:$0xff]   ;;  %v5028_v2 = vld [vmem:[#allocation10 + $0x120] ss:$8 sps:$4 sm:$0xff]  }
 0x350   :  { %3061 = vmatprep.subr.bf16.mxu1 %v4580_v55  ;;  %3100 = vmatprep.subr.bf16.mxu0 %v4716_v1  ;;  %v907_v55 = vld [vmem:[#allocation7 + $0x618] sm:$0xff]  ;;  %v5015_v8 = vld [vmem:[#allocation10 + $0x4] ss:$8 sps:$4 sm:$0xff]  }
 0x351   :  { %v911_v1 = vld [vmem:[#allocation7 + $0x638] sm:$0xff] }
 0x352   :  { %v4660_v21 = vcombine.high %v907_v55, %v911_v1 }
 0x353   :  { %3062 = vmatpush2.bf16.msra.mxu1 %v4579_v12  ;;  %3101 = vmatpush2.bf16.msra.mxu0 %v4715_v13  ;;  %v4659_v12 = vcombine.low %v907_v55, %v911_v1  ;;  %v4983_v13 = vld [vmem:[#allocation10 + $0x70] ss:$8 sps:$4 sm:$0xff]   ;;  %v5042_v55 = vld [vmem:[#allocation10 + $0x104] ss:$8 sps:$4 sm:$0xff]  }
 0x354   :  { %3063 = vmatprep.subr.bf16.mxu1 %v4572_v14  ;;  %3102 = vmatprep.subr.bf16.mxu0 %v4708_v16  ;;  %v4988_v14 = vld [vmem:[#allocation10 + $0x64] ss:$8 sps:$4 sm:$0xff]   ;;  %v5000_v16 = vld [vmem:[#allocation10 + $0x174] ss:$8 sps:$4 sm:$0xff]   ;;  %v5019_v1 = vld [vmem:[#allocation10 + $0xf0] ss:$8 sps:$4 sm:$0xff]  }
 0x357   :  { %3064 = vmatpush2.bf16.msra.mxu1 %v4571_v23  ;;  %3103 = vmatpush2.bf16.msra.mxu0 %v4707_v46  ;;  %v4991_v23 = vld [vmem:[#allocation10 + $0x54] ss:$8 sps:$4 sm:$0xff]   ;;  %v5006_v46 = vld [vmem:[#allocation10 + $0x164] ss:$8 sps:$4 sm:$0xff]  }
 0x358   :  { %3065 = vmatprep.subr.bf16.mxu1 %v4564_v25  ;;  %3104 = vmatprep.subr.bf16.mxu0 %v4700_v34 }
 0x35b   :  { %3066 = vmatpush2.bf16.msra.mxu1 %v4563_v43  ;;  %3105 = vmatpush2.bf16.msra.mxu0 %v4699_v45 }
 0x35c   :  { %3067 = vmatprep.subr.bf16.mxu1 %v4556_v47  ;;  %3106 = vmatprep.subr.bf16.mxu0 %v4692_v49  ;;  %v5012_v47 = vld [vmem:[#allocation10 + $0x154] ss:$8 sps:$4 sm:$0xff]  }
 0x35f   :  { %3068 = vmatpush2.bf16.msra.mxu1 %v4555_v54  ;;  %3107 = vmatpush2.bf16.msra.mxu0 %v4691_v56  ;;  %v4997_v54 = vld [vmem:[#allocation10 + $0x34] ss:$8 sps:$4 sm:$0xff]   ;;  %v5018_v56 = vld [vmem:[#allocation10 + $0x144] ss:$8 sps:$4 sm:$0xff]  }
 0x360   :  { %3069 = vmatprep.subr.bf16.mxu1 %v4548_v61  ;;  %3108 = vmatprep.subr.bf16.mxu0 %v4684_v35  ;;  %v4995_v35 = vld [vmem:[#allocation10 + $0x30] ss:$8 sps:$4 sm:$0xff]  }
 0x363   :  { %3070 = vmatpush2.bf16.msra.mxu1 %v4547_v30  ;;  %3109 = vmatpush2.bf16.msra.mxu0 %v4683_v33  ;;  %v5024_v30 = vld [vmem:[#allocation10 + $0x134] ss:$8 sps:$4 sm:$0xff]   ;;  %v5001_v33 = vld [vmem:[#allocation10 + $0x20] ss:$8 sps:$4 sm:$0xff]  }
 0x364   :  { %3071 = vmatprep.subr.bf16.mxu1 %v4540_v62  ;;  %3110 = vmatprep.subr.bf16.mxu0 %v4676_v63  ;;  %v5009_v62 = vld [vmem:[#allocation10 + $0x14] ss:$8 sps:$4 sm:$0xff]   ;;  %v5022_v63 = vld [vmem:[#allocation10 + $0x130] ss:$8 sps:$4 sm:$0xff]  }
 0x367   :  { %3072 = vmatpush2.bf16.msra.mxu1 %v4539_v50  ;;  %3111 = vmatpush2.bf16.msra.mxu0 %v4675_v3  ;;  %v5036_v50 = vld [vmem:[#allocation10 + $0x114] ss:$8 sps:$4 sm:$0xff]   ;;  %v5013_v3 = vld [vmem:[#allocation10] ss:$8 sps:$4 sm:$0xff]  }
 0x368   :  { %3073 = vmatprep.subr.bf16.mxu1 %v4532_v5  ;;  %3112 = vmatprep.subr.bf16.mxu0 %v4668_v7  ;;  %v5021_v5 = vld [vmem:[#allocation10 + $0xf4] ss:$8 sps:$4 sm:$0xff]   ;;  %v5034_v7 = vld [vmem:[#allocation10 + $0x110] ss:$8 sps:$4 sm:$0xff]  }
 0x36b   :  { %3074 = vmatpush2.bf16.msra.mxu1 %v4531_v9  ;;  %3113 = vmatpush2.bf16.msra.mxu0 %v4667_v10  ;;  %v5027_v9 = vld [vmem:[#allocation10 + $0xe4] ss:$8 sps:$4 sm:$0xff]   ;;  %v5040_v10 = vld [vmem:[#allocation10 + $0x100] ss:$8 sps:$4 sm:$0xff]  }
 0x36c   :  { %3114 = vmatprep.subr.bf16.mxu0 %v4660_v21  ;;  %3979 = vmatprep.subr.bf16.mxu1 %v4985_v11  ;;  %v5048_v21 = vld [vmem:[#allocation10 + $0x1f4] ss:$8 sps:$4 sm:$0xff]   ;;  %v5025_v11 = vld [vmem:[#allocation10 + $0xe0] ss:$8 sps:$4 sm:$0xff]  }
 0x36e   :  { %3076 = vmatmul.mubr.bf16.vlgmr.msra.gmra.mxu1 %v5621_v24  ;;  %v5660_v17 = vpop.f32.mrf.mxu1  ;;  %v5668_v24 = vld [vmem:[%s5724_s13] sm:$0xff] }
 0x36f   :  { %3115 = vmatpush2.bf16.msra.mxu0 %v4659_v12  ;;  %3980 = vmatpush1.bf16.msra.mxu1 %v4983_v13  ;;  %v3134_v38 = vrot.slane %v5668_v24, %v5533_v31  ;;  %v5033_v12 = vld [vmem:[#allocation10 + $0xd4] ss:$8 sps:$4 sm:$0xff]   ;;  %v5046_v13 = vld [vmem:[#allocation10 + $0x1f0] ss:$8 sps:$4 sm:$0xff]  }
 0x370   :  { %v2833_v22 = vpop.f32.mrf.mxu1  ;;  %3981 = vmatprep.subr.bf16.mxu1 %v4988_v14  ;;  %4020 = vmatprep.subr.bf16.mxu0 %v5000_v16  ;;  %v5054_v14 = vld [vmem:[#allocation10 + $0x1e4] ss:$8 sps:$4 sm:$0xff]   ;;  %v5031_v16 = vld [vmem:[#allocation10 + $0xd0] ss:$8 sps:$4 sm:$0xff]  }
 0x371   :  { %v2834_v37 = vadd.f32 %v2833_v22, %v5623_v26  ;;  %v5010_v26 = vld [vmem:[#allocation10 + $0x150] ss:$8 sps:$4 sm:$0xff]   ;;  %v5060_v22 = vld [vmem:[#allocation10 + $0x1d4] ss:$8 sps:$4 sm:$0xff]  }
 0x372   :  { %3117 = vmatmul.mubr.bf16.vlgmr.msra.gmra.mxu0 %v5639_v48  ;;  %v2835_v25 = vpop.f32.mrf.mxu1  ;;  %v5663_v34 = vpop.f32.mrf.mxu0  ;;  %v4994_v48 = vld [vmem:[#allocation10 + $0x44] ss:$8 sps:$4 sm:$0xff]  }
 0x373   :  { %3982 = vmatpush1.bf16.msra.mxu1 %v4986_v18  ;;  %4021 = vmatpush1.bf16.msra.mxu0 %v4998_v20  ;;  %v5039_v18 = vld [vmem:[#allocation10 + $0xc4] ss:$8 sps:$4 sm:$0xff]   ;;  %v5052_v20 = vld [vmem:[#allocation10 + $0x1e0] ss:$8 sps:$4 sm:$0xff]   ;;  %v5058_v25 = vld [vmem:[#allocation10 + $0x1d0] ss:$8 sps:$4 sm:$0xff]  }
 0x374   :  { %v2836_v43 = vpop.f32.mrf.mxu1  ;;  %v2874_v45 = vpop.f32.mrf.mxu0  ;;  %3983 = vmatprep.subr.bf16.mxu1 %v4991_v23  ;;  %4022 = vmatprep.subr.bf16.mxu0 %v5006_v46  ;;  %v5037_v23 = vld [vmem:[#allocation10 + $0xc0] ss:$8 sps:$4 sm:$0xff]   ;;  %v5045_v46 = vld [vmem:[#allocation10 + $0xb4] ss:$8 sps:$4 sm:$0xff]  }
 0x375   :  { %v2875_v49 = vadd.f32 %v2874_v45, %v2834_v37  ;;  %v5066_v37 = vld [vmem:[#allocation10 + $0x1c4] ss:$8 sps:$4 sm:$0xff]   ;;  %v3130_v43 = vrot.slane %v5668_v24, %v5536_v32 }
 0x376   :  { %v2876_v51 = vpop.f32.mrf.mxu0  ;;  %v5051_v45 = vld [vmem:[#allocation10 + $0xa4] ss:$8 sps:$4 sm:$0xff]  }
 0x377   :  { %v3168_v29 = vadd.f32 %v3134_v38, %v2875_v49  ;;  %3984 = vmatpush1.bf16.msra.mxu1 %v4989_v40  ;;  %4023 = vmatpush1.bf16.msra.mxu0 %v5004_v41  ;;  %v2832_v38 = vadd.f32 %v5660_v17, %v5617_v19  ;;  %v5043_v40 = vld [vmem:[#allocation10 + $0xb0] ss:$8 sps:$4 sm:$0xff]   ;;  %v5049_v49 = vld [vmem:[#allocation10 + $0xa0] ss:$8 sps:$4 sm:$0xff]   ;;  %v5072_v17 = vld [vmem:[#allocation10 + $0x1a4] ss:$8 sps:$4 sm:$0xff]  }
 0x378   :  { %v2877_v53 = vpop.f32.mrf.mxu0  ;;  %3985 = vmatprep.subr.bf16.mxu1 %v4994_v48  ;;  %4024 = vmatprep.subr.bf16.mxu0 %v5012_v47  ;;  %v5064_v48 = vld [vmem:[#allocation10 + $0x1c0] ss:$8 sps:$4 sm:$0xff]   ;;  %v5069_v47 = vld [vmem:[#allocation10 + $0x1b4] ss:$8 sps:$4 sm:$0xff]   ;;  %v5067_v19 = vld [vmem:[#allocation10 + $0x1b0] ss:$8 sps:$4 sm:$0xff]  }
 0x379   :  { %v3176_v61 = vmul.f32 0.2, %v3168_v29  ;;  %v2873_v41 = vadd.f32 %v5663_v34, %v2832_v38  ;;  %v5055_v34 = vld [vmem:[#allocation10 + $0x90] ss:$8 sps:$4 sm:$0xff]   ;;  %v5070_v53 = vld [vmem:[#allocation10 + $0x1a0] ss:$8 sps:$4 sm:$0xff]  }
 0x37b   :  { %3986 = vmatpush1.bf16.msra.mxu1 %v4992_v52  ;;  %v3184_v0 = vmax.f32 %v3168_v29, %v3176_v61  ;;  %4025 = vmatpush1.bf16.msra.mxu0 %v5010_v26  ;;  %v3167_v51 = vadd.f32 %v3130_v43, %v2873_v41  ;;  %v5057_v29 = vld [vmem:[#allocation10 + $0x94] ss:$8 sps:$4 sm:$0xff]   ;;  %v5063_v26 = vld [vmem:[#allocation10 + $0x84] ss:$8 sps:$4 sm:$0xff]  }
 0x37c   :  { %3987 = vmatprep.subr.bf16.mxu1 %v4997_v54  ;;  %4026 = vmatprep.subr.bf16.mxu0 %v5018_v56  ;;  %v5075_v54 = vld [vmem:[#allocation10 + $0x194] ss:$8 sps:$4 sm:$0xff]   ;;  %v5061_v56 = vld [vmem:[#allocation10 + $0x80] ss:$8 sps:$4 sm:$0xff]   ;;  %v5132_v43 = vld [vmem:[#allocation10 + $0x364] ss:$8 sps:$4 sm:$0xff]  }
 0x37d   :  { %v3192_v60 = vpack.c.bf16 %v3184_v0, %v3184_v0  ;;  %v3175_v52 = vmul.f32 0.2, %v3167_v51  ;;  %v5081_v0 = vld [vmem:[#allocation10 + $0x274] ss:$8 sps:$4 sm:$0xff]  }
 0x37f   :  { %3988 = vmatpush1.bf16.msra.mxu1 %v4995_v35  ;;  %4011 = vmatprep.mubr.bf16.mxu1 %v3192_v60  ;;  %v3183_v61 = vmax.f32 %v3167_v51, %v3175_v52  ;;  %v5073_v35 = vld [vmem:[#allocation10 + $0x190] ss:$8 sps:$4 sm:$0xff]   ;;  %v5105_v52 = vld [vmem:[#allocation10 + $0x2f4] ss:$8 sps:$4 sm:$0xff]  }
 0x380   :  { %3989 = vmatprep.subr.bf16.mxu1 %v5003_v42  ;;  %4027 = vmatpush1.bf16.msra.mxu0 %v5016_v58  ;;  %v5078_v42 = vld [vmem:[#allocation10 + $0x184] ss:$8 sps:$4 sm:$0xff]   ;;  %v5079_v58 = vld [vmem:[#allocation10 + $0x270] ss:$8 sps:$4 sm:$0xff]  }
 0x381   :  { %4028 = vmatprep.subr.bf16.mxu0 %v5024_v30  ;;  %v3191_v60 = vpack.c.bf16 %v3183_v61, %v3183_v61  ;;  %v5076_v30 = vld [vmem:[#allocation10 + $0x180] ss:$8 sps:$4 sm:$0xff]   ;;  %v5097_v51 = vld [vmem:[#allocation10 + $0x210] ss:$8 sps:$4 sm:$0xff]  }
 0x382   :  { %v5139_v61 = vld [vmem:[#allocation10 + $0x330] ss:$8 sps:$4 sm:$0xff]  }
 0x383   :  { %3990 = vmatpush1.bf16.msra.mxu1 %v5001_v33  ;;  %v5084_v33 = vld [vmem:[#allocation10 + $0x264] ss:$8 sps:$4 sm:$0xff]  }
 0x384   :  { %3991 = vmatprep.subr.bf16.mxu1 %v5009_v62  ;;  %4029 = vmatpush1.bf16.msra.mxu0 %v5022_v63  ;;  %v5129_v62 = vld [vmem:[#allocation10 + $0x374] ss:$8 sps:$4 sm:$0xff]  }
 0x385   :  { %4030 = vmatprep.subr.bf16.mxu0 %v5030_v4  ;;  %v3141_v4 = vsub.s32 3, %v5530_v28 }
 0x387   :  { %3992 = vmatpush1.bf16.msra.mxu1 %v5007_v6  ;;  %v5082_v6 = vld [vmem:[#allocation10 + $0x260] ss:$8 sps:$4 sm:$0xff]  }
 0x388   :  { %3993 = vmatprep.subr.bf16.mxu1 %v5015_v8  ;;  %4031 = vmatpush1.bf16.msra.mxu0 %v5028_v2  ;;  %v5087_v2 = vld [vmem:[#allocation10 + $0x254] ss:$8 sps:$4 sm:$0xff]  }
 0x389   :  { %4032 = vmatprep.subr.bf16.mxu0 %v5036_v50 }
 0x38b   :  { %3994 = vmatpush1.bf16.msra.mxu1 %v5013_v3  ;;  %v3138_v3 = vrot.slane %v5668_v24, %v225_v36  ;;  %v5088_v36 = vld [vmem:[#allocation10 + $0x240] ss:$8 sps:$4 sm:$0xff]  }
 0x38c   :  { %3995 = vmatprep.subr.bf16.mxu1 %v5021_v5  ;;  %4033 = vmatpush1.bf16.msra.mxu0 %v5034_v7 }
 0x38d   :  { %4034 = vmatprep.subr.bf16.mxu0 %v5042_v55 }
 0x38f   :  { %3996 = vmatpush2.bf16.msra.mxu1 %v5019_v1 }
 0x390   :  { %3997 = vmatprep.subr.bf16.mxu1 %v5027_v9  ;;  %4035 = vmatpush1.bf16.msra.mxu0 %v5040_v10  ;;  %v3142_v9 = vrot.slane %v5668_v24, %v3141_v4  ;;  %v5085_v10 = vld [vmem:[#allocation10 + $0x250] ss:$8 sps:$4 sm:$0xff]   ;;  %v5112_v4 = vld [vmem:[#allocation10 + $0x2c0] ss:$8 sps:$4 sm:$0xff]  }
 0x391   :  { %4036 = vmatprep.subr.bf16.mxu0 %v5048_v21 }
 0x393   :  { %3998 = vmatpush2.bf16.msra.mxu1 %v5025_v11 }
 0x394   :  { %3999 = vmatprep.subr.bf16.mxu1 %v5033_v12  ;;  %4037 = vmatpush2.bf16.msra.mxu0 %v5046_v13  ;;  %v5090_v12 = vld [vmem:[#allocation10 + $0x244] ss:$8 sps:$4 sm:$0xff]  }
 0x395   :  { %4038 = vmatprep.subr.bf16.mxu0 %v5054_v14 }
 0x397   :  { %4000 = vmatpush2.bf16.msra.mxu1 %v5031_v16 }
 0x398   :  { %4001 = vmatprep.subr.bf16.mxu1 %v5039_v18  ;;  %4039 = vmatpush2.bf16.msra.mxu0 %v5052_v20 }
 0x399   :  { %4040 = vmatprep.subr.bf16.mxu0 %v5060_v22  ;;  %v5093_v22 = vld [vmem:[#allocation10 + $0x234] ss:$8 sps:$4 sm:$0xff]  }
 0x39b   :  { %4002 = vmatpush2.bf16.msra.mxu1 %v5037_v23 }
 0x39c   :  { %4003 = vmatprep.subr.bf16.mxu1 %v5045_v46  ;;  %4041 = vmatpush2.bf16.msra.mxu0 %v5058_v25  ;;  %v5091_v25 = vld [vmem:[#allocation10 + $0x230] ss:$8 sps:$4 sm:$0xff]  }
 0x39d   :  { %4042 = vmatprep.subr.bf16.mxu0 %v5066_v37  ;;  %v5096_v37 = vld [vmem:[#allocation10 + $0x224] ss:$8 sps:$4 sm:$0xff]  }
 0x39f   :  { %4004 = vmatpush2.bf16.msra.mxu1 %v5043_v40  ;;  %v5127_v40 = vld [vmem:[#allocation10 + $0x370] ss:$8 sps:$4 sm:$0xff]  }
 0x3a0   :  { %4005 = vmatprep.subr.bf16.mxu1 %v5051_v45  ;;  %4043 = vmatpush2.bf16.msra.mxu0 %v5064_v48  ;;  %v5094_v45 = vld [vmem:[#allocation10 + $0x220] ss:$8 sps:$4 sm:$0xff]   ;;  %v5099_v48 = vld [vmem:[#allocation10 + $0x214] ss:$8 sps:$4 sm:$0xff]  }
 0x3a1   :  { %4044 = vmatprep.subr.bf16.mxu0 %v5069_v47  ;;  %v5130_v47 = vld [vmem:[#allocation10 + $0x360] ss:$8 sps:$4 sm:$0xff]  }
 0x3a3   :  { %4006 = vmatpush2.bf16.msra.mxu1 %v5049_v49  ;;  %v5135_v49 = vld [vmem:[#allocation10 + $0x354] ss:$8 sps:$4 sm:$0xff]  }
 0x3a4   :  { %4007 = vmatprep.subr.bf16.mxu1 %v5057_v29  ;;  %4045 = vmatpush2.bf16.msra.mxu0 %v5067_v19  ;;  %v5102_v29 = vld [vmem:[#allocation10 + $0x204] ss:$8 sps:$4 sm:$0xff]   ;;  %v5133_v19 = vld [vmem:[#allocation10 + $0x350] ss:$8 sps:$4 sm:$0xff]  }
 0x3a5   :  { %4046 = vmatprep.subr.bf16.mxu0 %v5072_v17  ;;  %v5138_v17 = vld [vmem:[#allocation10 + $0x344] ss:$8 sps:$4 sm:$0xff]  }
 0x3a7   :  { %4008 = vmatpush2.bf16.msra.mxu1 %v5055_v34  ;;  %v5100_v34 = vld [vmem:[#allocation10 + $0x200] ss:$8 sps:$4 sm:$0xff]  }
 0x3a8   :  { %4009 = vmatprep.subr.bf16.mxu1 %v5063_v26  ;;  %4047 = vmatpush2.bf16.msra.mxu0 %v5070_v53  ;;  %v5136_v26 = vld [vmem:[#allocation10 + $0x340] ss:$8 sps:$4 sm:$0xff]   ;;  %v5141_v53 = vld [vmem:[#allocation10 + $0x334] ss:$8 sps:$4 sm:$0xff]  }
 0x3a9   :  { %4048 = vmatprep.subr.bf16.mxu0 %v5075_v54  ;;  %v5103_v54 = vld [vmem:[#allocation10 + $0x2f0] ss:$8 sps:$4 sm:$0xff]  }
 0x3ab   :  { %4010 = vmatpush2.bf16.msra.mxu1 %v5061_v56  ;;  %v5108_v56 = vld [vmem:[#allocation10 + $0x2e4] ss:$8 sps:$4 sm:$0xff]  }
 0x3ac   :  { %4049 = vmatpush2.bf16.msra.mxu0 %v5073_v35  ;;  %4061 = vmatprep.subr.bf16.mxu1 %v5081_v0  ;;  %v5144_v35 = vld [vmem:[#allocation10 + $0x324] ss:$8 sps:$4 sm:$0xff]   ;;  %v5106_v0 = vld [vmem:[#allocation10 + $0x2e0] ss:$8 sps:$4 sm:$0xff]  }
 0x3ad   :  { %4050 = vmatprep.subr.bf16.mxu0 %v5078_v42  ;;  %v5111_v42 = vld [vmem:[#allocation10 + $0x2d4] ss:$8 sps:$4 sm:$0xff]  }
 0x3ae   :  { %v2913_v63 = vpop.f32.mrf.mxu1  ;;  %4012 = vmatmul.mubr.bf16.vlgmr.msra.gmra.mxu1 %v3191_v60  ;;  %v5147_v60 = vld [vmem:[#allocation10 + $0x314] ss:$8 sps:$4 sm:$0xff]  }
 0x3af   :  { %4062 = vmatpush1.bf16.msra.mxu1 %v5079_v58  ;;  %v2914_v50 = vadd.f32 %v2913_v63, %v5611_v39  ;;  %v5142_v58 = vld [vmem:[#allocation10 + $0x320] ss:$8 sps:$4 sm:$0xff]   ;;  %v5150_v63 = vld [vmem:[#allocation10 + $0x304] ss:$8 sps:$4 sm:$0xff]  }
 0x3b0   :  { %v2915_v8 = vpop.f32.mrf.mxu1  ;;  %4051 = vmatpush2.bf16.msra.mxu0 %v5076_v30  ;;  %4063 = vmatprep.subr.bf16.mxu1 %v5084_v33  ;;  %v5109_v30 = vld [vmem:[#allocation10 + $0x2d0] ss:$8 sps:$4 sm:$0xff]   ;;  %v5114_v33 = vld [vmem:[#allocation10 + $0x2c4] ss:$8 sps:$4 sm:$0xff]  }
 0x3b1   :  { %4102 = vmatprep.subr.bf16.mxu0 %v5129_v62  ;;  %v2916_v55 = vadd.f32 %v2915_v8, %v5613_v44  ;;  %v5145_v62 = vld [vmem:[#allocation10 + $0x310] ss:$8 sps:$4 sm:$0xff]   ;;  %v5148_v8 = vld [vmem:[#allocation10 + $0x300] ss:$8 sps:$4 sm:$0xff]  }
 0x3b2   :  { %v2917_v5 = vpop.f32.mrf.mxu1  ;;  %v2954_v7 = vpop.f32.mrf.mxu0 }
 0x3b3   :  { %v2955_v1 = vadd.f32 %v2954_v7, %v2914_v50  ;;  %4064 = vmatpush1.bf16.msra.mxu1 %v5082_v6  ;;  %v5117_v6 = vld [vmem:[#allocation10 + $0x2b4] ss:$8 sps:$4 sm:$0xff]   ;;  %v5115_v50 = vld [vmem:[#allocation10 + $0x2b0] ss:$8 sps:$4 sm:$0xff]   ;;  %v5156_v7 = vld [vmem:[#allocation10 + $0x3e4] ss:$8 sps:$4 sm:$0xff]  }
 0x3b4   :  { %v2918_v21 = vpop.f32.mrf.mxu1  ;;  %v2956_v11 = vpop.f32.mrf.mxu0  ;;  %4065 = vmatprep.subr.bf16.mxu1 %v5087_v2  ;;  %v5153_v2 = vld [vmem:[#allocation10 + $0x3f4] ss:$8 sps:$4 sm:$0xff]   ;;  %v5151_v5 = vld [vmem:[#allocation10 + $0x3f0] ss:$8 sps:$4 sm:$0xff]  }
 0x3b5   :  { %v3169_v13 = vadd.f32 %v3138_v3, %v2955_v1  ;;  %v2957_v39 = vadd.f32 %v2956_v11, %v2916_v55  ;;  %v5120_v3 = vld [vmem:[#allocation10 + $0x2a4] ss:$8 sps:$4 sm:$0xff]   ;;  %v5118_v55 = vld [vmem:[#allocation10 + $0x2a0] ss:$8 sps:$4 sm:$0xff]   ;;  %v5123_v1 = vld [vmem:[#allocation10 + $0x294] ss:$8 sps:$4 sm:$0xff]  }
 0x3b6   :  { %v2958_v14 = vpop.f32.mrf.mxu0  ;;  %v5121_v21 = vld [vmem:[#allocation10 + $0x290] ss:$8 sps:$4 sm:$0xff]   ;;  %v5126_v11 = vld [vmem:[#allocation10 + $0x284] ss:$8 sps:$4 sm:$0xff]  }
 0x3b7   :  { %v3177_v16 = vmul.f32 0.2, %v3169_v13  ;;  %v3170_v18 = vadd.f32 %v3142_v9, %v2957_v39  ;;  %4066 = vmatpush1.bf16.msra.mxu1 %v5085_v10  ;;  %v5154_v9 = vld [vmem:[#allocation10 + $0x3e0] ss:$8 sps:$4 sm:$0xff]   ;;  %v5159_v10 = vld [vmem:[#allocation10 + $0x3d4] ss:$8 sps:$4 sm:$0xff]  }
 0x3b8   :  { %v2959_v20 = vpop.f32.mrf.mxu0  ;;  %4067 = vmatprep.subr.bf16.mxu1 %v5090_v12  ;;  %v5157_v12 = vld [vmem:[#allocation10 + $0x3d0] ss:$8 sps:$4 sm:$0xff]   ;;  %v5124_v39 = vld [vmem:[#allocation10 + $0x280] ss:$8 sps:$4 sm:$0xff]  }
 0x3b9   :  { %v3178_v44 = vmul.f32 0.2, %v3170_v18  ;;  %v3185_v23 = vmax.f32 %v3169_v13, %v3177_v16  ;;  %v5162_v13 = vld [vmem:[#allocation10 + $0x3c4] ss:$8 sps:$4 sm:$0xff]   ;;  %v5160_v14 = vld [vmem:[#allocation10 + $0x3c0] ss:$8 sps:$4 sm:$0xff]  }
 0x3ba   :  { %v5165_v16 = vld [vmem:[#allocation10 + $0x3b4] ss:$8 sps:$4 sm:$0xff]  }
 0x3bb   :  { %v3186_v46 = vmax.f32 %v3170_v18, %v3178_v44  ;;  %4068 = vmatpush1.bf16.msra.mxu1 %v5088_v36  ;;  %v3193_v41 = vpack.c.bf16 %v3185_v23, %v3185_v23  ;;  %v3145_v18 = vsub.s32 4, %v5530_v28  ;;  %v5163_v36 = vld [vmem:[#allocation10 + $0x3b0] ss:$8 sps:$4 sm:$0xff]   ;;  %v3149_v44 = vsub.s32 5, %v5530_v28 }
 0x3bc   :  { %4069 = vmatprep.subr.bf16.mxu1 %v5093_v22  ;;  %v5168_v22 = vld [vmem:[#allocation10 + $0x3a4] ss:$8 sps:$4 sm:$0xff]  }
 0x3bd   :  { %v3194_v38 = vpack.c.bf16 %v3186_v46, %v3186_v46 }
 0x3bf   :  { %4052 = vmatprep.mubr.bf16.mxu0 %v3194_v38  ;;  %4070 = vmatpush1.bf16.msra.mxu1 %v5091_v25  ;;  %v3146_v25 = vrot.slane %v5668_v24, %v3145_v18  ;;  %v5182_v18 = vld [vmem:[#allocation11 + $0x20] sm:$0xff]  }
 0x3c0   :  { %4053 = vmatmul.mubr.bf16.vlgmr.msra.gmra.mxu0 %v3193_v41  ;;  %4071 = vmatprep.subr.bf16.mxu1 %v5096_v37  ;;  %v5166_v37 = vld [vmem:[#allocation10 + $0x3a0] ss:$8 sps:$4 sm:$0xff]   ;;  %v5171_v41 = vld [vmem:[#allocation10 + $0x394] ss:$8 sps:$4 sm:$0xff]  }
 0x3c1   :  { %4103 = vmatpush1.bf16.msra.mxu0 %v5127_v40 }
 0x3c2   :  { %4104 = vmatprep.subr.bf16.mxu0 %v5132_v43 }
 0x3c3   :  { %4072 = vmatpush1.bf16.msra.mxu1 %v5094_v45 }
 0x3c4   :  { %4073 = vmatprep.subr.bf16.mxu1 %v5099_v48  ;;  %v3150_v48 = vrot.slane %v5668_v24, %v3149_v44 }
 0x3c5   :  { %4105 = vmatpush1.bf16.msra.mxu0 %v5130_v47 }
 0x3c6   :  { %4106 = vmatprep.subr.bf16.mxu0 %v5135_v49 }
 0x3c7   :  { %4074 = vmatpush1.bf16.msra.mxu1 %v5097_v51 }
 0x3c8   :  { %4075 = vmatprep.subr.bf16.mxu1 %v5102_v29 }
 0x3c9   :  { %4107 = vmatpush1.bf16.msra.mxu0 %v5133_v19  ;;  %v5169_v19 = vld [vmem:[#allocation10 + $0x390] ss:$8 sps:$4 sm:$0xff]  }
 0x3ca   :  { %4108 = vmatprep.subr.bf16.mxu0 %v5138_v17  ;;  %v5174_v17 = vld [vmem:[#allocation10 + $0x384] ss:$8 sps:$4 sm:$0xff]  }
 0x3cb   :  { %4076 = vmatpush1.bf16.msra.mxu1 %v5100_v34 }
 0x3cc   :  { %4077 = vmatprep.subr.bf16.mxu1 %v5105_v52 }
 0x3cd   :  { %4109 = vmatpush1.bf16.msra.mxu0 %v5136_v26 }
 0x3ce   :  { %4110 = vmatprep.subr.bf16.mxu0 %v5141_v53 }
 0x3cf   :  { %4078 = vmatpush2.bf16.msra.mxu1 %v5103_v54  ;;  %v5172_v54 = vld [vmem:[#allocation10 + $0x380] ss:$8 sps:$4 sm:$0xff]  }
 0x3d0   :  { %4079 = vmatprep.subr.bf16.mxu1 %v5108_v56 }
 0x3d1   :  { %4111 = vmatpush1.bf16.msra.mxu0 %v5139_v61 }
 0x3d2   :  { %4112 = vmatprep.subr.bf16.mxu0 %v5144_v35 }
 0x3d3   :  { %4080 = vmatpush2.bf16.msra.mxu1 %v5106_v0  ;;  %v3153_v0 = vsub.s32 6, %v5530_v28 }
 0x3d4   :  { %4081 = vmatprep.subr.bf16.mxu1 %v5111_v42 }
 0x3d5   :  { %4113 = vmatpush1.bf16.msra.mxu0 %v5142_v58  ;;  %v3157_v58 = vsub.s32 7, %v5530_v28 }
 0x3d6   :  { %4114 = vmatprep.subr.bf16.mxu0 %v5147_v60 }
 0x3d7   :  { %4082 = vmatpush2.bf16.msra.mxu1 %v5109_v30 }
 0x3d8   :  { %4083 = vmatprep.subr.bf16.mxu1 %v5114_v33  ;;  %v3154_v33 = vrot.slane %v5668_v24, %v3153_v0 }
 0x3d9   :  { %4115 = vmatpush1.bf16.msra.mxu0 %v5145_v62 }
 0x3da   :  { %4116 = vmatprep.subr.bf16.mxu0 %v5150_v63 }
 0x3db   :  { %4084 = vmatpush2.bf16.msra.mxu1 %v5112_v4 }
 0x3dc   :  { %4085 = vmatprep.subr.bf16.mxu1 %v5117_v6 }
 0x3dd   :  { %4117 = vmatpush1.bf16.msra.mxu0 %v5148_v8  ;;  %v3158_v8 = vrot.slane %v5668_v24, %v3157_v58  ;;  %v5178_v24 = vld [vmem:[#allocation11 + $0x30] sm:$0xff]  }
 0x3de   :  { %4118 = vmatprep.subr.bf16.mxu0 %v5153_v2 }
 0x3df   :  { %4086 = vmatpush2.bf16.msra.mxu1 %v5115_v50 }
 0x3e0   :  { %4087 = vmatprep.subr.bf16.mxu1 %v5120_v3 }
 0x3e1   :  { %4119 = vmatpush2.bf16.msra.mxu0 %v5151_v5 }
 0x3e2   :  { %4120 = vmatprep.subr.bf16.mxu0 %v5156_v7 }
 0x3e3   :  { %4088 = vmatpush2.bf16.msra.mxu1 %v5118_v55 }
 0x3e4   :  { %4089 = vmatprep.subr.bf16.mxu1 %v5123_v1 }
 0x3e5   :  { %4121 = vmatpush2.bf16.msra.mxu0 %v5154_v9 }
 0x3e6   :  { %4122 = vmatprep.subr.bf16.mxu0 %v5159_v10 }
 0x3e7   :  { %4090 = vmatpush2.bf16.msra.mxu1 %v5121_v21 }
 0x3e8   :  { %4091 = vmatprep.subr.bf16.mxu1 %v5126_v11 }
 0x3e9   :  { %4123 = vmatpush2.bf16.msra.mxu0 %v5157_v12  ;;  %v5175_v12 = vld [vmem:[#allocation11 + $0x78] sm:$0xff]  }
 0x3ea   :  { %4124 = vmatprep.subr.bf16.mxu0 %v5162_v13  ;;  %v5177_v13 = vld [vmem:[#allocation11 + $0x70] sm:$0xff]  }
 0x3eb   :  { %4092 = vmatpush2.bf16.msra.mxu1 %v5124_v39  ;;  %v5179_v39 = vld [vmem:[#allocation11 + $0x68] sm:$0xff]  }
 0x3ec   :  { %4875 = vmatprep.subr.bf16.mxu1 %v5175_v12 }
 0x3ed   :  { %4125 = vmatpush2.bf16.msra.mxu0 %v5160_v14  ;;  %v5180_v14 = vld [vmem:[#allocation11 + $0x28] sm:$0xff]  }
 0x3ee   :  { %v2995_v20 = vpop.f32.mrf.mxu1  ;;  %4126 = vmatprep.subr.bf16.mxu0 %v5165_v16  ;;  %v5181_v16 = vld [vmem:[#allocation11 + $0x60] sm:$0xff]  }
 0x3ef   :  { %v2996_v46 = vadd.f32 %v2995_v20, %v5647_v57  ;;  %v5184_v20 = vld [vmem:[#allocation11 + $0x18] sm:$0xff]  }
 0x3f0   :  { %v2997_v23 = vpop.f32.mrf.mxu1 }
 0x3f1   :  { %4127 = vmatpush2.bf16.msra.mxu0 %v5163_v36  ;;  %v2998_v43 = vadd.f32 %v2997_v23, %v5649_v59  ;;  %v5183_v36 = vld [vmem:[#allocation11 + $0x58] sm:$0xff]  }
 0x3f2   :  { %v2999_v38 = vpop.f32.mrf.mxu1  ;;  %v3036_v40 = vpop.f32.mrf.mxu0  ;;  %4128 = vmatprep.subr.bf16.mxu0 %v5168_v22 }
 0x3f3   :  { %v3037_v45 = vadd.f32 %v3036_v40, %v2996_v46 }
 0x3f4   :  { %v3000_v47 = vpop.f32.mrf.mxu1  ;;  %v3038_v49 = vpop.f32.mrf.mxu0 }
 0x3f5   :  { %v3171_v51 = vadd.f32 %v3146_v25, %v3037_v45  ;;  %v3039_v29 = vadd.f32 %v3038_v49, %v2998_v43  ;;  %4129 = vmatpush2.bf16.msra.mxu0 %v5166_v37  ;;  %v3327_v25 = vld [vmem:[%s5726_s15] sm:$0x3]  ;;  %v5186_v45 = vld [vmem:[#allocation11 + $0x10] sm:$0xff]   ;;  %s5380_s15 = smov [#allocation13]  }
 0x3f6   :  { %v3040_v57 = vpop.f32.mrf.mxu0  ;;  %4130 = vmatprep.subr.bf16.mxu0 %v5171_v41  ;;  %v3332_v37 = vrot.slane %v3327_v25, %v5536_v32  ;;  %v3336_v38 = vrot.slane %v3327_v25, %v5533_v31  ;;  %v5185_v41 = vld [vmem:[#allocation11 + $0x50] sm:$0xff]   ;;  %v5190_v32 = vld [vmem:[#allocation11] sm:$0xff]   ;;  %s4343_s25 = sshll.u32 %s5380_s15, 4  ;;  %s4344_s25 = int_to_ptr.vmem [resolvable:$true] %s4343_s25 }
 0x3f7   :  { %v3179_v34 = vmul.f32 0.2, %v3171_v51  ;;  %v3172_v52 = vadd.f32 %v3150_v48, %v3039_v29  ;;  %v5187_v29 = vld [vmem:[#allocation11 + $0x48] sm:$0xff]   ;;  %s5311_s12 = scalar_lea.vmem %s4344_s25, 64  ;;  %p5316_p3 = scmp.lt.s32.totalorder %s4344_s25, %s4344_s25 }
 0x3f8   :  { %v3041_v26 = vpop.f32.mrf.mxu0  ;;  %v5188_v57 = vld [vmem:[#allocation11 + $0x8] sm:$0xff]   ;;  %p5312_p2 = scmp.ne.s32.totalorder %s4344_s25, %s5311_s12  ;;  %p5317_p4 = scmp.lt.s32.totalorder %s5311_s12, %s5311_s12 }
 0x3f9   :  { %v3180_v53 = vmul.f32 0.2, %v3172_v52  ;;  %4131 = vmatpush2.bf16.msra.mxu0 %v5169_v19  ;;  %v3187_v56 = vmax.f32 %v3171_v51, %v3179_v34  ;;  %v5189_v34 = vld [vmem:[#allocation11 + $0x40] sm:$0xff]  }
 0x3fa   :  { %4132 = vmatprep.subr.bf16.mxu0 %v5174_v17  ;;  %p5318_p5 = por %p5317_p4, %p5316_p3 }
 0x3fb   :  { %v3188_v59 = vmax.f32 %v3172_v52, %v3180_v53  ;;  %v3195_v35 = vpack.c.bf16 %v3187_v56, %v3187_v56 }
 0x3fc   :  { %p5319_p6 = pnand %p5318_p5, %p5312_p2 }
 0x3fd   :  { %v3196_v61 = vpack.c.bf16 %v3188_v59, %v3188_v59  ;;  %4133 = vmatpush2.bf16.msra.mxu0 %v5172_v54 }
 0x3ff   :  { %4093 = vmatprep.mubr.bf16.mxu1 %v3196_v61 }
 0x400   :  { %4094 = vmatmul.mubr.bf16.vlgmr.msra.gmra.mxu1 %v3195_v35 }
 0x42e   :  { %v3077_v42 = vpop.f32.mrf.mxu1 }
 0x42f   :  { %v3078_v30 = vadd.f32 %v3077_v42, %v5625_v27 }
 0x430   :  { %v3079_v60 = vpop.f32.mrf.mxu1 }
 0x431   :  { %v3080_v4 = vadd.f32 %v3079_v60, %v5631_v15  ;;  %v5176_v15 = vld [vmem:[#allocation11 + $0x38] sm:$0xff]  }
 0x432   :  { %v3081_v62 = vpop.f32.mrf.mxu1  ;;  %v3118_v63 = vpop.f32.mrf.mxu0  ;;  %4876 = vmatpush3.bf16.msra.mxu1 %v5176_v15 }
 0x433   :  { %v3119_v6 = vadd.f32 %v3118_v63, %v3078_v30  ;;  %4877 = vmatprep.subr.bf16.mxu1 %v5177_v13 }
 0x434   :  { %v3082_v2 = vpop.f32.mrf.mxu1  ;;  %v3120_v50 = vpop.f32.mrf.mxu0 }
 0x435   :  { %v3173_v3 = vadd.f32 %v3154_v33, %v3119_v6  ;;  %v3121_v5 = vadd.f32 %v3120_v50, %v3080_v4 }
 0x436   :  { %v3122_v7 = vpop.f32.mrf.mxu0  ;;  %4878 = vmatpush3.bf16.msra.mxu1 %v5178_v24 }
 0x437   :  { %v3181_v55 = vmul.f32 0.2, %v3173_v3  ;;  %v3174_v1 = vadd.f32 %v3158_v8, %v3121_v5  ;;  %4879 = vmatprep.subr.bf16.mxu1 %v5179_v39 }
 0x438   :  { %v3123_v28 = vpop.f32.mrf.mxu0 }
 0x439   :  { %v3182_v9 = vmul.f32 0.2, %v3174_v1  ;;  %v3189_v10 = vmax.f32 %v3173_v3, %v3181_v55 }
 0x43a   :  { %4880 = vmatpush3.bf16.msra.mxu1 %v5180_v14 }
 0x43b   :  { %v3190_v27 = vmax.f32 %v3174_v1, %v3182_v9  ;;  %v3197_v11 = vpack.c.bf16 %v3189_v10, %v3189_v10  ;;  %4881 = vmatprep.subr.bf16.mxu1 %v5181_v16 }
 0x43d   :  { %v3198_v21 = vpack.c.bf16 %v3190_v27, %v3190_v27 }
 0x43e   :  { %4882 = vmatpush3.bf16.msra.mxu1 %v5182_v18 }
 0x43f   :  { %4134 = vmatprep.mubr.bf16.mxu0 %v3198_v21  ;;  %4883 = vmatprep.subr.bf16.mxu1 %v5183_v36 }
 0x440   :  { %4135 = vmatmul.mubr.bf16.vlgmr.msra.gmra.mxu0 %v3197_v11 }
 0x442   :  { %4884 = vmatpush3.bf16.msra.mxu1 %v5184_v20 }
 0x443   :  { %4885 = vmatprep.subr.bf16.mxu1 %v5185_v41 }
 0x446   :  { %4886 = vmatpush3.bf16.msra.mxu1 %v5186_v45 }
 0x447   :  { %4887 = vmatprep.subr.bf16.mxu1 %v5187_v29 }
 0x44a   :  { %4888 = vmatpush3.bf16.msra.mxu1 %v5188_v57 }
 0x44b   :  { %4889 = vmatprep.subr.bf16.mxu1 %v5189_v34 }
 0x44e   :  { %4890 = vmatpush3.bf16.msra.mxu1 %v5190_v32 }
 0x46e   :  { %v4013_v22 = vpop.f32.mrf.mxu1 }
 0x46f   :  { %v4014_v40 = vadd.f32 %v4013_v22, %v3332_v37 }
 0x470   :  { %v4015_v44 = vpop.f32.mrf.mxu1 }
 0x471   :  { %v4016_v48 = vadd.f32 %v4015_v44, %v3336_v38 }
 0x472   :  { %v4017_v23 = vpop.f32.mrf.mxu1 }
 0x474   :  { %v4018_v46 = vpop.f32.mrf.mxu1 }
 0x480   :  { %v4054_v43 = vpop.f32.mrf.mxu0 }
 0x481   :  { %v4055_v47 = vadd.f32 %v4054_v43, %v4014_v40 }
 0x482   :  { %v4056_v49 = vpop.f32.mrf.mxu0 }
 0x483   :  { %v4057_v51 = vadd.f32 %v4056_v49, %v4016_v48 }
 0x484   :  { %v4058_v19 = vpop.f32.mrf.mxu0 }
 0x486   :  { %v4059_v17 = vpop.f32.mrf.mxu0 }
 0x4c0   :  { %v4095_v31 = vpop.f32.mrf.mxu1 }
 0x4c1   :  { %v4096_v52 = vadd.f32 %v4095_v31, %v4055_v47 }
 0x4c2   :  { %v4097_v26 = vpop.f32.mrf.mxu1 }
 0x4c3   :  { %v4098_v59 = vadd.f32 %v4097_v26, %v4057_v51 }
 0x4c4   :  { %v4099_v53 = vpop.f32.mrf.mxu1 }
 0x4c6   :  { %v4100_v54 = vpop.f32.mrf.mxu1 }
 0x500   :  { %v4136_v56 = vpop.f32.mrf.mxu0 }
 0x501   :  { %v4137_v61 = vadd.f32 %v4136_v56, %v4096_v52 }
 0x502   :  { %v4138_v35 = vpop.f32.mrf.mxu0 }
 0x503   :  { %v4143_v0 = vmul.f32 0.2, %v4137_v61  ;;  %v4139_v42 = vadd.f32 %v4138_v35, %v4098_v59 }
 0x504   :  { %v4140_v58 = vpop.f32.mrf.mxu0 }
 0x505   :  { %v4144_v60 = vmul.f32 0.2, %v4139_v42  ;;  %v4145_v30 = vmax.f32 %v4137_v61, %v4143_v0 }
 0x506   :  { %v4141_v33 = vpop.f32.mrf.mxu0 }
 0x507   :  { %v4146_v62 = vmax.f32 %v4139_v42, %v4144_v60  ;;  %v4159_v6 = vpack.c.bf16 %v4145_v30, %v4145_v30 }
 0x509   :  { %v4160_v63 = vpack.c.bf16 %v4146_v62, %v4146_v62  ;;  %v4149_v4 = vcombine.low %v4145_v30, %v4146_v62 }
 0x50b   :  { %4328 = vmatprep.mubr.bf16.mxu1 %v4160_v63  ;;  %4845 = vst.sshfl [vmem:[#allocation13] sm:$0x33 pattern:$0x76325410] %v4149_v4 }
 0x50c   :  { %4329 = vmatmul.mubr.bf16.vlgmr.msra.gmra.mxu1 %v4159_v6 }
 0x50d   :  { %5322 = shalt.err (!%p5319_p6)
}
 0x50e   :  { %4346 = dma.vmem_to_hbm [thread:$0]  %s4344_s25, 64, %s5729_s18, [#allocation4]   ;;  %v4846_v2 = vld [vmem:[%s5728_s17] ss:$0 sm:$0xff] }
 0x50f   :  { %s5381_s7 = smov [#allocation14]  }
 0x510   :  { %s4353_s4 = sshll.u32 %s5381_s7, 4  ;;  %s4354_s4 = int_to_ptr.vmem [resolvable:$true] %s4353_s4 }
 0x511   :  { %s5331_s5 = scalar_lea.vmem %s4354_s4, 32  ;;  %p5336_p8 = scmp.lt.s32.totalorder %s4354_s4, %s4354_s4 }
 0x512   :  { %p5332_p7 = scmp.ne.s32.totalorder %s4354_s4, %s5331_s5  ;;  %p5337_p9 = scmp.lt.s32.totalorder %s5331_s5, %s5331_s5 }
 0x514   :  { %p5338_p10 = por %p5337_p9, %p5336_p8 }
 0x516   :  { %p5339_p11 = pnand %p5338_p10, %p5332_p7 }
 0x5cc   :  { %v4891_v8 = vpop.f32.mrf.mxu1 }
 0x5ce   :  { %v4892_v50 = vpop.f32.mrf.mxu1 }
 0x5cf   :  { %v4893_v3 = vadd.f32 %v4892_v50, %v4891_v8 }
 0x5d0   :  { %v4894_v5 = vpop.f32.mrf.mxu1 }
 0x5d1   :  { %v4331_v7 = vadd.f32 %v4893_v3, %v4846_v2 }
 0x5d2   :  { %v4895_v55 = vpop.f32.mrf.mxu1 }
 0x5d3   :  { %4336 = vst [vmem:[#allocation14] sm:$0x3] %v4331_v7 }
 0x5d4   :  { %5342 = shalt.err (!%p5339_p11)
}
 0x5d5   :  { %4356 = dma.vmem_to_hbm [thread:$0]  %s4354_s4, 32, %s5730_s19, [#allocation15]  }
 0x5d6   :  { %5359 = dma.done.wait [#allocation4], 64  }
 0x5d7   :  { %5360 = vsyncadd [#allocation4], 4294967232 }
 0x5d8   :  { %5361 = dma.done.wait [#allocation15], 32  }
 0x5d9   :  { %5362 = vsyncadd [#allocation15], 4294967264 }
 0x5da   :  { %4363 = vsyncpa [#allocation3], 1 }
 0x5db   :  { %4364 = vsyncpa [#allocation6], 1 }
 0x5dc   :  { %4365 = vsyncpa [#allocation9], 1 }
 0x5dd   :  { %4366 = vsyncpa [#allocation12], 1 }
 0x5de   :  { %4367 = vsyncpa [#allocation4], 1 }
 0x5df   :  { %4368 = vsyncpa [#allocation15], 1 }

</bundles_post_ra>
